<compile_context>
chip_gen: v6e
topology: v6e:2x2x1
jax: 0.10.0
libtpu: 0.0.40
codegen_flags: <defaults>
</compile_context>

<pallas_src>
import functools

import jax
import jax.numpy as jnp
from jax import lax
from jax.experimental import pallas as pl
from jax.experimental.pallas import tpu as pltpu

EPS = 1e-5
_CHUNK = 128   # row chunk for the streamed stats / apply / matmul passes


def _bn_scale_shift(ref, gamma, beta, *, chunk):
    """Per-channel (lane-axis) BatchNorm scale/shift from batch statistics.

    Two streamed passes (mean, then centered sum of squares) over `chunk`-row
    slices of the VMEM ref, so no full activation is held live in vregs and
    the variance does not suffer E[x^2]-E[x]^2 cancellation.
    """
    m, c = ref.shape
    n_chunks = m // chunk
    inv_m = 1.0 / m

    def _sum_body(k, acc):
        r = pl.multiple_of(k * chunk, chunk)
        return acc + jnp.sum(ref[pl.ds(r, chunk), :], axis=0, keepdims=True)

    mean = lax.fori_loop(0, n_chunks, _sum_body,
                         jnp.zeros((1, c), jnp.float32)) * inv_m

    def _var_body(k, acc):
        r = pl.multiple_of(k * chunk, chunk)
        d = ref[pl.ds(r, chunk), :] - mean
        return acc + jnp.sum(d * d, axis=0, keepdims=True)

    var = lax.fori_loop(0, n_chunks, _var_body,
                        jnp.zeros((1, c), jnp.float32)) * inv_m

    a = gamma * lax.rsqrt(var + EPS)     # per-channel scale (rsqrt -> EUP)
    b = beta - mean * a                  # per-channel shift
    return a, b


def dn_composite_kernel(x_ref, g1_ref, b1_ref, w1_ref, g2_ref, b2_ref, w2_ref,
                        o_ref, h_ref, hp_ref, im_ref, *, n, h, w):
    # x_ref : (M, Cin) f32, rows ordered (j, i, n), M = W*H*N
    # g1/b1 : (1, Cin) f32          w1_ref: (Cin, C0) bf16
    # g2/b2 : (1, C0)  f32          w2_ref: (9*C0, C1) bf16, tap-permuted
    # o_ref : (M, C1)  f32, rows ordered (j, i, n)
    # h_ref : (M, C0)  f32 scratch   -- conv1 output (pre-BN2), rows (j, i, n)
    # hp_ref: ((H+2)*N, (W+2)*C0) bf16 scratch -- zero-padded post-BN2 acts,
    #          rows = (padded_row, image), lanes = (padded_col, channel)
    # im_ref: (M, 9*C0) bf16 scratch -- im2col slab
    m_total = x_ref.shape[0]
    c0 = w1_ref.shape[1]
    hn = h * n                         # rows per output-column block (= 32)
    hp_rows = (h + 2) * n
    wp_c0 = (w + 2) * c0

    # ---- BatchNorm2d(Cin): streamed batch stats -> per-channel scale/shift --
    a1, b1 = _bn_scale_shift(x_ref, g1_ref[...], b1_ref[...], chunk=_CHUNK)

    # ---- fused BN1-apply + ReLU + 1x1 conv (bf16 MXU, f32 acc), streamed ----
    @pl.loop(0, m_total // _CHUNK)
    def _conv1(k):
        r = pl.multiple_of(k * _CHUNK, _CHUNK)
        xa = jnp.maximum(x_ref[pl.ds(r, _CHUNK), :] * a1 + b1, 0.0)
        h_ref[pl.ds(r, _CHUNK), :] = jnp.dot(
            xa.astype(jnp.bfloat16), w1_ref[...],
            preferred_element_type=jnp.float32)

    # ---- BatchNorm2d(C0): streamed batch stats over the VMEM copy of h ------
    a2, b2 = _bn_scale_shift(h_ref, g2_ref[...], b2_ref[...], chunk=_CHUNK)

    # ---- zero ONLY the halo of hp (interior is overwritten right after) -----
    hp_ref[0:n, :] = jnp.zeros((n, wp_c0), jnp.bfloat16)                  # top
    hp_ref[(h + 1) * n:hp_rows, :] = jnp.zeros((n, wp_c0), jnp.bfloat16)  # bottom
    hp_ref[:, 0:c0] = jnp.zeros((hp_rows, c0), jnp.bfloat16)              # left
    hp_ref[:, (w + 1) * c0:wp_c0] = jnp.zeros((hp_rows, c0), jnp.bfloat16)  # right

    # ---- BN2-apply + ReLU + single bf16 cast, written straight into the
    #      hp interior: 16 aligned (hn, C0) block stores, no reshapes ---------
    for j in range(w):
        hb = jnp.maximum(h_ref[j * hn:(j + 1) * hn, :] * a2 + b2, 0.0)
        hp_ref[n:n + hn, (j + 1) * c0:(j + 2) * c0] = hb.astype(jnp.bfloat16)

    # ---- im2col: pure 2-D block copies out of hp ----------------------------
    # column layout: [pair(ky, kx=0..1): 2*C0 lanes] x3, then [single(ky, kx=2):
    # C0 lanes] x3.  Pair blocks are 128-lane aligned (C0 = 64).
    singles_off = 3 * 2 * c0
    for j in range(w):
        dst = slice(j * hn, (j + 1) * hn)
        for ky in range(3):
            src_r = ky * n
            # taps (ky,0) and (ky,1): one 128-lane-aligned copy
            im_ref[dst, ky * 2 * c0:(ky + 1) * 2 * c0] = \
                hp_ref[src_r:src_r + hn, j * c0:(j + 2) * c0]
            # tap (ky,2): 64-lane copy
            im_ref[dst, singles_off + ky * c0:singles_off + (ky + 1) * c0] = \
                hp_ref[src_r:src_r + hn, (j + 2) * c0:(j + 3) * c0]

    # ---- 3x3 conv (pad=1, no bias): ONE K = 9*C0 matmul per 128-row chunk ---
    @pl.loop(0, m_total // _CHUNK)
    def _conv2(k):
        r = pl.multiple_of(k * _CHUNK, _CHUNK)
        o_ref[pl.ds(r, _CHUNK), :] = jnp.dot(
            im_ref[pl.ds(r, _CHUNK), :], w2_ref[...],
            preferred_element_type=jnp.float32)


def dn_composite_block(x_nchw, params):
    """DNCompositeBlock forward (bottleneck variant). Input/output NCHW."""
    N, Cin, H, W = x_nchw.shape
    C0 = params["w1"].shape[1]
    C1 = params["w2"].shape[3]
    M = N * H * W
    assert M % _CHUNK == 0, "row count must be a multiple of the chunk size"

    # Wrapper-side one-time prep: rows ordered (j, i, n) so every in-kernel
    # step is a plain 2-D block copy (channels + W-shifts live on lanes).
    x2d = jnp.transpose(x_nchw, (3, 2, 0, 1)).astype(jnp.float32).reshape(M, Cin)
    w1b = params["w1"].astype(jnp.bfloat16)                       # (Cin, C0)
    w2 = params["w2"]
    # Row-permuted 3x3 weight matching the im2col column layout:
    #   [(0,0),(0,1), (1,0),(1,1), (2,0),(2,1), (0,2),(1,2),(2,2)]
    w2r = jnp.concatenate(
        [w2[0, 0], w2[0, 1], w2[1, 0], w2[1, 1], w2[2, 0], w2[2, 1],
         w2[0, 2], w2[1, 2], w2[2, 2]], axis=0).astype(jnp.bfloat16)  # (9*C0, C1)

    vmem = pl.BlockSpec(memory_space=pltpu.MemorySpace.VMEM)
    kernel = functools.partial(dn_composite_kernel, n=N, h=H, w=W)

    out_flat = pl.pallas_call(
        kernel,
        out_shape=jax.ShapeDtypeStruct((M, C1), jnp.float32),
        in_specs=[vmem] * 7,
        out_specs=vmem,
        scratch_shapes=[
            pltpu.VMEM((M, C0), jnp.float32),                        # conv1 out
            pltpu.VMEM(((H + 2) * N, (W + 2) * C0), jnp.bfloat16),   # padded acts
            pltpu.VMEM((M, 9 * C0), jnp.bfloat16),                   # im2col slab
        ],
    )(x2d, params["g1"], params["b1"], w1b, params["g2"], params["b2"], w2r)

    # rows (j, i, n) -> NCHW
    return jnp.transpose(out_flat.reshape(W, H, N, C1), (2, 3, 1, 0))


def _reference(x_nchw, p):
    """Pure-JAX f32 reference (independent path via lax.conv) for validation."""
    x = jnp.transpose(x_nchw, (0, 2, 3, 1)).astype(jnp.float32)
    m = jnp.mean(x, axis=(0, 1, 2), keepdims=True)
    v = jnp.mean((x - m) ** 2, axis=(0, 1, 2), keepdims=True)
    x = (x - m) / jnp.sqrt(v + EPS) * p["g1"] + p["b1"]
    x = jnp.maximum(x, 0.0)
    x = jax.lax.conv_general_dilated(
        x, p["w1"][None, None], (1, 1), "VALID",
        dimension_numbers=("NHWC", "HWIO", "NHWC"),
        precision=jax.lax.Precision.HIGHEST)
    m = jnp.mean(x, axis=(0, 1, 2), keepdims=True)
    v = jnp.mean((x - m) ** 2, axis=(0, 1, 2), keepdims=True)
    x = (x - m) / jnp.sqrt(v + EPS) * p["g2"] + p["b2"]
    x = jnp.maximum(x, 0.0)
    x = jax.lax.conv_general_dilated(
        x, p["w2"], (1, 1), ((1, 1), (1, 1)),
        dimension_numbers=("NHWC", "HWIO", "NHWC"),
        precision=jax.lax.Precision.HIGHEST)
    return jnp.transpose(x, (0, 3, 1, 2))


if __name__ == "__main__":
    # Small shapes consistent with the module: n_inpch=16, cfg=(4k, k), k=16.
    N, Cin, H, W = 2, 16, 16, 16
    growth = 16
    C0, C1 = 4 * growth, growth   # cfg = (64, 16)

    key = jax.random.PRNGKey(0)
    kx, k1, k2, kg1, kb1, kg2, kb2 = jax.random.split(key, 7)
    x = jax.random.normal(kx, (N, Cin, H, W), jnp.float32)
    params = dict(
        g1=1.0 + 0.1 * jax.random.normal(kg1, (1, Cin), jnp.float32),
        b1=0.1 * jax.random.normal(kb1, (1, Cin), jnp.float32),
        w1=0.1 * jax.random.normal(k1, (Cin, C0), jnp.float32),       # 1x1 conv
        g2=1.0 + 0.1 * jax.random.normal(kg2, (1, C0), jnp.float32),
        b2=0.1 * jax.random.normal(kb2, (1, C0), jnp.float32),
        w2=0.1 * jax.random.normal(k2, (3, 3, C0, C1), jnp.float32),  # 3x3 conv (HWIO)
    )

    out = jax.block_until_ready(dn_composite_block(x, params))
    ref = jax.block_until_ready(_reference(x, params))

    assert out.shape == (N, C1, H, W), out.shape
    # bf16 MXU operands (f32 accumulate) vs an f32 HIGHEST reference: relaxed
    # but still structure-catching tolerance.
    if not jnp.allclose(out, ref, rtol=2e-2, atol=3e-2):
        max_err = float(jnp.max(jnp.abs(out - ref)))
        raise AssertionError(f"Pallas kernel output mismatch vs JAX reference "
                             f"(max abs err {max_err:.4e})")
    print("KERNEL_OK")
</pallas_src>

<mosaic_0001>
module attributes {stable_mosaic.version = 11 : i64} {
  func.func @dn_composite_kernel(%arg0: memref<512x16xf32, #tpu.memory_space<vmem>>, %arg1: memref<1x16xf32, #tpu.memory_space<vmem>>, %arg2: memref<1x16xf32, #tpu.memory_space<vmem>>, %arg3: memref<16x64xbf16, #tpu.memory_space<vmem>>, %arg4: memref<1x64xf32, #tpu.memory_space<vmem>>, %arg5: memref<1x64xf32, #tpu.memory_space<vmem>>, %arg6: memref<576x16xbf16, #tpu.memory_space<vmem>>, %arg7: memref<512x16xf32, #tpu.memory_space<vmem>>, %arg8: memref<512x64xf32, #tpu.memory_space<vmem>>, %arg9: memref<36x1152xbf16, #tpu.memory_space<vmem>>, %arg10: memref<512x576xbf16, #tpu.memory_space<vmem>>) attributes {dimension_semantics = [], scalar_prefetch = 0 : i64, scratch_operands = 3 : i64, tpu.core_type = #tpu.core_type<tc>} {
    %c0 = arith.constant 0 : index
    %c0_0 = arith.constant 0 : index
    %0 = vector.load %arg1[%c0, %c0_0] : memref<1x16xf32, #tpu.memory_space<vmem>>, vector<1x16xf32>
    %c0_1 = arith.constant 0 : index
    %c0_2 = arith.constant 0 : index
    %1 = vector.load %arg2[%c0_1, %c0_2] : memref<1x16xf32, #tpu.memory_space<vmem>>, vector<1x16xf32>
    %cst = arith.constant 0.000000e+00 : f32
    %2 = vector.broadcast %cst : f32 to vector<1x16xf32>
    %c0_i32 = arith.constant 0 : i32
    %c4_i32 = arith.constant 4 : i32
    %3 = arith.addi %c0_i32, %c4_i32 : i32
    %c1_i32 = arith.constant 1 : i32
    %4 = scf.for %arg11 = %c0_i32 to %3 step %c1_i32 iter_args(%arg12 = %2) -> (vector<1x16xf32>)  : i32 {
      %c128_i32 = arith.constant 128 : i32
      %382 = arith.muli %arg11, %c128_i32 : i32
      %383 = tpu.assume_multiple %382, 128 : i32
      %384 = arith.index_cast %383 : i32 to index
      %c0_485 = arith.constant 0 : index
      %385 = vector.load %arg0[%384, %c0_485] : memref<512x16xf32, #tpu.memory_space<vmem>>, vector<128x16xf32>
      %cst_486 = arith.constant dense<0.000000e+00> : vector<16xf32>
      %386 = vector.multi_reduction <add>, %385, %cst_486 [0] : vector<128x16xf32> to vector<16xf32>
      %387 = vector.shape_cast %386 : vector<16xf32> to vector<1x16xf32>
      %388 = arith.addf %arg12, %387 : vector<1x16xf32>
      scf.yield %388 : vector<1x16xf32>
    }
    %c4_i32_3 = arith.constant 4 : i32
    %cst_4 = arith.constant 0.001953125 : f32
    %5 = vector.broadcast %cst_4 : f32 to vector<1x16xf32>
    %6 = arith.mulf %4, %5 : vector<1x16xf32>
    %cst_5 = arith.constant 0.000000e+00 : f32
    %7 = vector.broadcast %cst_5 : f32 to vector<1x16xf32>
    %c0_i32_6 = arith.constant 0 : i32
    %c4_i32_7 = arith.constant 4 : i32
    %8 = arith.addi %c0_i32_6, %c4_i32_7 : i32
    %c1_i32_8 = arith.constant 1 : i32
    %9 = scf.for %arg11 = %c0_i32_6 to %8 step %c1_i32_8 iter_args(%arg12 = %7) -> (vector<1x16xf32>)  : i32 {
      %c128_i32 = arith.constant 128 : i32
      %382 = arith.muli %arg11, %c128_i32 : i32
      %383 = tpu.assume_multiple %382, 128 : i32
      %384 = arith.index_cast %383 : i32 to index
      %c0_485 = arith.constant 0 : index
      %385 = vector.load %arg0[%384, %c0_485] : memref<512x16xf32, #tpu.memory_space<vmem>>, vector<128x16xf32>
      %386 = vector.broadcast %6 : vector<1x16xf32> to vector<128x16xf32>
      %387 = arith.subf %385, %386 : vector<128x16xf32>
      %388 = arith.mulf %387, %387 : vector<128x16xf32>
      %cst_486 = arith.constant dense<0.000000e+00> : vector<16xf32>
      %389 = vector.multi_reduction <add>, %388, %cst_486 [0] : vector<128x16xf32> to vector<16xf32>
      %390 = vector.shape_cast %389 : vector<16xf32> to vector<1x16xf32>
      %391 = arith.addf %arg12, %390 : vector<1x16xf32>
      scf.yield %391 : vector<1x16xf32>
    }
    %c4_i32_9 = arith.constant 4 : i32
    %cst_10 = arith.constant 0.001953125 : f32
    %10 = vector.broadcast %cst_10 : f32 to vector<1x16xf32>
    %11 = arith.mulf %9, %10 : vector<1x16xf32>
    %cst_11 = arith.constant 9.99999974E-6 : f32
    %12 = vector.broadcast %cst_11 : f32 to vector<1x16xf32>
    %13 = arith.addf %11, %12 : vector<1x16xf32>
    %14 = math.rsqrt %13 : vector<1x16xf32>
    %15 = arith.mulf %0, %14 : vector<1x16xf32>
    %16 = arith.mulf %6, %15 : vector<1x16xf32>
    %17 = arith.subf %1, %16 : vector<1x16xf32>
    %c0_i32_12 = arith.constant 0 : i32
    %c4_i32_13 = arith.constant 4 : i32
    %18 = arith.addi %c0_i32_12, %c4_i32_13 : i32
    %c1_i32_14 = arith.constant 1 : i32
    scf.for %arg11 = %c0_i32_12 to %18 step %c1_i32_14  : i32 {
      %c1_i32_485 = arith.constant 1 : i32
      %382 = arith.muli %arg11, %c1_i32_485 : i32
      %c0_i32_486 = arith.constant 0 : i32
      %383 = arith.addi %c0_i32_486, %382 : i32
      %c128_i32 = arith.constant 128 : i32
      %384 = arith.muli %383, %c128_i32 : i32
      %385 = tpu.assume_multiple %384, 128 : i32
      %386 = arith.index_cast %385 : i32 to index
      %c0_487 = arith.constant 0 : index
      %387 = vector.load %arg0[%386, %c0_487] : memref<512x16xf32, #tpu.memory_space<vmem>>, vector<128x16xf32>
      %388 = vector.broadcast %15 : vector<1x16xf32> to vector<128x16xf32>
      %389 = arith.mulf %387, %388 : vector<128x16xf32>
      %390 = vector.broadcast %17 : vector<1x16xf32> to vector<128x16xf32>
      %391 = arith.addf %389, %390 : vector<128x16xf32>
      %cst_488 = arith.constant 0.000000e+00 : f32
      %392 = vector.broadcast %cst_488 : f32 to vector<128x16xf32>
      %393 = arith.maximumf %391, %392 : vector<128x16xf32>
      %394 = arith.truncf %393 : vector<128x16xf32> to vector<128x16xbf16>
      %c0_489 = arith.constant 0 : index
      %c0_490 = arith.constant 0 : index
      %395 = vector.load %arg3[%c0_489, %c0_490] : memref<16x64xbf16, #tpu.memory_space<vmem>>, vector<16x64xbf16>
      %cst_491 = arith.constant dense<0.000000e+00> : vector<128x64xf32>
      %396 = tpu.matmul %394, %395, %cst_491 {dimension_numbers = #tpu.dot_dimension_numbers<[1], [0], [0], [1], [0, 0, 1, 1], [], []>} : vector<128x16xbf16>, vector<16x64xbf16>, vector<128x64xf32> -> vector<128x64xf32>
      %397 = arith.index_cast %385 : i32 to index
      %c0_492 = arith.constant 0 : index
      %398 = vector.load %arg8[%397, %c0_492] : memref<512x64xf32, #tpu.memory_space<vmem>>, vector<128x64xf32>
      tpu.vector_store %arg8[%397, %c0_492], %396 {strides = array<i32>} : memref<512x64xf32, #tpu.memory_space<vmem>>, vector<128x64xf32>,
    }
    %c4_i32_15 = arith.constant 4 : i32
    %c0_16 = arith.constant 0 : index
    %c0_17 = arith.constant 0 : index
    %19 = vector.load %arg4[%c0_16, %c0_17] : memref<1x64xf32, #tpu.memory_space<vmem>>, vector<1x64xf32>
    %c0_18 = arith.constant 0 : index
    %c0_19 = arith.constant 0 : index
    %20 = vector.load %arg5[%c0_18, %c0_19] : memref<1x64xf32, #tpu.memory_space<vmem>>, vector<1x64xf32>
    %cst_20 = arith.constant 0.000000e+00 : f32
    %21 = vector.broadcast %cst_20 : f32 to vector<1x64xf32>
    %c0_i32_21 = arith.constant 0 : i32
    %c4_i32_22 = arith.constant 4 : i32
    %22 = arith.addi %c0_i32_21, %c4_i32_22 : i32
    %c1_i32_23 = arith.constant 1 : i32
    %23 = scf.for %arg11 = %c0_i32_21 to %22 step %c1_i32_23 iter_args(%arg12 = %21) -> (vector<1x64xf32>)  : i32 {
      %c128_i32 = arith.constant 128 : i32
      %382 = arith.muli %arg11, %c128_i32 : i32
      %383 = tpu.assume_multiple %382, 128 : i32
      %384 = arith.index_cast %383 : i32 to index
      %c0_485 = arith.constant 0 : index
      %385 = vector.load %arg8[%384, %c0_485] : memref<512x64xf32, #tpu.memory_space<vmem>>, vector<128x64xf32>
      %cst_486 = arith.constant dense<0.000000e+00> : vector<64xf32>
      %386 = vector.multi_reduction <add>, %385, %cst_486 [0] : vector<128x64xf32> to vector<64xf32>
      %387 = vector.shape_cast %386 : vector<64xf32> to vector<1x64xf32>
      %388 = arith.addf %arg12, %387 : vector<1x64xf32>
      scf.yield %388 : vector<1x64xf32>
    }
    %c4_i32_24 = arith.constant 4 : i32
    %cst_25 = arith.constant 0.001953125 : f32
    %24 = vector.broadcast %cst_25 : f32 to vector<1x64xf32>
    %25 = arith.mulf %23, %24 : vector<1x64xf32>
    %cst_26 = arith.constant 0.000000e+00 : f32
    %26 = vector.broadcast %cst_26 : f32 to vector<1x64xf32>
    %c0_i32_27 = arith.constant 0 : i32
    %c4_i32_28 = arith.constant 4 : i32
    %27 = arith.addi %c0_i32_27, %c4_i32_28 : i32
    %c1_i32_29 = arith.constant 1 : i32
    %28 = scf.for %arg11 = %c0_i32_27 to %27 step %c1_i32_29 iter_args(%arg12 = %26) -> (vector<1x64xf32>)  : i32 {
      %c128_i32 = arith.constant 128 : i32
      %382 = arith.muli %arg11, %c128_i32 : i32
      %383 = tpu.assume_multiple %382, 128 : i32
      %384 = arith.index_cast %383 : i32 to index
      %c0_485 = arith.constant 0 : index
      %385 = vector.load %arg8[%384, %c0_485] : memref<512x64xf32, #tpu.memory_space<vmem>>, vector<128x64xf32>
      %386 = vector.broadcast %25 : vector<1x64xf32> to vector<128x64xf32>
      %387 = arith.subf %385, %386 : vector<128x64xf32>
      %388 = arith.mulf %387, %387 : vector<128x64xf32>
      %cst_486 = arith.constant dense<0.000000e+00> : vector<64xf32>
      %389 = vector.multi_reduction <add>, %388, %cst_486 [0] : vector<128x64xf32> to vector<64xf32>
      %390 = vector.shape_cast %389 : vector<64xf32> to vector<1x64xf32>
      %391 = arith.addf %arg12, %390 : vector<1x64xf32>
      scf.yield %391 : vector<1x64xf32>
    }
    %c4_i32_30 = arith.constant 4 : i32
    %cst_31 = arith.constant 0.001953125 : f32
    %29 = vector.broadcast %cst_31 : f32 to vector<1x64xf32>
    %30 = arith.mulf %28, %29 : vector<1x64xf32>
    %cst_32 = arith.constant 9.99999974E-6 : f32
    %31 = vector.broadcast %cst_32 : f32 to vector<1x64xf32>
    %32 = arith.addf %30, %31 : vector<1x64xf32>
    %33 = math.rsqrt %32 : vector<1x64xf32>
    %34 = arith.mulf %19, %33 : vector<1x64xf32>
    %35 = arith.mulf %25, %34 : vector<1x64xf32>
    %36 = arith.subf %20, %35 : vector<1x64xf32>
    %cst_33 = arith.constant 0.000000e+00 : bf16
    %37 = vector.broadcast %cst_33 : bf16 to vector<2x1152xbf16>
    %c0_34 = arith.constant 0 : index
    %c0_35 = arith.constant 0 : index
    %38 = vector.load %arg9[%c0_34, %c0_35] : memref<36x1152xbf16, #tpu.memory_space<vmem>>, vector<2x1152xbf16>
    tpu.vector_store %arg9[%c0_34, %c0_35], %37 {strides = array<i32>} : memref<36x1152xbf16, #tpu.memory_space<vmem>>, vector<2x1152xbf16>,
    %cst_36 = arith.constant 0.000000e+00 : bf16
    %39 = vector.broadcast %cst_36 : bf16 to vector<2x1152xbf16>
    %c34 = arith.constant 34 : index
    %c0_37 = arith.constant 0 : index
    %40 = vector.load %arg9[%c34, %c0_37] : memref<36x1152xbf16, #tpu.memory_space<vmem>>, vector<2x1152xbf16>
    tpu.vector_store %arg9[%c34, %c0_37], %39 {strides = array<i32>} : memref<36x1152xbf16, #tpu.memory_space<vmem>>, vector<2x1152xbf16>,
    %cst_38 = arith.constant 0.000000e+00 : bf16
    %41 = vector.broadcast %cst_38 : bf16 to vector<36x64xbf16>
    %c0_39 = arith.constant 0 : index
    %c0_40 = arith.constant 0 : index
    %42 = vector.load %arg9[%c0_39, %c0_40] : memref<36x1152xbf16, #tpu.memory_space<vmem>>, vector<36x64xbf16>
    tpu.vector_store %arg9[%c0_39, %c0_40], %41 {strides = array<i32>} : memref<36x1152xbf16, #tpu.memory_space<vmem>>, vector<36x64xbf16>,
    %cst_41 = arith.constant 0.000000e+00 : bf16
    %43 = vector.broadcast %cst_41 : bf16 to vector<36x64xbf16>
    %c0_42 = arith.constant 0 : index
    %c1088 = arith.constant 1088 : index
    %44 = vector.load %arg9[%c0_42, %c1088] : memref<36x1152xbf16, #tpu.memory_space<vmem>>, vector<36x64xbf16>
    tpu.vector_store %arg9[%c0_42, %c1088], %43 {strides = array<i32>} : memref<36x1152xbf16, #tpu.memory_space<vmem>>, vector<36x64xbf16>,
    %c0_43 = arith.constant 0 : index
    %c0_44 = arith.constant 0 : index
    %45 = vector.load %arg8[%c0_43, %c0_44] : memref<512x64xf32, #tpu.memory_space<vmem>>, vector<32x64xf32>
    %46 = vector.broadcast %34 : vector<1x64xf32> to vector<32x64xf32>
    %47 = arith.mulf %45, %46 : vector<32x64xf32>
    %48 = vector.broadcast %36 : vector<1x64xf32> to vector<32x64xf32>
    %49 = arith.addf %47, %48 : vector<32x64xf32>
    %cst_45 = arith.constant 0.000000e+00 : f32
    %50 = vector.broadcast %cst_45 : f32 to vector<32x64xf32>
    %51 = arith.maximumf %49, %50 : vector<32x64xf32>
    %52 = arith.truncf %51 : vector<32x64xf32> to vector<32x64xbf16>
    %c2 = arith.constant 2 : index
    %c64 = arith.constant 64 : index
    %53 = vector.load %arg9[%c2, %c64] : memref<36x1152xbf16, #tpu.memory_space<vmem>>, vector<32x64xbf16>
    tpu.vector_store %arg9[%c2, %c64], %52 {strides = array<i32>} : memref<36x1152xbf16, #tpu.memory_space<vmem>>, vector<32x64xbf16>,
    %c32 = arith.constant 32 : index
    %c0_46 = arith.constant 0 : index
    %54 = vector.load %arg8[%c32, %c0_46] : memref<512x64xf32, #tpu.memory_space<vmem>>, vector<32x64xf32>
    %55 = vector.broadcast %34 : vector<1x64xf32> to vector<32x64xf32>
    %56 = arith.mulf %54, %55 : vector<32x64xf32>
    %57 = vector.broadcast %36 : vector<1x64xf32> to vector<32x64xf32>
    %58 = arith.addf %56, %57 : vector<32x64xf32>
    %cst_47 = arith.constant 0.000000e+00 : f32
    %59 = vector.broadcast %cst_47 : f32 to vector<32x64xf32>
    %60 = arith.maximumf %58, %59 : vector<32x64xf32>
    %61 = arith.truncf %60 : vector<32x64xf32> to vector<32x64xbf16>
    %c2_48 = arith.constant 2 : index
    %c128 = arith.constant 128 : index
    %62 = vector.load %arg9[%c2_48, %c128] : memref<36x1152xbf16, #tpu.memory_space<vmem>>, vector<32x64xbf16>
    tpu.vector_store %arg9[%c2_48, %c128], %61 {strides = array<i32>} : memref<36x1152xbf16, #tpu.memory_space<vmem>>, vector<32x64xbf16>,
    %c64_49 = arith.constant 64 : index
    %c0_50 = arith.constant 0 : index
    %63 = vector.load %arg8[%c64_49, %c0_50] : memref<512x64xf32, #tpu.memory_space<vmem>>, vector<32x64xf32>
    %64 = vector.broadcast %34 : vector<1x64xf32> to vector<32x64xf32>
    %65 = arith.mulf %63, %64 : vector<32x64xf32>
    %66 = vector.broadcast %36 : vector<1x64xf32> to vector<32x64xf32>
    %67 = arith.addf %65, %66 : vector<32x64xf32>
    %cst_51 = arith.constant 0.000000e+00 : f32
    %68 = vector.broadcast %cst_51 : f32 to vector<32x64xf32>
    %69 = arith.maximumf %67, %68 : vector<32x64xf32>
    %70 = arith.truncf %69 : vector<32x64xf32> to vector<32x64xbf16>
    %c2_52 = arith.constant 2 : index
    %c192 = arith.constant 192 : index
    %71 = vector.load %arg9[%c2_52, %c192] : memref<36x1152xbf16, #tpu.memory_space<vmem>>, vector<32x64xbf16>
    tpu.vector_store %arg9[%c2_52, %c192], %70 {strides = array<i32>} : memref<36x1152xbf16, #tpu.memory_space<vmem>>, vector<32x64xbf16>,
    %c96 = arith.constant 96 : index
    %c0_53 = arith.constant 0 : index
    %72 = vector.load %arg8[%c96, %c0_53] : memref<512x64xf32, #tpu.memory_space<vmem>>, vector<32x64xf32>
    %73 = vector.broadcast %34 : vector<1x64xf32> to vector<32x64xf32>
    %74 = arith.mulf %72, %73 : vector<32x64xf32>
    %75 = vector.broadcast %36 : vector<1x64xf32> to vector<32x64xf32>
    %76 = arith.addf %74, %75 : vector<32x64xf32>
    %cst_54 = arith.constant 0.000000e+00 : f32
    %77 = vector.broadcast %cst_54 : f32 to vector<32x64xf32>
    %78 = arith.maximumf %76, %77 : vector<32x64xf32>
    %79 = arith.truncf %78 : vector<32x64xf32> to vector<32x64xbf16>
    %c2_55 = arith.constant 2 : index
    %c256 = arith.constant 256 : index
    %80 = vector.load %arg9[%c2_55, %c256] : memref<36x1152xbf16, #tpu.memory_space<vmem>>, vector<32x64xbf16>
    tpu.vector_store %arg9[%c2_55, %c256], %79 {strides = array<i32>} : memref<36x1152xbf16, #tpu.memory_space<vmem>>, vector<32x64xbf16>,
    %c128_56 = arith.constant 128 : index
    %c0_57 = arith.constant 0 : index
    %81 = vector.load %arg8[%c128_56, %c0_57] : memref<512x64xf32, #tpu.memory_space<vmem>>, vector<32x64xf32>
    %82 = vector.broadcast %34 : vector<1x64xf32> to vector<32x64xf32>
    %83 = arith.mulf %81, %82 : vector<32x64xf32>
    %84 = vector.broadcast %36 : vector<1x64xf32> to vector<32x64xf32>
    %85 = arith.addf %83, %84 : vector<32x64xf32>
    %cst_58 = arith.constant 0.000000e+00 : f32
    %86 = vector.broadcast %cst_58 : f32 to vector<32x64xf32>
    %87 = arith.maximumf %85, %86 : vector<32x64xf32>
    %88 = arith.truncf %87 : vector<32x64xf32> to vector<32x64xbf16>
    %c2_59 = arith.constant 2 : index
    %c320 = arith.constant 320 : index
    %89 = vector.load %arg9[%c2_59, %c320] : memref<36x1152xbf16, #tpu.memory_space<vmem>>, vector<32x64xbf16>
    tpu.vector_store %arg9[%c2_59, %c320], %88 {strides = array<i32>} : memref<36x1152xbf16, #tpu.memory_space<vmem>>, vector<32x64xbf16>,
    %c160 = arith.constant 160 : index
    %c0_60 = arith.constant 0 : index
    %90 = vector.load %arg8[%c160, %c0_60] : memref<512x64xf32, #tpu.memory_space<vmem>>, vector<32x64xf32>
    %91 = vector.broadcast %34 : vector<1x64xf32> to vector<32x64xf32>
    %92 = arith.mulf %90, %91 : vector<32x64xf32>
    %93 = vector.broadcast %36 : vector<1x64xf32> to vector<32x64xf32>
    %94 = arith.addf %92, %93 : vector<32x64xf32>
    %cst_61 = arith.constant 0.000000e+00 : f32
    %95 = vector.broadcast %cst_61 : f32 to vector<32x64xf32>
    %96 = arith.maximumf %94, %95 : vector<32x64xf32>
    %97 = arith.truncf %96 : vector<32x64xf32> to vector<32x64xbf16>
    %c2_62 = arith.constant 2 : index
    %c384 = arith.constant 384 : index
    %98 = vector.load %arg9[%c2_62, %c384] : memref<36x1152xbf16, #tpu.memory_space<vmem>>, vector<32x64xbf16>
    tpu.vector_store %arg9[%c2_62, %c384], %97 {strides = array<i32>} : memref<36x1152xbf16, #tpu.memory_space<vmem>>, vector<32x64xbf16>,
    %c192_63 = arith.constant 192 : index
    %c0_64 = arith.constant 0 : index
    %99 = vector.load %arg8[%c192_63, %c0_64] : memref<512x64xf32, #tpu.memory_space<vmem>>, vector<32x64xf32>
    %100 = vector.broadcast %34 : vector<1x64xf32> to vector<32x64xf32>
    %101 = arith.mulf %99, %100 : vector<32x64xf32>
    %102 = vector.broadcast %36 : vector<1x64xf32> to vector<32x64xf32>
    %103 = arith.addf %101, %102 : vector<32x64xf32>
    %cst_65 = arith.constant 0.000000e+00 : f32
    %104 = vector.broadcast %cst_65 : f32 to vector<32x64xf32>
    %105 = arith.maximumf %103, %104 : vector<32x64xf32>
    %106 = arith.truncf %105 : vector<32x64xf32> to vector<32x64xbf16>
    %c2_66 = arith.constant 2 : index
    %c448 = arith.constant 448 : index
    %107 = vector.load %arg9[%c2_66, %c448] : memref<36x1152xbf16, #tpu.memory_space<vmem>>, vector<32x64xbf16>
    tpu.vector_store %arg9[%c2_66, %c448], %106 {strides = array<i32>} : memref<36x1152xbf16, #tpu.memory_space<vmem>>, vector<32x64xbf16>,
    %c224 = arith.constant 224 : index
    %c0_67 = arith.constant 0 : index
    %108 = vector.load %arg8[%c224, %c0_67] : memref<512x64xf32, #tpu.memory_space<vmem>>, vector<32x64xf32>
    %109 = vector.broadcast %34 : vector<1x64xf32> to vector<32x64xf32>
    %110 = arith.mulf %108, %109 : vector<32x64xf32>
    %111 = vector.broadcast %36 : vector<1x64xf32> to vector<32x64xf32>
    %112 = arith.addf %110, %111 : vector<32x64xf32>
    %cst_68 = arith.constant 0.000000e+00 : f32
    %113 = vector.broadcast %cst_68 : f32 to vector<32x64xf32>
    %114 = arith.maximumf %112, %113 : vector<32x64xf32>
    %115 = arith.truncf %114 : vector<32x64xf32> to vector<32x64xbf16>
    %c2_69 = arith.constant 2 : index
    %c512 = arith.constant 512 : index
    %116 = vector.load %arg9[%c2_69, %c512] : memref<36x1152xbf16, #tpu.memory_space<vmem>>, vector<32x64xbf16>
    tpu.vector_store %arg9[%c2_69, %c512], %115 {strides = array<i32>} : memref<36x1152xbf16, #tpu.memory_space<vmem>>, vector<32x64xbf16>,
    %c256_70 = arith.constant 256 : index
    %c0_71 = arith.constant 0 : index
    %117 = vector.load %arg8[%c256_70, %c0_71] : memref<512x64xf32, #tpu.memory_space<vmem>>, vector<32x64xf32>
    %118 = vector.broadcast %34 : vector<1x64xf32> to vector<32x64xf32>
    %119 = arith.mulf %117, %118 : vector<32x64xf32>
    %120 = vector.broadcast %36 : vector<1x64xf32> to vector<32x64xf32>
    %121 = arith.addf %119, %120 : vector<32x64xf32>
    %cst_72 = arith.constant 0.000000e+00 : f32
    %122 = vector.broadcast %cst_72 : f32 to vector<32x64xf32>
    %123 = arith.maximumf %121, %122 : vector<32x64xf32>
    %124 = arith.truncf %123 : vector<32x64xf32> to vector<32x64xbf16>
    %c2_73 = arith.constant 2 : index
    %c576 = arith.constant 576 : index
    %125 = vector.load %arg9[%c2_73, %c576] : memref<36x1152xbf16, #tpu.memory_space<vmem>>, vector<32x64xbf16>
    tpu.vector_store %arg9[%c2_73, %c576], %124 {strides = array<i32>} : memref<36x1152xbf16, #tpu.memory_space<vmem>>, vector<32x64xbf16>,
    %c288 = arith.constant 288 : index
    %c0_74 = arith.constant 0 : index
    %126 = vector.load %arg8[%c288, %c0_74] : memref<512x64xf32, #tpu.memory_space<vmem>>, vector<32x64xf32>
    %127 = vector.broadcast %34 : vector<1x64xf32> to vector<32x64xf32>
    %128 = arith.mulf %126, %127 : vector<32x64xf32>
    %129 = vector.broadcast %36 : vector<1x64xf32> to vector<32x64xf32>
    %130 = arith.addf %128, %129 : vector<32x64xf32>
    %cst_75 = arith.constant 0.000000e+00 : f32
    %131 = vector.broadcast %cst_75 : f32 to vector<32x64xf32>
    %132 = arith.maximumf %130, %131 : vector<32x64xf32>
    %133 = arith.truncf %132 : vector<32x64xf32> to vector<32x64xbf16>
    %c2_76 = arith.constant 2 : index
    %c640 = arith.constant 640 : index
    %134 = vector.load %arg9[%c2_76, %c640] : memref<36x1152xbf16, #tpu.memory_space<vmem>>, vector<32x64xbf16>
    tpu.vector_store %arg9[%c2_76, %c640], %133 {strides = array<i32>} : memref<36x1152xbf16, #tpu.memory_space<vmem>>, vector<32x64xbf16>,
    %c320_77 = arith.constant 320 : index
    %c0_78 = arith.constant 0 : index
    %135 = vector.load %arg8[%c320_77, %c0_78] : memref<512x64xf32, #tpu.memory_space<vmem>>, vector<32x64xf32>
    %136 = vector.broadcast %34 : vector<1x64xf32> to vector<32x64xf32>
    %137 = arith.mulf %135, %136 : vector<32x64xf32>
    %138 = vector.broadcast %36 : vector<1x64xf32> to vector<32x64xf32>
    %139 = arith.addf %137, %138 : vector<32x64xf32>
    %cst_79 = arith.constant 0.000000e+00 : f32
    %140 = vector.broadcast %cst_79 : f32 to vector<32x64xf32>
    %141 = arith.maximumf %139, %140 : vector<32x64xf32>
    %142 = arith.truncf %141 : vector<32x64xf32> to vector<32x64xbf16>
    %c2_80 = arith.constant 2 : index
    %c704 = arith.constant 704 : index
    %143 = vector.load %arg9[%c2_80, %c704] : memref<36x1152xbf16, #tpu.memory_space<vmem>>, vector<32x64xbf16>
    tpu.vector_store %arg9[%c2_80, %c704], %142 {strides = array<i32>} : memref<36x1152xbf16, #tpu.memory_space<vmem>>, vector<32x64xbf16>,
    %c352 = arith.constant 352 : index
    %c0_81 = arith.constant 0 : index
    %144 = vector.load %arg8[%c352, %c0_81] : memref<512x64xf32, #tpu.memory_space<vmem>>, vector<32x64xf32>
    %145 = vector.broadcast %34 : vector<1x64xf32> to vector<32x64xf32>
    %146 = arith.mulf %144, %145 : vector<32x64xf32>
    %147 = vector.broadcast %36 : vector<1x64xf32> to vector<32x64xf32>
    %148 = arith.addf %146, %147 : vector<32x64xf32>
    %cst_82 = arith.constant 0.000000e+00 : f32
    %149 = vector.broadcast %cst_82 : f32 to vector<32x64xf32>
    %150 = arith.maximumf %148, %149 : vector<32x64xf32>
    %151 = arith.truncf %150 : vector<32x64xf32> to vector<32x64xbf16>
    %c2_83 = arith.constant 2 : index
    %c768 = arith.constant 768 : index
    %152 = vector.load %arg9[%c2_83, %c768] : memref<36x1152xbf16, #tpu.memory_space<vmem>>, vector<32x64xbf16>
    tpu.vector_store %arg9[%c2_83, %c768], %151 {strides = array<i32>} : memref<36x1152xbf16, #tpu.memory_space<vmem>>, vector<32x64xbf16>,
    %c384_84 = arith.constant 384 : index
    %c0_85 = arith.constant 0 : index
    %153 = vector.load %arg8[%c384_84, %c0_85] : memref<512x64xf32, #tpu.memory_space<vmem>>, vector<32x64xf32>
    %154 = vector.broadcast %34 : vector<1x64xf32> to vector<32x64xf32>
    %155 = arith.mulf %153, %154 : vector<32x64xf32>
    %156 = vector.broadcast %36 : vector<1x64xf32> to vector<32x64xf32>
    %157 = arith.addf %155, %156 : vector<32x64xf32>
    %cst_86 = arith.constant 0.000000e+00 : f32
    %158 = vector.broadcast %cst_86 : f32 to vector<32x64xf32>
    %159 = arith.maximumf %157, %158 : vector<32x64xf32>
    %160 = arith.truncf %159 : vector<32x64xf32> to vector<32x64xbf16>
    %c2_87 = arith.constant 2 : index
    %c832 = arith.constant 832 : index
    %161 = vector.load %arg9[%c2_87, %c832] : memref<36x1152xbf16, #tpu.memory_space<vmem>>, vector<32x64xbf16>
    tpu.vector_store %arg9[%c2_87, %c832], %160 {strides = array<i32>} : memref<36x1152xbf16, #tpu.memory_space<vmem>>, vector<32x64xbf16>,
    %c416 = arith.constant 416 : index
    %c0_88 = arith.constant 0 : index
    %162 = vector.load %arg8[%c416, %c0_88] : memref<512x64xf32, #tpu.memory_space<vmem>>, vector<32x64xf32>
    %163 = vector.broadcast %34 : vector<1x64xf32> to vector<32x64xf32>
    %164 = arith.mulf %162, %163 : vector<32x64xf32>
    %165 = vector.broadcast %36 : vector<1x64xf32> to vector<32x64xf32>
    %166 = arith.addf %164, %165 : vector<32x64xf32>
    %cst_89 = arith.constant 0.000000e+00 : f32
    %167 = vector.broadcast %cst_89 : f32 to vector<32x64xf32>
    %168 = arith.maximumf %166, %167 : vector<32x64xf32>
    %169 = arith.truncf %168 : vector<32x64xf32> to vector<32x64xbf16>
    %c2_90 = arith.constant 2 : index
    %c896 = arith.constant 896 : index
    %170 = vector.load %arg9[%c2_90, %c896] : memref<36x1152xbf16, #tpu.memory_space<vmem>>, vector<32x64xbf16>
    tpu.vector_store %arg9[%c2_90, %c896], %169 {strides = array<i32>} : memref<36x1152xbf16, #tpu.memory_space<vmem>>, vector<32x64xbf16>,
    %c448_91 = arith.constant 448 : index
    %c0_92 = arith.constant 0 : index
    %171 = vector.load %arg8[%c448_91, %c0_92] : memref<512x64xf32, #tpu.memory_space<vmem>>, vector<32x64xf32>
    %172 = vector.broadcast %34 : vector<1x64xf32> to vector<32x64xf32>
    %173 = arith.mulf %171, %172 : vector<32x64xf32>
    %174 = vector.broadcast %36 : vector<1x64xf32> to vector<32x64xf32>
    %175 = arith.addf %173, %174 : vector<32x64xf32>
    %cst_93 = arith.constant 0.000000e+00 : f32
    %176 = vector.broadcast %cst_93 : f32 to vector<32x64xf32>
    %177 = arith.maximumf %175, %176 : vector<32x64xf32>
    %178 = arith.truncf %177 : vector<32x64xf32> to vector<32x64xbf16>
    %c2_94 = arith.constant 2 : index
    %c960 = arith.constant 960 : index
    %179 = vector.load %arg9[%c2_94, %c960] : memref<36x1152xbf16, #tpu.memory_space<vmem>>, vector<32x64xbf16>
    tpu.vector_store %arg9[%c2_94, %c960], %178 {strides = array<i32>} : memref<36x1152xbf16, #tpu.memory_space<vmem>>, vector<32x64xbf16>,
    %c480 = arith.constant 480 : index
    %c0_95 = arith.constant 0 : index
    %180 = vector.load %arg8[%c480, %c0_95] : memref<512x64xf32, #tpu.memory_space<vmem>>, vector<32x64xf32>
    %181 = vector.broadcast %34 : vector<1x64xf32> to vector<32x64xf32>
    %182 = arith.mulf %180, %181 : vector<32x64xf32>
    %183 = vector.broadcast %36 : vector<1x64xf32> to vector<32x64xf32>
    %184 = arith.addf %182, %183 : vector<32x64xf32>
    %cst_96 = arith.constant 0.000000e+00 : f32
    %185 = vector.broadcast %cst_96 : f32 to vector<32x64xf32>
    %186 = arith.maximumf %184, %185 : vector<32x64xf32>
    %187 = arith.truncf %186 : vector<32x64xf32> to vector<32x64xbf16>
    %c2_97 = arith.constant 2 : index
    %c1024 = arith.constant 1024 : index
    %188 = vector.load %arg9[%c2_97, %c1024] : memref<36x1152xbf16, #tpu.memory_space<vmem>>, vector<32x64xbf16>
    tpu.vector_store %arg9[%c2_97, %c1024], %187 {strides = array<i32>} : memref<36x1152xbf16, #tpu.memory_space<vmem>>, vector<32x64xbf16>,
    %c0_98 = arith.constant 0 : index
    %c0_99 = arith.constant 0 : index
    %189 = vector.load %arg9[%c0_98, %c0_99] : memref<36x1152xbf16, #tpu.memory_space<vmem>>, vector<32x128xbf16>
    %c0_100 = arith.constant 0 : index
    %c0_101 = arith.constant 0 : index
    %190 = vector.load %arg10[%c0_100, %c0_101] : memref<512x576xbf16, #tpu.memory_space<vmem>>, vector<32x128xbf16>
    tpu.vector_store %arg10[%c0_100, %c0_101], %189 {strides = array<i32>} : memref<512x576xbf16, #tpu.memory_space<vmem>>, vector<32x128xbf16>,
    %c0_102 = arith.constant 0 : index
    %c128_103 = arith.constant 128 : index
    %191 = vector.load %arg9[%c0_102, %c128_103] : memref<36x1152xbf16, #tpu.memory_space<vmem>>, vector<32x64xbf16>
    %c0_104 = arith.constant 0 : index
    %c384_105 = arith.constant 384 : index
    %192 = vector.load %arg10[%c0_104, %c384_105] : memref<512x576xbf16, #tpu.memory_space<vmem>>, vector<32x64xbf16>
    tpu.vector_store %arg10[%c0_104, %c384_105], %191 {strides = array<i32>} : memref<512x576xbf16, #tpu.memory_space<vmem>>, vector<32x64xbf16>,
    %c2_106 = arith.constant 2 : index
    %c0_107 = arith.constant 0 : index
    %193 = vector.load %arg9[%c2_106, %c0_107] : memref<36x1152xbf16, #tpu.memory_space<vmem>>, vector<32x128xbf16>
    %c0_108 = arith.constant 0 : index
    %c128_109 = arith.constant 128 : index
    %194 = vector.load %arg10[%c0_108, %c128_109] : memref<512x576xbf16, #tpu.memory_space<vmem>>, vector<32x128xbf16>
    tpu.vector_store %arg10[%c0_108, %c128_109], %193 {strides = array<i32>} : memref<512x576xbf16, #tpu.memory_space<vmem>>, vector<32x128xbf16>,
    %c2_110 = arith.constant 2 : index
    %c128_111 = arith.constant 128 : index
    %195 = vector.load %arg9[%c2_110, %c128_111] : memref<36x1152xbf16, #tpu.memory_space<vmem>>, vector<32x64xbf16>
    %c0_112 = arith.constant 0 : index
    %c448_113 = arith.constant 448 : index
    %196 = vector.load %arg10[%c0_112, %c448_113] : memref<512x576xbf16, #tpu.memory_space<vmem>>, vector<32x64xbf16>
    tpu.vector_store %arg10[%c0_112, %c448_113], %195 {strides = array<i32>} : memref<512x576xbf16, #tpu.memory_space<vmem>>, vector<32x64xbf16>,
    %c4 = arith.constant 4 : index
    %c0_114 = arith.constant 0 : index
    %197 = vector.load %arg9[%c4, %c0_114] : memref<36x1152xbf16, #tpu.memory_space<vmem>>, vector<32x128xbf16>
    %c0_115 = arith.constant 0 : index
    %c256_116 = arith.constant 256 : index
    %198 = vector.load %arg10[%c0_115, %c256_116] : memref<512x576xbf16, #tpu.memory_space<vmem>>, vector<32x128xbf16>
    tpu.vector_store %arg10[%c0_115, %c256_116], %197 {strides = array<i32>} : memref<512x576xbf16, #tpu.memory_space<vmem>>, vector<32x128xbf16>,
    %c4_117 = arith.constant 4 : index
    %c128_118 = arith.constant 128 : index
    %199 = vector.load %arg9[%c4_117, %c128_118] : memref<36x1152xbf16, #tpu.memory_space<vmem>>, vector<32x64xbf16>
    %c0_119 = arith.constant 0 : index
    %c512_120 = arith.constant 512 : index
    %200 = vector.load %arg10[%c0_119, %c512_120] : memref<512x576xbf16, #tpu.memory_space<vmem>>, vector<32x64xbf16>
    tpu.vector_store %arg10[%c0_119, %c512_120], %199 {strides = array<i32>} : memref<512x576xbf16, #tpu.memory_space<vmem>>, vector<32x64xbf16>,
    %c0_121 = arith.constant 0 : index
    %c64_122 = arith.constant 64 : index
    %201 = vector.load %arg9[%c0_121, %c64_122] : memref<36x1152xbf16, #tpu.memory_space<vmem>>, vector<32x128xbf16>
    %c32_123 = arith.constant 32 : index
    %c0_124 = arith.constant 0 : index
    %202 = vector.load %arg10[%c32_123, %c0_124] : memref<512x576xbf16, #tpu.memory_space<vmem>>, vector<32x128xbf16>
    tpu.vector_store %arg10[%c32_123, %c0_124], %201 {strides = array<i32>} : memref<512x576xbf16, #tpu.memory_space<vmem>>, vector<32x128xbf16>,
    %c0_125 = arith.constant 0 : index
    %c192_126 = arith.constant 192 : index
    %203 = vector.load %arg9[%c0_125, %c192_126] : memref<36x1152xbf16, #tpu.memory_space<vmem>>, vector<32x64xbf16>
    %c32_127 = arith.constant 32 : index
    %c384_128 = arith.constant 384 : index
    %204 = vector.load %arg10[%c32_127, %c384_128] : memref<512x576xbf16, #tpu.memory_space<vmem>>, vector<32x64xbf16>
    tpu.vector_store %arg10[%c32_127, %c384_128], %203 {strides = array<i32>} : memref<512x576xbf16, #tpu.memory_space<vmem>>, vector<32x64xbf16>,
    %c2_129 = arith.constant 2 : index
    %c64_130 = arith.constant 64 : index
    %205 = vector.load %arg9[%c2_129, %c64_130] : memref<36x1152xbf16, #tpu.memory_space<vmem>>, vector<32x128xbf16>
    %c32_131 = arith.constant 32 : index
    %c128_132 = arith.constant 128 : index
    %206 = vector.load %arg10[%c32_131, %c128_132] : memref<512x576xbf16, #tpu.memory_space<vmem>>, vector<32x128xbf16>
    tpu.vector_store %arg10[%c32_131, %c128_132], %205 {strides = array<i32>} : memref<512x576xbf16, #tpu.memory_space<vmem>>, vector<32x128xbf16>,
    %c2_133 = arith.constant 2 : index
    %c192_134 = arith.constant 192 : index
    %207 = vector.load %arg9[%c2_133, %c192_134] : memref<36x1152xbf16, #tpu.memory_space<vmem>>, vector<32x64xbf16>
    %c32_135 = arith.constant 32 : index
    %c448_136 = arith.constant 448 : index
    %208 = vector.load %arg10[%c32_135, %c448_136] : memref<512x576xbf16, #tpu.memory_space<vmem>>, vector<32x64xbf16>
    tpu.vector_store %arg10[%c32_135, %c448_136], %207 {strides = array<i32>} : memref<512x576xbf16, #tpu.memory_space<vmem>>, vector<32x64xbf16>,
    %c4_137 = arith.constant 4 : index
    %c64_138 = arith.constant 64 : index
    %209 = vector.load %arg9[%c4_137, %c64_138] : memref<36x1152xbf16, #tpu.memory_space<vmem>>, vector<32x128xbf16>
    %c32_139 = arith.constant 32 : index
    %c256_140 = arith.constant 256 : index
    %210 = vector.load %arg10[%c32_139, %c256_140] : memref<512x576xbf16, #tpu.memory_space<vmem>>, vector<32x128xbf16>
    tpu.vector_store %arg10[%c32_139, %c256_140], %209 {strides = array<i32>} : memref<512x576xbf16, #tpu.memory_space<vmem>>, vector<32x128xbf16>,
    %c4_141 = arith.constant 4 : index
    %c192_142 = arith.constant 192 : index
    %211 = vector.load %arg9[%c4_141, %c192_142] : memref<36x1152xbf16, #tpu.memory_space<vmem>>, vector<32x64xbf16>
    %c32_143 = arith.constant 32 : index
    %c512_144 = arith.constant 512 : index
    %212 = vector.load %arg10[%c32_143, %c512_144] : memref<512x576xbf16, #tpu.memory_space<vmem>>, vector<32x64xbf16>
    tpu.vector_store %arg10[%c32_143, %c512_144], %211 {strides = array<i32>} : memref<512x576xbf16, #tpu.memory_space<vmem>>, vector<32x64xbf16>,
    %c0_145 = arith.constant 0 : index
    %c128_146 = arith.constant 128 : index
    %213 = vector.load %arg9[%c0_145, %c128_146] : memref<36x1152xbf16, #tpu.memory_space<vmem>>, vector<32x128xbf16>
    %c64_147 = arith.constant 64 : index
    %c0_148 = arith.constant 0 : index
    %214 = vector.load %arg10[%c64_147, %c0_148] : memref<512x576xbf16, #tpu.memory_space<vmem>>, vector<32x128xbf16>
    tpu.vector_store %arg10[%c64_147, %c0_148], %213 {strides = array<i32>} : memref<512x576xbf16, #tpu.memory_space<vmem>>, vector<32x128xbf16>,
    %c0_149 = arith.constant 0 : index
    %c256_150 = arith.constant 256 : index
    %215 = vector.load %arg9[%c0_149, %c256_150] : memref<36x1152xbf16, #tpu.memory_space<vmem>>, vector<32x64xbf16>
    %c64_151 = arith.constant 64 : index
    %c384_152 = arith.constant 384 : index
    %216 = vector.load %arg10[%c64_151, %c384_152] : memref<512x576xbf16, #tpu.memory_space<vmem>>, vector<32x64xbf16>
    tpu.vector_store %arg10[%c64_151, %c384_152], %215 {strides = array<i32>} : memref<512x576xbf16, #tpu.memory_space<vmem>>, vector<32x64xbf16>,
    %c2_153 = arith.constant 2 : index
    %c128_154 = arith.constant 128 : index
    %217 = vector.load %arg9[%c2_153, %c128_154] : memref<36x1152xbf16, #tpu.memory_space<vmem>>, vector<32x128xbf16>
    %c64_155 = arith.constant 64 : index
    %c128_156 = arith.constant 128 : index
    %218 = vector.load %arg10[%c64_155, %c128_156] : memref<512x576xbf16, #tpu.memory_space<vmem>>, vector<32x128xbf16>
    tpu.vector_store %arg10[%c64_155, %c128_156], %217 {strides = array<i32>} : memref<512x576xbf16, #tpu.memory_space<vmem>>, vector<32x128xbf16>,
    %c2_157 = arith.constant 2 : index
    %c256_158 = arith.constant 256 : index
    %219 = vector.load %arg9[%c2_157, %c256_158] : memref<36x1152xbf16, #tpu.memory_space<vmem>>, vector<32x64xbf16>
    %c64_159 = arith.constant 64 : index
    %c448_160 = arith.constant 448 : index
    %220 = vector.load %arg10[%c64_159, %c448_160] : memref<512x576xbf16, #tpu.memory_space<vmem>>, vector<32x64xbf16>
    tpu.vector_store %arg10[%c64_159, %c448_160], %219 {strides = array<i32>} : memref<512x576xbf16, #tpu.memory_space<vmem>>, vector<32x64xbf16>,
    %c4_161 = arith.constant 4 : index
    %c128_162 = arith.constant 128 : index
    %221 = vector.load %arg9[%c4_161, %c128_162] : memref<36x1152xbf16, #tpu.memory_space<vmem>>, vector<32x128xbf16>
    %c64_163 = arith.constant 64 : index
    %c256_164 = arith.constant 256 : index
    %222 = vector.load %arg10[%c64_163, %c256_164] : memref<512x576xbf16, #tpu.memory_space<vmem>>, vector<32x128xbf16>
    tpu.vector_store %arg10[%c64_163, %c256_164], %221 {strides = array<i32>} : memref<512x576xbf16, #tpu.memory_space<vmem>>, vector<32x128xbf16>,
    %c4_165 = arith.constant 4 : index
    %c256_166 = arith.constant 256 : index
    %223 = vector.load %arg9[%c4_165, %c256_166] : memref<36x1152xbf16, #tpu.memory_space<vmem>>, vector<32x64xbf16>
    %c64_167 = arith.constant 64 : index
    %c512_168 = arith.constant 512 : index
    %224 = vector.load %arg10[%c64_167, %c512_168] : memref<512x576xbf16, #tpu.memory_space<vmem>>, vector<32x64xbf16>
    tpu.vector_store %arg10[%c64_167, %c512_168], %223 {strides = array<i32>} : memref<512x576xbf16, #tpu.memory_space<vmem>>, vector<32x64xbf16>,
    %c0_169 = arith.constant 0 : index
    %c192_170 = arith.constant 192 : index
    %225 = vector.load %arg9[%c0_169, %c192_170] : memref<36x1152xbf16, #tpu.memory_space<vmem>>, vector<32x128xbf16>
    %c96_171 = arith.constant 96 : index
    %c0_172 = arith.constant 0 : index
    %226 = vector.load %arg10[%c96_171, %c0_172] : memref<512x576xbf16, #tpu.memory_space<vmem>>, vector<32x128xbf16>
    tpu.vector_store %arg10[%c96_171, %c0_172], %225 {strides = array<i32>} : memref<512x576xbf16, #tpu.memory_space<vmem>>, vector<32x128xbf16>,
    %c0_173 = arith.constant 0 : index
    %c320_174 = arith.constant 320 : index
    %227 = vector.load %arg9[%c0_173, %c320_174] : memref<36x1152xbf16, #tpu.memory_space<vmem>>, vector<32x64xbf16>
    %c96_175 = arith.constant 96 : index
    %c384_176 = arith.constant 384 : index
    %228 = vector.load %arg10[%c96_175, %c384_176] : memref<512x576xbf16, #tpu.memory_space<vmem>>, vector<32x64xbf16>
    tpu.vector_store %arg10[%c96_175, %c384_176], %227 {strides = array<i32>} : memref<512x576xbf16, #tpu.memory_space<vmem>>, vector<32x64xbf16>,
    %c2_177 = arith.constant 2 : index
    %c192_178 = arith.constant 192 : index
    %229 = vector.load %arg9[%c2_177, %c192_178] : memref<36x1152xbf16, #tpu.memory_space<vmem>>, vector<32x128xbf16>
    %c96_179 = arith.constant 96 : index
    %c128_180 = arith.constant 128 : index
    %230 = vector.load %arg10[%c96_179, %c128_180] : memref<512x576xbf16, #tpu.memory_space<vmem>>, vector<32x128xbf16>
    tpu.vector_store %arg10[%c96_179, %c128_180], %229 {strides = array<i32>} : memref<512x576xbf16, #tpu.memory_space<vmem>>, vector<32x128xbf16>,
    %c2_181 = arith.constant 2 : index
    %c320_182 = arith.constant 320 : index
    %231 = vector.load %arg9[%c2_181, %c320_182] : memref<36x1152xbf16, #tpu.memory_space<vmem>>, vector<32x64xbf16>
    %c96_183 = arith.constant 96 : index
    %c448_184 = arith.constant 448 : index
    %232 = vector.load %arg10[%c96_183, %c448_184] : memref<512x576xbf16, #tpu.memory_space<vmem>>, vector<32x64xbf16>
    tpu.vector_store %arg10[%c96_183, %c448_184], %231 {strides = array<i32>} : memref<512x576xbf16, #tpu.memory_space<vmem>>, vector<32x64xbf16>,
    %c4_185 = arith.constant 4 : index
    %c192_186 = arith.constant 192 : index
    %233 = vector.load %arg9[%c4_185, %c192_186] : memref<36x1152xbf16, #tpu.memory_space<vmem>>, vector<32x128xbf16>
    %c96_187 = arith.constant 96 : index
    %c256_188 = arith.constant 256 : index
    %234 = vector.load %arg10[%c96_187, %c256_188] : memref<512x576xbf16, #tpu.memory_space<vmem>>, vector<32x128xbf16>
    tpu.vector_store %arg10[%c96_187, %c256_188], %233 {strides = array<i32>} : memref<512x576xbf16, #tpu.memory_space<vmem>>, vector<32x128xbf16>,
    %c4_189 = arith.constant 4 : index
    %c320_190 = arith.constant 320 : index
    %235 = vector.load %arg9[%c4_189, %c320_190] : memref<36x1152xbf16, #tpu.memory_space<vmem>>, vector<32x64xbf16>
    %c96_191 = arith.constant 96 : index
    %c512_192 = arith.constant 512 : index
    %236 = vector.load %arg10[%c96_191, %c512_192] : memref<512x576xbf16, #tpu.memory_space<vmem>>, vector<32x64xbf16>
    tpu.vector_store %arg10[%c96_191, %c512_192], %235 {strides = array<i32>} : memref<512x576xbf16, #tpu.memory_space<vmem>>, vector<32x64xbf16>,
    %c0_193 = arith.constant 0 : index
    %c256_194 = arith.constant 256 : index
    %237 = vector.load %arg9[%c0_193, %c256_194] : memref<36x1152xbf16, #tpu.memory_space<vmem>>, vector<32x128xbf16>
    %c128_195 = arith.constant 128 : index
    %c0_196 = arith.constant 0 : index
    %238 = vector.load %arg10[%c128_195, %c0_196] : memref<512x576xbf16, #tpu.memory_space<vmem>>, vector<32x128xbf16>
    tpu.vector_store %arg10[%c128_195, %c0_196], %237 {strides = array<i32>} : memref<512x576xbf16, #tpu.memory_space<vmem>>, vector<32x128xbf16>,
    %c0_197 = arith.constant 0 : index
    %c384_198 = arith.constant 384 : index
    %239 = vector.load %arg9[%c0_197, %c384_198] : memref<36x1152xbf16, #tpu.memory_space<vmem>>, vector<32x64xbf16>
    %c128_199 = arith.constant 128 : index
    %c384_200 = arith.constant 384 : index
    %240 = vector.load %arg10[%c128_199, %c384_200] : memref<512x576xbf16, #tpu.memory_space<vmem>>, vector<32x64xbf16>
    tpu.vector_store %arg10[%c128_199, %c384_200], %239 {strides = array<i32>} : memref<512x576xbf16, #tpu.memory_space<vmem>>, vector<32x64xbf16>,
    %c2_201 = arith.constant 2 : index
    %c256_202 = arith.constant 256 : index
    %241 = vector.load %arg9[%c2_201, %c256_202] : memref<36x1152xbf16, #tpu.memory_space<vmem>>, vector<32x128xbf16>
    %c128_203 = arith.constant 128 : index
    %c128_204 = arith.constant 128 : index
    %242 = vector.load %arg10[%c128_203, %c128_204] : memref<512x576xbf16, #tpu.memory_space<vmem>>, vector<32x128xbf16>
    tpu.vector_store %arg10[%c128_203, %c128_204], %241 {strides = array<i32>} : memref<512x576xbf16, #tpu.memory_space<vmem>>, vector<32x128xbf16>,
    %c2_205 = arith.constant 2 : index
    %c384_206 = arith.constant 384 : index
    %243 = vector.load %arg9[%c2_205, %c384_206] : memref<36x1152xbf16, #tpu.memory_space<vmem>>, vector<32x64xbf16>
    %c128_207 = arith.constant 128 : index
    %c448_208 = arith.constant 448 : index
    %244 = vector.load %arg10[%c128_207, %c448_208] : memref<512x576xbf16, #tpu.memory_space<vmem>>, vector<32x64xbf16>
    tpu.vector_store %arg10[%c128_207, %c448_208], %243 {strides = array<i32>} : memref<512x576xbf16, #tpu.memory_space<vmem>>, vector<32x64xbf16>,
    %c4_209 = arith.constant 4 : index
    %c256_210 = arith.constant 256 : index
    %245 = vector.load %arg9[%c4_209, %c256_210] : memref<36x1152xbf16, #tpu.memory_space<vmem>>, vector<32x128xbf16>
    %c128_211 = arith.constant 128 : index
    %c256_212 = arith.constant 256 : index
    %246 = vector.load %arg10[%c128_211, %c256_212] : memref<512x576xbf16, #tpu.memory_space<vmem>>, vector<32x128xbf16>
    tpu.vector_store %arg10[%c128_211, %c256_212], %245 {strides = array<i32>} : memref<512x576xbf16, #tpu.memory_space<vmem>>, vector<32x128xbf16>,
    %c4_213 = arith.constant 4 : index
    %c384_214 = arith.constant 384 : index
    %247 = vector.load %arg9[%c4_213, %c384_214] : memref<36x1152xbf16, #tpu.memory_space<vmem>>, vector<32x64xbf16>
    %c128_215 = arith.constant 128 : index
    %c512_216 = arith.constant 512 : index
    %248 = vector.load %arg10[%c128_215, %c512_216] : memref<512x576xbf16, #tpu.memory_space<vmem>>, vector<32x64xbf16>
    tpu.vector_store %arg10[%c128_215, %c512_216], %247 {strides = array<i32>} : memref<512x576xbf16, #tpu.memory_space<vmem>>, vector<32x64xbf16>,
    %c0_217 = arith.constant 0 : index
    %c320_218 = arith.constant 320 : index
    %249 = vector.load %arg9[%c0_217, %c320_218] : memref<36x1152xbf16, #tpu.memory_space<vmem>>, vector<32x128xbf16>
    %c160_219 = arith.constant 160 : index
    %c0_220 = arith.constant 0 : index
    %250 = vector.load %arg10[%c160_219, %c0_220] : memref<512x576xbf16, #tpu.memory_space<vmem>>, vector<32x128xbf16>
    tpu.vector_store %arg10[%c160_219, %c0_220], %249 {strides = array<i32>} : memref<512x576xbf16, #tpu.memory_space<vmem>>, vector<32x128xbf16>,
    %c0_221 = arith.constant 0 : index
    %c448_222 = arith.constant 448 : index
    %251 = vector.load %arg9[%c0_221, %c448_222] : memref<36x1152xbf16, #tpu.memory_space<vmem>>, vector<32x64xbf16>
    %c160_223 = arith.constant 160 : index
    %c384_224 = arith.constant 384 : index
    %252 = vector.load %arg10[%c160_223, %c384_224] : memref<512x576xbf16, #tpu.memory_space<vmem>>, vector<32x64xbf16>
    tpu.vector_store %arg10[%c160_223, %c384_224], %251 {strides = array<i32>} : memref<512x576xbf16, #tpu.memory_space<vmem>>, vector<32x64xbf16>,
    %c2_225 = arith.constant 2 : index
    %c320_226 = arith.constant 320 : index
    %253 = vector.load %arg9[%c2_225, %c320_226] : memref<36x1152xbf16, #tpu.memory_space<vmem>>, vector<32x128xbf16>
    %c160_227 = arith.constant 160 : index
    %c128_228 = arith.constant 128 : index
    %254 = vector.load %arg10[%c160_227, %c128_228] : memref<512x576xbf16, #tpu.memory_space<vmem>>, vector<32x128xbf16>
    tpu.vector_store %arg10[%c160_227, %c128_228], %253 {strides = array<i32>} : memref<512x576xbf16, #tpu.memory_space<vmem>>, vector<32x128xbf16>,
    %c2_229 = arith.constant 2 : index
    %c448_230 = arith.constant 448 : index
    %255 = vector.load %arg9[%c2_229, %c448_230] : memref<36x1152xbf16, #tpu.memory_space<vmem>>, vector<32x64xbf16>
    %c160_231 = arith.constant 160 : index
    %c448_232 = arith.constant 448 : index
    %256 = vector.load %arg10[%c160_231, %c448_232] : memref<512x576xbf16, #tpu.memory_space<vmem>>, vector<32x64xbf16>
    tpu.vector_store %arg10[%c160_231, %c448_232], %255 {strides = array<i32>} : memref<512x576xbf16, #tpu.memory_space<vmem>>, vector<32x64xbf16>,
    %c4_233 = arith.constant 4 : index
    %c320_234 = arith.constant 320 : index
    %257 = vector.load %arg9[%c4_233, %c320_234] : memref<36x1152xbf16, #tpu.memory_space<vmem>>, vector<32x128xbf16>
    %c160_235 = arith.constant 160 : index
    %c256_236 = arith.constant 256 : index
    %258 = vector.load %arg10[%c160_235, %c256_236] : memref<512x576xbf16, #tpu.memory_space<vmem>>, vector<32x128xbf16>
    tpu.vector_store %arg10[%c160_235, %c256_236], %257 {strides = array<i32>} : memref<512x576xbf16, #tpu.memory_space<vmem>>, vector<32x128xbf16>,
    %c4_237 = arith.constant 4 : index
    %c448_238 = arith.constant 448 : index
    %259 = vector.load %arg9[%c4_237, %c448_238] : memref<36x1152xbf16, #tpu.memory_space<vmem>>, vector<32x64xbf16>
    %c160_239 = arith.constant 160 : index
    %c512_240 = arith.constant 512 : index
    %260 = vector.load %arg10[%c160_239, %c512_240] : memref<512x576xbf16, #tpu.memory_space<vmem>>, vector<32x64xbf16>
    tpu.vector_store %arg10[%c160_239, %c512_240], %259 {strides = array<i32>} : memref<512x576xbf16, #tpu.memory_space<vmem>>, vector<32x64xbf16>,
    %c0_241 = arith.constant 0 : index
    %c384_242 = arith.constant 384 : index
    %261 = vector.load %arg9[%c0_241, %c384_242] : memref<36x1152xbf16, #tpu.memory_space<vmem>>, vector<32x128xbf16>
    %c192_243 = arith.constant 192 : index
    %c0_244 = arith.constant 0 : index
    %262 = vector.load %arg10[%c192_243, %c0_244] : memref<512x576xbf16, #tpu.memory_space<vmem>>, vector<32x128xbf16>
    tpu.vector_store %arg10[%c192_243, %c0_244], %261 {strides = array<i32>} : memref<512x576xbf16, #tpu.memory_space<vmem>>, vector<32x128xbf16>,
    %c0_245 = arith.constant 0 : index
    %c512_246 = arith.constant 512 : index
    %263 = vector.load %arg9[%c0_245, %c512_246] : memref<36x1152xbf16, #tpu.memory_space<vmem>>, vector<32x64xbf16>
    %c192_247 = arith.constant 192 : index
    %c384_248 = arith.constant 384 : index
    %264 = vector.load %arg10[%c192_247, %c384_248] : memref<512x576xbf16, #tpu.memory_space<vmem>>, vector<32x64xbf16>
    tpu.vector_store %arg10[%c192_247, %c384_248], %263 {strides = array<i32>} : memref<512x576xbf16, #tpu.memory_space<vmem>>, vector<32x64xbf16>,
    %c2_249 = arith.constant 2 : index
    %c384_250 = arith.constant 384 : index
    %265 = vector.load %arg9[%c2_249, %c384_250] : memref<36x1152xbf16, #tpu.memory_space<vmem>>, vector<32x128xbf16>
    %c192_251 = arith.constant 192 : index
    %c128_252 = arith.constant 128 : index
    %266 = vector.load %arg10[%c192_251, %c128_252] : memref<512x576xbf16, #tpu.memory_space<vmem>>, vector<32x128xbf16>
    tpu.vector_store %arg10[%c192_251, %c128_252], %265 {strides = array<i32>} : memref<512x576xbf16, #tpu.memory_space<vmem>>, vector<32x128xbf16>,
    %c2_253 = arith.constant 2 : index
    %c512_254 = arith.constant 512 : index
    %267 = vector.load %arg9[%c2_253, %c512_254] : memref<36x1152xbf16, #tpu.memory_space<vmem>>, vector<32x64xbf16>
    %c192_255 = arith.constant 192 : index
    %c448_256 = arith.constant 448 : index
    %268 = vector.load %arg10[%c192_255, %c448_256] : memref<512x576xbf16, #tpu.memory_space<vmem>>, vector<32x64xbf16>
    tpu.vector_store %arg10[%c192_255, %c448_256], %267 {strides = array<i32>} : memref<512x576xbf16, #tpu.memory_space<vmem>>, vector<32x64xbf16>,
    %c4_257 = arith.constant 4 : index
    %c384_258 = arith.constant 384 : index
    %269 = vector.load %arg9[%c4_257, %c384_258] : memref<36x1152xbf16, #tpu.memory_space<vmem>>, vector<32x128xbf16>
    %c192_259 = arith.constant 192 : index
    %c256_260 = arith.constant 256 : index
    %270 = vector.load %arg10[%c192_259, %c256_260] : memref<512x576xbf16, #tpu.memory_space<vmem>>, vector<32x128xbf16>
    tpu.vector_store %arg10[%c192_259, %c256_260], %269 {strides = array<i32>} : memref<512x576xbf16, #tpu.memory_space<vmem>>, vector<32x128xbf16>,
    %c4_261 = arith.constant 4 : index
    %c512_262 = arith.constant 512 : index
    %271 = vector.load %arg9[%c4_261, %c512_262] : memref<36x1152xbf16, #tpu.memory_space<vmem>>, vector<32x64xbf16>
    %c192_263 = arith.constant 192 : index
    %c512_264 = arith.constant 512 : index
    %272 = vector.load %arg10[%c192_263, %c512_264] : memref<512x576xbf16, #tpu.memory_space<vmem>>, vector<32x64xbf16>
    tpu.vector_store %arg10[%c192_263, %c512_264], %271 {strides = array<i32>} : memref<512x576xbf16, #tpu.memory_space<vmem>>, vector<32x64xbf16>,
    %c0_265 = arith.constant 0 : index
    %c448_266 = arith.constant 448 : index
    %273 = vector.load %arg9[%c0_265, %c448_266] : memref<36x1152xbf16, #tpu.memory_space<vmem>>, vector<32x128xbf16>
    %c224_267 = arith.constant 224 : index
    %c0_268 = arith.constant 0 : index
    %274 = vector.load %arg10[%c224_267, %c0_268] : memref<512x576xbf16, #tpu.memory_space<vmem>>, vector<32x128xbf16>
    tpu.vector_store %arg10[%c224_267, %c0_268], %273 {strides = array<i32>} : memref<512x576xbf16, #tpu.memory_space<vmem>>, vector<32x128xbf16>,
    %c0_269 = arith.constant 0 : index
    %c576_270 = arith.constant 576 : index
    %275 = vector.load %arg9[%c0_269, %c576_270] : memref<36x1152xbf16, #tpu.memory_space<vmem>>, vector<32x64xbf16>
    %c224_271 = arith.constant 224 : index
    %c384_272 = arith.constant 384 : index
    %276 = vector.load %arg10[%c224_271, %c384_272] : memref<512x576xbf16, #tpu.memory_space<vmem>>, vector<32x64xbf16>
    tpu.vector_store %arg10[%c224_271, %c384_272], %275 {strides = array<i32>} : memref<512x576xbf16, #tpu.memory_space<vmem>>, vector<32x64xbf16>,
    %c2_273 = arith.constant 2 : index
    %c448_274 = arith.constant 448 : index
    %277 = vector.load %arg9[%c2_273, %c448_274] : memref<36x1152xbf16, #tpu.memory_space<vmem>>, vector<32x128xbf16>
    %c224_275 = arith.constant 224 : index
    %c128_276 = arith.constant 128 : index
    %278 = vector.load %arg10[%c224_275, %c128_276] : memref<512x576xbf16, #tpu.memory_space<vmem>>, vector<32x128xbf16>
    tpu.vector_store %arg10[%c224_275, %c128_276], %277 {strides = array<i32>} : memref<512x576xbf16, #tpu.memory_space<vmem>>, vector<32x128xbf16>,
    %c2_277 = arith.constant 2 : index
    %c576_278 = arith.constant 576 : index
    %279 = vector.load %arg9[%c2_277, %c576_278] : memref<36x1152xbf16, #tpu.memory_space<vmem>>, vector<32x64xbf16>
    %c224_279 = arith.constant 224 : index
    %c448_280 = arith.constant 448 : index
    %280 = vector.load %arg10[%c224_279, %c448_280] : memref<512x576xbf16, #tpu.memory_space<vmem>>, vector<32x64xbf16>
    tpu.vector_store %arg10[%c224_279, %c448_280], %279 {strides = array<i32>} : memref<512x576xbf16, #tpu.memory_space<vmem>>, vector<32x64xbf16>,
    %c4_281 = arith.constant 4 : index
    %c448_282 = arith.constant 448 : index
    %281 = vector.load %arg9[%c4_281, %c448_282] : memref<36x1152xbf16, #tpu.memory_space<vmem>>, vector<32x128xbf16>
    %c224_283 = arith.constant 224 : index
    %c256_284 = arith.constant 256 : index
    %282 = vector.load %arg10[%c224_283, %c256_284] : memref<512x576xbf16, #tpu.memory_space<vmem>>, vector<32x128xbf16>
    tpu.vector_store %arg10[%c224_283, %c256_284], %281 {strides = array<i32>} : memref<512x576xbf16, #tpu.memory_space<vmem>>, vector<32x128xbf16>,
    %c4_285 = arith.constant 4 : index
    %c576_286 = arith.constant 576 : index
    %283 = vector.load %arg9[%c4_285, %c576_286] : memref<36x1152xbf16, #tpu.memory_space<vmem>>, vector<32x64xbf16>
    %c224_287 = arith.constant 224 : index
    %c512_288 = arith.constant 512 : index
    %284 = vector.load %arg10[%c224_287, %c512_288] : memref<512x576xbf16, #tpu.memory_space<vmem>>, vector<32x64xbf16>
    tpu.vector_store %arg10[%c224_287, %c512_288], %283 {strides = array<i32>} : memref<512x576xbf16, #tpu.memory_space<vmem>>, vector<32x64xbf16>,
    %c0_289 = arith.constant 0 : index
    %c512_290 = arith.constant 512 : index
    %285 = vector.load %arg9[%c0_289, %c512_290] : memref<36x1152xbf16, #tpu.memory_space<vmem>>, vector<32x128xbf16>
    %c256_291 = arith.constant 256 : index
    %c0_292 = arith.constant 0 : index
    %286 = vector.load %arg10[%c256_291, %c0_292] : memref<512x576xbf16, #tpu.memory_space<vmem>>, vector<32x128xbf16>
    tpu.vector_store %arg10[%c256_291, %c0_292], %285 {strides = array<i32>} : memref<512x576xbf16, #tpu.memory_space<vmem>>, vector<32x128xbf16>,
    %c0_293 = arith.constant 0 : index
    %c640_294 = arith.constant 640 : index
    %287 = vector.load %arg9[%c0_293, %c640_294] : memref<36x1152xbf16, #tpu.memory_space<vmem>>, vector<32x64xbf16>
    %c256_295 = arith.constant 256 : index
    %c384_296 = arith.constant 384 : index
    %288 = vector.load %arg10[%c256_295, %c384_296] : memref<512x576xbf16, #tpu.memory_space<vmem>>, vector<32x64xbf16>
    tpu.vector_store %arg10[%c256_295, %c384_296], %287 {strides = array<i32>} : memref<512x576xbf16, #tpu.memory_space<vmem>>, vector<32x64xbf16>,
    %c2_297 = arith.constant 2 : index
    %c512_298 = arith.constant 512 : index
    %289 = vector.load %arg9[%c2_297, %c512_298] : memref<36x1152xbf16, #tpu.memory_space<vmem>>, vector<32x128xbf16>
    %c256_299 = arith.constant 256 : index
    %c128_300 = arith.constant 128 : index
    %290 = vector.load %arg10[%c256_299, %c128_300] : memref<512x576xbf16, #tpu.memory_space<vmem>>, vector<32x128xbf16>
    tpu.vector_store %arg10[%c256_299, %c128_300], %289 {strides = array<i32>} : memref<512x576xbf16, #tpu.memory_space<vmem>>, vector<32x128xbf16>,
    %c2_301 = arith.constant 2 : index
    %c640_302 = arith.constant 640 : index
    %291 = vector.load %arg9[%c2_301, %c640_302] : memref<36x1152xbf16, #tpu.memory_space<vmem>>, vector<32x64xbf16>
    %c256_303 = arith.constant 256 : index
    %c448_304 = arith.constant 448 : index
    %292 = vector.load %arg10[%c256_303, %c448_304] : memref<512x576xbf16, #tpu.memory_space<vmem>>, vector<32x64xbf16>
    tpu.vector_store %arg10[%c256_303, %c448_304], %291 {strides = array<i32>} : memref<512x576xbf16, #tpu.memory_space<vmem>>, vector<32x64xbf16>,
    %c4_305 = arith.constant 4 : index
    %c512_306 = arith.constant 512 : index
    %293 = vector.load %arg9[%c4_305, %c512_306] : memref<36x1152xbf16, #tpu.memory_space<vmem>>, vector<32x128xbf16>
    %c256_307 = arith.constant 256 : index
    %c256_308 = arith.constant 256 : index
    %294 = vector.load %arg10[%c256_307, %c256_308] : memref<512x576xbf16, #tpu.memory_space<vmem>>, vector<32x128xbf16>
    tpu.vector_store %arg10[%c256_307, %c256_308], %293 {strides = array<i32>} : memref<512x576xbf16, #tpu.memory_space<vmem>>, vector<32x128xbf16>,
    %c4_309 = arith.constant 4 : index
    %c640_310 = arith.constant 640 : index
    %295 = vector.load %arg9[%c4_309, %c640_310] : memref<36x1152xbf16, #tpu.memory_space<vmem>>, vector<32x64xbf16>
    %c256_311 = arith.constant 256 : index
    %c512_312 = arith.constant 512 : index
    %296 = vector.load %arg10[%c256_311, %c512_312] : memref<512x576xbf16, #tpu.memory_space<vmem>>, vector<32x64xbf16>
    tpu.vector_store %arg10[%c256_311, %c512_312], %295 {strides = array<i32>} : memref<512x576xbf16, #tpu.memory_space<vmem>>, vector<32x64xbf16>,
    %c0_313 = arith.constant 0 : index
    %c576_314 = arith.constant 576 : index
    %297 = vector.load %arg9[%c0_313, %c576_314] : memref<36x1152xbf16, #tpu.memory_space<vmem>>, vector<32x128xbf16>
    %c288_315 = arith.constant 288 : index
    %c0_316 = arith.constant 0 : index
    %298 = vector.load %arg10[%c288_315, %c0_316] : memref<512x576xbf16, #tpu.memory_space<vmem>>, vector<32x128xbf16>
    tpu.vector_store %arg10[%c288_315, %c0_316], %297 {strides = array<i32>} : memref<512x576xbf16, #tpu.memory_space<vmem>>, vector<32x128xbf16>,
    %c0_317 = arith.constant 0 : index
    %c704_318 = arith.constant 704 : index
    %299 = vector.load %arg9[%c0_317, %c704_318] : memref<36x1152xbf16, #tpu.memory_space<vmem>>, vector<32x64xbf16>
    %c288_319 = arith.constant 288 : index
    %c384_320 = arith.constant 384 : index
    %300 = vector.load %arg10[%c288_319, %c384_320] : memref<512x576xbf16, #tpu.memory_space<vmem>>, vector<32x64xbf16>
    tpu.vector_store %arg10[%c288_319, %c384_320], %299 {strides = array<i32>} : memref<512x576xbf16, #tpu.memory_space<vmem>>, vector<32x64xbf16>,
    %c2_321 = arith.constant 2 : index
    %c576_322 = arith.constant 576 : index
    %301 = vector.load %arg9[%c2_321, %c576_322] : memref<36x1152xbf16, #tpu.memory_space<vmem>>, vector<32x128xbf16>
    %c288_323 = arith.constant 288 : index
    %c128_324 = arith.constant 128 : index
    %302 = vector.load %arg10[%c288_323, %c128_324] : memref<512x576xbf16, #tpu.memory_space<vmem>>, vector<32x128xbf16>
    tpu.vector_store %arg10[%c288_323, %c128_324], %301 {strides = array<i32>} : memref<512x576xbf16, #tpu.memory_space<vmem>>, vector<32x128xbf16>,
    %c2_325 = arith.constant 2 : index
    %c704_326 = arith.constant 704 : index
    %303 = vector.load %arg9[%c2_325, %c704_326] : memref<36x1152xbf16, #tpu.memory_space<vmem>>, vector<32x64xbf16>
    %c288_327 = arith.constant 288 : index
    %c448_328 = arith.constant 448 : index
    %304 = vector.load %arg10[%c288_327, %c448_328] : memref<512x576xbf16, #tpu.memory_space<vmem>>, vector<32x64xbf16>
    tpu.vector_store %arg10[%c288_327, %c448_328], %303 {strides = array<i32>} : memref<512x576xbf16, #tpu.memory_space<vmem>>, vector<32x64xbf16>,
    %c4_329 = arith.constant 4 : index
    %c576_330 = arith.constant 576 : index
    %305 = vector.load %arg9[%c4_329, %c576_330] : memref<36x1152xbf16, #tpu.memory_space<vmem>>, vector<32x128xbf16>
    %c288_331 = arith.constant 288 : index
    %c256_332 = arith.constant 256 : index
    %306 = vector.load %arg10[%c288_331, %c256_332] : memref<512x576xbf16, #tpu.memory_space<vmem>>, vector<32x128xbf16>
    tpu.vector_store %arg10[%c288_331, %c256_332], %305 {strides = array<i32>} : memref<512x576xbf16, #tpu.memory_space<vmem>>, vector<32x128xbf16>,
    %c4_333 = arith.constant 4 : index
    %c704_334 = arith.constant 704 : index
    %307 = vector.load %arg9[%c4_333, %c704_334] : memref<36x1152xbf16, #tpu.memory_space<vmem>>, vector<32x64xbf16>
    %c288_335 = arith.constant 288 : index
    %c512_336 = arith.constant 512 : index
    %308 = vector.load %arg10[%c288_335, %c512_336] : memref<512x576xbf16, #tpu.memory_space<vmem>>, vector<32x64xbf16>
    tpu.vector_store %arg10[%c288_335, %c512_336], %307 {strides = array<i32>} : memref<512x576xbf16, #tpu.memory_space<vmem>>, vector<32x64xbf16>,
    %c0_337 = arith.constant 0 : index
    %c640_338 = arith.constant 640 : index
    %309 = vector.load %arg9[%c0_337, %c640_338] : memref<36x1152xbf16, #tpu.memory_space<vmem>>, vector<32x128xbf16>
    %c320_339 = arith.constant 320 : index
    %c0_340 = arith.constant 0 : index
    %310 = vector.load %arg10[%c320_339, %c0_340] : memref<512x576xbf16, #tpu.memory_space<vmem>>, vector<32x128xbf16>
    tpu.vector_store %arg10[%c320_339, %c0_340], %309 {strides = array<i32>} : memref<512x576xbf16, #tpu.memory_space<vmem>>, vector<32x128xbf16>,
    %c0_341 = arith.constant 0 : index
    %c768_342 = arith.constant 768 : index
    %311 = vector.load %arg9[%c0_341, %c768_342] : memref<36x1152xbf16, #tpu.memory_space<vmem>>, vector<32x64xbf16>
    %c320_343 = arith.constant 320 : index
    %c384_344 = arith.constant 384 : index
    %312 = vector.load %arg10[%c320_343, %c384_344] : memref<512x576xbf16, #tpu.memory_space<vmem>>, vector<32x64xbf16>
    tpu.vector_store %arg10[%c320_343, %c384_344], %311 {strides = array<i32>} : memref<512x576xbf16, #tpu.memory_space<vmem>>, vector<32x64xbf16>,
    %c2_345 = arith.constant 2 : index
    %c640_346 = arith.constant 640 : index
    %313 = vector.load %arg9[%c2_345, %c640_346] : memref<36x1152xbf16, #tpu.memory_space<vmem>>, vector<32x128xbf16>
    %c320_347 = arith.constant 320 : index
    %c128_348 = arith.constant 128 : index
    %314 = vector.load %arg10[%c320_347, %c128_348] : memref<512x576xbf16, #tpu.memory_space<vmem>>, vector<32x128xbf16>
    tpu.vector_store %arg10[%c320_347, %c128_348], %313 {strides = array<i32>} : memref<512x576xbf16, #tpu.memory_space<vmem>>, vector<32x128xbf16>,
    %c2_349 = arith.constant 2 : index
    %c768_350 = arith.constant 768 : index
    %315 = vector.load %arg9[%c2_349, %c768_350] : memref<36x1152xbf16, #tpu.memory_space<vmem>>, vector<32x64xbf16>
    %c320_351 = arith.constant 320 : index
    %c448_352 = arith.constant 448 : index
    %316 = vector.load %arg10[%c320_351, %c448_352] : memref<512x576xbf16, #tpu.memory_space<vmem>>, vector<32x64xbf16>
    tpu.vector_store %arg10[%c320_351, %c448_352], %315 {strides = array<i32>} : memref<512x576xbf16, #tpu.memory_space<vmem>>, vector<32x64xbf16>,
    %c4_353 = arith.constant 4 : index
    %c640_354 = arith.constant 640 : index
    %317 = vector.load %arg9[%c4_353, %c640_354] : memref<36x1152xbf16, #tpu.memory_space<vmem>>, vector<32x128xbf16>
    %c320_355 = arith.constant 320 : index
    %c256_356 = arith.constant 256 : index
    %318 = vector.load %arg10[%c320_355, %c256_356] : memref<512x576xbf16, #tpu.memory_space<vmem>>, vector<32x128xbf16>
    tpu.vector_store %arg10[%c320_355, %c256_356], %317 {strides = array<i32>} : memref<512x576xbf16, #tpu.memory_space<vmem>>, vector<32x128xbf16>,
    %c4_357 = arith.constant 4 : index
    %c768_358 = arith.constant 768 : index
    %319 = vector.load %arg9[%c4_357, %c768_358] : memref<36x1152xbf16, #tpu.memory_space<vmem>>, vector<32x64xbf16>
    %c320_359 = arith.constant 320 : index
    %c512_360 = arith.constant 512 : index
    %320 = vector.load %arg10[%c320_359, %c512_360] : memref<512x576xbf16, #tpu.memory_space<vmem>>, vector<32x64xbf16>
    tpu.vector_store %arg10[%c320_359, %c512_360], %319 {strides = array<i32>} : memref<512x576xbf16, #tpu.memory_space<vmem>>, vector<32x64xbf16>,
    %c0_361 = arith.constant 0 : index
    %c704_362 = arith.constant 704 : index
    %321 = vector.load %arg9[%c0_361, %c704_362] : memref<36x1152xbf16, #tpu.memory_space<vmem>>, vector<32x128xbf16>
    %c352_363 = arith.constant 352 : index
    %c0_364 = arith.constant 0 : index
    %322 = vector.load %arg10[%c352_363, %c0_364] : memref<512x576xbf16, #tpu.memory_space<vmem>>, vector<32x128xbf16>
    tpu.vector_store %arg10[%c352_363, %c0_364], %321 {strides = array<i32>} : memref<512x576xbf16, #tpu.memory_space<vmem>>, vector<32x128xbf16>,
    %c0_365 = arith.constant 0 : index
    %c832_366 = arith.constant 832 : index
    %323 = vector.load %arg9[%c0_365, %c832_366] : memref<36x1152xbf16, #tpu.memory_space<vmem>>, vector<32x64xbf16>
    %c352_367 = arith.constant 352 : index
    %c384_368 = arith.constant 384 : index
    %324 = vector.load %arg10[%c352_367, %c384_368] : memref<512x576xbf16, #tpu.memory_space<vmem>>, vector<32x64xbf16>
    tpu.vector_store %arg10[%c352_367, %c384_368], %323 {strides = array<i32>} : memref<512x576xbf16, #tpu.memory_space<vmem>>, vector<32x64xbf16>,
    %c2_369 = arith.constant 2 : index
    %c704_370 = arith.constant 704 : index
    %325 = vector.load %arg9[%c2_369, %c704_370] : memref<36x1152xbf16, #tpu.memory_space<vmem>>, vector<32x128xbf16>
    %c352_371 = arith.constant 352 : index
    %c128_372 = arith.constant 128 : index
    %326 = vector.load %arg10[%c352_371, %c128_372] : memref<512x576xbf16, #tpu.memory_space<vmem>>, vector<32x128xbf16>
    tpu.vector_store %arg10[%c352_371, %c128_372], %325 {strides = array<i32>} : memref<512x576xbf16, #tpu.memory_space<vmem>>, vector<32x128xbf16>,
    %c2_373 = arith.constant 2 : index
    %c832_374 = arith.constant 832 : index
    %327 = vector.load %arg9[%c2_373, %c832_374] : memref<36x1152xbf16, #tpu.memory_space<vmem>>, vector<32x64xbf16>
    %c352_375 = arith.constant 352 : index
    %c448_376 = arith.constant 448 : index
    %328 = vector.load %arg10[%c352_375, %c448_376] : memref<512x576xbf16, #tpu.memory_space<vmem>>, vector<32x64xbf16>
    tpu.vector_store %arg10[%c352_375, %c448_376], %327 {strides = array<i32>} : memref<512x576xbf16, #tpu.memory_space<vmem>>, vector<32x64xbf16>,
    %c4_377 = arith.constant 4 : index
    %c704_378 = arith.constant 704 : index
    %329 = vector.load %arg9[%c4_377, %c704_378] : memref<36x1152xbf16, #tpu.memory_space<vmem>>, vector<32x128xbf16>
    %c352_379 = arith.constant 352 : index
    %c256_380 = arith.constant 256 : index
    %330 = vector.load %arg10[%c352_379, %c256_380] : memref<512x576xbf16, #tpu.memory_space<vmem>>, vector<32x128xbf16>
    tpu.vector_store %arg10[%c352_379, %c256_380], %329 {strides = array<i32>} : memref<512x576xbf16, #tpu.memory_space<vmem>>, vector<32x128xbf16>,
    %c4_381 = arith.constant 4 : index
    %c832_382 = arith.constant 832 : index
    %331 = vector.load %arg9[%c4_381, %c832_382] : memref<36x1152xbf16, #tpu.memory_space<vmem>>, vector<32x64xbf16>
    %c352_383 = arith.constant 352 : index
    %c512_384 = arith.constant 512 : index
    %332 = vector.load %arg10[%c352_383, %c512_384] : memref<512x576xbf16, #tpu.memory_space<vmem>>, vector<32x64xbf16>
    tpu.vector_store %arg10[%c352_383, %c512_384], %331 {strides = array<i32>} : memref<512x576xbf16, #tpu.memory_space<vmem>>, vector<32x64xbf16>,
    %c0_385 = arith.constant 0 : index
    %c768_386 = arith.constant 768 : index
    %333 = vector.load %arg9[%c0_385, %c768_386] : memref<36x1152xbf16, #tpu.memory_space<vmem>>, vector<32x128xbf16>
    %c384_387 = arith.constant 384 : index
    %c0_388 = arith.constant 0 : index
    %334 = vector.load %arg10[%c384_387, %c0_388] : memref<512x576xbf16, #tpu.memory_space<vmem>>, vector<32x128xbf16>
    tpu.vector_store %arg10[%c384_387, %c0_388], %333 {strides = array<i32>} : memref<512x576xbf16, #tpu.memory_space<vmem>>, vector<32x128xbf16>,
    %c0_389 = arith.constant 0 : index
    %c896_390 = arith.constant 896 : index
    %335 = vector.load %arg9[%c0_389, %c896_390] : memref<36x1152xbf16, #tpu.memory_space<vmem>>, vector<32x64xbf16>
    %c384_391 = arith.constant 384 : index
    %c384_392 = arith.constant 384 : index
    %336 = vector.load %arg10[%c384_391, %c384_392] : memref<512x576xbf16, #tpu.memory_space<vmem>>, vector<32x64xbf16>
    tpu.vector_store %arg10[%c384_391, %c384_392], %335 {strides = array<i32>} : memref<512x576xbf16, #tpu.memory_space<vmem>>, vector<32x64xbf16>,
    %c2_393 = arith.constant 2 : index
    %c768_394 = arith.constant 768 : index
    %337 = vector.load %arg9[%c2_393, %c768_394] : memref<36x1152xbf16, #tpu.memory_space<vmem>>, vector<32x128xbf16>
    %c384_395 = arith.constant 384 : index
    %c128_396 = arith.constant 128 : index
    %338 = vector.load %arg10[%c384_395, %c128_396] : memref<512x576xbf16, #tpu.memory_space<vmem>>, vector<32x128xbf16>
    tpu.vector_store %arg10[%c384_395, %c128_396], %337 {strides = array<i32>} : memref<512x576xbf16, #tpu.memory_space<vmem>>, vector<32x128xbf16>,
    %c2_397 = arith.constant 2 : index
    %c896_398 = arith.constant 896 : index
    %339 = vector.load %arg9[%c2_397, %c896_398] : memref<36x1152xbf16, #tpu.memory_space<vmem>>, vector<32x64xbf16>
    %c384_399 = arith.constant 384 : index
    %c448_400 = arith.constant 448 : index
    %340 = vector.load %arg10[%c384_399, %c448_400] : memref<512x576xbf16, #tpu.memory_space<vmem>>, vector<32x64xbf16>
    tpu.vector_store %arg10[%c384_399, %c448_400], %339 {strides = array<i32>} : memref<512x576xbf16, #tpu.memory_space<vmem>>, vector<32x64xbf16>,
    %c4_401 = arith.constant 4 : index
    %c768_402 = arith.constant 768 : index
    %341 = vector.load %arg9[%c4_401, %c768_402] : memref<36x1152xbf16, #tpu.memory_space<vmem>>, vector<32x128xbf16>
    %c384_403 = arith.constant 384 : index
    %c256_404 = arith.constant 256 : index
    %342 = vector.load %arg10[%c384_403, %c256_404] : memref<512x576xbf16, #tpu.memory_space<vmem>>, vector<32x128xbf16>
    tpu.vector_store %arg10[%c384_403, %c256_404], %341 {strides = array<i32>} : memref<512x576xbf16, #tpu.memory_space<vmem>>, vector<32x128xbf16>,
    %c4_405 = arith.constant 4 : index
    %c896_406 = arith.constant 896 : index
    %343 = vector.load %arg9[%c4_405, %c896_406] : memref<36x1152xbf16, #tpu.memory_space<vmem>>, vector<32x64xbf16>
    %c384_407 = arith.constant 384 : index
    %c512_408 = arith.constant 512 : index
    %344 = vector.load %arg10[%c384_407, %c512_408] : memref<512x576xbf16, #tpu.memory_space<vmem>>, vector<32x64xbf16>
    tpu.vector_store %arg10[%c384_407, %c512_408], %343 {strides = array<i32>} : memref<512x576xbf16, #tpu.memory_space<vmem>>, vector<32x64xbf16>,
    %c0_409 = arith.constant 0 : index
    %c832_410 = arith.constant 832 : index
    %345 = vector.load %arg9[%c0_409, %c832_410] : memref<36x1152xbf16, #tpu.memory_space<vmem>>, vector<32x128xbf16>
    %c416_411 = arith.constant 416 : index
    %c0_412 = arith.constant 0 : index
    %346 = vector.load %arg10[%c416_411, %c0_412] : memref<512x576xbf16, #tpu.memory_space<vmem>>, vector<32x128xbf16>
    tpu.vector_store %arg10[%c416_411, %c0_412], %345 {strides = array<i32>} : memref<512x576xbf16, #tpu.memory_space<vmem>>, vector<32x128xbf16>,
    %c0_413 = arith.constant 0 : index
    %c960_414 = arith.constant 960 : index
    %347 = vector.load %arg9[%c0_413, %c960_414] : memref<36x1152xbf16, #tpu.memory_space<vmem>>, vector<32x64xbf16>
    %c416_415 = arith.constant 416 : index
    %c384_416 = arith.constant 384 : index
    %348 = vector.load %arg10[%c416_415, %c384_416] : memref<512x576xbf16, #tpu.memory_space<vmem>>, vector<32x64xbf16>
    tpu.vector_store %arg10[%c416_415, %c384_416], %347 {strides = array<i32>} : memref<512x576xbf16, #tpu.memory_space<vmem>>, vector<32x64xbf16>,
    %c2_417 = arith.constant 2 : index
    %c832_418 = arith.constant 832 : index
    %349 = vector.load %arg9[%c2_417, %c832_418] : memref<36x1152xbf16, #tpu.memory_space<vmem>>, vector<32x128xbf16>
    %c416_419 = arith.constant 416 : index
    %c128_420 = arith.constant 128 : index
    %350 = vector.load %arg10[%c416_419, %c128_420] : memref<512x576xbf16, #tpu.memory_space<vmem>>, vector<32x128xbf16>
    tpu.vector_store %arg10[%c416_419, %c128_420], %349 {strides = array<i32>} : memref<512x576xbf16, #tpu.memory_space<vmem>>, vector<32x128xbf16>,
    %c2_421 = arith.constant 2 : index
    %c960_422 = arith.constant 960 : index
    %351 = vector.load %arg9[%c2_421, %c960_422] : memref<36x1152xbf16, #tpu.memory_space<vmem>>, vector<32x64xbf16>
    %c416_423 = arith.constant 416 : index
    %c448_424 = arith.constant 448 : index
    %352 = vector.load %arg10[%c416_423, %c448_424] : memref<512x576xbf16, #tpu.memory_space<vmem>>, vector<32x64xbf16>
    tpu.vector_store %arg10[%c416_423, %c448_424], %351 {strides = array<i32>} : memref<512x576xbf16, #tpu.memory_space<vmem>>, vector<32x64xbf16>,
    %c4_425 = arith.constant 4 : index
    %c832_426 = arith.constant 832 : index
    %353 = vector.load %arg9[%c4_425, %c832_426] : memref<36x1152xbf16, #tpu.memory_space<vmem>>, vector<32x128xbf16>
    %c416_427 = arith.constant 416 : index
    %c256_428 = arith.constant 256 : index
    %354 = vector.load %arg10[%c416_427, %c256_428] : memref<512x576xbf16, #tpu.memory_space<vmem>>, vector<32x128xbf16>
    tpu.vector_store %arg10[%c416_427, %c256_428], %353 {strides = array<i32>} : memref<512x576xbf16, #tpu.memory_space<vmem>>, vector<32x128xbf16>,
    %c4_429 = arith.constant 4 : index
    %c960_430 = arith.constant 960 : index
    %355 = vector.load %arg9[%c4_429, %c960_430] : memref<36x1152xbf16, #tpu.memory_space<vmem>>, vector<32x64xbf16>
    %c416_431 = arith.constant 416 : index
    %c512_432 = arith.constant 512 : index
    %356 = vector.load %arg10[%c416_431, %c512_432] : memref<512x576xbf16, #tpu.memory_space<vmem>>, vector<32x64xbf16>
    tpu.vector_store %arg10[%c416_431, %c512_432], %355 {strides = array<i32>} : memref<512x576xbf16, #tpu.memory_space<vmem>>, vector<32x64xbf16>,
    %c0_433 = arith.constant 0 : index
    %c896_434 = arith.constant 896 : index
    %357 = vector.load %arg9[%c0_433, %c896_434] : memref<36x1152xbf16, #tpu.memory_space<vmem>>, vector<32x128xbf16>
    %c448_435 = arith.constant 448 : index
    %c0_436 = arith.constant 0 : index
    %358 = vector.load %arg10[%c448_435, %c0_436] : memref<512x576xbf16, #tpu.memory_space<vmem>>, vector<32x128xbf16>
    tpu.vector_store %arg10[%c448_435, %c0_436], %357 {strides = array<i32>} : memref<512x576xbf16, #tpu.memory_space<vmem>>, vector<32x128xbf16>,
    %c0_437 = arith.constant 0 : index
    %c1024_438 = arith.constant 1024 : index
    %359 = vector.load %arg9[%c0_437, %c1024_438] : memref<36x1152xbf16, #tpu.memory_space<vmem>>, vector<32x64xbf16>
    %c448_439 = arith.constant 448 : index
    %c384_440 = arith.constant 384 : index
    %360 = vector.load %arg10[%c448_439, %c384_440] : memref<512x576xbf16, #tpu.memory_space<vmem>>, vector<32x64xbf16>
    tpu.vector_store %arg10[%c448_439, %c384_440], %359 {strides = array<i32>} : memref<512x576xbf16, #tpu.memory_space<vmem>>, vector<32x64xbf16>,
    %c2_441 = arith.constant 2 : index
    %c896_442 = arith.constant 896 : index
    %361 = vector.load %arg9[%c2_441, %c896_442] : memref<36x1152xbf16, #tpu.memory_space<vmem>>, vector<32x128xbf16>
    %c448_443 = arith.constant 448 : index
    %c128_444 = arith.constant 128 : index
    %362 = vector.load %arg10[%c448_443, %c128_444] : memref<512x576xbf16, #tpu.memory_space<vmem>>, vector<32x128xbf16>
    tpu.vector_store %arg10[%c448_443, %c128_444], %361 {strides = array<i32>} : memref<512x576xbf16, #tpu.memory_space<vmem>>, vector<32x128xbf16>,
    %c2_445 = arith.constant 2 : index
    %c1024_446 = arith.constant 1024 : index
    %363 = vector.load %arg9[%c2_445, %c1024_446] : memref<36x1152xbf16, #tpu.memory_space<vmem>>, vector<32x64xbf16>
    %c448_447 = arith.constant 448 : index
    %c448_448 = arith.constant 448 : index
    %364 = vector.load %arg10[%c448_447, %c448_448] : memref<512x576xbf16, #tpu.memory_space<vmem>>, vector<32x64xbf16>
    tpu.vector_store %arg10[%c448_447, %c448_448], %363 {strides = array<i32>} : memref<512x576xbf16, #tpu.memory_space<vmem>>, vector<32x64xbf16>,
    %c4_449 = arith.constant 4 : index
    %c896_450 = arith.constant 896 : index
    %365 = vector.load %arg9[%c4_449, %c896_450] : memref<36x1152xbf16, #tpu.memory_space<vmem>>, vector<32x128xbf16>
    %c448_451 = arith.constant 448 : index
    %c256_452 = arith.constant 256 : index
    %366 = vector.load %arg10[%c448_451, %c256_452] : memref<512x576xbf16, #tpu.memory_space<vmem>>, vector<32x128xbf16>
    tpu.vector_store %arg10[%c448_451, %c256_452], %365 {strides = array<i32>} : memref<512x576xbf16, #tpu.memory_space<vmem>>, vector<32x128xbf16>,
    %c4_453 = arith.constant 4 : index
    %c1024_454 = arith.constant 1024 : index
    %367 = vector.load %arg9[%c4_453, %c1024_454] : memref<36x1152xbf16, #tpu.memory_space<vmem>>, vector<32x64xbf16>
    %c448_455 = arith.constant 448 : index
    %c512_456 = arith.constant 512 : index
    %368 = vector.load %arg10[%c448_455, %c512_456] : memref<512x576xbf16, #tpu.memory_space<vmem>>, vector<32x64xbf16>
    tpu.vector_store %arg10[%c448_455, %c512_456], %367 {strides = array<i32>} : memref<512x576xbf16, #tpu.memory_space<vmem>>, vector<32x64xbf16>,
    %c0_457 = arith.constant 0 : index
    %c960_458 = arith.constant 960 : index
    %369 = vector.load %arg9[%c0_457, %c960_458] : memref<36x1152xbf16, #tpu.memory_space<vmem>>, vector<32x128xbf16>
    %c480_459 = arith.constant 480 : index
    %c0_460 = arith.constant 0 : index
    %370 = vector.load %arg10[%c480_459, %c0_460] : memref<512x576xbf16, #tpu.memory_space<vmem>>, vector<32x128xbf16>
    tpu.vector_store %arg10[%c480_459, %c0_460], %369 {strides = array<i32>} : memref<512x576xbf16, #tpu.memory_space<vmem>>, vector<32x128xbf16>,
    %c0_461 = arith.constant 0 : index
    %c1088_462 = arith.constant 1088 : index
    %371 = vector.load %arg9[%c0_461, %c1088_462] : memref<36x1152xbf16, #tpu.memory_space<vmem>>, vector<32x64xbf16>
    %c480_463 = arith.constant 480 : index
    %c384_464 = arith.constant 384 : index
    %372 = vector.load %arg10[%c480_463, %c384_464] : memref<512x576xbf16, #tpu.memory_space<vmem>>, vector<32x64xbf16>
    tpu.vector_store %arg10[%c480_463, %c384_464], %371 {strides = array<i32>} : memref<512x576xbf16, #tpu.memory_space<vmem>>, vector<32x64xbf16>,
    %c2_465 = arith.constant 2 : index
    %c960_466 = arith.constant 960 : index
    %373 = vector.load %arg9[%c2_465, %c960_466] : memref<36x1152xbf16, #tpu.memory_space<vmem>>, vector<32x128xbf16>
    %c480_467 = arith.constant 480 : index
    %c128_468 = arith.constant 128 : index
    %374 = vector.load %arg10[%c480_467, %c128_468] : memref<512x576xbf16, #tpu.memory_space<vmem>>, vector<32x128xbf16>
    tpu.vector_store %arg10[%c480_467, %c128_468], %373 {strides = array<i32>} : memref<512x576xbf16, #tpu.memory_space<vmem>>, vector<32x128xbf16>,
    %c2_469 = arith.constant 2 : index
    %c1088_470 = arith.constant 1088 : index
    %375 = vector.load %arg9[%c2_469, %c1088_470] : memref<36x1152xbf16, #tpu.memory_space<vmem>>, vector<32x64xbf16>
    %c480_471 = arith.constant 480 : index
    %c448_472 = arith.constant 448 : index
    %376 = vector.load %arg10[%c480_471, %c448_472] : memref<512x576xbf16, #tpu.memory_space<vmem>>, vector<32x64xbf16>
    tpu.vector_store %arg10[%c480_471, %c448_472], %375 {strides = array<i32>} : memref<512x576xbf16, #tpu.memory_space<vmem>>, vector<32x64xbf16>,
    %c4_473 = arith.constant 4 : index
    %c960_474 = arith.constant 960 : index
    %377 = vector.load %arg9[%c4_473, %c960_474] : memref<36x1152xbf16, #tpu.memory_space<vmem>>, vector<32x128xbf16>
    %c480_475 = arith.constant 480 : index
    %c256_476 = arith.constant 256 : index
    %378 = vector.load %arg10[%c480_475, %c256_476] : memref<512x576xbf16, #tpu.memory_space<vmem>>, vector<32x128xbf16>
    tpu.vector_store %arg10[%c480_475, %c256_476], %377 {strides = array<i32>} : memref<512x576xbf16, #tpu.memory_space<vmem>>, vector<32x128xbf16>,
    %c4_477 = arith.constant 4 : index
    %c1088_478 = arith.constant 1088 : index
    %379 = vector.load %arg9[%c4_477, %c1088_478] : memref<36x1152xbf16, #tpu.memory_space<vmem>>, vector<32x64xbf16>
    %c480_479 = arith.constant 480 : index
    %c512_480 = arith.constant 512 : index
    %380 = vector.load %arg10[%c480_479, %c512_480] : memref<512x576xbf16, #tpu.memory_space<vmem>>, vector<32x64xbf16>
    tpu.vector_store %arg10[%c480_479, %c512_480], %379 {strides = array<i32>} : memref<512x576xbf16, #tpu.memory_space<vmem>>, vector<32x64xbf16>,
    %c0_i32_481 = arith.constant 0 : i32
    %c4_i32_482 = arith.constant 4 : i32
    %381 = arith.addi %c0_i32_481, %c4_i32_482 : i32
    %c1_i32_483 = arith.constant 1 : i32
    scf.for %arg11 = %c0_i32_481 to %381 step %c1_i32_483  : i32 {
      %c1_i32_485 = arith.constant 1 : i32
      %382 = arith.muli %arg11, %c1_i32_485 : i32
      %c0_i32_486 = arith.constant 0 : i32
      %383 = arith.addi %c0_i32_486, %382 : i32
      %c128_i32 = arith.constant 128 : i32
      %384 = arith.muli %383, %c128_i32 : i32
      %385 = tpu.assume_multiple %384, 128 : i32
      %386 = arith.index_cast %385 : i32 to index
      %c0_487 = arith.constant 0 : index
      %387 = vector.load %arg10[%386, %c0_487] : memref<512x576xbf16, #tpu.memory_space<vmem>>, vector<128x576xbf16>
      %c0_488 = arith.constant 0 : index
      %c0_489 = arith.constant 0 : index
      %388 = vector.load %arg6[%c0_488, %c0_489] : memref<576x16xbf16, #tpu.memory_space<vmem>>, vector<576x16xbf16>
      %cst_490 = arith.constant dense<0.000000e+00> : vector<128x16xf32>
      %389 = tpu.matmul %387, %388, %cst_490 {dimension_numbers = #tpu.dot_dimension_numbers<[1], [0], [0], [1], [0, 0, 1, 1], [], []>} : vector<128x576xbf16>, vector<576x16xbf16>, vector<128x16xf32> -> vector<128x16xf32>
      %390 = arith.index_cast %385 : i32 to index
      %c0_491 = arith.constant 0 : index
      %391 = vector.load %arg7[%390, %c0_491] : memref<512x16xf32, #tpu.memory_space<vmem>>, vector<128x16xf32>
      tpu.vector_store %arg7[%390, %c0_491], %389 {strides = array<i32>} : memref<512x16xf32, #tpu.memory_space<vmem>>, vector<128x16xf32>,
    }
    %c4_i32_484 = arith.constant 4 : i32
    return
  }
}

</mosaic_0001>

<bundles_post_ra>
// kernel: tpu_custom_call.1
= control target key start
LH: loop header
LB: loop body
LE: loop exit
PB: predicated region body
PF: predicated region fallthrough
CT: control target
= control target key end

     0   :  { %v6212_v2 = vmov 0.0   ;;  %s6214_s28 = smov 0   ;;  %s9058_s0 = inlined_call_operand.vmem [shape: f32[512,16], index: 0, kind: input, shape index: {}]   ;;  %s9059_s1 = inlined_call_operand.vmem [shape: f32[1,16], index: 1, kind: input, shape index: {}]   ;;  %s9060_s2 = inlined_call_operand.vmem [shape: f32[1,16], index: 2, kind: input, shape index: {}]   ;;  %s9061_s3 = inlined_call_operand.vmem [shape: bf16[16,64], index: 3, kind: input, shape index: {}]   ;;  %s9062_s4 = inlined_call_operand.vmem [shape: f32[1,64], index: 4, kind: input, shape index: {}]   ;;  %s9063_s5 = inlined_call_operand.vmem [shape: f32[1,64], index: 5, kind: input, shape index: {}]   ;;  %s9064_s6 = inlined_call_operand.vmem [shape: bf16[576,16], index: 6, kind: input, shape index: {}]   ;;  %s9065_s7 = inlined_call_operand.vmem [shape: f32[512,16], index: 7, kind: output, shape index: {}]  }
   0x1   :  { %v6205_v0 = vld [vmem:[%s9059_s1] sm:$0x1] }
   0x2   :  { %v6210_v1 = vld [vmem:[%s9060_s2] sm:$0x1] }
   0x3 LB: > { %s5407_s29 = sshll.u32 %s6126_s28, 7  ;;  %vm54_vm0 = vcmask 130048   ;;  %s34_s28 = sadd.s32 1, %s6126_s28   ;;  %s6126_s28 = sphi %s6214_s28, %s34_s28   ;;  %v6122_v2 = vphi %v6212_v2, %v9068_v2  }
   0x4   : > { %s6224_s8 = scalar_lea.vmem %s9058_s0, %s5407_s29  ;;  %p31_p0 = scmp.ge.s32.totalorder %s34_s28, 4  }
   0x5   : > { %v38_v3 = vld [vmem:[%s6224_s8] sm:$0xff]  ;;  %v39_v4 = vld [vmem:[%s6224_s8 + $0x8] sm:$0xff]  ;;  %v40_v5 = vld [vmem:[%s6224_s8 + $0x10] sm:$0xff]  ;;  %v6265_v58 = vmov (%p31_p0), 0.0   ;;  %s6267_s2 = smov (%p31_p0), 0  }
   0x6   : > { %v41_v6 = vld [vmem:[%s6224_s8 + $0x18] sm:$0xff]  ;;  %v55_v7 = vsel %vm54_vm0, %v38_v3, 0.0  ;;  %v56_v8 = vsel %vm54_vm0, %v39_v4, 0.0  ;;  %v58_v9 = vsel %vm54_vm0, %v40_v5, 0.0  ;;  %v42_v10 = vld [vmem:[%s6224_s8 + $0x20] sm:$0xff]  ;;  %v43_v13 = vld [vmem:[%s6224_s8 + $0x28] sm:$0xff] }
   0x7   : > { %v57_v11 = vadd.f32 %v56_v8, %v55_v7  ;;  %v60_v12 = vsel %vm54_vm0, %v41_v6, 0.0  ;;  %v62_v15 = vsel %vm54_vm0, %v42_v10, 0.0  ;;  %v44_v16 = vld [vmem:[%s6224_s8 + $0x30] sm:$0xff]  ;;  %v64_v18 = vsel %vm54_vm0, %v43_v13, 0.0  ;;  %v45_v19 = vld [vmem:[%s6224_s8 + $0x38] sm:$0xff]  ;;  %v46_v22 = vld [vmem:[%s6224_s8 + $0x40] sm:$0xff] }
   0x8   : > { %v66_v21 = vsel %vm54_vm0, %v44_v16, 0.0  ;;  %v68_v24 = vsel %vm54_vm0, %v45_v19, 0.0  ;;  %v47_v25 = vld [vmem:[%s6224_s8 + $0x48] sm:$0xff]  ;;  %v70_v27 = vsel %vm54_vm0, %v46_v22, 0.0  ;;  %v48_v28 = vld [vmem:[%s6224_s8 + $0x50] sm:$0xff]  ;;  %v49_v31 = vld [vmem:[%s6224_s8 + $0x58] sm:$0xff] }
   0x9   : > { %v59_v14 = vadd.f32 %v58_v9, %v57_v11  ;;  %v72_v30 = vsel %vm54_vm0, %v47_v25, 0.0  ;;  %v74_v33 = vsel %vm54_vm0, %v48_v28, 0.0  ;;  %v50_v34 = vld [vmem:[%s6224_s8 + $0x60] sm:$0xff]  ;;  %v76_v36 = vsel %vm54_vm0, %v49_v31, 0.0  ;;  %v51_v37 = vld [vmem:[%s6224_s8 + $0x68] sm:$0xff]  ;;  %v52_v40 = vld [vmem:[%s6224_s8 + $0x70] sm:$0xff] }
   0xa   : > { %v78_v39 = vsel %vm54_vm0, %v50_v34, 0.0  ;;  %v80_v42 = vsel %vm54_vm0, %v51_v37, 0.0  ;;  %v53_v43 = vld [vmem:[%s6224_s8 + $0x78] sm:$0xff]  ;;  %v82_v45 = vsel %vm54_vm0, %v52_v40, 0.0 }
   0xb   : > { %v61_v17 = vadd.f32 %v60_v12, %v59_v14  ;;  %v84_v47 = vsel %vm54_vm0, %v53_v43, 0.0 }
   0xd   : > { %v63_v20 = vadd.f32 %v62_v15, %v61_v17 }
   0xf   : > { %v65_v23 = vadd.f32 %v64_v18, %v63_v20 }
  0x11   : > { %v67_v26 = vadd.f32 %v66_v21, %v65_v23 }
  0x13   : > { %v69_v29 = vadd.f32 %v68_v24, %v67_v26 }
  0x15   : > { %v71_v32 = vadd.f32 %v70_v27, %v69_v29 }
  0x17   : > { %v73_v35 = vadd.f32 %v72_v30, %v71_v32 }
  0x19   : > { %v75_v38 = vadd.f32 %v74_v33, %v73_v35 }
  0x1b   : > { %v77_v41 = vadd.f32 %v76_v36, %v75_v38 }
  0x1d   : > { %v79_v44 = vadd.f32 %v78_v39, %v77_v41 }
  0x1f   : > { %v81_v46 = vadd.f32 %v80_v42, %v79_v44 }
  0x21   : > { %v83_v48 = vadd.f32 %v82_v45, %v81_v46 }
  0x23   : > { %v85_v49 = vadd.f32 %v84_v47, %v83_v48 }
  0x25   : > { %v86_v50 = vrot.slane %v85_v49, 4 }
  0x27   : > { %v87_v51 = vadd.f32 %v86_v50, %v85_v49 }
  0x29   : > { %v88_v52 = vrot.slane %v87_v51, 2 }
  0x2b   : > { %v89_v53 = vadd.f32 %v88_v52, %v87_v51 }
  0x2d   : > { %v90_v54 = vrot.slane %v89_v53, 1 }
  0x2f   : > { %v91_v55 = vadd.f32 %v90_v54, %v89_v53  ;;  %33 = sbr.rel (!%p31_p0) target bundleno = 3 (0x3), region = 98 }
  0x31   : > { %v92_v56 = vadd.f32 %v6122_v2, %v91_v55  }
  0x33   : > { %v9068_v2 = vmov %v92_v56  ;;  %v6263_v57 = vmul.f32 (%p31_p0), 0.001953125, %v92_v56 }
  0x34 LB: > { %s5408_s9 = sshll.u32 %s6134_s2, 7  ;;  %s99_s2 = sadd.s32 1, %s6134_s2   ;;  %s6134_s2 = sphi %s6267_s2, %s99_s2   ;;  %v6130_v58 = vphi %v6265_v58, %v9069_v58  }
  0x35   : > { %s6279_s12 = scalar_lea.vmem %s9058_s0, %s5408_s9  ;;  %p96_p1 = scmp.ge.s32.totalorder %s99_s2, 4  }
  0x36   : > { %v103_v59 = vld [vmem:[%s6279_s12] sm:$0xff]  ;;  %v104_v60 = vld [vmem:[%s6279_s12 + $0x8] sm:$0xff]  ;;  %v105_v61 = vld [vmem:[%s6279_s12 + $0x10] sm:$0xff]  ;;  %s6344_s13 = smov (%p96_p1), 0  }
  0x37   : > { %v106_v62 = vld [vmem:[%s6279_s12 + $0x18] sm:$0xff]  ;;  %v119_v63 = vsub.f32 %v103_v59, %v6263_v57  ;;  %v120_v2 = vsub.f32 %v104_v60, %v6263_v57  ;;  %v107_v3 = vld [vmem:[%s6279_s12 + $0x20] sm:$0xff]  ;;  %v121_v4 = vsub.f32 %v105_v61, %v6263_v57  ;;  %v108_v6 = vld [vmem:[%s6279_s12 + $0x28] sm:$0xff] }
  0x38   : > { %v122_v5 = vsub.f32 %v106_v62, %v6263_v57  ;;  %v123_v7 = vsub.f32 %v107_v3, %v6263_v57  ;;  %v109_v10 = vld [vmem:[%s6279_s12 + $0x30] sm:$0xff]  ;;  %v124_v12 = vsub.f32 %v108_v6, %v6263_v57  ;;  %v110_v14 = vld [vmem:[%s6279_s12 + $0x38] sm:$0xff]  ;;  %v111_v19 = vld [vmem:[%s6279_s12 + $0x40] sm:$0xff] }
  0x39   : > { %v135_v8 = vmul.f32 %v119_v63, %v119_v63  ;;  %v136_v9 = vmul.f32 %v120_v2, %v120_v2  ;;  %v137_v11 = vmul.f32 %v121_v4, %v121_v4  ;;  %v125_v15 = vsub.f32 %v109_v10, %v6263_v57  ;;  %v112_v25 = vld [vmem:[%s6279_s12 + $0x48] sm:$0xff]  ;;  %v113_v30 = vld [vmem:[%s6279_s12 + $0x50] sm:$0xff]  ;;  %v114_v35 = vld [vmem:[%s6279_s12 + $0x58] sm:$0xff] }
  0x3a   : > { %v138_v13 = vmul.f32 %v122_v5, %v122_v5  ;;  %v139_v16 = vmul.f32 %v123_v7, %v123_v7  ;;  %v126_v22 = vsub.f32 %v110_v14, %v6263_v57  ;;  %v140_v23 = vmul.f32 %v124_v12, %v124_v12  ;;  %v115_v40 = vld [vmem:[%s6279_s12 + $0x60] sm:$0xff]  ;;  %v116_v45 = vld [vmem:[%s6279_s12 + $0x68] sm:$0xff]  ;;  %v117_v50 = vld [vmem:[%s6279_s12 + $0x70] sm:$0xff] }
  0x3b   : > { %v152_v17 = vsel %vm54_vm0, %v135_v8, 0.0  ;;  %v153_v18 = vsel %vm54_vm0, %v136_v9, 0.0  ;;  %v155_v21 = vsel %vm54_vm0, %v137_v11, 0.0  ;;  %v127_v27 = vsub.f32 %v111_v19, %v6263_v57  ;;  %v118_v55 = vld [vmem:[%s6279_s12 + $0x78] sm:$0xff] }
  0x3c   : > { %v154_v20 = vadd.f32 %v153_v18, %v152_v17  ;;  %v157_v24 = vsel %vm54_vm0, %v138_v13, 0.0  ;;  %v141_v28 = vmul.f32 %v125_v15, %v125_v15  ;;  %v159_v29 = vsel %vm54_vm0, %v139_v16, 0.0 }
  0x3d   : > { %v128_v32 = vsub.f32 %v112_v25, %v6263_v57  ;;  %v142_v33 = vmul.f32 %v126_v22, %v126_v22  ;;  %v161_v34 = vsel %vm54_vm0, %v140_v23, 0.0  ;;  %v129_v37 = vsub.f32 %v113_v30, %v6263_v57 }
  0x3e   : > { %v156_v26 = vadd.f32 %v155_v21, %v154_v20  ;;  %v143_v38 = vmul.f32 %v127_v27, %v127_v27  ;;  %v163_v39 = vsel %vm54_vm0, %v141_v28, 0.0  ;;  %v130_v42 = vsub.f32 %v114_v35, %v6263_v57 }
  0x3f   : > { %v144_v43 = vmul.f32 %v128_v32, %v128_v32  ;;  %v165_v44 = vsel %vm54_vm0, %v142_v33, 0.0  ;;  %v131_v47 = vsub.f32 %v115_v40, %v6263_v57  ;;  %v145_v48 = vmul.f32 %v129_v37, %v129_v37 }
  0x40   : > { %v158_v31 = vadd.f32 %v157_v24, %v156_v26  ;;  %v167_v49 = vsel %vm54_vm0, %v143_v38, 0.0  ;;  %v132_v52 = vsub.f32 %v116_v45, %v6263_v57  ;;  %v146_v53 = vmul.f32 %v130_v42, %v130_v42 }
  0x41   : > { %v169_v54 = vsel %vm54_vm0, %v144_v43, 0.0  ;;  %v133_v59 = vsub.f32 %v117_v50, %v6263_v57  ;;  %v147_v60 = vmul.f32 %v131_v47, %v131_v47  ;;  %v171_v61 = vsel %vm54_vm0, %v145_v48, 0.0 }
  0x42   : > { %v160_v36 = vadd.f32 %v159_v29, %v158_v31  ;;  %v134_v63 = vsub.f32 %v118_v55, %v6263_v57  ;;  %v148_v2 = vmul.f32 %v132_v52, %v132_v52  ;;  %v173_v3 = vsel %vm54_vm0, %v146_v53, 0.0 }
  0x43   : > { %v149_v5 = vmul.f32 %v133_v59, %v133_v59  ;;  %v175_v6 = vsel %vm54_vm0, %v147_v60, 0.0 }
  0x44   : > { %v162_v41 = vadd.f32 %v161_v34, %v160_v36  ;;  %v150_v8 = vmul.f32 %v134_v63, %v134_v63  ;;  %v177_v9 = vsel %vm54_vm0, %v148_v2, 0.0 }
  0x45   : > { %v179_v11 = vsel %vm54_vm0, %v149_v5, 0.0 }
  0x46   : > { %v164_v46 = vadd.f32 %v163_v39, %v162_v41  ;;  %v181_v13 = vsel %vm54_vm0, %v150_v8, 0.0 }
  0x48   : > { %v166_v51 = vadd.f32 %v165_v44, %v164_v46 }
  0x4a   : > { %v168_v56 = vadd.f32 %v167_v49, %v166_v51 }
  0x4c   : > { %v170_v62 = vadd.f32 %v169_v54, %v168_v56 }
  0x4e   : > { %v172_v4 = vadd.f32 %v171_v61, %v170_v62 }
  0x50   : > { %v174_v7 = vadd.f32 %v173_v3, %v172_v4 }
  0x52   : > { %v176_v10 = vadd.f32 %v175_v6, %v174_v7 }
  0x54   : > { %v178_v12 = vadd.f32 %v177_v9, %v176_v10 }
  0x56   : > { %v180_v14 = vadd.f32 %v179_v11, %v178_v12 }
  0x58   : > { %v182_v15 = vadd.f32 %v181_v13, %v180_v14 }
  0x5a   : > { %v183_v16 = vrot.slane %v182_v15, 4 }
  0x5c   : > { %v184_v17 = vadd.f32 %v183_v16, %v182_v15 }
  0x5e   : > { %v185_v18 = vrot.slane %v184_v17, 2 }
  0x60   : > { %v186_v19 = vadd.f32 %v185_v18, %v184_v17 }
  0x62   : > { %v187_v20 = vrot.slane %v186_v19, 1 }
  0x64   : > { %v188_v21 = vadd.f32 %v187_v20, %v186_v19  ;;  %98 = sbr.rel (!%p96_p1) target bundleno = 52 (0x34), region = 109 }
  0x66   : > { %v189_v22 = vadd.f32 %v6130_v58, %v188_v21  }
  0x68   : > { %v9069_v58 = vmov %v189_v22  ;;  %v190_v23 = vmul.f32 (%p96_p1), 0.001953125, %v189_v22 }
  0x6a   :  { %v191_v24 = vadd.f32 1e-05, %v190_v23 }
  0x6c   :  { %5983 = vrsqrt.f32 %v191_v24 }
  0x79   :  { %v5984_v25 = vpop.eup %5983 }
  0x7a   :  { %v6336_v26 = vmul.f32 %v5984_v25, %v6205_v0 }
  0x7c   :  { %v6340_v27 = vmul.f32 %v6336_v26, %v6263_v57 }
  0x7e   :  { %v195_v58 = vsub.f32 %v6210_v1, %v6340_v27 }
  0x7f LB: > { %v5985_v0 = vld [vmem:[%s9061_s3] sm:$0xff]   ;;  %v221_v28 = vlaneseq  ;;  %s5409_s16 = sshll.u32 %s6138_s13, 7  ;;  %vm419_vm1 = vcmask 523264   ;;  %s201_s13 = sadd.s32 1, %s6138_s13   ;;  %s6138_s13 = sphi %s6344_s13, %s201_s13  }
  0x80   : > { %5849 = vmatprep.subr.bf16.mxu0 %v5985_v0  ;;  %5891 = vmatprep.subr.bf16.mxu1 %v5985_v0  ;;  %s6358_s19 = scalar_lea.vmem %s9058_s0, %s5409_s16  ;;  %s418_s20 = scalar_lea.vmem [#allocation2], %s5409_s16 }
  0x81   : > { %v222_v57 = vshrl.u32 %v221_v28, 7  ;;  %5850 = vmatpush3.bf16.msra.mxu0 %v5985_v0  ;;  %5892 = vmatpush3.bf16.msra.mxu1 %v5985_v0  ;;  %v204_v29 = vld [vmem:[%s6358_s19] sm:$0xff]  ;;  %v205_v30 = vld [vmem:[%s6358_s19 + $0x8] sm:$0xff]  ;;  %v206_v34 = vld [vmem:[%s6358_s19 + $0x10] sm:$0xff]  ;;  %p198_p2 = scmp.ge.s32.totalorder %s201_s13, 4  }
  0x82   : > { %v212_v32 = vld [vmem:[%s6358_s19 + $0x40] sm:$0xff]  ;;  %v213_v33 = vld [vmem:[%s6358_s19 + $0x48] sm:$0xff]  ;;  %v207_v37 = vld [vmem:[%s6358_s19 + $0x18] sm:$0xff]  ;;  %s6443_s25 = smov (%p198_p2), 0  }
  0x83   : > { %v6362_v31 = vsub.s32 0, %v222_v57  ;;  %v214_v38 = vld [vmem:[%s6358_s19 + $0x50] sm:$0xff]  ;;  %v215_v39 = vld [vmem:[%s6358_s19 + $0x58] sm:$0xff]  ;;  %v208_v56 = vld [vmem:[%s6358_s19 + $0x20] sm:$0xff] }
  0x84   : > { %v209_v59 = vld [vmem:[%s6358_s19 + $0x28] sm:$0xff]  ;;  %v216_v2 = vld [vmem:[%s6358_s19 + $0x60] sm:$0xff]  ;;  %v210_v8 = vld [vmem:[%s6358_s19 + $0x30] sm:$0xff] }
  0x85   : > { %v224_v35 = vrot.slane %v6336_v26, %v6362_v31  ;;  %v6373_v36 = vrot.slane %v195_v58, %v6362_v31  ;;  %v217_v3 = vld [vmem:[%s6358_s19 + $0x68] sm:$0xff]  ;;  %v211_v13 = vld [vmem:[%s6358_s19 + $0x38] sm:$0xff]  ;;  %v218_v18 = vld [vmem:[%s6358_s19 + $0x70] sm:$0xff] }
  0x86   : > { %v219_v22 = vld [vmem:[%s6358_s19 + $0x78] sm:$0xff] }
  0x87   : > { %v226_v40 = vmul.f32 %v224_v35, %v204_v29  ;;  %v227_v41 = vmul.f32 %v224_v35, %v205_v30  ;;  %v234_v42 = vmul.f32 %v224_v35, %v212_v32  ;;  %v235_v43 = vmul.f32 %v224_v35, %v213_v33 }
  0x88   : > { %v228_v44 = vmul.f32 %v224_v35, %v206_v34  ;;  %v229_v45 = vmul.f32 %v224_v35, %v207_v37  ;;  %v236_v46 = vmul.f32 %v224_v35, %v214_v38  ;;  %v237_v47 = vmul.f32 %v224_v35, %v215_v39 }
  0x89   : > { %v248_v48 = vadd.f32 %v6373_v36, %v226_v40  ;;  %v249_v49 = vadd.f32 %v6373_v36, %v227_v41  ;;  %v256_v50 = vadd.f32 %v6373_v36, %v234_v42  ;;  %v257_v51 = vadd.f32 %v6373_v36, %v235_v43 }
  0x8a   : > { %v250_v52 = vadd.f32 %v6373_v36, %v228_v44  ;;  %v251_v53 = vadd.f32 %v6373_v36, %v229_v45  ;;  %v258_v54 = vadd.f32 %v6373_v36, %v236_v46  ;;  %v259_v55 = vadd.f32 %v6373_v36, %v237_v47 }
  0x8b   : > { %v264_v60 = vmax.f32 %v248_v48, 0.0  ;;  %v265_v61 = vmax.f32 %v249_v49, 0.0  ;;  %v272_v62 = vmax.f32 %v256_v50, 0.0  ;;  %v273_v63 = vmax.f32 %v257_v51, 0.0 }
  0x8c   : > { %v266_v4 = vmax.f32 %v250_v52, 0.0  ;;  %v267_v5 = vmax.f32 %v251_v53, 0.0  ;;  %v274_v6 = vmax.f32 %v258_v54, 0.0  ;;  %v275_v7 = vmax.f32 %v259_v55, 0.0 }
  0x8d   : > { %v280_v9 = vpack.c.bf16 %v265_v61, %v264_v60  ;;  %v284_v10 = vpack.c.bf16 %v273_v63, %v272_v62  ;;  %v230_v11 = vmul.f32 %v224_v35, %v208_v56  ;;  %v231_v12 = vmul.f32 %v224_v35, %v209_v59  ;;  %v6434_v63 = vld [vmem:[%s9062_s4] sm:$0x1] (%p198_p2) }
  0x8e   : > { %v281_v14 = vpack.c.bf16 %v267_v5, %v266_v4  ;;  %v285_v15 = vpack.c.bf16 %v275_v7, %v274_v6  ;;  %v238_v16 = vmul.f32 %v224_v35, %v216_v2  ;;  %v239_v17 = vmul.f32 %v224_v35, %v217_v3  ;;  %v6439_v2 = vld [vmem:[%s9063_s5] sm:$0x1] (%p198_p2) }
  0x8f   : > { %5851 = vmatprep.mubr.msk.bf16.mxu0 %vm54_vm0, %v280_v9  ;;  %5859 = vmatprep.mubr.msk.bf16.mxu1 %vm54_vm0, %v284_v10  ;;  %v252_v19 = vadd.f32 %v6373_v36, %v230_v11  ;;  %v253_v20 = vadd.f32 %v6373_v36, %v231_v12  ;;  %v232_v21 = vmul.f32 %v224_v35, %v210_v8  ;;  %v6441_v3 = vmov (%p198_p2), 0.0  }
  0x90   : > { %5852 = vmatmul.mubr.msk.bf16.vlgmr.msra.gmra.mxu0 %vm54_vm0, %v281_v14  ;;  %5860 = vmatmul.mubr.msk.bf16.vlgmr.msra.gmra.mxu1 %vm54_vm0, %v285_v15  ;;  %v260_v23 = vadd.f32 %v6373_v36, %v238_v16  ;;  %v261_v24 = vadd.f32 %v6373_v36, %v239_v17  ;;  %v233_v25 = vmul.f32 %v224_v35, %v211_v13 }
  0x91   : > { %v268_v0 = vmax.f32 %v252_v19, 0.0  ;;  %v269_v28 = vmax.f32 %v253_v20, 0.0  ;;  %v254_v57 = vadd.f32 %v6373_v36, %v232_v21  ;;  %v240_v29 = vmul.f32 %v224_v35, %v218_v18 }
  0x92   : > { %v276_v30 = vmax.f32 %v260_v23, 0.0  ;;  %v277_v32 = vmax.f32 %v261_v24, 0.0  ;;  %v255_v33 = vadd.f32 %v6373_v36, %v233_v25  ;;  %v241_v34 = vmul.f32 %v224_v35, %v219_v22 }
  0x93   : > { %v282_v37 = vpack.c.bf16 %v269_v28, %v268_v0  ;;  %v270_v38 = vmax.f32 %v254_v57, 0.0  ;;  %v262_v39 = vadd.f32 %v6373_v36, %v240_v29 }
  0x94   : > { %v286_v40 = vpack.c.bf16 %v277_v32, %v276_v30  ;;  %v271_v41 = vmax.f32 %v255_v33, 0.0  ;;  %v263_v42 = vadd.f32 %v6373_v36, %v241_v34 }
  0x95   : > { %5855 = vmatprep.mubr.msk.bf16.mxu0 %vm54_vm0, %v282_v37  ;;  %v278_v43 = vmax.f32 %v262_v39, 0.0 }
  0x96   : > { %5863 = vmatprep.mubr.msk.bf16.mxu1 %vm54_vm0, %v286_v40  ;;  %v283_v44 = vpack.c.bf16 %v271_v41, %v270_v38  ;;  %v279_v45 = vmax.f32 %v263_v42, 0.0 }
  0x98   : > { %5856 = vmatmul.mubr.msk.bf16.gmra.mxu0 %vm54_vm0, %v283_v44  ;;  %v287_v46 = vpack.c.bf16 %v279_v45, %v278_v43 }
  0x9a   : > { %5864 = vmatmul.mubr.msk.bf16.gmra.mxu1 %vm54_vm0, %v287_v46 }
 0x150   : > { %v5853_v35 = vpop.f32.mrf.mxu0  ;;  %v5861_v47 = vpop.f32.mrf.mxu1 }
 0x151   : > { %422 = vst.msk [vmem:[%s418_s20 + $0x10] sm:$0xff] %vm419_vm1, %v5853_v35  ;;  %430 = vst.msk [vmem:[%s418_s20 + $0x50] sm:$0xff] %vm419_vm1, %v5861_v47 }
 0x152   : > { %v355_v36 = vpop.f32.mrf.mxu0  ;;  %v387_v48 = vpop.f32.mrf.mxu1 }
 0x153   : > { %420 = vst.msk [vmem:[%s418_s20] sm:$0xff] %vm419_vm1, %v355_v36  ;;  %428 = vst.msk [vmem:[%s418_s20 + $0x40] sm:$0xff] %vm419_vm1, %v387_v48 }
 0x154   : > { %v5854_v49 = vpop.f32.mrf.mxu0  ;;  %v5862_v50 = vpop.f32.mrf.mxu1 }
 0x155   : > { %423 = vst.msk [vmem:[%s418_s20 + $0x18] sm:$0xff] %vm419_vm1, %v5854_v49  ;;  %431 = vst.msk [vmem:[%s418_s20 + $0x58] sm:$0xff] %vm419_vm1, %v5862_v50 }
 0x156   : > { %v358_v51 = vpop.f32.mrf.mxu0  ;;  %v390_v52 = vpop.f32.mrf.mxu1 }
 0x157   : > { %421 = vst.msk [vmem:[%s418_s20 + $0x8] sm:$0xff] %vm419_vm1, %v358_v51  ;;  %429 = vst.msk [vmem:[%s418_s20 + $0x48] sm:$0xff] %vm419_vm1, %v390_v52 }
 0x158   : > { %v5857_v53 = vpop.f32.mrf.mxu0 }
 0x159   : > { %426 = vst.msk [vmem:[%s418_s20 + $0x30] sm:$0xff] %vm419_vm1, %v5857_v53 }
 0x15a   : > { %v5865_v54 = vpop.f32.mrf.mxu1  ;;  %v371_v55 = vpop.f32.mrf.mxu0 }
 0x15b   : > { %434 = vst.msk [vmem:[%s418_s20 + $0x70] sm:$0xff] %vm419_vm1, %v5865_v54  ;;  %424 = vst.msk [vmem:[%s418_s20 + $0x20] sm:$0xff] %vm419_vm1, %v371_v55 }
 0x15c   : > { %v403_v56 = vpop.f32.mrf.mxu1  ;;  %v5858_v59 = vpop.f32.mrf.mxu0 }
 0x15d   : > { %432 = vst.msk [vmem:[%s418_s20 + $0x60] sm:$0xff] %vm419_vm1, %v403_v56  ;;  %427 = vst.msk [vmem:[%s418_s20 + $0x38] sm:$0xff] %vm419_vm1, %v5858_v59  ;;  %200 = sbr.rel (!%p198_p2) target bundleno = 127 (0x7f), region = 120 }
 0x15e   : > { %v5866_v60 = vpop.f32.mrf.mxu1  ;;  %v374_v61 = vpop.f32.mrf.mxu0 }
 0x15f   : > { %435 = vst.msk [vmem:[%s418_s20 + $0x78] sm:$0xff] %vm419_vm1, %v5866_v60  ;;  %425 = vst.msk [vmem:[%s418_s20 + $0x28] sm:$0xff] %vm419_vm1, %v374_v61 }
 0x160   : > { %v406_v62 = vpop.f32.mrf.mxu1 }
 0x161   : > { %433 = vst.msk [vmem:[%s418_s20 + $0x68] sm:$0xff] %vm419_vm1, %v406_v62 }
 0x162 LB: > { %s5419_s0 = sshll.u32 %s6146_s25, 7  ;;  %s443_s25 = sadd.s32 1, %s6146_s25   ;;  %s6146_s25 = sphi %s6443_s25, %s443_s25   ;;  %v6142_v3 = vphi %v6441_v3, %v9070_v3  }
 0x163   : > { %s6450_s3 = scalar_lea.vmem [#allocation2], %s5419_s0  ;;  %p440_p3 = scmp.ge.s32.totalorder %s443_s25, 4  }
 0x164   :  { %v6491_v56 = vmov (%p440_p3), 0.0   ;;  %s6493_s4 = smov (%p440_p3), 0  }
 0x168   : > { %v447_v1 = vld [vmem:[%s6450_s3] sm:$0xff]  ;;  %v448_v26 = vld [vmem:[%s6450_s3 + $0x8] sm:$0xff]  ;;  %v449_v27 = vld [vmem:[%s6450_s3 + $0x10] sm:$0xff] }
 0x169   : > { %v450_v58 = vld [vmem:[%s6450_s3 + $0x18] sm:$0xff]  ;;  %v464_v4 = vsel %vm419_vm1, %v447_v1, 0.0  ;;  %v465_v5 = vsel %vm419_vm1, %v448_v26, 0.0  ;;  %v467_v6 = vsel %vm419_vm1, %v449_v27, 0.0  ;;  %v451_v7 = vld [vmem:[%s6450_s3 + $0x20] sm:$0xff]  ;;  %v452_v10 = vld [vmem:[%s6450_s3 + $0x28] sm:$0xff] }
 0x16a   : > { %v466_v8 = vadd.f32 %v465_v5, %v464_v4  ;;  %v469_v9 = vsel %vm419_vm1, %v450_v58, 0.0  ;;  %v471_v12 = vsel %vm419_vm1, %v451_v7, 0.0  ;;  %v453_v13 = vld [vmem:[%s6450_s3 + $0x30] sm:$0xff]  ;;  %v473_v15 = vsel %vm419_vm1, %v452_v10, 0.0  ;;  %v454_v16 = vld [vmem:[%s6450_s3 + $0x38] sm:$0xff]  ;;  %v455_v19 = vld [vmem:[%s6450_s3 + $0x40] sm:$0xff] }
 0x16b   : > { %v475_v18 = vsel %vm419_vm1, %v453_v13, 0.0  ;;  %v477_v21 = vsel %vm419_vm1, %v454_v16, 0.0  ;;  %v456_v22 = vld [vmem:[%s6450_s3 + $0x48] sm:$0xff]  ;;  %v479_v24 = vsel %vm419_vm1, %v455_v19, 0.0  ;;  %v457_v25 = vld [vmem:[%s6450_s3 + $0x50] sm:$0xff]  ;;  %v458_v57 = vld [vmem:[%s6450_s3 + $0x58] sm:$0xff] }
 0x16c   : > { %v468_v11 = vadd.f32 %v467_v6, %v466_v8  ;;  %v481_v28 = vsel %vm419_vm1, %v456_v22, 0.0  ;;  %v483_v30 = vsel %vm419_vm1, %v457_v25, 0.0  ;;  %v459_v32 = vld [vmem:[%s6450_s3 + $0x60] sm:$0xff]  ;;  %v485_v34 = vsel %vm419_vm1, %v458_v57, 0.0  ;;  %v460_v37 = vld [vmem:[%s6450_s3 + $0x68] sm:$0xff]  ;;  %v461_v40 = vld [vmem:[%s6450_s3 + $0x70] sm:$0xff] }
 0x16d   : > { %v487_v39 = vsel %vm419_vm1, %v459_v32, 0.0  ;;  %v489_v42 = vsel %vm419_vm1, %v460_v37, 0.0  ;;  %v462_v43 = vld [vmem:[%s6450_s3 + $0x78] sm:$0xff]  ;;  %v491_v45 = vsel %vm419_vm1, %v461_v40, 0.0 }
 0x16e   : > { %v470_v14 = vadd.f32 %v469_v9, %v468_v11  ;;  %v493_v35 = vsel %vm419_vm1, %v462_v43, 0.0 }
 0x170   : > { %v472_v17 = vadd.f32 %v471_v12, %v470_v14 }
 0x172   : > { %v474_v20 = vadd.f32 %v473_v15, %v472_v17 }
 0x174   : > { %v476_v23 = vadd.f32 %v475_v18, %v474_v20 }
 0x176   : > { %v478_v0 = vadd.f32 %v477_v21, %v476_v23 }
 0x178   : > { %v480_v29 = vadd.f32 %v479_v24, %v478_v0 }
 0x17a   : > { %v482_v33 = vadd.f32 %v481_v28, %v480_v29 }
 0x17c   : > { %v484_v38 = vadd.f32 %v483_v30, %v482_v33 }
 0x17e   : > { %v486_v41 = vadd.f32 %v485_v34, %v484_v38 }
 0x180   : > { %v488_v44 = vadd.f32 %v487_v39, %v486_v41 }
 0x182   : > { %v490_v46 = vadd.f32 %v489_v42, %v488_v44 }
 0x184   : > { %v492_v47 = vadd.f32 %v491_v45, %v490_v46 }
 0x186   : > { %v494_v36 = vadd.f32 %v493_v35, %v492_v47 }
 0x188   : > { %v495_v48 = vrot.slane %v494_v36, 4 }
 0x18a   : > { %v496_v49 = vadd.f32 %v495_v48, %v494_v36 }
 0x18c   : > { %v497_v50 = vrot.slane %v496_v49, 2 }
 0x18e   : > { %v498_v51 = vadd.f32 %v497_v50, %v496_v49 }
 0x190   : > { %v499_v52 = vrot.slane %v498_v51, 1 }
 0x192   : > { %v500_v53 = vadd.f32 %v499_v52, %v498_v51  ;;  %442 = sbr.rel (!%p440_p3) target bundleno = 354 (0x162), region = 131 }
 0x194   : > { %v501_v54 = vadd.f32 %v6142_v3, %v500_v53  }
 0x196   : > { %v9070_v3 = vmov %v501_v54  ;;  %v6489_v55 = vmul.f32 (%p440_p3), 0.001953125, %v501_v54 }
 0x197 LB: > { %s5420_s5 = sshll.u32 %s6154_s4, 7  ;;  %s508_s4 = sadd.s32 1, %s6154_s4   ;;  %s6154_s4 = sphi %s6493_s4, %s508_s4   ;;  %v6150_v56 = vphi %v6491_v56, %v9071_v56  }
 0x198   : > { %s6502_s26 = scalar_lea.vmem [#allocation2], %s5420_s5  ;;  %p505_p4 = scmp.ge.s32.totalorder %s508_s4, 4  }
 0x199   : > { %v512_v59 = vld [vmem:[%s6502_s26] sm:$0xff]  ;;  %v513_v60 = vld [vmem:[%s6502_s26 + $0x8] sm:$0xff]  ;;  %v514_v61 = vld [vmem:[%s6502_s26 + $0x10] sm:$0xff]  ;;  %vm615_vm2 = vcmask (%p505_p4), 519168   ;;  %s6161_s27 = smov (%p505_p4), 64   ;;  %vm669_vm3 = vcmask (%p505_p4), 1040384  }
 0x19a   : > { %v515_v62 = vld [vmem:[%s6502_s26 + $0x18] sm:$0xff]  ;;  %v528_v3 = vsub.f32 %v512_v59, %v6489_v55  ;;  %v529_v1 = vsub.f32 %v513_v60, %v6489_v55  ;;  %v516_v26 = vld [vmem:[%s6502_s26 + $0x20] sm:$0xff]  ;;  %v530_v27 = vsub.f32 %v514_v61, %v6489_v55  ;;  %v517_v4 = vld [vmem:[%s6502_s26 + $0x28] sm:$0xff]  ;;  %vm670_vm4 = vcmask (%p505_p4), 1044484   ;;  %s8766_s28 = smov (%p505_p4), 0  }
 0x19b   : > { %v531_v58 = vsub.f32 %v515_v62, %v6489_v55  ;;  %v532_v5 = vsub.f32 %v516_v26, %v6489_v55  ;;  %v518_v8 = vld [vmem:[%s6502_s26 + $0x30] sm:$0xff]  ;;  %v533_v10 = vsub.f32 %v517_v4, %v6489_v55  ;;  %v519_v12 = vld [vmem:[%s6502_s26 + $0x38] sm:$0xff]  ;;  %v520_v17 = vld [vmem:[%s6502_s26 + $0x40] sm:$0xff]  ;;  %vm627_vm6 = vcmask (%p505_p4), 1041920  }
 0x19c   : > { %v544_v6 = vmul.f32 %v528_v3, %v528_v3  ;;  %v545_v7 = vmul.f32 %v529_v1, %v529_v1  ;;  %v546_v9 = vmul.f32 %v530_v27, %v530_v27  ;;  %v534_v13 = vsub.f32 %v518_v8, %v6489_v55  ;;  %v521_v23 = vld [vmem:[%s6502_s26 + $0x48] sm:$0xff]  ;;  %v522_v57 = vld [vmem:[%s6502_s26 + $0x50] sm:$0xff]  ;;  %v523_v34 = vld [vmem:[%s6502_s26 + $0x58] sm:$0xff] }
 0x19d   : > { %v547_v11 = vmul.f32 %v531_v58, %v531_v58  ;;  %v548_v14 = vmul.f32 %v532_v5, %v532_v5  ;;  %v535_v20 = vsub.f32 %v519_v12, %v6489_v55  ;;  %v549_v21 = vmul.f32 %v533_v10, %v533_v10  ;;  %v524_v41 = vld [vmem:[%s6502_s26 + $0x60] sm:$0xff]  ;;  %v525_v46 = vld [vmem:[%s6502_s26 + $0x68] sm:$0xff]  ;;  %v526_v49 = vld [vmem:[%s6502_s26 + $0x70] sm:$0xff] }
 0x19e   : > { %v561_v15 = vsel %vm419_vm1, %v544_v6, 0.0  ;;  %v562_v16 = vsel %vm419_vm1, %v545_v7, 0.0  ;;  %v564_v19 = vsel %vm419_vm1, %v546_v9, 0.0  ;;  %v536_v25 = vsub.f32 %v520_v17, %v6489_v55  ;;  %v527_v54 = vld [vmem:[%s6502_s26 + $0x78] sm:$0xff]  ;;  %vm6656_vm5 = vmor (%p505_p4), %vm669_vm3, %vm670_vm4 }
 0x19f   : > { %v563_v18 = vadd.f32 %v562_v16, %v561_v15  ;;  %v566_v22 = vsel %vm419_vm1, %v547_v11, 0.0  ;;  %v550_v0 = vmul.f32 %v534_v13, %v534_v13  ;;  %v568_v28 = vsel %vm419_vm1, %v548_v14, 0.0 }
 0x1a0   : > { %v537_v30 = vsub.f32 %v521_v23, %v6489_v55  ;;  %v551_v32 = vmul.f32 %v535_v20, %v535_v20  ;;  %v570_v33 = vsel %vm419_vm1, %v549_v21, 0.0  ;;  %v538_v38 = vsub.f32 %v522_v57, %v6489_v55  ;;  %v972_v57 = vld [vmem:[#allocation2 + $0xc0] sm:$0xff] (%p505_p4) }
 0x1a1   : > { %v565_v24 = vadd.f32 %v564_v19, %v563_v18  ;;  %v552_v39 = vmul.f32 %v536_v25, %v536_v25  ;;  %v572_v40 = vsel %vm419_vm1, %v550_v0, 0.0  ;;  %v539_v43 = vsub.f32 %v523_v34, %v6489_v55  ;;  %v756_v0 = vld [vmem:[#allocation2 + $0x40] sm:$0xff] (%p505_p4)  ;;  %v975_v34 = vld [vmem:[#allocation2 + $0xd8] sm:$0xff] (%p505_p4) }
 0x1a2   : > { %v553_v44 = vmul.f32 %v537_v30, %v537_v30  ;;  %v574_v45 = vsel %vm419_vm1, %v551_v32, 0.0  ;;  %v540_v47 = vsub.f32 %v524_v41, %v6489_v55  ;;  %v554_v36 = vmul.f32 %v538_v38, %v538_v38  ;;  %v759_v32 = vld [vmem:[#allocation2 + $0x58] sm:$0xff] (%p505_p4)  ;;  %v630_v41 = vld [vmem:[#allocation2 + $0x8] sm:$0xff] (%p505_p4) }
 0x1a3   : > { %v567_v29 = vadd.f32 %v566_v22, %v565_v24  ;;  %v576_v48 = vsel %vm419_vm1, %v552_v39, 0.0  ;;  %v541_v51 = vsub.f32 %v525_v46, %v6489_v55  ;;  %v555_v52 = vmul.f32 %v539_v43, %v539_v43  ;;  %v757_v43 = vld [vmem:[#allocation2 + $0x48] sm:$0xff] (%p505_p4) }
 0x1a4   : > { %v578_v53 = vsel %vm419_vm1, %v553_v44, 0.0  ;;  %v542_v60 = vsub.f32 %v526_v49, %v6489_v55  ;;  %v556_v61 = vmul.f32 %v540_v47, %v540_v47  ;;  %v580_v62 = vsel %vm419_vm1, %v554_v36, 0.0 }
 0x1a5   : > { %v569_v37 = vadd.f32 %v568_v28, %v567_v29  ;;  %v543_v1 = vsub.f32 %v527_v54, %v6489_v55  ;;  %v557_v26 = vmul.f32 %v541_v51, %v541_v51  ;;  %v582_v27 = vsel %vm419_vm1, %v555_v52, 0.0  ;;  %v629_v28 = vld [vmem:[#allocation2] sm:$0xff] (%p505_p4) }
 0x1a6   : > { %v558_v4 = vmul.f32 %v542_v60, %v542_v60  ;;  %v584_v5 = vsel %vm419_vm1, %v556_v61, 0.0  ;;  %v864_v29 = vld [vmem:[#allocation2 + $0x80] sm:$0xff] (%p505_p4)  ;;  %v6160_v30 = vmov (%p505_p4), 0   ;;  %vm749_vm7 = vcmask (%p505_p4), 519169  }
 0x1a7   : > { %v571_v42 = vadd.f32 %v570_v33, %v569_v37  ;;  %v559_v7 = vmul.f32 %v543_v1, %v543_v1  ;;  %v586_v8 = vsel %vm419_vm1, %v557_v26, 0.0  ;;  %605 = vst [vmem:[#allocation3] sm:$0x11] (%p505_p4), %v6160_v30  ;;  %606 = vst [vmem:[#allocation3 + $0x8] sm:$0x11] (%p505_p4), %v6160_v30  ;;  %v632_v33 = vld [vmem:[#allocation2 + $0x18] sm:$0xff] (%p505_p4) }
 0x1a8   : > { %v588_v10 = vsel %vm419_vm1, %v558_v4, 0.0  ;;  %607 = vst [vmem:[#allocation3 + $0x10] sm:$0x11] (%p505_p4), %v6160_v30  ;;  %608 = vst [vmem:[#allocation3 + $0x18] sm:$0x11] (%p505_p4), %v6160_v30  ;;  %v867_v37 = vld [vmem:[#allocation2 + $0x98] sm:$0xff] (%p505_p4) }
 0x1a9   : > { %v573_v35 = vadd.f32 %v572_v40, %v571_v42  ;;  %v590_v12 = vsel %vm419_vm1, %v559_v7, 0.0  ;;  %609 = vst [vmem:[#allocation3 + $0x20] sm:$0x1] (%p505_p4), %v6160_v30  ;;  %610 = vst [vmem:[#allocation3 + $0x90] sm:$0x22] (%p505_p4), %v6160_v30  ;;  %v631_v42 = vld [vmem:[#allocation2 + $0x10] sm:$0xff] (%p505_p4) }
 0x1aa   :  { %611 = vst [vmem:[#allocation3 + $0x98] sm:$0x22] (%p505_p4), %v6160_v30  ;;  %612 = vst [vmem:[#allocation3 + $0xa0] sm:$0x22] (%p505_p4), %v6160_v30  ;;  %vm620_vm8 = vcmask (%p505_p4), 517120   ;;  %vm622_vm9 = vcmask (%p505_p4), 1043968  }
 0x1ab   : > { %v575_v50 = vadd.f32 %v574_v45, %v573_v35  ;;  %613 = vst [vmem:[#allocation3 + $0xa8] sm:$0x22] (%p505_p4), %v6160_v30  ;;  %614 = vst [vmem:[#allocation3 + $0xb0] sm:$0x2] (%p505_p4), %v6160_v30  ;;  %vm754_vm10 = vcmask (%p505_p4), 516096   ;;  %vm698_vm11 = vcmask (%p505_p4), 1043969  }
 0x1ac   :  { %616 = vst.msk [vmem:[#allocation3] sm:$0xf] (%p505_p4), %vm615_vm2, %v6160_v30  ;;  %617 = vst.msk [vmem:[#allocation3 + $0x24] sm:$0xf] (%p505_p4), %vm615_vm2, %v6160_v30  ;;  %vm703_vm12 = vcmask (%p505_p4), 1040896   ;;  %vm1538_vm13 = vcmask (%p505_p4), 1042432  }
 0x1ad   : > { %v577_v59 = vadd.f32 %v576_v48, %v575_v50  ;;  %618 = vst.msk [vmem:[#allocation3 + $0x48] sm:$0xf] (%p505_p4), %vm615_vm2, %v6160_v30  ;;  %619 = vst.msk [vmem:[#allocation3 + $0x6c] sm:$0xf] (%p505_p4), %vm615_vm2, %v6160_v30  ;;  %vm1539_vm14 = vcmask (%p505_p4), 1046532   ;;  %vm1611_vm15 = vcmask (%p505_p4), 1041408  }
 0x1ae   :  { %628 = vst.msk [vmem:[#allocation3 + $0xb0] sm:$0x3] (%p505_p4), %vm627_vm6, %v6160_v30  ;;  %vm1612_vm3 = vcmask (%p505_p4), 1045508   ;;  %vm7156_vm4 = vmor (%p505_p4), %vm1538_vm13, %vm1539_vm14 }
 0x1af   : > { %v579_v3 = vadd.f32 %v578_v53, %v577_v59  ;;  %621 = vst.msk [vmem:[#allocation3 + $0x90] sm:$0x3] (%p505_p4), %vm620_vm8, %v6160_v30  ;;  %vm7166_vm6 = vmor (%p505_p4), %vm1611_vm15, %vm1612_vm3 }
 0x1b0   :  { %623 = vst.msk [vmem:[#allocation3 + $0x20] sm:$0xf] (%p505_p4), %vm622_vm9, %v6160_v30  ;;  %624 = vst.msk [vmem:[#allocation3 + $0x44] sm:$0xf] (%p505_p4), %vm622_vm9, %v6160_v30 }
 0x1b1   : > { %v581_v58 = vadd.f32 %v580_v62, %v579_v3  ;;  %625 = vst.msk [vmem:[#allocation3 + $0x68] sm:$0xf] (%p505_p4), %vm622_vm9, %v6160_v30  ;;  %626 = vst.msk [vmem:[#allocation3 + $0x8c] sm:$0xf] (%p505_p4), %vm622_vm9, %v6160_v30 }
 0x1b3   : > { %v583_v6 = vadd.f32 %v582_v27, %v581_v58 }
 0x1b5   : > { %v585_v9 = vadd.f32 %v584_v5, %v583_v6  ;;  %v758_v5 = vld [vmem:[#allocation2 + $0x50] sm:$0xff] (%p505_p4)  ;;  %v865_v6 = vld [vmem:[#allocation2 + $0x88] sm:$0xff] (%p505_p4) }
 0x1b7   : > { %v587_v11 = vadd.f32 %v586_v8, %v585_v9 }
 0x1b9   : > { %v589_v13 = vadd.f32 %v588_v10, %v587_v11  ;;  %v866_v11 = vld [vmem:[#allocation2 + $0x90] sm:$0xff] (%p505_p4) }
 0x1bb   : > { %v591_v14 = vadd.f32 %v590_v12, %v589_v13 }
 0x1bd   : > { %v592_v15 = vrot.slane %v591_v14, 4 }
 0x1bf   : > { %v593_v16 = vadd.f32 %v592_v15, %v591_v14 }
 0x1c1   : > { %v594_v17 = vrot.slane %v593_v16, 2 }
 0x1c3   : > { %v595_v18 = vadd.f32 %v594_v17, %v593_v16 }
 0x1c5   : > { %v596_v19 = vrot.slane %v595_v18, 1 }
 0x1c7   : > { %v597_v20 = vadd.f32 %v596_v19, %v595_v18  ;;  %507 = sbr.rel (!%p505_p4) target bundleno = 407 (0x197), region = 142 }
 0x1c9   : > { %v598_v21 = vadd.f32 %v6150_v56, %v597_v20  }
 0x1cb   : > { %v9071_v56 = vmov %v598_v21  ;;  %v599_v22 = vmul.f32 (%p505_p4), 0.001953125, %v598_v21 }
 0x1cd   :  { %v600_v23 = vadd.f32 1e-05, %v599_v22 }
 0x1cf   :  { %5986 = vrsqrt.f32 %v600_v23 }
 0x1dc   :  { %v5987_v24 = vpop.eup %5986 }
 0x1dd   :  { %v602_v25 = vmul.f32 %v5987_v24, %v6434_v63 }
 0x1df   :  { %v603_v63 = vmul.f32 %v602_v25, %v6489_v55  ;;  %v6571_v56 = vrot.slane %v602_v25, %v6362_v31 }
 0x1e1   :  { %v604_v55 = vsub.f32 %v6439_v2, %v603_v63  ;;  %v760_v38 = vmul.f32 %v756_v0, %v6571_v56  ;;  %v639_v39 = vmul.f32 %v6571_v56, %v629_v28  ;;  %v976_v40 = vmul.f32 %v972_v57, %v6571_v56  ;;  %v973_v0 = vld [vmem:[#allocation2 + $0xc8] sm:$0xff]  ;;  %v974_v28 = vld [vmem:[#allocation2 + $0xd0] sm:$0xff] }
 0x1e2   :  { %v868_v44 = vmul.f32 %v864_v29, %v6571_v56  ;;  %v763_v45 = vmul.f32 %v759_v32, %v6571_v56  ;;  %v642_v46 = vmul.f32 %v6571_v56, %v632_v33  ;;  %v979_v35 = vmul.f32 %v975_v34, %v6571_v56 }
 0x1e3   :  { %v6590_v47 = vrot.slane %v604_v55, %v6362_v31  ;;  %v871_v2 = vmul.f32 %v867_v37, %v6571_v56  ;;  %v640_v36 = vmul.f32 %v6571_v56, %v630_v41  ;;  %v641_v48 = vmul.f32 %v6571_v56, %v631_v42 }
 0x1e4   :  { %v761_v49 = vmul.f32 %v757_v43, %v6571_v56  ;;  %v762_v18 = vmul.f32 %v758_v5, %v6571_v56  ;;  %v869_v19 = vmul.f32 %v865_v6, %v6571_v56  ;;  %v870_v23 = vmul.f32 %v866_v11, %v6571_v56 }
 0x1e5   :  { %v764_v50 = vadd.f32 %v760_v38, %v6590_v47  ;;  %v649_v51 = vadd.f32 %v6590_v47, %v639_v39  ;;  %v980_v52 = vadd.f32 %v976_v40, %v6590_v47  ;;  %v872_v53 = vadd.f32 %v868_v44, %v6590_v47 }
 0x1e6   :  { %v767_v54 = vadd.f32 %v763_v45, %v6590_v47  ;;  %v652_v31 = vadd.f32 %v6590_v47, %v642_v46  ;;  %v983_v59 = vadd.f32 %v979_v35, %v6590_v47  ;;  %v875_v60 = vadd.f32 %v871_v2, %v6590_v47 }
 0x1e7   :  { %v768_v61 = vmax.f32 %v764_v50, 0.0  ;;  %v653_v62 = vmax.f32 %v649_v51, 0.0  ;;  %v984_v3 = vmax.f32 %v980_v52, 0.0  ;;  %v876_v1 = vmax.f32 %v872_v53, 0.0 }
 0x1e8   :  { %v771_v26 = vmax.f32 %v767_v54, 0.0  ;;  %v656_v27 = vmax.f32 %v652_v31, 0.0  ;;  %v987_v58 = vmax.f32 %v983_v59, 0.0  ;;  %v879_v4 = vmax.f32 %v875_v60, 0.0 }
 0x1e9   :  { %v5643_v7 = vpack.c.bf16 %v768_v61, %v768_v61  ;;  %v5635_v8 = vpack.c.bf16 %v653_v62, %v653_v62  ;;  %v6604_v9 = vpack.c.bf16 %v984_v3, %v984_v3  ;;  %v6606_v10 = vpack.c.bf16 %v876_v1, %v876_v1 }
 0x1ea   :  { %v6608_v12 = vpack.c.bf16 %v771_v26, %v771_v26  ;;  %v6610_v13 = vpack.c.bf16 %v656_v27, %v656_v27  ;;  %v6612_v14 = vpack.c.bf16 %v987_v58, %v987_v58  ;;  %v6614_v15 = vpack.c.bf16 %v879_v4, %v879_v4 }
 0x1eb   :  { %v784_v16 = vrot.slane %v5643_v7, 7  ;;  %v672_v17 = vrot.slane %v5635_v8, 7  ;;  %v1000_v24 = vrot.slane %v6604_v9, 7  ;;  %v892_v25 = vrot.slane %v6606_v10, 7  ;;  %v1080_v9 = vld [vmem:[#allocation2 + $0x100] sm:$0xff] }
 0x1ec   :  { %v792_v20 = vrot.slane %v6608_v12, 7  ;;  %v680_v21 = vrot.slane %v6610_v13, 7  ;;  %v1008_v22 = vrot.slane %v6612_v14, 7  ;;  %v900_v32 = vrot.slane %v6614_v15, 7  ;;  %v1189_v13 = vld [vmem:[#allocation2 + $0x148] sm:$0xff]  ;;  %v1298_v15 = vld [vmem:[#allocation2 + $0x190] sm:$0xff] }
 0x1ed   :  { %795 = vrot.lane.b32.xlu1 %v784_v16, %s6161_s27  ;;  %683 = vrot.lane.b32.xlu0 %v672_v17, %s6161_s27  ;;  %v650_v33 = vadd.f32 %v6590_v47, %v640_v36  ;;  %v651_v34 = vadd.f32 %v6590_v47, %v641_v48  ;;  %v765_v37 = vadd.f32 %v761_v49, %v6590_v47  ;;  %v785_v3 = vrot.slane %v784_v16, 4 }
 0x1ee   :  { %v794_v57 = vrot.slane %v792_v20, 4  ;;  %v682_v29 = vrot.slane %v680_v21, 4  ;;  %v1010_v63 = vrot.slane %v1008_v22, 4  ;;  %v766_v55 = vadd.f32 %v762_v18, %v6590_v47  ;;  %v1081_v18 = vld [vmem:[#allocation2 + $0x108] sm:$0xff] }
 0x1ef   :  { %v873_v38 = vadd.f32 %v869_v19, %v6590_v47  ;;  %v874_v39 = vadd.f32 %v870_v23, %v6590_v47  ;;  %v977_v40 = vmul.f32 %v973_v0, %v6571_v56  ;;  %v978_v41 = vmul.f32 %v974_v28, %v6571_v56  ;;  %v1082_v19 = vld [vmem:[#allocation2 + $0x110] sm:$0xff]  ;;  %v1083_v23 = vld [vmem:[#allocation2 + $0x118] sm:$0xff] }
 0x1f0   :  { %v654_v42 = vmax.f32 %v650_v33, 0.0  ;;  %v655_v43 = vmax.f32 %v651_v34, 0.0  ;;  %v769_v44 = vmax.f32 %v765_v37, 0.0  ;;  %v770_v45 = vmax.f32 %v766_v55, 0.0 }
 0x1f1   :  { %1011 = vrot.lane.b32.xlu1 %v1000_v24, %s6161_s27  ;;  %903 = vrot.lane.b32.xlu0 %v892_v25, %s6161_s27  ;;  %v877_v46 = vmax.f32 %v873_v38, 0.0  ;;  %v878_v35 = vmax.f32 %v874_v39, 0.0  ;;  %v981_v2 = vadd.f32 %v977_v40, %v6590_v47  ;;  %v982_v36 = vadd.f32 %v978_v41, %v6590_v47  ;;  %v1190_v40 = vld [vmem:[#allocation2 + $0x150] sm:$0xff] }
 0x1f2   :  { %v5636_v48 = vpack.c.bf16 %v654_v42, %v654_v42  ;;  %v5637_v49 = vpack.c.bf16 %v655_v43, %v655_v43  ;;  %v5644_v50 = vpack.c.bf16 %v769_v44, %v769_v44  ;;  %v5645_v51 = vpack.c.bf16 %v770_v45, %v770_v45  ;;  %v1191_v43 = vld [vmem:[#allocation2 + $0x158] sm:$0xff] }
 0x1f3   :  { %v902_v52 = vrot.slane %v900_v32, 4  ;;  %v6647_v53 = vpack.c.bf16 %v877_v46, %v877_v46  ;;  %v6649_v54 = vpack.c.bf16 %v878_v35, %v878_v35  ;;  %v985_v31 = vmax.f32 %v981_v2, 0.0 }
 0x1f4   :  { %v674_v59 = vrot.slane %v5636_v48, 7  ;;  %v677_v60 = vrot.slane %v5637_v49, 7  ;;  %v789_v61 = vrot.slane %v5645_v51, 7  ;;  %v986_v62 = vmax.f32 %v982_v36, 0.0 }
 0x1f5   :  { %803 = vrot.lane.b32.xlu1 %v794_v57, %s6161_s27  ;;  %691 = vrot.lane.b32.xlu0 %v682_v29, %s6161_s27  ;;  %v673_v1 = vrot.slane %v672_v17, 4  ;;  %v786_v26 = vrot.slane %v5644_v50, 7  ;;  %v894_v27 = vrot.slane %v6647_v53, 7  ;;  %v6660_v6 = vpack.c.bf16 %v985_v31, %v985_v31  ;;  %v1188_v57 = vld [vmem:[#allocation2 + $0x140] sm:$0xff] }
 0x1f6   :  { %v676_v4 = vrot.slane %v674_v59, 4  ;;  %v679_v5 = vrot.slane %v677_v60, 4  ;;  %v6662_v7 = vrot.slane %v1000_v24, 4  ;;  %v6664_v10 = vrot.slane %v892_v25, 4 }
 0x1f7   :  { %v788_v8 = vrot.slane %v786_v26, 4  ;;  %v791_v11 = vrot.slane %v789_v61, 4  ;;  %v897_v16 = vrot.slane %v6649_v54, 7  ;;  %v6669_v17 = vpack.c.bf16 %v986_v62, %v986_v62 }
 0x1f8   :  { %v678_v24 = vsel %vm6656_vm5, %v676_v4, %v677_v60  ;;  %v675_v0 = vsel %vm6656_vm5, %v673_v1, %v674_v59  ;;  %v787_v25 = vsel %vm6656_vm5, %v785_v3, %v786_v26  ;;  %v896_v28 = vrot.slane %v894_v27, 4 }
 0x1f9   :  { %1019 = vrot.lane.b32.xlu1 %v1010_v63, %s6161_s27  ;;  %911 = vrot.lane.b32.xlu0 %v902_v52, %s6161_s27  ;;  %v681_v29 = vsel %vm6656_vm5, %v679_v5, %v680_v21  ;;  %v899_v63 = vrot.slane %v897_v16, 4  ;;  %v1002_v33 = vrot.slane %v6660_v6, 7  ;;  %v1084_v34 = vmul.f32 %v1080_v9, %v6571_v56 }
 0x1fa   :  { %v790_v37 = vsel %vm6656_vm5, %v788_v8, %v789_v61  ;;  %v1085_v55 = vmul.f32 %v1081_v18, %v6571_v56  ;;  %v1086_v38 = vmul.f32 %v1082_v19, %v6571_v56  ;;  %v1087_v39 = vmul.f32 %v1083_v23, %v6571_v56  ;;  %v1296_v23 = vld [vmem:[#allocation2 + $0x180] sm:$0xff] }
 0x1fb   :  { %v793_v21 = vsel %vm6656_vm5, %v791_v11, %v792_v20  ;;  %v1088_v41 = vadd.f32 %v1084_v34, %v6590_v47  ;;  %v1192_v42 = vmul.f32 %v1188_v57, %v6571_v56  ;;  %v1005_v44 = vrot.slane %v6669_v17, 7 }
 0x1fc   :  { %v1089_v45 = vadd.f32 %v1085_v55, %v6590_v47  ;;  %v1090_v46 = vadd.f32 %v1086_v38, %v6590_v47  ;;  %v1091_v35 = vadd.f32 %v1087_v39, %v6590_v47  ;;  %v1193_v2 = vmul.f32 %v1189_v13, %v6571_v56  ;;  %v1404_v55 = vld [vmem:[#allocation2 + $0x1c0] sm:$0xff] }
 0x1fd   :  { %687 = vrot.lane.b32.xlu1 %v678_v24, %s6161_s27  ;;  %685 = vrot.lane.b32.xlu0 %v675_v0, %s6161_s27  ;;  %v1092_v12 = vmax.f32 %v1088_v41, 0.0  ;;  %v1196_v20 = vadd.f32 %v1192_v42, %v6590_v47  ;;  %v1194_v36 = vmul.f32 %v1190_v40, %v6571_v56  ;;  %v1195_v51 = vmul.f32 %v1191_v43, %v6571_v56  ;;  %v923_v41 = vld [vmem:[#allocation2 + $0xa0] sm:$0xff] }
 0x1fe   :  { %v1093_v48 = vmax.f32 %v1089_v45, 0.0  ;;  %v1094_v49 = vmax.f32 %v1090_v46, 0.0  ;;  %v1095_v50 = vmax.f32 %v1091_v35, 0.0  ;;  %v1197_v31 = vadd.f32 %v1193_v2, %v6590_v47 }
 0x1ff   :  { %v6711_v52 = vpack.c.bf16 %v1092_v12, %v1092_v12  ;;  %v1200_v59 = vmax.f32 %v1196_v20, 0.0  ;;  %v1198_v60 = vadd.f32 %v1194_v36, %v6590_v47  ;;  %v1199_v1 = vadd.f32 %v1195_v51, %v6590_v47 }
 0x200   :  { %v6715_v61 = vpack.c.bf16 %v1093_v48, %v1093_v48  ;;  %v6717_v62 = vpack.c.bf16 %v1094_v49, %v1094_v49  ;;  %v6719_v3 = vpack.c.bf16 %v1095_v50, %v1095_v50  ;;  %v1004_v26 = vrot.slane %v1002_v33, 4 }
 0x201   :  { %689 = vrot.lane.b32.xlu1 %v681_v29, %s6161_s27  ;;  %797 = vrot.lane.b32.xlu0 %v787_v25, %s6161_s27  ;;  %v1201_v4 = vmax.f32 %v1197_v31, 0.0  ;;  %v6722_v5 = vpack.c.bf16 %v1200_v59, %v1200_v59  ;;  %v1202_v6 = vmax.f32 %v1198_v60, 0.0  ;;  %v1007_v8 = vrot.slane %v1005_v44, 4 }
 0x202   :  { %v1108_v9 = vrot.slane %v6711_v52, 7  ;;  %v895_v11 = vsel %vm6656_vm5, %v6664_v10, %v894_v27  ;;  %v1113_v17 = vrot.slane %v6717_v62, 7  ;;  %v1116_v18 = vrot.slane %v6719_v3, 7  ;;  %v1297_v10 = vld [vmem:[#allocation2 + $0x188] sm:$0xff] }
 0x203   :  { %v1203_v19 = vmax.f32 %v1199_v1, 0.0  ;;  %v898_v24 = vsel %vm6656_vm5, %v896_v28, %v897_v16  ;;  %v901_v53 = vsel %vm6656_vm5, %v899_v63, %v900_v32  ;;  %v1110_v0 = vrot.slane %v6715_v61, 7  ;;  %v1299_v28 = vld [vmem:[#allocation2 + $0x198] sm:$0xff] }
 0x204   :  { %v1216_v27 = vrot.slane %v6722_v5, 7  ;;  %v1003_v25 = vsel %vm6656_vm5, %v6662_v7, %v1002_v33  ;;  %v1006_v54 = vsel %vm6656_vm5, %v1004_v26, %v1005_v44  ;;  %v6749_v57 = vpack.c.bf16 %v1201_v4, %v1201_v4  ;;  %v705_v33 = vld [vmem:[#allocation2 + $0x20] sm:$0xff] }
 0x205   :  { %799 = vrot.lane.b32.xlu1 %v790_v37, %s6161_s27  ;;  %801 = vrot.lane.b32.xlu0 %v793_v21, %s6161_s27  ;;  %v6751_v16 = vpack.c.bf16 %v1202_v6, %v1202_v6  ;;  %v1009_v32 = vsel %vm6656_vm5, %v1007_v8, %v1008_v22  ;;  %v1109_v29 = vrot.slane %v1108_v9, 4  ;;  %v1112_v63 = vrot.slane %v1110_v0, 4  ;;  %v1405_v21 = vld [vmem:[#allocation2 + $0x1c8] sm:$0xff] }
 0x206   :  { %v1300_v7 = vmul.f32 %v1296_v23, %v6571_v56  ;;  %v1115_v34 = vrot.slane %v1113_v17, 4  ;;  %v6766_v14 = vrot.slane %v1116_v18, 4  ;;  %v6768_v37 = vpack.c.bf16 %v1203_v19, %v1203_v19 }
 0x207   :  { %v1301_v22 = vmul.f32 %v1297_v10, %v6571_v56  ;;  %v1217_v38 = vrot.slane %v1216_v27, 4  ;;  %v1302_v13 = vmul.f32 %v1298_v15, %v6571_v56  ;;  %v1303_v40 = vmul.f32 %v1299_v28, %v6571_v56 }
 0x208   :  { %v1304_v39 = vadd.f32 %v1300_v7, %v6590_v47  ;;  %v1218_v42 = vrot.slane %v6749_v57, 7  ;;  %v1221_v43 = vrot.slane %v6751_v16, 7  ;;  %v709_v45 = vmul.f32 %v705_v33, %v6571_v56  ;;  %v815_v7 = vld [vmem:[#allocation2 + $0x60] sm:$0xff]  ;;  %v1406_v33 = vld [vmem:[#allocation2 + $0x1d0] sm:$0xff] }
 0x209   :  { %905 = vrot.lane.b32.xlu1 %v895_v11, %s6161_s27  ;;  %907 = vrot.lane.b32.xlu0 %v898_v24, %s6161_s27  ;;  %v1305_v44 = vadd.f32 %v1301_v22, %v6590_v47  ;;  %v1306_v35 = vadd.f32 %v1302_v13, %v6590_v47  ;;  %v1307_v12 = vadd.f32 %v1303_v40, %v6590_v47  ;;  %v1224_v6 = vrot.slane %v6768_v37, 7  ;;  %v708_v37 = vld [vmem:[#allocation2 + $0x38] sm:$0xff] }
 0x20a   :  { %v1308_v46 = vmax.f32 %v1304_v39, 0.0  ;;  %v1408_v2 = vmul.f32 %v1404_v55, %v6571_v56  ;;  %v713_v36 = vadd.f32 %v709_v45, %v6590_v47  ;;  %v1409_v48 = vmul.f32 %v1405_v21, %v6571_v56  ;;  %v1466_v39 = vld [vmem:[#allocation2 + $0x1f8] sm:$0xff] }
 0x20b   :  { %v1309_v20 = vmax.f32 %v1305_v44, 0.0  ;;  %v927_v49 = vmul.f32 %v923_v41, %v6571_v56  ;;  %v1310_v51 = vmax.f32 %v1306_v35, 0.0  ;;  %v1311_v31 = vmax.f32 %v1307_v12, 0.0  ;;  %v818_v35 = vld [vmem:[#allocation2 + $0x78] sm:$0xff] }
 0x20c   :  { %v6788_v50 = vpack.c.bf16 %v1308_v46, %v1308_v46  ;;  %v1412_v59 = vadd.f32 %v1408_v2, %v6590_v47  ;;  %v717_v61 = vmax.f32 %v713_v36, 0.0  ;;  %v1413_v1 = vadd.f32 %v1409_v48, %v6590_v47 }
 0x20d   :  { %909 = vrot.lane.b32.xlu1 %v901_v53, %s6161_s27  ;;  %1013 = vrot.lane.b32.xlu0 %v1003_v25, %s6161_s27  ;;  %v5684_v60 = vpack.c.bf16 %v1309_v20, %v1309_v20  ;;  %v931_v26 = vadd.f32 %v927_v49, %v6590_v47  ;;  %v1223_v4 = vrot.slane %v1221_v43, 4  ;;  %v6794_v8 = vpack.c.bf16 %v1311_v31, %v1311_v31 }
 0x20e   :  { %v1416_v11 = vmax.f32 %v1412_v59, 0.0  ;;  %v1220_v19 = vrot.slane %v1218_v42, 4  ;;  %v1324_v23 = vrot.slane %v6788_v50, 7  ;;  %v6799_v24 = vpack.c.bf16 %v717_v61, %v717_v61 }
 0x20f   :  { %v935_v53 = vmax.f32 %v931_v26, 0.0  ;;  %v1111_v10 = vsel %vm6656_vm5, %v1109_v29, %v1110_v0  ;;  %v1114_v25 = vsel %vm6656_vm5, %v1112_v63, %v1113_v17  ;;  %v5685_v57 = vpack.c.bf16 %v1310_v51, %v1310_v51  ;;  %v1407_v63 = vld [vmem:[#allocation2 + $0x1d8] sm:$0xff] }
 0x210   :  { %v1326_v16 = vrot.slane %v5684_v60, 7  ;;  %v733_v15 = vrot.slane %v6799_v24, 7  ;;  %v1417_v28 = vmax.f32 %v1413_v1, 0.0  ;;  %v1117_v62 = vsel %vm6656_vm5, %v1115_v34, %v1116_v18  ;;  %v706_v24 = vld [vmem:[#allocation2 + $0x28] sm:$0xff] }
 0x211   :  { %1015 = vrot.lane.b32.xlu1 %v1006_v54, %s6161_s27  ;;  %1017 = vrot.lane.b32.xlu0 %v1009_v32, %s6161_s27  ;;  %v1325_v54 = vrot.slane %v1324_v23, 4  ;;  %v6810_v32 = vpack.c.bf16 %v935_v53, %v935_v53  ;;  %v6818_v17 = vsel %vm6656_vm5, %v1217_v38, %v1218_v42  ;;  %v1332_v0 = vrot.slane %v6794_v8, 7  ;;  %v926_v42 = vld [vmem:[#allocation2 + $0xb8] sm:$0xff] }
 0x212   :  { %v6821_v29 = vpack.c.bf16 %v1416_v11, %v1416_v11  ;;  %v6829_v3 = vsel %vm6656_vm5, %v1223_v4, %v1224_v6  ;;  %v6833_v18 = vsel %vm6656_vm5, %v1220_v19, %v1221_v43  ;;  %v6835_v34 = vrot.slane %v1224_v6, 4  ;;  %750 = vst.msk [vmem:[#allocation3 + $0x4] sm:$0xe] %vm749_vm7, %v733_v15 }
 0x213   :  { %v951_v22 = vrot.slane %v6810_v32, 7  ;;  %v1328_v55 = vrot.slane %v1326_v16, 4  ;;  %v1329_v38 = vrot.slane %v5685_v57, 7  ;;  %v819_v52 = vmul.f32 %v815_v7, %v6571_v56 }
 0x214   :  { %v6845_v13 = vsel %vm6656_vm5, %v1325_v54, %v1326_v16  ;;  %v6847_v40 = vpack.c.bf16 %v1417_v28, %v1417_v28  ;;  %v1411_v21 = vmul.f32 %v1407_v63, %v6571_v56  ;;  %v712_v41 = vmul.f32 %v708_v37, %v6571_v56  ;;  %v817_v63 = vld [vmem:[#allocation2 + $0x70] sm:$0xff] }
 0x215   :  { %1121 = vrot.lane.b32.xlu1 %v1111_v10, %s6161_s27  ;;  %1119 = vrot.lane.b32.xlu0 %v1108_v9, %s6161_s27  ;;  %v1410_v9 = vmul.f32 %v1406_v33, %v6571_v56  ;;  %967 = vst.msk [vmem:[#allocation3 + $0xc] sm:$0xe] %vm749_vm7, %v951_v22  ;;  %v6854_v43 = vrot.slane %v1332_v0, 4  ;;  %v1432_v44 = vrot.slane %v6821_v29, 7  ;;  %v823_v45 = vadd.f32 %v819_v52, %v6590_v47 }
 0x216   :  { %v1331_v12 = vrot.slane %v1329_v38, 4  ;;  %v1470_v2 = vmul.f32 %v1466_v39, %v6571_v56  ;;  %v716_v20 = vadd.f32 %v712_v41, %v6590_v47  ;;  %v1415_v48 = vadd.f32 %v1411_v21, %v6590_v47  ;;  %v1031_v21 = vld [vmem:[#allocation2 + $0xe0] sm:$0xff] }
 0x217   :  { %v1414_v46 = vadd.f32 %v1410_v9, %v6590_v47  ;;  %v827_v36 = vmax.f32 %v823_v45, 0.0  ;;  %v930_v51 = vmul.f32 %v926_v42, %v6571_v56  ;;  %v6868_v31 = vsel %vm6656_vm5, %v1328_v55, %v1329_v38  ;;  %v924_v55 = vld [vmem:[#allocation2 + $0xa8] sm:$0xff]  ;;  %v925_v38 = vld [vmem:[#allocation2 + $0xb0] sm:$0xff] }
 0x218   :  { %v1474_v59 = vadd.f32 %v1470_v2, %v6590_v47  ;;  %v720_v60 = vmax.f32 %v716_v20, 0.0  ;;  %v822_v61 = vmul.f32 %v818_v35, %v6571_v56  ;;  %v1434_v1 = vrot.slane %v6847_v40, 7  ;;  %v1032_v35 = vld [vmem:[#allocation2 + $0xe8] sm:$0xff] }
 0x219   :  { %1123 = vrot.lane.b32.xlu0 %v1114_v25, %s6161_s27  ;;  %1125 = vrot.lane.b32.xlu1 %v1117_v62, %s6161_s27  ;;  %v1418_v49 = vmax.f32 %v1414_v46, 0.0  ;;  %v5647_v26 = vpack.c.bf16 %v827_v36, %v827_v36  ;;  %v934_v4 = vadd.f32 %v930_v51, %v6590_v47  ;;  %v1433_v6 = vrot.slane %v1432_v44, 4  ;;  %v707_v62 = vld [vmem:[#allocation2 + $0x30] sm:$0xff] }
 0x21a   :  { %v1478_v11 = vmax.f32 %v1474_v59, 0.0  ;;  %v6881_v19 = vpack.c.bf16 %v720_v60, %v720_v60  ;;  %v826_v53 = vadd.f32 %v822_v61, %v6590_v47  ;;  %v6896_v25 = vrot.slane %v733_v15, 4 }
 0x21b   :  { %v843_v5 = vrot.slane %v5647_v26, 7  ;;  %v938_v10 = vmax.f32 %v934_v4, 0.0  ;;  %v6905_v28 = vsel %vm6656_vm5, %v1331_v12, %v1332_v0  ;;  %v6907_v30 = vrot.slane %v951_v22, 4  ;;  %v816_v0 = vld [vmem:[#allocation2 + $0x68] sm:$0xff] }
 0x21c   :  { %v6898_v57 = vpack.c.bf16 %v1478_v11, %v1478_v11  ;;  %v741_v16 = vrot.slane %v6881_v19, 7  ;;  %v830_v54 = vmax.f32 %v826_v53, 0.0  ;;  %v6918_v8 = vsel %vm6656_vm5, %v1433_v6, %v1434_v1 }
 0x21d   :  { %1127 = vrot.lane.b32.xlu0 %v6766_v14, %s6161_s27  ;;  %1227 = vrot.lane.b32.xlu1 %v1216_v27, %s6161_s27  ;;  %v1419_v27 = vmax.f32 %v1415_v48, 0.0  ;;  %v6892_v14 = vpack.c.bf16 %v1418_v49, %v1418_v49  ;;  %859 = vst.msk [vmem:[#allocation3 + $0x8] sm:$0xe] %vm749_vm7, %v843_v5  ;;  %v6910_v32 = vpack.c.bf16 %v938_v10, %v938_v10  ;;  %v6928_v22 = vrot.slane %v1434_v1, 4 }
 0x21e   :  { %v9066_v15 = vrot.slane %v6898_v57, 7  ;;  %v743_v7 = vrot.slane %v741_v16, 4  ;;  %v6923_v33 = vpack.c.bf16 %v830_v54, %v830_v54  ;;  %v844_v52 = vrot.slane %v843_v5, 4 }
 0x21f   :  { %v6925_v37 = vpack.c.bf16 %v1419_v27, %v1419_v27  ;;  %v710_v40 = vmul.f32 %v706_v24, %v6571_v56  ;;  %v711_v42 = vmul.f32 %v707_v62, %v6571_v56  ;;  %v820_v45 = vmul.f32 %v816_v0, %v6571_v56 }
 0x220   :  { %v1501_v9 = vrot.slane %v9066_v15, 4  ;;  %755 = vst.msk [vmem:[#allocation3 + $0x94] sm:$0x1] %vm754_vm10, %v743_v7  ;;  %v851_v39 = vrot.slane %v6923_v33, 7  ;;  %v821_v46 = vmul.f32 %v817_v63, %v6571_v56  ;;  %v928_v20 = vmul.f32 %v924_v55, %v6571_v56 }
 0x221   :  { %1229 = vrot.lane.b32.xlu0 %v6818_v17, %s6161_s27  ;;  %1231 = vrot.lane.b32.xlu1 %v6833_v18, %s6161_s27  ;;  %v1437_v17 = vrot.slane %v6892_v14, 7  ;;  %v959_v18 = vrot.slane %v6910_v32, 7  ;;  %v714_v2 = vadd.f32 %v710_v40, %v6590_v47  ;;  %v929_v36 = vmul.f32 %v925_v38, %v6571_v56 }
 0x222   :  { %1511 = vst.msk [vmem:[#allocation3 + $0xb0] sm:$0x1] %vm754_vm10, %v1501_v9  ;;  %v853_v12 = vrot.slane %v851_v39, 4  ;;  %v715_v48 = vadd.f32 %v711_v42, %v6590_v47  ;;  %v825_v49 = vadd.f32 %v821_v46, %v6590_v47  ;;  %v932_v59 = vadd.f32 %v928_v20, %v6590_v47 }
 0x223   :  { %v961_v41 = vrot.slane %v959_v18, 4  ;;  %v718_v51 = vmax.f32 %v714_v2, 0.0  ;;  %v933_v60 = vadd.f32 %v929_v36, %v6590_v47  ;;  %v1036_v61 = vmul.f32 %v1032_v35, %v6571_v56  ;;  %v1033_v35 = vld [vmem:[#allocation2 + $0xf0] sm:$0xff]  ;;  %v1034_v2 = vld [vmem:[#allocation2 + $0xf8] sm:$0xff] }
 0x224   :  { %863 = vst.msk [vmem:[#allocation3 + $0x98] sm:$0x1] %vm754_vm10, %v853_v12  ;;  %v719_v1 = vmax.f32 %v715_v48, 0.0  ;;  %v829_v4 = vmax.f32 %v825_v49, 0.0  ;;  %v936_v53 = vmax.f32 %v932_v59, 0.0  ;;  %v1440_v62 = vrot.slane %v6925_v37, 7 }
 0x225   :  { %1233 = vrot.lane.b32.xlu0 %v6829_v3, %s6161_s27  ;;  %1235 = vrot.lane.b32.xlu1 %v6835_v34, %s6161_s27  ;;  %971 = vst.msk [vmem:[#allocation3 + $0x9c] sm:$0x1] %vm754_vm10, %v961_v41  ;;  %v824_v3 = vadd.f32 %v820_v45, %v6590_v47  ;;  %v1035_v34 = vmul.f32 %v1031_v21, %v6571_v56  ;;  %v937_v5 = vmax.f32 %v933_v60, 0.0 }
 0x226   :  { %v5640_v11 = vpack.c.bf16 %v718_v51, %v718_v51  ;;  %v1040_v27 = vadd.f32 %v1036_v61, %v6590_v47  ;;  %v5641_v10 = vpack.c.bf16 %v719_v1, %v719_v1  ;;  %v5649_v24 = vpack.c.bf16 %v829_v4, %v829_v4 }
 0x227   :  { %v828_v26 = vmax.f32 %v824_v3, 0.0  ;;  %v1039_v6 = vadd.f32 %v1035_v34, %v6590_v47  ;;  %v5656_v63 = vpack.c.bf16 %v936_v53, %v936_v53  ;;  %v5657_v55 = vpack.c.bf16 %v937_v5, %v937_v5  ;;  %v1139_v53 = vld [vmem:[#allocation2 + $0x120] sm:$0xff]  ;;  %v1140_v5 = vld [vmem:[#allocation2 + $0x128] sm:$0xff] }
 0x228   :  { %v735_v0 = vrot.slane %v5640_v11, 7  ;;  %v738_v38 = vrot.slane %v5641_v10, 7  ;;  %v1044_v9 = vmax.f32 %v1040_v27, 0.0  ;;  %v1438_v29 = vsel %vm6656_vm5, %v6928_v22, %v1437_v17 }
 0x229   :  { %1335 = vrot.lane.b32.xlu0 %v1324_v23, %s6161_s27  ;;  %1337 = vrot.lane.b32.xlu1 %v6845_v13, %s6161_s27  ;;  %v5648_v54 = vpack.c.bf16 %v828_v26, %v828_v26  ;;  %v1043_v7 = vmax.f32 %v1039_v6, 0.0  ;;  %v848_v23 = vrot.slane %v5649_v24, 7  ;;  %v953_v21 = vrot.slane %v5656_v63, 7 }
 0x22a   :  { %v736_v13 = vsel %vm6656_vm5, %v6896_v25, %v735_v0  ;;  %v737_v40 = vrot.slane %v735_v0, 4  ;;  %v740_v41 = vrot.slane %v738_v38, 4  ;;  %v956_v12 = vrot.slane %v5657_v55, 7 }
 0x22b   :  { %v845_v50 = vrot.slane %v5648_v54, 7  ;;  %v5663_v37 = vpack.c.bf16 %v1043_v7, %v1043_v7  ;;  %751 = vst.msk [vmem:[#allocation3 + $0x28] sm:$0xf] %vm615_vm2, %v736_v13  ;;  %v850_v46 = vrot.slane %v848_v23, 4  ;;  %v954_v25 = vsel %vm6656_vm5, %v6907_v30, %v953_v21  ;;  %v1141_v7 = vld [vmem:[#allocation2 + $0x130] sm:$0xff] }
 0x22c   :  { %968 = vst.msk [vmem:[#allocation3 + $0x30] sm:$0xf] %vm615_vm2, %v954_v25  ;;  %v5664_v30 = vpack.c.bf16 %v1044_v9, %v1044_v9  ;;  %v1038_v48 = vmul.f32 %v1034_v2, %v6571_v56  ;;  %v1143_v27 = vmul.f32 %v1139_v53, %v6571_v56  ;;  %v1144_v10 = vmul.f32 %v1140_v5, %v6571_v56  ;;  %v1249_v2 = vld [vmem:[#allocation2 + $0x170] sm:$0xff] }
 0x22d   :  { %1339 = vrot.lane.b32.xlu0 %v6868_v31, %s6161_s27  ;;  %1341 = vrot.lane.b32.xlu1 %v6905_v28, %s6161_s27  ;;  %v846_v42 = vsel %vm6656_vm5, %v844_v52, %v845_v50  ;;  %v847_v45 = vrot.slane %v845_v50, 4  ;;  %v739_v31 = vsel %vm6656_vm5, %v737_v40, %v738_v38  ;;  %v955_v28 = vrot.slane %v953_v21, 4  ;;  %v1247_v40 = vld [vmem:[#allocation2 + $0x160] sm:$0xff] }
 0x22e   :  { %860 = vst.msk [vmem:[#allocation3 + $0x2c] sm:$0xf] %vm615_vm2, %v846_v42  ;;  %752 = vst.msk [vmem:[#allocation3 + $0x4c] sm:$0xf] %vm615_vm2, %v739_v31  ;;  %v742_v52 = vsel %vm6656_vm5, %v740_v41, %v741_v16  ;;  %v852_v36 = vsel %vm6656_vm5, %v850_v46, %v851_v39  ;;  %v958_v16 = vrot.slane %v956_v12, 4  ;;  %v1059_v33 = vrot.slane %v5663_v37, 7 }
 0x22f   :  { %v849_v20 = vsel %vm6656_vm5, %v847_v45, %v848_v23  ;;  %753 = vst.msk [vmem:[#allocation3 + $0x70] sm:$0xf] %vm615_vm2, %v742_v52  ;;  %862 = vst.msk [vmem:[#allocation3 + $0x74] sm:$0xf] %vm615_vm2, %v852_v36  ;;  %v957_v19 = vsel %vm6656_vm5, %v955_v28, %v956_v12  ;;  %v1037_v39 = vmul.f32 %v1033_v35, %v6571_v56  ;;  %v1248_v12 = vld [vmem:[#allocation2 + $0x168] sm:$0xff] }
 0x230   :  { %861 = vst.msk [vmem:[#allocation3 + $0x50] sm:$0xf] %vm615_vm2, %v849_v20  ;;  %969 = vst.msk [vmem:[#allocation3 + $0x54] sm:$0xf] %vm615_vm2, %v957_v19  ;;  %v960_v3 = vsel %vm6656_vm5, %v958_v16, %v959_v18  ;;  %v1060_v49 = vrot.slane %v1059_v33, 4  ;;  %v1042_v14 = vadd.f32 %v1038_v48, %v6590_v47  ;;  %v1147_v54 = vadd.f32 %v1143_v27, %v6590_v47 }
 0x231   :  { %1343 = vrot.lane.b32.xlu0 %v6854_v43, %s6161_s27  ;;  %1443 = vrot.lane.b32.xlu1 %v1432_v44, %s6161_s27  ;;  %v1439_v43 = vrot.slane %v1437_v17, 4  ;;  %v1061_v44 = vrot.slane %v5664_v30, 7  ;;  %1075 = vst.msk [vmem:[#allocation3 + $0x10] sm:$0xe] %vm749_vm7, %v1059_v33  ;;  %v1041_v34 = vadd.f32 %v1037_v39, %v6590_v47  ;;  %v1442_v17 = vrot.slane %v1440_v62, 4 }
 0x232   :  { %970 = vst.msk [vmem:[#allocation3 + $0x78] sm:$0xf] %vm615_vm2, %v960_v3  ;;  %v1046_v51 = vmax.f32 %v1042_v14, 0.0  ;;  %v1148_v24 = vadd.f32 %v1144_v10, %v6590_v47  ;;  %v1151_v0 = vmax.f32 %v1147_v54, 0.0  ;;  %v1145_v55 = vmul.f32 %v1141_v7, %v6571_v56 }
 0x233   :  { %v1062_v32 = vsel %vm6656_vm5, %v1060_v49, %v1061_v44  ;;  %v1045_v22 = vmax.f32 %v1041_v34, 0.0  ;;  %v1441_v18 = vsel %vm6656_vm5, %v1439_v43, %v1440_v62  ;;  %v1063_v60 = vrot.slane %v1061_v44, 4  ;;  %v1142_v62 = vld [vmem:[#allocation2 + $0x138] sm:$0xff] }
 0x234   :  { %1076 = vst.msk [vmem:[#allocation3 + $0x34] sm:$0xf] %vm615_vm2, %v1062_v32  ;;  %v5666_v61 = vpack.c.bf16 %v1046_v51, %v1046_v51  ;;  %v1152_v63 = vmax.f32 %v1148_v24, 0.0  ;;  %v1146_v38 = vmul.f32 %v1142_v62, %v6571_v56  ;;  %v5671_v50 = vpack.c.bf16 %v1151_v0, %v1151_v0 }
 0x235   :  { %1445 = vrot.lane.b32.xlu0 %v6918_v8, %s6161_s27  ;;  %1447 = vrot.lane.b32.xlu1 %v1438_v29, %s6161_s27  ;;  %v5665_v59 = vpack.c.bf16 %v1045_v22, %v1045_v22  ;;  %v1149_v9 = vadd.f32 %v1145_v55, %v6590_v47  ;;  %v1251_v45 = vmul.f32 %v1247_v40, %v6571_v56 }
 0x236   :  { %v1067_v1 = vrot.slane %v5666_v61, 7  ;;  %v5672_v23 = vpack.c.bf16 %v1152_v63, %v1152_v63  ;;  %v1150_v13 = vadd.f32 %v1146_v38, %v6590_v47  ;;  %v1167_v21 = vrot.slane %v5671_v50, 7 }
 0x237   :  { %v1064_v8 = vrot.slane %v5665_v59, 7  ;;  %v1153_v41 = vmax.f32 %v1149_v9, 0.0  ;;  %v1255_v28 = vadd.f32 %v1251_v45, %v6590_v47  ;;  %v1252_v30 = vmul.f32 %v1248_v12, %v6571_v56 }
 0x238   :  { %v1069_v6 = vrot.slane %v1067_v1, 4  ;;  %v1169_v37 = vrot.slane %v5672_v23, 7  ;;  %v1154_v42 = vmax.f32 %v1150_v13, 0.0  ;;  %v1168_v46 = vrot.slane %v1167_v21, 4  ;;  %1183 = vst.msk [vmem:[#allocation3 + $0x14] sm:$0xe] %vm749_vm7, %v1167_v21 }
 0x239   :  { %1449 = vrot.lane.b32.xlu0 %v1441_v18, %s6161_s27  ;;  %1451 = vrot.lane.b32.xlu1 %v1442_v17, %s6161_s27  ;;  %v1065_v26 = vsel %vm6656_vm5, %v1063_v60, %v1064_v8  ;;  %v1066_v4 = vrot.slane %v1064_v8, 4  ;;  %v5673_v35 = vpack.c.bf16 %v1153_v41, %v1153_v41  ;;  %v1259_v19 = vmax.f32 %v1255_v28, 0.0 }
 0x23a   :  { %1077 = vst.msk [vmem:[#allocation3 + $0x58] sm:$0xf] %vm615_vm2, %v1065_v26  ;;  %v5674_v31 = vpack.c.bf16 %v1154_v42, %v1154_v42  ;;  %v1171_v25 = vrot.slane %v1169_v37, 4  ;;  %v1170_v52 = vsel %vm6656_vm5, %v1168_v46, %v1169_v37  ;;  %v1253_v16 = vmul.f32 %v1249_v2, %v6571_v56 }
 0x23b   :  { %v1068_v11 = vsel %vm6656_vm5, %v1066_v4, %v1067_v1  ;;  %1079 = vst.msk [vmem:[#allocation3 + $0xa0] sm:$0x1] %vm754_vm10, %v1069_v6  ;;  %v1172_v20 = vrot.slane %v5673_v35, 7  ;;  %v1256_v48 = vadd.f32 %v1252_v30, %v6590_v47  ;;  %v5679_v3 = vpack.c.bf16 %v1259_v19, %v1259_v19 }
 0x23c   :  { %1078 = vst.msk [vmem:[#allocation3 + $0x7c] sm:$0xf] %vm615_vm2, %v1068_v11  ;;  %v1175_v36 = vrot.slane %v5674_v31, 7  ;;  %1184 = vst.msk [vmem:[#allocation3 + $0x38] sm:$0xf] %vm615_vm2, %v1170_v52  ;;  %v1257_v34 = vadd.f32 %v1253_v16, %v6590_v47 }
 0x23d   :  { %v1174_v43 = vrot.slane %v1172_v20, 4  ;;  %v1173_v29 = vsel %vm6656_vm5, %v1171_v25, %v1172_v20  ;;  %v1260_v14 = vmax.f32 %v1256_v48, 0.0  ;;  %v1275_v17 = vrot.slane %v5679_v3, 7 }
 0x23e   :  { %v1177_v44 = vrot.slane %v1175_v36, 4  ;;  %1185 = vst.msk [vmem:[#allocation3 + $0x5c] sm:$0xf] %vm615_vm2, %v1173_v29  ;;  %v1261_v59 = vmax.f32 %v1257_v34, 0.0 }
 0x23f   :  { %v1176_v49 = vsel %vm6656_vm5, %v1174_v43, %v1175_v36  ;;  %v7068_v18 = vpack.c.bf16 %v1260_v14, %v1260_v14  ;;  %v1276_v51 = vrot.slane %v1275_v17, 4  ;;  %1291 = vst.msk [vmem:[#allocation3 + $0x18] sm:$0xe] %vm749_vm7, %v1275_v17 }
 0x240   :  { %1187 = vst.msk [vmem:[#allocation3 + $0xa4] sm:$0x1] %vm754_vm10, %v1177_v44  ;;  %v7084_v53 = vpack.c.bf16 %v1261_v59, %v1261_v59 }
 0x241   :  { %1186 = vst.msk [vmem:[#allocation3 + $0x80] sm:$0xf] %vm615_vm2, %v1176_v49  ;;  %v1277_v60 = vrot.slane %v7068_v18, 7 }
 0x242   :  { %v9067_v50 = vrot.slane %v7084_v53, 7 }
 0x243   :  { %v1278_v1 = vsel %vm6656_vm5, %v1276_v51, %v1277_v60 }
 0x244   :  { %1292 = vst.msk [vmem:[#allocation3 + $0x3c] sm:$0xf] %vm615_vm2, %v1278_v1 }
 0x25f   :  { %v796_v33 = vpop.permute.xlu1 %795  ;;  %v684_v39 = vpop.permute.xlu0 %683 }
 0x260   :  { %810 = vst.msk [vmem:[#allocation3 + $0x4] sm:$0xe] %vm698_vm11, %v796_v33  ;;  %699 = vst.msk [vmem:[#allocation3] sm:$0xe] %vm698_vm11, %v684_v39 }
 0x263   :  { %v1012_v32 = vpop.permute.xlu1 %1011  ;;  %v904_v22 = vpop.permute.xlu0 %903 }
 0x264   :  { %1026 = vst.msk [vmem:[#allocation3 + $0xc] sm:$0xe] %vm698_vm11, %v1012_v32  ;;  %918 = vst.msk [vmem:[#allocation3 + $0x8] sm:$0xe] %vm698_vm11, %v904_v22 }
 0x267   :  { %v804_v61 = vpop.permute.xlu1 %803  ;;  %v692_v8 = vpop.permute.xlu0 %691  ;;  %v1887_v26 = vld [vmem:[#allocation3 + $0x4] sm:$0xf]  ;;  %v1512_v11 = vld [vmem:[#allocation3] sm:$0xf] }
 0x268   :  { %814 = vst.msk [vmem:[#allocation3 + $0x94] sm:$0x1] %vm703_vm12, %v804_v61  ;;  %704 = vst.msk [vmem:[#allocation3 + $0x90] sm:$0x1] %vm703_vm12, %v692_v8  ;;  %v1666_v4 = vld [vmem:[#allocation3] sm:$0xff] }
 0x269   :  { %v7081_v6 = vld [vmem:[#allocation3 + $0x4] sm:$0xc]  ;;  %1891 = vst [vmem:[#allocation4 + $0xa0] sm:$0xf] %v1887_v26  ;;  %1674 = vrot.lane.b32.xlu0 %v1666_v4, %s6161_s27  ;;  %1516 = vst [vmem:[#allocation4] sm:$0xf] %v1512_v11 }
 0x26a   :  { %v7086_v5 = vld [vmem:[#allocation3 + $0x4] sm:$0xe]  ;;  %v7090_v54 = vld [vmem:[#allocation3] sm:$0xe]  ;;  %v5488_v63 = vrot.slane %v7081_v6, 10 }
 0x26b   :  { %v7088_v27 = vld [vmem:[#allocation3 + $0x4] sm:$0xc]  ;;  %v7092_v24 = vld [vmem:[#allocation3] sm:$0xc]  ;;  %v2623_v7 = vld [vmem:[#allocation3 + $0xc] sm:$0xf]  ;;  %v1020_v62 = vpop.permute.xlu1 %1019  ;;  %v912_v0 = vpop.permute.xlu0 %911 }
 0x26c   :  { %v1699_v10 = vld [vmem:[#allocation3 + $0x4] sm:$0xf]  ;;  %2627 = vst [vmem:[#allocation4 + $0x1e0] sm:$0xf] %v2623_v7  ;;  %1030 = vst.msk [vmem:[#allocation3 + $0x9c] sm:$0x1] %vm703_vm12, %v1020_v62 }
 0x26d   :  { %922 = vst.msk [vmem:[#allocation3 + $0x98] sm:$0x1] %vm703_vm12, %v912_v0  ;;  %v7097_v55 = vld [vmem:[#allocation3 + $0xc] sm:$0xc]  ;;  %v2255_v38 = vld [vmem:[#allocation3 + $0x8] sm:$0xf]  ;;  %1707 = vrot.lane.b32.xlu0 %v1699_v10, %s6161_s27 }
 0x26e   :  { %v5493_v23 = vrot.slane %v7086_v5, 9  ;;  %v5495_v9 = vrot.slane %v7088_v27, 10  ;;  %v5485_v13 = vrot.slane %v7090_v54, 9  ;;  %v5487_v40 = vrot.slane %v7092_v24, 10  ;;  %2259 = vst [vmem:[#allocation4 + $0x140] sm:$0xf] %v2255_v38 }
 0x26f   :  { %v7105_v21 = vld [vmem:[#allocation3 + $0xc] sm:$0xe]  ;;  %v7109_v41 = vld [vmem:[#allocation3 + $0x8] sm:$0xc]  ;;  %v688_v42 = vpop.permute.xlu1 %687  ;;  %v686_v45 = vpop.permute.xlu0 %685  ;;  %v5504_v46 = vrot.slane %v7097_v55, 10 }
 0x270   :  { %v7107_v37 = vld [vmem:[#allocation3 + $0xc] sm:$0xc]  ;;  %v7112_v35 = vld [vmem:[#allocation3 + $0x8] sm:$0xe]  ;;  %701 = vst.msk [vmem:[#allocation3 + $0x48] sm:$0xf] %vm622_vm9, %v688_v42 }
 0x271   :  { %v7114_v31 = vld [vmem:[#allocation3 + $0x8] sm:$0xc]  ;;  %700 = vst.msk [vmem:[#allocation3 + $0x24] sm:$0xf] %vm622_vm9, %v686_v45  ;;  %v7118_v28 = vld [vmem:[#allocation3 + $0x94] sm:$0x1] }
 0x272   :  { %v2035_v25 = vld [vmem:[#allocation3 + $0x4] sm:$0xff]  ;;  %v7120_v12 = vld [vmem:[#allocation3 + $0x94] sm:$0x3]  ;;  %v7127_v36 = vld [vmem:[#allocation3 + $0x90] sm:$0x1]  ;;  %v5496_v19 = vrot.slane %v7109_v41, 10 }
 0x273   :  { %v7122_v2 = vld [vmem:[#allocation3 + $0x94] sm:$0x3]  ;;  %2043 = vrot.lane.b32.xlu0 %v2035_v25, %s6161_s27  ;;  %v7129_v30 = vld [vmem:[#allocation3 + $0x90] sm:$0x3]  ;;  %v5501_v16 = vrot.slane %v7112_v35, 9  ;;  %v690_v43 = vpop.permute.xlu1 %689  ;;  %v798_v29 = vpop.permute.xlu0 %797  ;;  %v5503_v44 = vrot.slane %v7114_v31, 10 }
 0x274   :  { %v7133_v33 = vld [vmem:[#allocation3 + $0x9c] sm:$0x3]  ;;  %v1924_v48 = vrot.slane %v7118_v28, 5  ;;  %v1656_v3 = vrot.slane %v7120_v12, 6  ;;  %v1994_v49 = vrot.slane %v7122_v2, 6  ;;  %v1552_v14 = vrot.slane %v7127_v36, 5 }
 0x275   :  { %v7135_v39 = vld [vmem:[#allocation3 + $0x9c] sm:$0x1]  ;;  %702 = vst.msk [vmem:[#allocation3 + $0x6c] sm:$0xf] %vm622_vm9, %v690_v43  ;;  %811 = vst.msk [vmem:[#allocation3 + $0x28] sm:$0xf] %vm622_vm9, %v798_v29 }
 0x276   :  { %v2067_v34 = vld [vmem:[#allocation3 + $0x8] sm:$0xf]  ;;  %v1625_v17 = vrot.slane %v7129_v30, 6  ;;  %v7148_v51 = vld [vmem:[#allocation3 + $0x98] sm:$0x3]  ;;  %v9079_v55 = vrot.slane %v7107_v37, 10 }
 0x277   :  { %2075 = vrot.lane.b32.xlu0 %v2067_v34, %s6161_s27  ;;  %v7150_v59 = vld [vmem:[#allocation3 + $0x98] sm:$0x1]  ;;  %v1514_v8 = vld [vmem:[#allocation3 + $0x48] sm:$0xf]  ;;  %v800_v4 = vpop.permute.xlu1 %799  ;;  %v802_v11 = vpop.permute.xlu0 %801  ;;  %v2025_v42 = vrot.slane %v7148_v51, 6  ;;  %v1279_v34 = vrot.slane %v1277_v60, 4 }
 0x278   :  { %v7152_v61 = vld [vmem:[#allocation3 + $0x98] sm:$0x3]  ;;  %v1530_v1 = vld [vmem:[#allocation3 + $0x48] sm:$0xf]  ;;  %1518 = vst [vmem:[#allocation4 + $0x28] sm:$0xf] %v1514_v8 }
 0x279   :  { %v1603_v26 = vld [vmem:[#allocation3 + $0x48] sm:$0xf]  ;;  %v1546_v10 = vrot.slane %v1530_v1, 5  ;;  %v1513_v0 = vld [vmem:[#allocation3 + $0x24] sm:$0xf]  ;;  %v2292_v45 = vrot.slane %v7150_v59, 5  ;;  %v1281_v18 = vsel %vm6656_vm5, %v1279_v34, %v9067_v50 }
 0x27a   :  { %v1619_v7 = vrot.slane %v1603_v26, 6  ;;  %v1529_v38 = vld [vmem:[#allocation3 + $0x24] sm:$0xf]  ;;  %812 = vst.msk [vmem:[#allocation3 + $0x4c] sm:$0xf] %vm622_vm9, %v800_v4  ;;  %v2362_v8 = vrot.slane %v7152_v61, 6 }
 0x27b   :  { %813 = vst.msk [vmem:[#allocation3 + $0x70] sm:$0xf] %vm622_vm9, %v802_v11  ;;  %1517 = vst [vmem:[#allocation4 + $0x14] sm:$0xf] %v1513_v0  ;;  %v1543_v43 = vrot.slane %v1529_v38, 5  ;;  %v1548_v1 = vrot.slane %v1546_v10, 4  ;;  %v906_v0 = vpop.permute.xlu1 %905  ;;  %v908_v38 = vpop.permute.xlu0 %907 }
 0x27c   :  { %v1602_v29 = vld [vmem:[#allocation3 + $0x24] sm:$0xf]  ;;  %v1621_v26 = vrot.slane %v1619_v7, 4  ;;  %v1250_v11 = vld [vmem:[#allocation2 + $0x178] sm:$0xff]  ;;  %v1515_v32 = vld [vmem:[#allocation3 + $0x6c] sm:$0xf] }
 0x27d   :  { %v1616_v4 = vrot.slane %v1602_v29, 6  ;;  %v1544_v15 = vsel %vm7156_vm4, %v5485_v13, %v1543_v43  ;;  %v1545_v22 = vrot.slane %v1543_v43, 4  ;;  %v1531_v20 = vld [vmem:[#allocation3 + $0x6c] sm:$0xf]  ;;  %v7177_v52 = vld [vmem:[#allocation3 + $0x24] sm:$0xff] }
 0x27e   :  { %1558 = vst [vmem:[#allocation4 + $0x4] sm:$0xf] %v1544_v15  ;;  %1519 = vst [vmem:[#allocation4 + $0x3c] sm:$0xf] %v1515_v32  ;;  %v1549_v13 = vrot.slane %v1531_v20, 5  ;;  %1676 = vrot.lane.b32.xlu1 %v7177_v52, %s6161_s27  ;;  %v7195_v20 = vmul.f32 %v1250_v11, %v6571_v56 }
 0x27f   :  { %v1617_v60 = vsel %vm7166_vm6, %v5487_v40, %v1616_v4  ;;  %v1618_v54 = vrot.slane %v1616_v4, 4  ;;  %v1604_v43 = vld [vmem:[#allocation3 + $0x6c] sm:$0xf]  ;;  %v1636_v29 = vld [vmem:[#allocation3 + $0x28] sm:$0xf]  ;;  %v1547_v15 = vsel %vm7156_vm4, %v1545_v22, %v1546_v10 }
 0x280   :  { %919 = vst.msk [vmem:[#allocation3 + $0x2c] sm:$0xf] %vm622_vm9, %v906_v0  ;;  %920 = vst.msk [vmem:[#allocation3 + $0x50] sm:$0xf] %vm622_vm9, %v908_v38  ;;  %v1622_v24 = vrot.slane %v1604_v43, 6  ;;  %v1647_v40 = vrot.slane %v1636_v29, 6  ;;  %v1550_v0 = vsel %vm7156_vm4, %v1548_v1, %v1549_v13  ;;  %v910_v43 = vpop.permute.xlu1 %909  ;;  %v1014_v1 = vpop.permute.xlu0 %1013 }
 0x281   :  { %1293 = vst.msk [vmem:[#allocation3 + $0x60] sm:$0xf] %vm615_vm2, %v1281_v18  ;;  %1631 = vst [vmem:[#allocation4 + $0x8] sm:$0xf] %v1617_v60  ;;  %v1888_v34 = vld [vmem:[#allocation3 + $0x28] sm:$0xf]  ;;  %v1620_v4 = vsel %vm7166_vm6, %v1618_v54, %v1619_v7 }
 0x282   :  { %v1904_v32 = vld [vmem:[#allocation3 + $0x28] sm:$0xf]  ;;  %1559 = vst [vmem:[#allocation4 + $0x18] sm:$0xf] %v1547_v15  ;;  %v1551_v38 = vrot.slane %v1549_v13, 4  ;;  %v1623_v22 = vsel %vm7166_vm6, %v1621_v26, %v1622_v24  ;;  %v1624_v10 = vrot.slane %v1622_v24, 4  ;;  %v1648_v11 = vsel %vm7166_vm6, %v5488_v63, %v1647_v40 }
 0x283   :  { %1892 = vst [vmem:[#allocation4 + $0xb4] sm:$0xf] %v1888_v34  ;;  %v1915_v18 = vrot.slane %v1904_v32, 5  ;;  %v1974_v50 = vld [vmem:[#allocation3 + $0x28] sm:$0xf]  ;;  %v1649_v60 = vrot.slane %v1647_v40, 4 }
 0x284   :  { %1632 = vst [vmem:[#allocation4 + $0x1c] sm:$0xf] %v1620_v4  ;;  %1560 = vst [vmem:[#allocation4 + $0x2c] sm:$0xf] %v1550_v0  ;;  %v1637_v7 = vld [vmem:[#allocation3 + $0x4c] sm:$0xf]  ;;  %v1553_v13 = vsel %vm7156_vm4, %v1551_v38, %v1552_v14  ;;  %v1626_v36 = vsel %vm7166_vm6, %v1624_v10, %v1625_v17  ;;  %v1018_v10 = vpop.permute.xlu0 %1017 }
 0x285   :  { %v1889_v54 = vld [vmem:[#allocation3 + $0x4c] sm:$0xf]  ;;  %1633 = vst [vmem:[#allocation4 + $0x30] sm:$0xf] %v1623_v22  ;;  %1662 = vst.msk [vmem:[#allocation4 + $0x10] sm:$0xf] %vm615_vm2, %v1648_v11  ;;  %v1916_v6 = vsel %vm7156_vm4, %v5493_v23, %v1915_v18 }
 0x286   :  { %v1917_v26 = vrot.slane %v1915_v18, 4  ;;  %v1985_v63 = vrot.slane %v1974_v50, 6  ;;  %1893 = vst [vmem:[#allocation4 + $0xc8] sm:$0xf] %v1889_v54  ;;  %v1905_v29 = vld [vmem:[#allocation3 + $0x4c] sm:$0xf] }
 0x287   :  { %v1975_v15 = vld [vmem:[#allocation3 + $0x4c] sm:$0xf]  ;;  %921 = vst.msk [vmem:[#allocation3 + $0x74] sm:$0xf] %vm622_vm9, %v910_v43  ;;  %1027 = vst.msk [vmem:[#allocation3 + $0x30] sm:$0xf] %vm622_vm9, %v1014_v1 }
 0x288   :  { %1561 = vst [vmem:[#allocation4 + $0x40] sm:$0xf] %v1553_v13  ;;  %1930 = vst [vmem:[#allocation4 + $0xa4] sm:$0xf] %v1916_v6  ;;  %v1650_v5 = vrot.slane %v1637_v7, 6  ;;  %v1918_v14 = vrot.slane %v1905_v29, 5  ;;  %v1986_v50 = vsel %vm7166_vm6, %v5495_v9, %v1985_v63  ;;  %v1016_v9 = vpop.permute.xlu1 %1015 }
 0x289   :  { %v1988_v24 = vrot.slane %v1975_v15, 6  ;;  %v1638_v23 = vld [vmem:[#allocation3 + $0x70] sm:$0xf]  ;;  %v7222_v40 = vld [vmem:[#allocation3 + $0x48] sm:$0xff]  ;;  %1634 = vst [vmem:[#allocation4 + $0x44] sm:$0xf] %v1626_v36  ;;  %v7247_v15 = vadd.f32 %v7195_v20, %v6590_v47 }
 0x28a   :  { %v1987_v34 = vrot.slane %v1985_v63, 4  ;;  %v1653_v32 = vrot.slane %v1638_v23, 6  ;;  %v1890_v4 = vld [vmem:[#allocation3 + $0x70] sm:$0xf]  ;;  %1678 = vrot.lane.b32.xlu0 %v7222_v40, %s6161_s27  ;;  %2000 = vst [vmem:[#allocation4 + $0xa8] sm:$0xf] %v1986_v50  ;;  %v1651_v17 = vsel %vm7166_vm6, %v1649_v60, %v1650_v5  ;;  %v1919_v38 = vsel %vm7156_vm4, %v1917_v26, %v1918_v14 }
 0x28b   :  { %v1906_v30 = vld [vmem:[#allocation3 + $0x70] sm:$0xf]  ;;  %v1652_v0 = vrot.slane %v1650_v5, 4  ;;  %v1920_v18 = vrot.slane %v1918_v14, 4  ;;  %1894 = vst [vmem:[#allocation4 + $0xdc] sm:$0xf] %v1890_v4 }
 0x28c   :  { %v1976_v27 = vld [vmem:[#allocation3 + $0x70] sm:$0xf]  ;;  %v2005_v22 = vld [vmem:[#allocation3 + $0x2c] sm:$0xf]  ;;  %1663 = vst.msk [vmem:[#allocation4 + $0x24] sm:$0xf] %vm615_vm2, %v1651_v17  ;;  %v1989_v11 = vsel %vm7166_vm6, %v1987_v34, %v1988_v24  ;;  %v1122_v17 = vpop.permute.xlu1 %1121 }
 0x28d   :  { %1931 = vst [vmem:[#allocation4 + $0xb8] sm:$0xf] %v1919_v38  ;;  %v1990_v7 = vrot.slane %v1988_v24, 4  ;;  %v1655_v54 = vrot.slane %v1653_v32, 4  ;;  %v1921_v43 = vrot.slane %v1906_v30, 5  ;;  %v7237_v1 = vld [vmem:[#allocation3 + $0x6c] sm:$0xff]  ;;  %v1654_v13 = vsel %vm7166_vm6, %v1652_v0, %v1653_v32  ;;  %v1120_v0 = vpop.permute.xlu0 %1119 }
 0x28e   :  { %v2256_v60 = vld [vmem:[#allocation3 + $0x2c] sm:$0xf]  ;;  %1028 = vst.msk [vmem:[#allocation3 + $0x54] sm:$0xf] %vm622_vm9, %v1016_v9  ;;  %1029 = vst.msk [vmem:[#allocation3 + $0x78] sm:$0xf] %vm622_vm9, %v1018_v10  ;;  %1680 = vrot.lane.b32.xlu1 %v7237_v1, %s6161_s27 }
 0x28f   :  { %2001 = vst [vmem:[#allocation4 + $0xbc] sm:$0xf] %v1989_v11  ;;  %v1991_v6 = vrot.slane %v1976_v27, 6  ;;  %v2016_v26 = vrot.slane %v2005_v22, 6  ;;  %2260 = vst [vmem:[#allocation4 + $0x154] sm:$0xf] %v2256_v60  ;;  %v1657_v36 = vsel %vm7166_vm6, %v1655_v54, %v1656_v3  ;;  %v1922_v5 = vsel %vm7156_vm4, %v1920_v18, %v1921_v43 }
 0x290   :  { %v2272_v63 = vld [vmem:[#allocation3 + $0x2c] sm:$0xf]  ;;  %1664 = vst.msk [vmem:[#allocation4 + $0x38] sm:$0xf] %vm615_vm2, %v1654_v13  ;;  %v1923_v14 = vrot.slane %v1921_v43, 4  ;;  %v1126_v31 = vpop.permute.xlu1 %1125 }
 0x291   :  { %v2342_v29 = vld [vmem:[#allocation3 + $0x2c] sm:$0xf]  ;;  %v2283_v24 = vrot.slane %v2272_v63, 5  ;;  %v2006_v23 = vld [vmem:[#allocation3 + $0x50] sm:$0xf]  ;;  %v1992_v20 = vsel %vm7166_vm6, %v1990_v7, %v1991_v6  ;;  %v1993_v12 = vrot.slane %v1991_v6, 4  ;;  %v2017_v3 = vsel %vm7166_vm6, %v5496_v19, %v2016_v26  ;;  %v1124_v63 = vpop.permute.xlu0 %1123 }
 0x292   :  { %v2257_v50 = vld [vmem:[#allocation3 + $0x50] sm:$0xf]  ;;  %v1700_v34 = vld [vmem:[#allocation3 + $0x28] sm:$0xf]  ;;  %1665 = vst.msk [vmem:[#allocation4 + $0x4c] sm:$0xf] %vm615_vm2, %v1657_v36  ;;  %v1925_v38 = vsel %vm7156_vm4, %v1923_v14, %v1924_v48 }
 0x293   :  { %1932 = vst [vmem:[#allocation4 + $0xcc] sm:$0xf] %v1922_v5  ;;  %v2018_v32 = vrot.slane %v2016_v26, 4  ;;  %2261 = vst [vmem:[#allocation4 + $0x168] sm:$0xf] %v2257_v50  ;;  %v2284_v41 = vsel %vm7156_vm4, %v5501_v16, %v2283_v24  ;;  %v2285_v19 = vrot.slane %v2283_v24, 4  ;;  %v1995_v28 = vsel %vm7166_vm6, %v1993_v12, %v1994_v49  ;;  %1709 = vrot.lane.b32.xlu1 %v1700_v34, %s6161_s27 }
 0x294   :  { %v2273_v4 = vld [vmem:[#allocation3 + $0x50] sm:$0xf]  ;;  %2002 = vst [vmem:[#allocation4 + $0xd0] sm:$0xf] %v1992_v20  ;;  %2031 = vst.msk [vmem:[#allocation4 + $0xb0] sm:$0xf] %vm615_vm2, %v2017_v3 }
 0x295   :  { %v2343_v30 = vld [vmem:[#allocation3 + $0x50] sm:$0xf]  ;;  %v2353_v18 = vrot.slane %v2342_v29, 6  ;;  %v2007_v27 = vld [vmem:[#allocation3 + $0x74] sm:$0xf]  ;;  %v2019_v48 = vrot.slane %v2006_v23, 6 }
 0x296   :  { %v2258_v22 = vld [vmem:[#allocation3 + $0x74] sm:$0xf]  ;;  %1135 = vst.msk [vmem:[#allocation3 + $0x34] sm:$0xf] %vm622_vm9, %v1122_v17  ;;  %1933 = vst [vmem:[#allocation4 + $0xe0] sm:$0xf] %v1925_v38 }
 0x297   :  { %1134 = vst.msk [vmem:[#allocation3 + $0x10] sm:$0xe] %vm698_vm11, %v1120_v0  ;;  %2298 = vst [vmem:[#allocation4 + $0x144] sm:$0xf] %v2284_v41  ;;  %v2286_v35 = vrot.slane %v2273_v4, 5  ;;  %v2356_v9 = vrot.slane %v2343_v30, 6  ;;  %v2354_v10 = vsel %vm7166_vm6, %v5503_v44, %v2353_v18  ;;  %v2020_v49 = vsel %vm7166_vm6, %v2018_v32, %v2019_v48 }
 0x298   :  { %2262 = vst [vmem:[#allocation4 + $0x17c] sm:$0xf] %v2258_v22  ;;  %v2274_v16 = vld [vmem:[#allocation3 + $0x74] sm:$0xf]  ;;  %2003 = vst [vmem:[#allocation4 + $0xe4] sm:$0xf] %v1995_v28 }
 0x299   :  { %v2355_v11 = vrot.slane %v2353_v18, 4  ;;  %v2022_v7 = vrot.slane %v2007_v27, 6  ;;  %v2289_v2 = vrot.slane %v2274_v16, 5  ;;  %v2344_v54 = vld [vmem:[#allocation3 + $0x74] sm:$0xf]  ;;  %v2021_v43 = vrot.slane %v2019_v48, 4  ;;  %v1128_v18 = vpop.permute.xlu0 %1127  ;;  %v1228_v27 = vpop.permute.xlu1 %1227 }
 0x29a   :  { %2368 = vst [vmem:[#allocation4 + $0x148] sm:$0xf] %v2354_v10  ;;  %v2287_v60 = vsel %vm7156_vm4, %v2285_v19, %v2286_v35  ;;  %v2288_v13 = vrot.slane %v2286_v35, 4  ;;  %v2373_v6 = vld [vmem:[#allocation3 + $0x30] sm:$0xf]  ;;  %v2358_v29 = vrot.slane %v2356_v9, 4 }
 0x29b   :  { %v2624_v26 = vld [vmem:[#allocation3 + $0x30] sm:$0xf]  ;;  %2032 = vst.msk [vmem:[#allocation4 + $0xc4] sm:$0xf] %vm615_vm2, %v2020_v49  ;;  %2299 = vst [vmem:[#allocation4 + $0x158] sm:$0xf] %v2287_v60  ;;  %v2357_v44 = vsel %vm7166_vm6, %v2355_v11, %v2356_v9  ;;  %v2023_v23 = vsel %vm7166_vm6, %v2021_v43, %v2022_v7 }
 0x29c   :  { %v2024_v36 = vrot.slane %v2022_v7, 4  ;;  %v2291_v5 = vrot.slane %v2289_v2, 4  ;;  %2628 = vst [vmem:[#allocation4 + $0x1f4] sm:$0xf] %v2624_v26  ;;  %v2640_v14 = vld [vmem:[#allocation3 + $0x30] sm:$0xf]  ;;  %v2290_v50 = vsel %vm7156_vm4, %v2288_v13, %v2289_v2 }
 0x29d   :  { %1136 = vst.msk [vmem:[#allocation3 + $0x58] sm:$0xf] %vm622_vm9, %v1124_v63  ;;  %1137 = vst.msk [vmem:[#allocation3 + $0x7c] sm:$0xf] %vm622_vm9, %v1126_v31  ;;  %v7292_v24 = vld [vmem:[#allocation3 + $0x9c] sm:$0x3]  ;;  %v1230_v31 = vpop.permute.xlu0 %1229 }
 0x29e   :  { %2369 = vst [vmem:[#allocation4 + $0x15c] sm:$0xf] %v2357_v44  ;;  %v2359_v34 = vrot.slane %v2344_v54, 6  ;;  %v2384_v20 = vrot.slane %v2373_v6, 6  ;;  %v2710_v12 = vld [vmem:[#allocation3 + $0x30] sm:$0xf]  ;;  %v2026_v32 = vsel %vm7166_vm6, %v2024_v36, %v2025_v42  ;;  %v2293_v4 = vsel %vm7156_vm4, %v2291_v5, %v2292_v45  ;;  %v1232_v44 = vpop.permute.xlu1 %1231 }
 0x29f   :  { %v2374_v3 = vld [vmem:[#allocation3 + $0x54] sm:$0xf]  ;;  %2033 = vst.msk [vmem:[#allocation4 + $0xd8] sm:$0xf] %vm615_vm2, %v2023_v23  ;;  %2300 = vst [vmem:[#allocation4 + $0x16c] sm:$0xf] %v2290_v50 }
 0x2a0   :  { %v2651_v30 = vrot.slane %v2640_v14, 5  ;;  %v2721_v17 = vrot.slane %v2710_v12, 6  ;;  %v2625_v0 = vld [vmem:[#allocation3 + $0x54] sm:$0xf]  ;;  %2034 = vst.msk [vmem:[#allocation4 + $0xec] sm:$0xf] %vm615_vm2, %v2026_v32  ;;  %v2360_v51 = vsel %vm7166_vm6, %v2358_v29, %v2359_v34  ;;  %v2385_v59 = vsel %vm7166_vm6, %v5504_v46, %v2384_v20 }
 0x2a1   :  { %v2641_v38 = vld [vmem:[#allocation3 + $0x54] sm:$0xf]  ;;  %2301 = vst [vmem:[#allocation4 + $0x180] sm:$0xf] %v2293_v4  ;;  %v2361_v41 = vrot.slane %v2359_v34, 4  ;;  %v2386_v42 = vrot.slane %v2384_v20, 4 }
 0x2a2   :  { %2629 = vst [vmem:[#allocation4 + $0x208] sm:$0xf] %v2625_v0  ;;  %v2711_v45 = vld [vmem:[#allocation3 + $0x54] sm:$0xf]  ;;  %v2375_v19 = vld [vmem:[#allocation3 + $0x78] sm:$0xf]  ;;  %v2722_v46 = vsel %vm7166_vm6, %v9079_v55, %v2721_v17 }
 0x2a3   :  { %2370 = vst [vmem:[#allocation4 + $0x170] sm:$0xf] %v2360_v51  ;;  %2399 = vst.msk [vmem:[#allocation4 + $0x150] sm:$0xf] %vm615_vm2, %v2385_v59  ;;  %v9078_v22 = vrot.slane %v7105_v21, 9  ;;  %v2653_v48 = vrot.slane %v2651_v30, 4  ;;  %v2363_v21 = vsel %vm7166_vm6, %v2361_v41, %v2362_v8 }
 0x2a4   :  { %v2723_v35 = vrot.slane %v2721_v17, 4  ;;  %v2626_v9 = vld [vmem:[#allocation3 + $0x78] sm:$0xf]  ;;  %1138 = vst.msk [vmem:[#allocation3 + $0xa0] sm:$0x1] %vm703_vm12, %v1128_v18  ;;  %v2387_v10 = vrot.slane %v2374_v3, 6  ;;  %v1236_v18 = vpop.permute.xlu1 %1235 }
 0x2a5   :  { %v2652_v28 = vsel %vm7156_vm4, %v9078_v22, %v2651_v30  ;;  %v2642_v16 = vld [vmem:[#allocation3 + $0x78] sm:$0xf]  ;;  %1242 = vst.msk [vmem:[#allocation3 + $0x14] sm:$0xe] %vm698_vm11, %v1228_v27  ;;  %2736 = vst [vmem:[#allocation4 + $0x1e8] sm:$0xf] %v2722_v46 }
 0x2a6   :  { %2666 = vst [vmem:[#allocation4 + $0x1e4] sm:$0xf] %v2652_v28  ;;  %v2654_v11 = vrot.slane %v2641_v38, 5  ;;  %v2724_v37 = vrot.slane %v2711_v45, 6  ;;  %2630 = vst [vmem:[#allocation4 + $0x21c] sm:$0xf] %v2626_v9  ;;  %v2388_v61 = vsel %vm7166_vm6, %v2386_v42, %v2387_v10 }
 0x2a7   :  { %v2712_v7 = vld [vmem:[#allocation3 + $0x78] sm:$0xf]  ;;  %v2730_v2 = vrot.slane %v7292_v24, 6  ;;  %2371 = vst [vmem:[#allocation4 + $0x184] sm:$0xf] %v2363_v21  ;;  %v2390_v54 = vrot.slane %v2375_v19, 6  ;;  %v1234_v19 = vpop.permute.xlu0 %1233 }
 0x2a8   :  { %v2657_v49 = vrot.slane %v2642_v16, 5  ;;  %v2727_v43 = vrot.slane %v2712_v7, 6  ;;  %v1701_v60 = vld [vmem:[#allocation3 + $0x4c] sm:$0xf]  ;;  %v2389_v13 = vrot.slane %v2387_v10, 4  ;;  %v2655_v8 = vsel %vm7156_vm4, %v2653_v48, %v2654_v11 }
 0x2a9   :  { %v2656_v6 = vrot.slane %v2654_v11, 4  ;;  %1711 = vrot.lane.b32.xlu0 %v1701_v60, %s6161_s27  ;;  %v2741_v26 = vld [vmem:[#allocation3 + $0x34] sm:$0xf]  ;;  %2400 = vst.msk [vmem:[#allocation4 + $0x164] sm:$0xf] %vm615_vm2, %v2388_v61  ;;  %v2725_v29 = vsel %vm7166_vm6, %v2723_v35, %v2724_v37  ;;  %v2726_v36 = vrot.slane %v2724_v37, 4 }
 0x2aa   :  { %v2992_v63 = vld [vmem:[#allocation3 + $0x34] sm:$0xf]  ;;  %2667 = vst [vmem:[#allocation4 + $0x1f8] sm:$0xf] %v2655_v8  ;;  %v2392_v5 = vrot.slane %v2390_v54, 4  ;;  %v2659_v14 = vrot.slane %v2657_v49, 4  ;;  %v2391_v23 = vsel %vm7166_vm6, %v2389_v13, %v2390_v54  ;;  %v1338_v8 = vpop.permute.xlu1 %1337 }
 0x2ab   :  { %2996 = vst [vmem:[#allocation4 + $0x294] sm:$0xf] %v2992_v63  ;;  %v3008_v24 = vld [vmem:[#allocation3 + $0x34] sm:$0xf]  ;;  %1243 = vst.msk [vmem:[#allocation3 + $0x38] sm:$0xf] %vm622_vm9, %v1230_v31  ;;  %v2658_v50 = vsel %vm7156_vm4, %v2656_v6, %v2657_v49  ;;  %v2728_v0 = vsel %vm7166_vm6, %v2726_v36, %v2727_v43  ;;  %v1336_v13 = vpop.permute.xlu0 %1335 }
 0x2ac   :  { %1244 = vst.msk [vmem:[#allocation3 + $0x5c] sm:$0xf] %vm622_vm9, %v1232_v44  ;;  %2737 = vst [vmem:[#allocation4 + $0x1fc] sm:$0xf] %v2725_v29  ;;  %v2729_v34 = vrot.slane %v2727_v43, 4  ;;  %v2752_v20 = vrot.slane %v2741_v26, 6 }
 0x2ad   :  { %v3078_v12 = vld [vmem:[#allocation3 + $0x34] sm:$0xf]  ;;  %v2740_v3 = vld [vmem:[#allocation3 + $0x10] sm:$0xc]  ;;  %v9080_v32 = vrot.slane %v7133_v33, 6  ;;  %v9081_v30 = vrot.slane %v7135_v39, 5 }
 0x2ae   :  { %2401 = vst.msk [vmem:[#allocation4 + $0x178] sm:$0xf] %vm615_vm2, %v2391_v23  ;;  %2668 = vst [vmem:[#allocation4 + $0x20c] sm:$0xf] %v2658_v50  ;;  %v3019_v38 = vrot.slane %v3008_v24, 5  ;;  %v7355_v59 = vld [vmem:[#allocation3 + $0x4c] sm:$0xff]  ;;  %v2731_v33 = vsel %vm7166_vm6, %v2729_v34, %v2730_v2 }
 0x2af   :  { %v2394_v4 = vsel %vm7166_vm6, %v2392_v5, %v9080_v32  ;;  %v2661_v17 = vsel %vm7156_vm4, %v2659_v14, %v9081_v30  ;;  %v2991_v51 = vld [vmem:[#allocation3 + $0x10] sm:$0xf]  ;;  %2738 = vst [vmem:[#allocation4 + $0x210] sm:$0xf] %v2728_v0  ;;  %v3089_v39 = vrot.slane %v3078_v12, 6  ;;  %v5512_v42 = vrot.slane %v2740_v3, 10  ;;  %2047 = vrot.lane.b32.xlu0 %v7355_v59, %s6161_s27 }
 0x2b0   :  { %v3007_v41 = vld [vmem:[#allocation3 + $0x10] sm:$0xe]  ;;  %2402 = vst.msk [vmem:[#allocation4 + $0x18c] sm:$0xf] %vm615_vm2, %v2394_v4  ;;  %2669 = vst [vmem:[#allocation4 + $0x220] sm:$0xf] %v2661_v17 }
 0x2b1   :  { %2995 = vst [vmem:[#allocation4 + $0x280] sm:$0xf] %v2991_v51  ;;  %v3077_v45 = vld [vmem:[#allocation3 + $0x10] sm:$0xc]  ;;  %2739 = vst [vmem:[#allocation4 + $0x224] sm:$0xf] %v2731_v33  ;;  %v2753_v9 = vsel %vm7166_vm6, %v5512_v42, %v2752_v20 }
 0x2b2   :  { %v2754_v27 = vrot.slane %v2752_v20, 4  ;;  %v5517_v22 = vrot.slane %v3007_v41, 9  ;;  %v5519_v28 = vrot.slane %v3077_v45, 10  ;;  %v1702_v48 = vld [vmem:[#allocation3 + $0x70] sm:$0xf]  ;;  %v1262_v55 = vmax.f32 %v7247_v15, 0.0 }
 0x2b3   :  { %1245 = vst.msk [vmem:[#allocation3 + $0x80] sm:$0xf] %vm622_vm9, %v1234_v19  ;;  %v3021_v46 = vrot.slane %v3019_v38, 4  ;;  %v3091_v35 = vrot.slane %v3089_v39, 4  ;;  %1713 = vrot.lane.b32.xlu1 %v1702_v48, %s6161_s27  ;;  %v2742_v16 = vld [vmem:[#allocation3 + $0x58] sm:$0xf] }
 0x2b4   :  { %1246 = vst.msk [vmem:[#allocation3 + $0xa4] sm:$0x1] %vm703_vm12, %v1236_v18  ;;  %v2993_v21 = vld [vmem:[#allocation3 + $0x58] sm:$0xf]  ;;  %v3020_v10 = vsel %vm7156_vm4, %v5517_v22, %v3019_v38  ;;  %v3090_v11 = vsel %vm7166_vm6, %v5519_v28, %v3089_v39  ;;  %v2755_v37 = vrot.slane %v2742_v16, 6  ;;  %v7373_v54 = vld [vmem:[#allocation3 + $0x28] sm:$0xff]  ;;  %v1340_v38 = vpop.permute.xlu0 %1339 }
 0x2b5   :  { %2767 = vst.msk [vmem:[#allocation4 + $0x1f0] sm:$0xf] %vm615_vm2, %v2753_v9  ;;  %2997 = vst [vmem:[#allocation4 + $0x2a8] sm:$0xf] %v2993_v21  ;;  %v3009_v7 = vld [vmem:[#allocation3 + $0x58] sm:$0xf] }
 0x2b6   :  { %v3079_v2 = vld [vmem:[#allocation3 + $0x58] sm:$0xf]  ;;  %3034 = vst [vmem:[#allocation4 + $0x284] sm:$0xf] %v3020_v10  ;;  %3104 = vst [vmem:[#allocation4 + $0x288] sm:$0xf] %v3090_v11  ;;  %v2756_v6 = vsel %vm7166_vm6, %v2754_v27, %v2755_v37 }
 0x2b7   :  { %v3022_v49 = vrot.slane %v3009_v7, 5  ;;  %v3092_v43 = vrot.slane %v3079_v2, 6  ;;  %v2069_v60 = vld [vmem:[#allocation3 + $0x50] sm:$0xf]  ;;  %v2743_v61 = vld [vmem:[#allocation3 + $0x7c] sm:$0xf]  ;;  %2045 = vrot.lane.b32.xlu1 %v7373_v54, %s6161_s27  ;;  %v7419_v7 = vpack.c.bf16 %v1262_v55, %v1262_v55 }
 0x2b8   :  { %v2757_v26 = vrot.slane %v2755_v37, 4  ;;  %2079 = vrot.lane.b32.xlu0 %v2069_v60, %s6161_s27  ;;  %v2758_v63 = vrot.slane %v2743_v61, 6  ;;  %v2994_v31 = vld [vmem:[#allocation3 + $0x7c] sm:$0xf]  ;;  %v1562_v29 = vld [vmem:[#allocation3 + $0x4] sm:$0xe] }
 0x2b9   :  { %v3010_v44 = vld [vmem:[#allocation3 + $0x7c] sm:$0xf]  ;;  %1350 = vst.msk [vmem:[#allocation3 + $0x18] sm:$0xe] %vm698_vm11, %v1336_v13  ;;  %v3023_v36 = vsel %vm7156_vm4, %v3021_v46, %v3022_v49  ;;  %v3024_v5 = vrot.slane %v3022_v49, 4  ;;  %v3093_v14 = vsel %vm7166_vm6, %v3091_v35, %v3092_v43  ;;  %v3094_v24 = vrot.slane %v3092_v43, 4 }
 0x2ba   :  { %1351 = vst.msk [vmem:[#allocation3 + $0x3c] sm:$0xf] %vm622_vm9, %v1338_v8  ;;  %2998 = vst [vmem:[#allocation4 + $0x2bc] sm:$0xf] %v2994_v31  ;;  %v3080_v23 = vld [vmem:[#allocation3 + $0x7c] sm:$0xf]  ;;  %v2759_v34 = vsel %vm7166_vm6, %v2757_v26, %v2758_v63 }
 0x2bb   :  { %2768 = vst.msk [vmem:[#allocation4 + $0x204] sm:$0xf] %vm615_vm2, %v2756_v6  ;;  %v2744_v50 = vld [vmem:[#allocation3 + $0xa0] sm:$0x3]  ;;  %3035 = vst [vmem:[#allocation4 + $0x298] sm:$0xf] %v3023_v36 }
 0x2bc   :  { %3105 = vst [vmem:[#allocation4 + $0x29c] sm:$0xf] %v3093_v14  ;;  %v2760_v20 = vrot.slane %v2758_v63, 4  ;;  %v3025_v12 = vrot.slane %v3010_v44, 5  ;;  %v3095_v3 = vrot.slane %v3080_v23, 6  ;;  %v2761_v4 = vrot.slane %v2744_v50, 6 }
 0x2bd   :  { %v3011_v32 = vld [vmem:[#allocation3 + $0xa0] sm:$0x1]  ;;  %2769 = vst.msk [vmem:[#allocation4 + $0x218] sm:$0xf] %vm615_vm2, %v2759_v34  ;;  %v1563_v0 = vld [vmem:[#allocation3 + $0x28] sm:$0xf] }
 0x2be   :  { %v3028_v30 = vrot.slane %v3011_v32, 5  ;;  %v3081_v17 = vld [vmem:[#allocation3 + $0xa0] sm:$0x3]  ;;  %v3026_v51 = vsel %vm7156_vm4, %v3024_v5, %v3025_v12  ;;  %v3027_v41 = vrot.slane %v3025_v12, 4  ;;  %v3096_v33 = vsel %vm7166_vm6, %v3094_v24, %v3095_v3  ;;  %v7394_v42 = vld [vmem:[#allocation3 + $0x70] sm:$0xff]  ;;  %v1356_v61 = vld [vmem:[#allocation2 + $0x1a8] sm:$0xff] }
 0x2bf   :  { %v3097_v39 = vrot.slane %v3095_v3, 4  ;;  %1352 = vst.msk [vmem:[#allocation3 + $0x60] sm:$0xf] %vm622_vm9, %v1340_v38  ;;  %3036 = vst [vmem:[#allocation4 + $0x2ac] sm:$0xf] %v3026_v51  ;;  %v2762_v45 = vsel %vm7166_vm6, %v2760_v20, %v2761_v4  ;;  %v3098_v19 = vrot.slane %v3081_v17, 6  ;;  %2049 = vrot.lane.b32.xlu1 %v7394_v42, %s6161_s27  ;;  %v1360_v12 = vmul.f32 %v1356_v61, %v6571_v56 }
 0x2c0   :  { %3106 = vst [vmem:[#allocation4 + $0x2b0] sm:$0xf] %v3096_v33  ;;  %v5486_v18 = vrot.slane %v1562_v29, 9  ;;  %v1574_v27 = vrot.slane %v1563_v0, 5  ;;  %2770 = vst.msk [vmem:[#allocation4 + $0x22c] sm:$0xf] %vm615_vm2, %v2762_v45  ;;  %v3029_v22 = vsel %vm7156_vm4, %v3027_v41, %v3028_v30 }
 0x2c1   :  { %v1723_v28 = vld [vmem:[#allocation3] sm:$0xee]  ;;  %3037 = vst [vmem:[#allocation4 + $0x2c0] sm:$0xf] %v3029_v22  ;;  %v3099_v46 = vsel %vm7166_vm6, %v3097_v39, %v3098_v19  ;;  %v1735_v9 = vrot.slane %v7177_v52, 5  ;;  %v1813_v13 = vrot.slane %v7177_v52, 6 }
 0x2c2   :  { %v1801_v48 = vld [vmem:[#allocation3] sm:$0xcc]  ;;  %v1575_v35 = vsel %vm7156_vm4, %v5486_v18, %v1574_v27  ;;  %v7411_v21 = vld [vmem:[#allocation3 + $0x94] sm:$0x1]  ;;  %3107 = vst [vmem:[#allocation4 + $0x2c4] sm:$0xf] %v3099_v46 }
 0x2c3   :  { %v7409_v16 = vld [vmem:[#allocation3 + $0x4] sm:$0xc]  ;;  %1585 = vrot.lane.b32.xlu0 %v1575_v35, %s6161_s27  ;;  %v2068_v10 = vld [vmem:[#allocation3 + $0x2c] sm:$0xf]  ;;  %v7414_v37 = vld [vmem:[#allocation3 + $0x70] sm:$0xf] }
 0x2c4   :  { %v1564_v11 = vld [vmem:[#allocation3 + $0x4c] sm:$0xf]  ;;  %2077 = vrot.lane.b32.xlu1 %v2068_v10, %s6161_s27  ;;  %v5489_v2 = vrot.slane %v1723_v28, 9  ;;  %v5491_v49 = vrot.slane %v1801_v48, 10  ;;  %v7422_v43 = vld [vmem:[#allocation3 + $0x8] sm:$0xe] }
 0x2c5   :  { %v1355_v60 = vld [vmem:[#allocation2 + $0x1a0] sm:$0xff]  ;;  %v5492_v8 = vrot.slane %v7409_v16, 10  ;;  %v1583_v6 = vrot.slane %v7411_v21, 5  ;;  %v1357_v15 = vld [vmem:[#allocation2 + $0x1b0] sm:$0xff]  ;;  %v1577_v63 = vrot.slane %v1564_v11, 5  ;;  %v1580_v44 = vrot.slane %v7414_v37, 5 }
 0x2c6   :  { %v7427_v26 = vld [vmem:[#allocation3 + $0x4] sm:$0xee]  ;;  %v1736_v55 = vsel %vm7156_vm4, %v5489_v2, %v1735_v9  ;;  %v7434_v29 = vld [vmem:[#allocation3 + $0x2c] sm:$0xf]  ;;  %v2070_v52 = vld [vmem:[#allocation3 + $0x74] sm:$0xf]  ;;  %v1359_v20 = vmul.f32 %v1355_v60, %v6571_v56  ;;  %v1361_v3 = vmul.f32 %v1357_v15, %v6571_v56  ;;  %v1814_v32 = vsel %vm7166_vm6, %v5491_v49, %v1813_v13 }
 0x2c7   :  { %v7431_v31 = vld [vmem:[#allocation3 + $0x28] sm:$0xf]  ;;  %1746 = vrot.lane.b32.xlu0 %v1736_v55, %s6161_s27  ;;  %v1576_v36 = vrot.slane %v1574_v27, 4  ;;  %v5494_v5 = vrot.slane %v7422_v43, 9  ;;  %v1741_v14 = vrot.slane %v7237_v1, 5  ;;  %v1283_v24 = vrot.slane %v7419_v7, 7 }
 0x2c8   :  { %2081 = vrot.lane.b32.xlu1 %v2070_v52, %s6161_s27  ;;  %v7441_v23 = vld [vmem:[#allocation3 + $0x90] sm:$0x11]  ;;  %v7443_v50 = vld [vmem:[#allocation3 + $0x4] sm:$0xcc]  ;;  %v3360_v34 = vld [vmem:[#allocation3 + $0x38] sm:$0xf]  ;;  %v7468_v35 = vadd.f32 %v1359_v20, %v6590_v47  ;;  %v7482_v15 = vadd.f32 %v1360_v12, %v6590_v47 }
 0x2c9   :  { %v1860_v4 = vrot.slane %v7431_v31, 6  ;;  %v1946_v30 = vrot.slane %v7434_v29, 5  ;;  %v1737_v17 = vrot.slane %v1735_v9, 4  ;;  %3364 = vst [vmem:[#allocation4 + $0x334] sm:$0xf] %v3360_v34  ;;  %v1358_v0 = vld [vmem:[#allocation2 + $0x1b8] sm:$0xff]  ;;  %v1578_v38 = vsel %vm7156_vm4, %v1576_v36, %v1577_v63  ;;  %v1344_v29 = vpop.permute.xlu0 %1343 }
 0x2ca   :  { %v1582_v51 = vrot.slane %v1580_v44, 4  ;;  %v1738_v41 = vrot.slane %v7222_v40, 5  ;;  %v5497_v33 = vrot.slane %v7427_v26, 9  ;;  %v2103_v39 = vrot.slane %v7373_v54, 5  ;;  %v7464_v27 = vld [vmem:[#allocation3 + $0x90] sm:$0x33] }
 0x2cb   :  { %1824 = vrot.lane.b32.xlu0 %v1814_v32, %s6161_s27  ;;  %v1743_v45 = vrot.slane %v1741_v14, 4  ;;  %v1744_v19 = vrot.slane %v7441_v23, 5  ;;  %v5499_v18 = vrot.slane %v7443_v50, 10  ;;  %v3359_v22 = vld [vmem:[#allocation3 + $0x14] sm:$0xf]  ;;  %v1362_v9 = vmul.f32 %v1358_v0, %v6571_v56 }
 0x2cc   :  { %1587 = vrot.lane.b32.xlu1 %v1578_v38, %s6161_s27  ;;  %v3109_v28 = vld [vmem:[#allocation3 + $0x38] sm:$0xf]  ;;  %3363 = vst [vmem:[#allocation4 + $0x320] sm:$0xf] %v3359_v22  ;;  %v2181_v16 = vrot.slane %v7373_v54, 6  ;;  %v1815_v21 = vrot.slane %v1813_v13, 4  ;;  %v1861_v49 = vsel %vm7166_vm6, %v5492_v8, %v1860_v4  ;;  %v1584_v43 = vsel %vm7156_vm4, %v1582_v51, %v1583_v6 }
 0x2cd   :  { %v3376_v48 = vld [vmem:[#allocation3 + $0x38] sm:$0xf]  ;;  %v1816_v10 = vrot.slane %v7222_v40, 6  ;;  %v7473_v11 = vrot.slane %v1577_v63, 4  ;;  %v3108_v2 = vld [vmem:[#allocation3 + $0x14] sm:$0xc]  ;;  %v7485_v13 = vadd.f32 %v1361_v3, %v6590_v47  ;;  %v1947_v8 = vsel %vm7156_vm4, %v5494_v5, %v1946_v30 }
 0x2ce   :  { %v3446_v46 = vld [vmem:[#allocation3 + $0x38] sm:$0xf]  ;;  %v3375_v60 = vld [vmem:[#allocation3 + $0x14] sm:$0xe]  ;;  %v3362_v26 = vld [vmem:[#allocation3 + $0x80] sm:$0xf]  ;;  %v7500_v34 = vadd.f32 %v1362_v9, %v6590_v47  ;;  %v1739_v5 = vsel %vm7156_vm4, %v1737_v17, %v1738_v41  ;;  %v2104_v51 = vsel %vm7156_vm4, %v5497_v33, %v2103_v39  ;;  %v1745_v22 = vsel %vm7156_vm4, %v1743_v45, %v1744_v19 }
 0x2cf   :  { %v3445_v61 = vld [vmem:[#allocation3 + $0x14] sm:$0xc]  ;;  %1871 = vrot.lane.b32.xlu0 %v1861_v49, %s6161_s27  ;;  %v1819_v40 = vrot.slane %v7237_v1, 6  ;;  %v3120_v55 = vrot.slane %v3109_v28, 6  ;;  %v3387_v63 = vrot.slane %v3376_v48, 5  ;;  %v3457_v52 = vrot.slane %v3446_v46, 6 }
 0x2d0   :  { %3366 = vst [vmem:[#allocation4 + $0x35c] sm:$0xf] %v3362_v26  ;;  %1591 = vrot.lane.b32.xlu1 %v1584_v43, %s6161_s27  ;;  %v1822_v6 = vrot.slane %v7464_v27, 6  ;;  %v7495_v36 = vrot.slane %v1738_v41, 4  ;;  %v7497_v23 = vld [vmem:[#allocation3 + $0x80] sm:$0xf]  ;;  %v2182_v28 = vsel %vm7166_vm6, %v5499_v18, %v2181_v16  ;;  %v1817_v18 = vsel %vm7166_vm6, %v1815_v21, %v1816_v10 }
 0x2d1   :  { %v3361_v50 = vld [vmem:[#allocation3 + $0x5c] sm:$0xf]  ;;  %v7502_v20 = vld [vmem:[#allocation3 + $0x4c] sm:$0xf]  ;;  %v3122_v12 = vrot.slane %v3120_v55, 4  ;;  %v5520_v3 = vrot.slane %v3108_v2, 10 }
 0x2d2   :  { %v5525_v32 = vrot.slane %v3375_v60, 9  ;;  %v5527_v0 = vrot.slane %v3445_v61, 10  ;;  %v3378_v38 = vld [vmem:[#allocation3 + $0x80] sm:$0xf]  ;;  %3365 = vst [vmem:[#allocation4 + $0x348] sm:$0xf] %v3361_v50 }
 0x2d3   :  { %v3448_v48 = vld [vmem:[#allocation3 + $0x80] sm:$0xf]  ;;  %v3110_v46 = vld [vmem:[#allocation3 + $0x5c] sm:$0xf]  ;;  %1957 = vrot.lane.b32.xlu0 %v1947_v8, %s6161_s27  ;;  %v3389_v2 = vrot.slane %v3387_v63, 4  ;;  %v3121_v17 = vsel %vm7166_vm6, %v5520_v3, %v3120_v55  ;;  %v1821_v49 = vrot.slane %v1819_v40, 4 }
 0x2d4   :  { %v3377_v9 = vld [vmem:[#allocation3 + $0x5c] sm:$0xf]  ;;  %v3388_v41 = vsel %vm7156_vm4, %v5525_v32, %v3387_v63  ;;  %v3458_v33 = vsel %vm7166_vm6, %v5527_v0, %v3457_v52  ;;  %v3727_v19 = vld [vmem:[#allocation3 + $0x18] sm:$0xf]  ;;  %1748 = vrot.lane.b32.xlu1 %v1739_v5, %s6161_s27  ;;  %v7528_v43 = vld [vmem:[#allocation3 + $0x70] sm:$0xf] }
 0x2d5   :  { %v3447_v45 = vld [vmem:[#allocation3 + $0x5c] sm:$0xf]  ;;  %v3459_v60 = vrot.slane %v3457_v52, 4  ;;  %3135 = vst.msk [vmem:[#allocation4 + $0x290] sm:$0xf] %vm615_vm2, %v3121_v17  ;;  %v3126_v61 = vrot.slane %v7497_v23, 6 }
 0x2d6   :  { %3402 = vst [vmem:[#allocation4 + $0x324] sm:$0xf] %v3388_v41  ;;  %3472 = vst [vmem:[#allocation4 + $0x328] sm:$0xf] %v3458_v33  ;;  %v7532_v26 = vld [vmem:[#allocation3 + $0x94] sm:$0x3] }
 0x2d7   :  { %3731 = vst [vmem:[#allocation4 + $0x3c0] sm:$0xf] %v3727_v19  ;;  %v3393_v55 = vrot.slane %v3378_v38, 5  ;;  %v3463_v63 = vrot.slane %v3448_v48, 6  ;;  %v3123_v8 = vrot.slane %v3110_v46, 6  ;;  %v3390_v50 = vrot.slane %v3377_v9, 5  ;;  %2114 = vrot.lane.b32.xlu0 %v2104_v51, %s6161_s27 }
 0x2d8   :  { %v1862_v21 = vrot.slane %v1860_v4, 4  ;;  %v1863_v3 = vrot.slane %v7502_v20, 6  ;;  %v1818_v32 = vrot.slane %v1816_v10, 4  ;;  %v7537_v52 = vld [vmem:[#allocation3 + $0x50] sm:$0xf]  ;;  %v3460_v0 = vrot.slane %v3447_v45, 6  ;;  %1752 = vrot.lane.b32.xlu1 %v1745_v22, %s6161_s27 }
 0x2d9   :  { %v1866_v23 = vrot.slane %v7528_v43, 6  ;;  %v7541_v5 = vld [vmem:[#allocation3 + $0x74] sm:$0xf]  ;;  %v3124_v38 = vsel %vm7166_vm6, %v3122_v12, %v3123_v8  ;;  %v3125_v48 = vrot.slane %v3123_v8, 4  ;;  %v3391_v31 = vsel %vm7156_vm4, %v3389_v2, %v3390_v50  ;;  %v3112_v4 = vld [vmem:[#allocation3 + $0xa4] sm:$0x3] }
 0x2da   :  { %v1581_v10 = vsel %vm7156_vm4, %v7473_v11, %v1580_v44  ;;  %3136 = vst.msk [vmem:[#allocation4 + $0x2a4] sm:$0xf] %vm615_vm2, %v3124_v38  ;;  %v3392_v20 = vrot.slane %v3390_v50, 4  ;;  %3403 = vst [vmem:[#allocation4 + $0x338] sm:$0xf] %v3391_v31  ;;  %v3461_v12 = vsel %vm7166_vm6, %v3459_v60, %v3460_v0  ;;  %v3462_v51 = vrot.slane %v3460_v0, 4 }
 0x2db   :  { %v3379_v46 = vld [vmem:[#allocation3 + $0xa4] sm:$0x1]  ;;  %v3128_v2 = vrot.slane %v3126_v61, 4  ;;  %v3395_v17 = vrot.slane %v3393_v55, 4  ;;  %v3465_v41 = vrot.slane %v3463_v63, 4  ;;  %v3127_v37 = vsel %vm7166_vm6, %v3125_v48, %v3126_v61  ;;  %2192 = vrot.lane.b32.xlu0 %v2182_v28, %s6161_s27 }
 0x2dc   :  { %v3449_v9 = vld [vmem:[#allocation3 + $0xa4] sm:$0x3]  ;;  %3473 = vst [vmem:[#allocation4 + $0x33c] sm:$0xf] %v3461_v12  ;;  %v1869_v22 = vrot.slane %v7532_v26, 6  ;;  %v1949_v44 = vrot.slane %v7537_v52, 5  ;;  %v3394_v11 = vsel %vm7156_vm4, %v3392_v20, %v3393_v55  ;;  %v3464_v33 = vsel %vm7166_vm6, %v3462_v51, %v3463_v63  ;;  %1826 = vrot.lane.b32.xlu1 %v1817_v18, %s6161_s27 }
 0x2dd   :  { %3137 = vst.msk [vmem:[#allocation4 + $0x2b8] sm:$0xf] %vm615_vm2, %v3127_v37  ;;  %v3476_v45 = vld [vmem:[#allocation3 + $0x18] sm:$0xc]  ;;  %v3729_v19 = vld [vmem:[#allocation3 + $0x60] sm:$0xf]  ;;  %v1823_v55 = vsel %vm7166_vm6, %v1821_v49, %v1822_v6  ;;  %v1742_v28 = vsel %vm7156_vm4, %v7495_v36, %v1741_v14  ;;  %v7589_v36 = vpop.permute.xlu1 %1341  ;;  %v1820_v20 = vsel %vm7166_vm6, %v1818_v32, %v1819_v40 }
 0x2de   :  { %v1952_v60 = vrot.slane %v7541_v5, 5  ;;  %3404 = vst [vmem:[#allocation4 + $0x34c] sm:$0xf] %v3394_v11  ;;  %3474 = vst [vmem:[#allocation4 + $0x350] sm:$0xf] %v3464_v33  ;;  %v3129_v26 = vrot.slane %v3112_v4, 6  ;;  %v1864_v4 = vsel %vm7166_vm6, %v1862_v21, %v1863_v3 }
 0x2df   :  { %v3743_v61 = vld [vmem:[#allocation3 + $0x18] sm:$0xe]  ;;  %v3396_v8 = vrot.slane %v3379_v46, 5  ;;  %v3466_v50 = vrot.slane %v3449_v9, 6  ;;  %3733 = vst [vmem:[#allocation4 + $0x3e8] sm:$0xf] %v3729_v19  ;;  %1589 = vrot.lane.b32.xlu0 %v1581_v10, %s6161_s27 }
 0x2e0   :  { %v1868_v63 = vrot.slane %v1866_v23, 4  ;;  %v1865_v0 = vrot.slane %v1863_v3, 4  ;;  %v3813_v38 = vld [vmem:[#allocation3 + $0x18] sm:$0xc]  ;;  %v7579_v48 = vld [vmem:[#allocation3 + $0x60] sm:$0xf]  ;;  %v3130_v27 = vsel %vm7166_vm6, %v3128_v2, %v3129_v26  ;;  %1830 = vrot.lane.b32.xlu1 %v1823_v55, %s6161_s27 }
 0x2e1   :  { %v5528_v31 = vrot.slane %v3476_v45, 10  ;;  %v3397_v6 = vsel %vm7156_vm4, %v3395_v17, %v3396_v8  ;;  %v3467_v18 = vsel %vm7166_vm6, %v3465_v41, %v3466_v50  ;;  %v7587_v49 = vld [vmem:[#allocation3 + $0x60] sm:$0xf]  ;;  %v3477_v14 = vld [vmem:[#allocation3 + $0x3c] sm:$0xf]  ;;  %v1951_v12 = vrot.slane %v1949_v44, 4 }
 0x2e2   :  { %v5533_v51 = vrot.slane %v3743_v61, 9  ;;  %3138 = vst.msk [vmem:[#allocation4 + $0x2cc] sm:$0xf] %vm615_vm2, %v3130_v27  ;;  %3405 = vst [vmem:[#allocation4 + $0x360] sm:$0xf] %v3397_v6  ;;  %v2106_v21 = vrot.slane %v7355_v59, 5  ;;  %v1870_v11 = vsel %vm7166_vm6, %v1868_v63, %v1869_v22  ;;  %v7617_v33 = vsel %vm7166_vm6, %v1865_v0, %v1866_v23 }
 0x2e3   :  { %3475 = vst [vmem:[#allocation4 + $0x364] sm:$0xf] %v3467_v18  ;;  %v7600_v46 = vld [vmem:[#allocation3 + $0x60] sm:$0xf]  ;;  %v3728_v9 = vld [vmem:[#allocation3 + $0x3c] sm:$0xf]  ;;  %1750 = vrot.lane.b32.xlu0 %v1742_v28, %s6161_s27  ;;  %v7632_v23 = vsel %vm7156_vm4, %v1951_v12, %v1952_v60  ;;  %v1444_v28 = vpop.permute.xlu1 %1443 }
 0x2e4   :  { %v3491_v1 = vrot.slane %v7579_v48, 6  ;;  %v3488_v3 = vrot.slane %v3477_v14, 6  ;;  %3732 = vst [vmem:[#allocation4 + $0x3d4] sm:$0xf] %v3728_v9  ;;  %v3744_v40 = vld [vmem:[#allocation3 + $0x3c] sm:$0xf]  ;;  %1873 = vrot.lane.b32.xlu1 %v1864_v4, %s6161_s27 }
 0x2e5   :  { %v1285_v32 = vrot.slane %v1283_v24, 4  ;;  %v1948_v2 = vrot.slane %v1946_v30, 4  ;;  %v5535_v17 = vrot.slane %v3813_v38, 10  ;;  %v3758_v41 = vrot.slane %v7587_v49, 5  ;;  %v3814_v10 = vld [vmem:[#allocation3 + $0x3c] sm:$0xf] }
 0x2e6   :  { %v3755_v37 = vrot.slane %v3744_v40, 5  ;;  %v3489_v45 = vsel %vm7166_vm6, %v5528_v31, %v3488_v3  ;;  %v3490_v19 = vrot.slane %v3488_v3, 4  ;;  %v3828_v30 = vrot.slane %v7600_v46, 6  ;;  %v1938_v8 = vld [vmem:[#allocation3 + $0x98] sm:$0x1] }
 0x2e7   :  { %1295 = vst.msk [vmem:[#allocation3 + $0xa8] sm:$0x1] %vm754_vm10, %v1285_v32  ;;  %v3825_v43 = vrot.slane %v3814_v10, 6  ;;  %v7636_v26 = vrot.slane %v2106_v21, 4  ;;  %v1367_v55 = vmax.f32 %v7468_v35, 0.0  ;;  %v2109_v63 = vrot.slane %v7394_v42, 5  ;;  %1828 = vrot.lane.b32.xlu0 %v1820_v20, %s6161_s27  ;;  %v1448_v10 = vpop.permute.xlu1 %1447 }
 0x2e8   :  { %3503 = vst.msk [vmem:[#allocation4 + $0x330] sm:$0xf] %vm615_vm2, %v3489_v45  ;;  %v3756_v22 = vsel %vm7156_vm4, %v5533_v51, %v3755_v37  ;;  %v3757_v61 = vrot.slane %v3755_v37, 4  ;;  %v3492_v50 = vsel %vm7166_vm6, %v3490_v19, %v3491_v1  ;;  %v2184_v27 = vrot.slane %v7355_v59, 6  ;;  %v7653_v6 = vld [vmem:[#allocation3 + $0x50] sm:$0xf]  ;;  %1877 = vrot.lane.b32.xlu1 %v1870_v11, %s6161_s27 }
 0x2e9   :  { %1354 = vst.msk [vmem:[#allocation3 + $0xa8] sm:$0x1] %vm703_vm12, %v1344_v29  ;;  %3770 = vst [vmem:[#allocation4 + $0x3c4] sm:$0xf] %v3756_v22  ;;  %v3826_v38 = vsel %vm7166_vm6, %v5535_v17, %v3825_v43  ;;  %v3827_v31 = vrot.slane %v3825_v43, 4  ;;  %v1368_v35 = vmax.f32 %v7482_v15, 0.0  ;;  %v5687_v18 = vpack.c.bf16 %v1367_v55, %v1367_v55  ;;  %v1446_v29 = vpop.permute.xlu0 %1445 }
 0x2ea   :  { %3504 = vst.msk [vmem:[#allocation4 + $0x344] sm:$0xf] %vm615_vm2, %v3492_v50  ;;  %v3759_v0 = vsel %vm7156_vm4, %v3757_v61, %v3758_v41  ;;  %3840 = vst [vmem:[#allocation4 + $0x3c8] sm:$0xf] %v3826_v38  ;;  %v9082_v14 = vrot.slane %v7084_v53, 7  ;;  %v1950_v12 = vsel %vm7156_vm4, %v1948_v2, %v1949_v44  ;;  %v1954_v51 = vrot.slane %v1952_v60, 4 }
 0x2eb   :  { %3771 = vst [vmem:[#allocation4 + $0x3d8] sm:$0xf] %v3759_v0  ;;  %v1955_v9 = vrot.slane %v1938_v8, 5  ;;  %v7664_v3 = vld [vmem:[#allocation3 + $0x8] sm:$0xc]  ;;  %v3829_v15 = vsel %vm7166_vm6, %v3827_v31, %v3828_v30  ;;  %v5688_v52 = vpack.c.bf16 %v1368_v35, %v1368_v35  ;;  %v1383_v44 = vrot.slane %v5687_v18, 7  ;;  %1875 = vrot.lane.b32.xlu0 %v7617_v33, %s6161_s27 }
 0x2ec   :  { %v1282_v4 = vrot.slane %v9082_v14, 4  ;;  %v7666_v40 = vld [vmem:[#allocation3 + $0x2c] sm:$0xf]  ;;  %v7673_v53 = vld [vmem:[#allocation3 + $0x94] sm:$0x11]  ;;  %v1369_v60 = vmax.f32 %v7485_v13, 0.0  ;;  %1959 = vrot.lane.b32.xlu1 %v1950_v12, %s6161_s27 }
 0x2ed   :  { %3841 = vst [vmem:[#allocation4 + $0x3dc] sm:$0xf] %v3829_v15  ;;  %v2187_v32 = vrot.slane %v7394_v42, 6  ;;  %v7684_v2 = vrot.slane %v2103_v39, 4  ;;  %v2231_v20 = vrot.slane %v7653_v6, 6  ;;  %v1370_v17 = vmax.f32 %v7500_v34, 0.0 }
 0x2ee   :  { %v1284_v5 = vsel %vm6656_vm5, %v1282_v4, %v1283_v24  ;;  %v7691_v7 = vrot.slane %v2184_v27, 4  ;;  %v5500_v24 = vrot.slane %v7664_v3, 10  ;;  %v2228_v13 = vrot.slane %v7666_v40, 6  ;;  %v7695_v37 = vld [vmem:[#allocation3 + $0x74] sm:$0xf] }
 0x2ef   :  { %1294 = vst.msk [vmem:[#allocation3 + $0x84] sm:$0xf] %vm615_vm2, %v1284_v5  ;;  %v5689_v39 = vpack.c.bf16 %v1369_v60, %v1369_v60  ;;  %v7702_v34 = vrot.slane %v2109_v63, 4  ;;  %v2112_v11 = vrot.slane %v7673_v53, 5  ;;  %v3493_v45 = vrot.slane %v3491_v1, 4  ;;  %1961 = vrot.lane.b32.xlu0 %v7632_v23, %s6161_s27  ;;  %v1450_v23 = vpop.permute.xlu0 %1449 }
 0x2f0   :  { %1399 = vst.msk [vmem:[#allocation3 + $0x1c] sm:$0xe] %vm749_vm7, %v1383_v44  ;;  %v1384_v19 = vrot.slane %v1383_v44, 4  ;;  %v7712_v22 = vld [vmem:[#allocation3 + $0xa8] sm:$0x3]  ;;  %v1385_v43 = vrot.slane %v5688_v52, 7  ;;  %v5690_v8 = vpack.c.bf16 %v1370_v17, %v1370_v17 }
 0x2f1   :  { %1353 = vst.msk [vmem:[#allocation3 + $0x84] sm:$0xf] %vm622_vm9, %v7589_v36  ;;  %v1956_v36 = vsel %vm7156_vm4, %v1954_v51, %v1955_v9  ;;  %v7714_v61 = vld [vmem:[#allocation3 + $0x94] sm:$0x33]  ;;  %v1388_v50 = vrot.slane %v5689_v39, 7  ;;  %v3760_v48 = vrot.slane %v3758_v41, 4  ;;  %v1452_v51 = vpop.permute.xlu1 %1451  ;;  %v2110_v39 = vsel %vm7156_vm4, %v7636_v26, %v2109_v63 }
 0x2f2   :  { %1458 = vst.msk [vmem:[#allocation3 + $0x1c] sm:$0xe] %vm698_vm11, %v1444_v28  ;;  %v3830_v1 = vrot.slane %v3828_v30, 4  ;;  %v7723_v33 = vrot.slane %v2231_v20, 4  ;;  %v2234_v55 = vrot.slane %v7695_v37, 6  ;;  %v1386_v0 = vsel %vm6656_vm5, %v1384_v19, %v1385_v43  ;;  %1963 = vrot.lane.b32.xlu1 %v1956_v36, %s6161_s27 }
 0x2f3   :  { %v3747_v28 = vld [vmem:[#allocation3 + $0xa8] sm:$0x1]  ;;  %v1390_v38 = vrot.slane %v1388_v50, 4  ;;  %v1391_v31 = vrot.slane %v5690_v8, 7  ;;  %v1387_v35 = vrot.slane %v1385_v43, 4  ;;  %v7730_v49 = vrot.slane %v2181_v16, 4  ;;  %2118 = vrot.lane.b32.xlu0 %v2110_v39, %s6161_s27 }
 0x2f4   :  { %v3497_v46 = vrot.slane %v7712_v22, 6  ;;  %v7735_v41 = vrot.slane %v2187_v32, 4  ;;  %v2190_v30 = vrot.slane %v7714_v61, 6  ;;  %1400 = vst.msk [vmem:[#allocation3 + $0x40] sm:$0xf] %vm615_vm2, %v1386_v0  ;;  %v3764_v18 = vrot.slane %v3747_v28, 5 }
 0x2f5   :  { %v3817_v14 = vld [vmem:[#allocation3 + $0xa8] sm:$0x3]  ;;  %v7741_v4 = vld [vmem:[#allocation3 + $0xc] sm:$0xe]  ;;  %1459 = vst.msk [vmem:[#allocation3 + $0x40] sm:$0xf] %vm622_vm9, %v1446_v29  ;;  %v1392_v54 = vsel %vm6656_vm5, %v1390_v38, %v1391_v31  ;;  %v1389_v16 = vsel %vm6656_vm5, %v1387_v35, %v1388_v50  ;;  %v2107_v19 = vsel %vm7156_vm4, %v7684_v2, %v2106_v21 }
 0x2f6   :  { %v1393_v12 = vrot.slane %v1391_v31, 4  ;;  %1402 = vst.msk [vmem:[#allocation3 + $0x88] sm:$0xf] %vm615_vm2, %v1392_v54  ;;  %1401 = vst.msk [vmem:[#allocation3 + $0x64] sm:$0xf] %vm615_vm2, %v1389_v16  ;;  %v3834_v29 = vrot.slane %v3817_v14, 6  ;;  %2116 = vrot.lane.b32.xlu1 %v2107_v19, %s6161_s27 }
 0x2f7   :  { %1461 = vst.msk [vmem:[#allocation3 + $0x88] sm:$0xf] %vm622_vm9, %v1450_v23  ;;  %1460 = vst.msk [vmem:[#allocation3 + $0x64] sm:$0xf] %vm622_vm9, %v1448_v10  ;;  %v7766_v10 = vld [vmem:[#allocation3 + $0x30] sm:$0xf] }
 0x2f8   :  { %v3479_v9 = vld [vmem:[#allocation3 + $0x84] sm:$0xf]  ;;  %1403 = vst.msk [vmem:[#allocation3 + $0xac] sm:$0x1] %vm754_vm10, %v1393_v12  ;;  %v5502_v2 = vrot.slane %v7741_v4, 9  ;;  %v2314_v42 = vrot.slane %v7766_v10, 5 }
 0x2f9   :  { %v3730_v15 = vld [vmem:[#allocation3 + $0x84] sm:$0xf]  ;;  %v3494_v44 = vrot.slane %v3479_v9, 6  ;;  %v3844_v17 = vld [vmem:[#allocation3 + $0x1c] sm:$0xc] }
 0x2fa   :  { %v3746_v52 = vld [vmem:[#allocation3 + $0x84] sm:$0xf]  ;;  %3734 = vst [vmem:[#allocation4 + $0x3fc] sm:$0xf] %v3730_v15  ;;  %v4095_v22 = vld [vmem:[#allocation3 + $0x1c] sm:$0xf]  ;;  %v2185_v15 = vsel %vm7166_vm6, %v7730_v49, %v2184_v27 }
 0x2fb   :  { %v3761_v5 = vrot.slane %v3746_v52, 5  ;;  %v3816_v60 = vld [vmem:[#allocation3 + $0x84] sm:$0xf]  ;;  %v4111_v43 = vld [vmem:[#allocation3 + $0x1c] sm:$0xe]  ;;  %v3495_v8 = vsel %vm7166_vm6, %v3493_v45, %v3494_v44  ;;  %v3496_v26 = vrot.slane %v3494_v44, 4 }
 0x2fc   :  { %v3831_v36 = vrot.slane %v3816_v60, 6  ;;  %1462 = vst.msk [vmem:[#allocation3 + $0xac] sm:$0x1] %vm703_vm12, %v1452_v51  ;;  %4099 = vst [vmem:[#allocation4 + $0x460] sm:$0xf] %v4095_v22  ;;  %v5536_v45 = vrot.slane %v3844_v17, 10 }
 0x2fd   :  { %v3762_v63 = vsel %vm7156_vm4, %v3760_v48, %v3761_v5  ;;  %v3763_v50 = vrot.slane %v3761_v5, 4  ;;  %v4181_v21 = vld [vmem:[#allocation3 + $0x1c] sm:$0xc]  ;;  %3505 = vst.msk [vmem:[#allocation4 + $0x358] sm:$0xf] %vm615_vm2, %v3495_v8  ;;  %v3498_v48 = vsel %vm7166_vm6, %v3496_v26, %v3497_v46  ;;  %v5541_v35 = vrot.slane %v4111_v43, 9 }
 0x2fe   :  { %3772 = vst [vmem:[#allocation4 + $0x3ec] sm:$0xf] %v3762_v63  ;;  %v3832_v28 = vsel %vm7166_vm6, %v3830_v1, %v3831_v36  ;;  %v3833_v0 = vrot.slane %v3831_v36, 4  ;;  %v7777_v38 = vld [vmem:[#allocation3 + $0x54] sm:$0xf]  ;;  %v5543_v14 = vrot.slane %v4181_v21, 10  ;;  %v2188_v1 = vsel %vm7166_vm6, %v7691_v7, %v2187_v32  ;;  %v1675_v36 = vpop.permute.xlu0 %1674 }
 0x2ff   :  { %v3765_v31 = vsel %vm7156_vm4, %v3763_v50, %v3764_v18  ;;  %3842 = vst [vmem:[#allocation4 + $0x3f0] sm:$0xf] %v3832_v28  ;;  %v7783_v54 = vld [vmem:[#allocation3 + $0x4] sm:$0xe]  ;;  %v7785_v16 = vld [vmem:[#allocation3 + $0x28] sm:$0xf]  ;;  %v2113_v46 = vsel %vm7156_vm4, %v7702_v34, %v2112_v11  ;;  %2196 = vrot.lane.b32.xlu0 %v2188_v1, %s6161_s27  ;;  %v2229_v11 = vsel %vm7166_vm6, %v5500_v24, %v2228_v13 }
 0x300   :  { %v3845_v18 = vld [vmem:[#allocation3 + $0x40] sm:$0xf]  ;;  %3506 = vst.msk [vmem:[#allocation4 + $0x36c] sm:$0xf] %vm615_vm2, %v3498_v48  ;;  %3773 = vst [vmem:[#allocation4 + $0x400] sm:$0xf] %v3765_v31  ;;  %v3835_v9 = vsel %vm7166_vm6, %v3833_v0, %v3834_v29  ;;  %2120 = vrot.lane.b32.xlu1 %v2113_v46, %s6161_s27  ;;  %v2235_v21 = vsel %vm7166_vm6, %v7723_v33, %v2234_v55  ;;  %v2191_v28 = vsel %vm7166_vm6, %v7735_v41, %v2190_v30 }
 0x301   :  { %v4096_v12 = vld [vmem:[#allocation3 + $0x40] sm:$0xf]  ;;  %v3856_v32 = vrot.slane %v3845_v18, 6  ;;  %3843 = vst [vmem:[#allocation4 + $0x404] sm:$0xf] %v3835_v9  ;;  %v2317_v34 = vrot.slane %v7777_v38, 5 }
 0x302   :  { %v4112_v51 = vld [vmem:[#allocation3 + $0x40] sm:$0xf]  ;;  %4100 = vst [vmem:[#allocation4 + $0x474] sm:$0xf] %v4096_v12  ;;  %v3847_v23 = vld [vmem:[#allocation3 + $0x88] sm:$0xf]  ;;  %v1708_v41 = vpop.permute.xlu0 %1707 }
 0x303   :  { %v4123_v53 = vrot.slane %v4112_v51, 5  ;;  %v4182_v7 = vld [vmem:[#allocation3 + $0x40] sm:$0xf]  ;;  %v4098_v44 = vld [vmem:[#allocation3 + $0x88] sm:$0xf]  ;;  %v5490_v5 = vrot.slane %v7783_v54, 9  ;;  %v3857_v24 = vsel %vm7166_vm6, %v5536_v45, %v3856_v32  ;;  %2239 = vrot.lane.b32.xlu0 %v2229_v11, %s6161_s27 }
 0x304   :  { %v4193_v52 = vrot.slane %v4182_v7, 6  ;;  %v3858_v60 = vrot.slane %v3856_v32, 4  ;;  %v3862_v17 = vrot.slane %v3847_v23, 6  ;;  %4102 = vst [vmem:[#allocation4 + $0x49c] sm:$0xf] %v4098_v44  ;;  %v1782_v39 = vrot.slane %v7785_v16, 5  ;;  %2194 = vrot.lane.b32.xlu1 %v2185_v15, %s6161_s27 }
 0x305   :  { %v7816_v3 = vld [vmem:[#allocation3 + $0x88] sm:$0xf]  ;;  %v4125_v59 = vrot.slane %v4123_v53, 4  ;;  %3871 = vst.msk [vmem:[#allocation4 + $0x3d0] sm:$0xf] %vm615_vm2, %v3857_v24  ;;  %v4124_v27 = vsel %vm7156_vm4, %v5541_v35, %v4123_v53  ;;  %v1682_v26 = vrot.slane %v1675_v36, 4 }
 0x306   :  { %v4129_v19 = vrot.slane %v7816_v3, 5  ;;  %v7822_v29 = vld [vmem:[#allocation3 + $0x88] sm:$0xf]  ;;  %v4194_v49 = vsel %vm7166_vm6, %v5543_v14, %v4193_v52  ;;  %v3846_v22 = vld [vmem:[#allocation3 + $0x64] sm:$0xf]  ;;  %v4195_v43 = vrot.slane %v4193_v52, 4  ;;  %v1783_v53 = vsel %vm7156_vm4, %v5490_v5, %v1782_v39 }
 0x307   :  { %v4199_v8 = vrot.slane %v7822_v29, 6  ;;  %4138 = vst [vmem:[#allocation4 + $0x464] sm:$0xf] %v4124_v27  ;;  %4208 = vst [vmem:[#allocation4 + $0x468] sm:$0xf] %v4194_v49  ;;  %v3859_v63 = vrot.slane %v3846_v22, 6  ;;  %v1687_v14 = vsel %vm419_vm1, %v1675_v36, %v1682_v26  ;;  %2243 = vrot.lane.b32.xlu0 %v2235_v21, %s6161_s27  ;;  %v2315_v3 = vsel %vm7156_vm4, %v5502_v2, %v2314_v42  ;;  %v2044_v49 = vpop.permute.xlu0 %2043 }
 0x308   :  { %v4097_v50 = vld [vmem:[#allocation3 + $0x64] sm:$0xf]  ;;  %v3864_v0 = vrot.slane %v3862_v17, 4  ;;  %v4131_v45 = vrot.slane %v4129_v19, 4  ;;  %v3848_v1 = vld [vmem:[#allocation3 + $0xac] sm:$0x3]  ;;  %2198 = vrot.lane.b32.xlu1 %v2191_v28, %s6161_s27 }
 0x309   :  { %4101 = vst [vmem:[#allocation4 + $0x488] sm:$0xf] %v4097_v50  ;;  %v4113_v48 = vld [vmem:[#allocation3 + $0x64] sm:$0xf]  ;;  %v4201_v35 = vrot.slane %v4199_v8, 4  ;;  %v3860_v54 = vsel %vm7166_vm6, %v3858_v60, %v3859_v63  ;;  %v3861_v33 = vrot.slane %v3859_v63, 4 }
 0x30a   :  { %v4183_v31 = vld [vmem:[#allocation3 + $0x64] sm:$0xf]  ;;  %v4115_v46 = vld [vmem:[#allocation3 + $0xac] sm:$0x1]  ;;  %1695 = vst [vmem:[#allocation4 + $0x50] sm:$0xf] %v1687_v14  ;;  %v1677_v14 = vpop.permute.xlu1 %1676 }
 0x30b   :  { %3872 = vst.msk [vmem:[#allocation4 + $0x3e4] sm:$0xf] %vm615_vm2, %v3860_v54  ;;  %v4126_v61 = vrot.slane %v4113_v48, 5  ;;  %v4196_v18 = vrot.slane %v4183_v31, 6  ;;  %v3865_v30 = vrot.slane %v3848_v1, 6  ;;  %v4132_v12 = vrot.slane %v4115_v46, 5  ;;  %2325 = vrot.lane.b32.xlu0 %v2315_v3, %s6161_s27 }
 0x30c   :  { %v4185_v51 = vld [vmem:[#allocation3 + $0xac] sm:$0x3]  ;;  %v2230_v9 = vrot.slane %v2228_v13, 4  ;;  %v3863_v32 = vsel %vm7166_vm6, %v3861_v33, %v3862_v17  ;;  %1719 = vst.msk [vmem:[#allocation4 + $0x5c] sm:$0xf] %vm615_vm2, %v1708_v41  ;;  %v2319_v24 = vrot.slane %v2317_v34, 4 }
 0x30d   :  { %v4202_v7 = vrot.slane %v4185_v51, 6  ;;  %3873 = vst.msk [vmem:[#allocation4 + $0x3f8] sm:$0xf] %vm615_vm2, %v3863_v32  ;;  %v4127_v11 = vsel %vm7156_vm4, %v4125_v59, %v4126_v61  ;;  %v4128_v40 = vrot.slane %v4126_v61, 4  ;;  %v4197_v13 = vsel %vm7166_vm6, %v4195_v43, %v4196_v18  ;;  %v7863_v52 = vld [vmem:[#allocation3 + $0x2c] sm:$0xf] }
 0x30e   :  { %v4198_v15 = vrot.slane %v4196_v18, 4  ;;  %1797 = vst.msk [vmem:[#allocation4 + $0x5c] sm:$0xf] %vm622_vm9, %v1783_v53  ;;  %v2305_v23 = vld [vmem:[#allocation3 + $0x78] sm:$0xf]  ;;  %v3866_v44 = vsel %vm7166_vm6, %v3864_v0, %v3865_v30  ;;  %v4133_v5 = vsel %vm7156_vm4, %v4131_v45, %v4132_v12  ;;  %v2232_v4 = vsel %vm7166_vm6, %v2230_v9, %v2231_v20  ;;  %v2076_v20 = vpop.permute.xlu0 %2075  ;;  %v2403_v48 = vld [vmem:[#allocation3 + $0x8] sm:$0xff] }
 0x30f   :  { %4139 = vst [vmem:[#allocation4 + $0x478] sm:$0xf] %v4127_v11  ;;  %4209 = vst [vmem:[#allocation4 + $0x47c] sm:$0xf] %v4197_v13  ;;  %v4203_v60 = vsel %vm7166_vm6, %v4201_v35, %v4202_v7  ;;  %v1520_v17 = vld [vmem:[#allocation3 + $0x4] sm:$0xf]  ;;  %v4130_v29 = vsel %vm7156_vm4, %v4128_v40, %v4129_v19  ;;  %2241 = vrot.lane.b32.xlu1 %v2232_v4, %s6161_s27  ;;  %v1681_v11 = vpop.permute.xlu1 %1680 }
 0x310   :  { %v2220_v59 = vld [vmem:[#allocation3 + $0x98] sm:$0x3]  ;;  %v4200_v27 = vsel %vm7166_vm6, %v4198_v15, %v4199_v8  ;;  %3874 = vst.msk [vmem:[#allocation4 + $0x40c] sm:$0xf] %vm615_vm2, %v3866_v44  ;;  %4141 = vst [vmem:[#allocation4 + $0x4a0] sm:$0xf] %v4133_v5 }
 0x311   :  { %4211 = vst [vmem:[#allocation4 + $0x4a4] sm:$0xf] %v4203_v60  ;;  %v2138_v36 = vld [vmem:[#allocation3 + $0x8] sm:$0xe]  ;;  %1524 = vst.msk [vmem:[#allocation4 + $0xc] sm:$0xf] %vm615_vm2, %v1520_v17 }
 0x312   :  { %v2236_v2 = vrot.slane %v2234_v55, 4  ;;  %4140 = vst [vmem:[#allocation4 + $0x48c] sm:$0xf] %v4130_v29  ;;  %4210 = vst [vmem:[#allocation4 + $0x490] sm:$0xf] %v4200_v27  ;;  %v2051_v19 = vrot.slane %v2044_v49, 4  ;;  %v1679_v41 = vpop.permute.xlu0 %1678 }
 0x313   :  { %v2150_v22 = vrot.slane %v7863_v52, 5  ;;  %v2320_v43 = vrot.slane %v2305_v23, 5  ;;  %v1521_v8 = vld [vmem:[#allocation3 + $0x28] sm:$0xf]  ;;  %v2237_v26 = vrot.slane %v2220_v59, 6  ;;  %v5498_v50 = vrot.slane %v2138_v36, 9  ;;  %v1710_v29 = vpop.permute.xlu1 %1709 }
 0x314   :  { %v2055_v63 = vsel %vm419_vm1, %v2044_v49, %v2051_v19  ;;  %1525 = vst.msk [vmem:[#allocation4 + $0x20] sm:$0xf] %vm615_vm2, %v1521_v8  ;;  %v1523_v37 = vld [vmem:[#allocation3 + $0x70] sm:$0xf]  ;;  %v2316_v21 = vrot.slane %v2314_v42, 4  ;;  %v1683_v33 = vrot.slane %v1677_v14, 4 }
 0x315   :  { %v2321_v6 = vsel %vm7156_vm4, %v2319_v24, %v2320_v43  ;;  %2063 = vst [vmem:[#allocation4 + $0xf0] sm:$0xf] %v2055_v63  ;;  %v2238_v55 = vsel %vm7166_vm6, %v2236_v2, %v2237_v26  ;;  %v2151_v28 = vsel %vm7156_vm4, %v5498_v50, %v2150_v22  ;;  %2087 = vst.msk [vmem:[#allocation4 + $0xfc] sm:$0xf] %vm615_vm2, %v2076_v20  ;;  %v1895_v0 = vld [vmem:[#allocation3 + $0x8] sm:$0xf] }
 0x316   :  { %2329 = vrot.lane.b32.xlu0 %v2321_v6, %s6161_s27  ;;  %1527 = vst.msk [vmem:[#allocation4 + $0x48] sm:$0xf] %vm615_vm2, %v1523_v37  ;;  %2245 = vrot.lane.b32.xlu1 %v2238_v55, %s6161_s27  ;;  %1899 = vst.msk [vmem:[#allocation4 + $0xac] sm:$0xf] %vm615_vm2, %v1895_v0  ;;  %v1522_v45 = vld [vmem:[#allocation3 + $0x4c] sm:$0xf]  ;;  %v2318_v42 = vsel %vm7156_vm4, %v2316_v21, %v2317_v34  ;;  %v1688_v38 = vsel %vm419_vm1, %v1677_v14, %v1683_v33 }
 0x317   :  { %2165 = vst.msk [vmem:[#allocation4 + $0xfc] sm:$0xf] %vm622_vm9, %v2151_v28  ;;  %v2306_v10 = vld [vmem:[#allocation3 + $0x9c] sm:$0x1]  ;;  %v2322_v31 = vrot.slane %v2320_v43, 4  ;;  %v7919_v54 = vld [vmem:[#allocation3 + $0x50] sm:$0xff] }
 0x318   :  { %1526 = vst.msk [vmem:[#allocation4 + $0x34] sm:$0xf] %vm615_vm2, %v1522_v45  ;;  %v2323_v35 = vrot.slane %v2306_v10, 5  ;;  %v1896_v46 = vld [vmem:[#allocation3 + $0x2c] sm:$0xf]  ;;  %v1684_v12 = vrot.slane %v1679_v41, 4 }
 0x319   :  { %v1897_v34 = vld [vmem:[#allocation3 + $0x50] sm:$0xf]  ;;  %1696 = vst [vmem:[#allocation4 + $0x64] sm:$0xf] %v1688_v38  ;;  %1900 = vst.msk [vmem:[#allocation4 + $0xc0] sm:$0xf] %vm615_vm2, %v1896_v46 }
 0x31a   :  { %2411 = vrot.lane.b32.xlu0 %v2403_v48, %s6161_s27  ;;  %2327 = vrot.lane.b32.xlu1 %v2318_v42, %s6161_s27  ;;  %v2324_v1 = vsel %vm7156_vm4, %v2322_v31, %v2323_v35  ;;  %1901 = vst.msk [vmem:[#allocation4 + $0xd4] sm:$0xf] %vm615_vm2, %v1897_v34  ;;  %v2435_v61 = vld [vmem:[#allocation3 + $0xc] sm:$0xf]  ;;  %v1898_v30 = vld [vmem:[#allocation3 + $0x74] sm:$0xf]  ;;  %v1689_v40 = vsel %vm419_vm1, %v1679_v41, %v1684_v12 }
 0x31b   :  { %v7930_v18 = vld [vmem:[#allocation3 + $0x2c] sm:$0xff]  ;;  %1902 = vst.msk [vmem:[#allocation4 + $0xe8] sm:$0xf] %vm615_vm2, %v1898_v30  ;;  %v2437_v32 = vld [vmem:[#allocation3 + $0x54] sm:$0xf]  ;;  %v2474_v7 = vrot.slane %v7919_v54, 5  ;;  %v1712_v31 = vpop.permute.xlu0 %1711 }
 0x31c   :  { %v1772_v51 = vld [vmem:[#allocation3 + $0x4c] sm:$0xf]  ;;  %v2471_v53 = vrot.slane %v7930_v18, 5  ;;  %v7939_v13 = vld [vmem:[#allocation3 + $0x74] sm:$0xff]  ;;  %v1685_v15 = vrot.slane %v1681_v11, 4  ;;  %v1784_v17 = vrot.slane %v1782_v39, 4 }
 0x31d   :  { %v2459_v9 = vld [vmem:[#allocation3 + $0x8] sm:$0xee]  ;;  %1697 = vst [vmem:[#allocation4 + $0x78] sm:$0xf] %v1689_v40  ;;  %v1785_v23 = vrot.slane %v1772_v51, 5  ;;  %v2476_v59 = vrot.slane %v2474_v7, 4 }
 0x31e   :  { %2415 = vrot.lane.b32.xlu0 %v7919_v54, %s6161_s27  ;;  %2331 = vrot.lane.b32.xlu1 %v2324_v1, %s6161_s27  ;;  %v5505_v44 = vrot.slane %v2459_v9, 9  ;;  %v2263_v5 = vld [vmem:[#allocation3 + $0xc] sm:$0xf]  ;;  %v1690_v60 = vsel %vm419_vm1, %v1681_v11, %v1685_v15  ;;  %v2265_v3 = vld [vmem:[#allocation3 + $0x54] sm:$0xf]  ;;  %v2477_v16 = vrot.slane %v7939_v13, 5 }
 0x31f   :  { %2267 = vst.msk [vmem:[#allocation4 + $0x14c] sm:$0xf] %vm615_vm2, %v2263_v5  ;;  %1698 = vst [vmem:[#allocation4 + $0x8c] sm:$0xf] %v1690_v60  ;;  %v2436_v27 = vld [vmem:[#allocation3 + $0x30] sm:$0xf]  ;;  %v1786_v49 = vsel %vm7156_vm4, %v1784_v17, %v1785_v23 }
 0x320   :  { %v2472_v24 = vsel %vm7156_vm4, %v5505_v44, %v2471_v53  ;;  %2269 = vst.msk [vmem:[#allocation4 + $0x174] sm:$0xf] %vm615_vm2, %v2265_v3  ;;  %1720 = vst.msk [vmem:[#allocation4 + $0x70] sm:$0xf] %vm615_vm2, %v1710_v29  ;;  %v2264_v39 = vld [vmem:[#allocation3 + $0x30] sm:$0xf]  ;;  %v2478_v4 = vsel %vm7156_vm4, %v2476_v59, %v2477_v16 }
 0x321   :  { %1798 = vst.msk [vmem:[#allocation4 + $0x70] sm:$0xf] %vm622_vm9, %v1786_v49  ;;  %v2537_v36 = vld [vmem:[#allocation3 + $0x8] sm:$0xcc]  ;;  %v2549_v2 = vrot.slane %v7930_v18, 6  ;;  %v2552_v19 = vrot.slane %v7919_v54, 6  ;;  %v2048_v12 = vpop.permute.xlu0 %2047 }
 0x322   :  { %2443 = vrot.lane.b32.xlu0 %v2435_v61, %s6161_s27  ;;  %2413 = vrot.lane.b32.xlu1 %v7930_v18, %s6161_s27  ;;  %2268 = vst.msk [vmem:[#allocation4 + $0x160] sm:$0xf] %vm615_vm2, %v2264_v39  ;;  %v2266_v43 = vld [vmem:[#allocation3 + $0x78] sm:$0xf]  ;;  %v2473_v26 = vrot.slane %v2471_v53, 4  ;;  %v5507_v63 = vrot.slane %v2537_v36, 10 }
 0x323   :  { %v2438_v8 = vld [vmem:[#allocation3 + $0x78] sm:$0xf]  ;;  %2270 = vst.msk [vmem:[#allocation4 + $0x188] sm:$0xf] %vm615_vm2, %v2266_v43  ;;  %v1773_v50 = vld [vmem:[#allocation3 + $0x70] sm:$0xf] }
 0x324   :  { %v1787_v6 = vrot.slane %v1785_v23, 4  ;;  %v2550_v20 = vsel %vm7166_vm6, %v5507_v63, %v2549_v2  ;;  %v2554_v37 = vrot.slane %v2552_v19, 4  ;;  %v2463_v55 = vld [vmem:[#allocation3 + $0x98] sm:$0x11]  ;;  %v7967_v21 = vld [vmem:[#allocation3 + $0x30] sm:$0xf]  ;;  %v2475_v28 = vsel %vm7156_vm4, %v2473_v26, %v2474_v7 }
 0x325   :  { %v1788_v0 = vrot.slane %v1773_v50, 5  ;;  %v2479_v45 = vrot.slane %v2477_v16, 4  ;;  %v7972_v48 = vld [vmem:[#allocation3 + $0x54] sm:$0xf]  ;;  %v7974_v10 = vld [vmem:[#allocation3 + $0x50] sm:$0xf]  ;;  %v1714_v40 = vpop.permute.xlu1 %1713 }
 0x326   :  { %2447 = vrot.lane.b32.xlu0 %v2437_v32, %s6161_s27  ;;  %2417 = vrot.lane.b32.xlu1 %v7939_v13, %s6161_s27  ;;  %v2555_v42 = vrot.slane %v7939_v13, 6  ;;  %1721 = vst.msk [vmem:[#allocation4 + $0x84] sm:$0xf] %vm615_vm2, %v1712_v31  ;;  %v2480_v14 = vrot.slane %v2463_v55, 5  ;;  %v2584_v54 = vld [vmem:[#allocation3 + $0xc] sm:$0xc] }
 0x327   :  { %v1789_v35 = vsel %vm7156_vm4, %v1787_v6, %v1788_v0  ;;  %v2596_v1 = vrot.slane %v7967_v21, 6  ;;  %v1774_v38 = vld [vmem:[#allocation3 + $0x94] sm:$0x1]  ;;  %v2599_v46 = vrot.slane %v7972_v48, 6  ;;  %v2153_v34 = vrot.slane %v7974_v10, 5 }
 0x328   :  { %v2556_v33 = vsel %vm7166_vm6, %v2554_v37, %v2555_v42  ;;  %1799 = vst.msk [vmem:[#allocation4 + $0x84] sm:$0xf] %vm622_vm9, %v1789_v35  ;;  %v2481_v61 = vsel %vm7156_vm4, %v2479_v45, %v2480_v14  ;;  %v1790_v18 = vrot.slane %v1788_v0, 4  ;;  %v2551_v41 = vrot.slane %v2549_v2, 4  ;;  %v2587_v51 = vld [vmem:[#allocation3 + $0x78] sm:$0xf] }
 0x329   :  { %v5508_v30 = vrot.slane %v2584_v54, 10  ;;  %v1791_v9 = vrot.slane %v1774_v38, 5  ;;  %v2053_v32 = vrot.slane %v2048_v12, 4  ;;  %v7991_v53 = vld [vmem:[#allocation3 + $0x74] sm:$0xf]  ;;  %v2601_v13 = vrot.slane %v2599_v46, 4  ;;  %v2046_v2 = vpop.permute.xlu1 %2045 }
 0x32a   :  { %2482 = vrot.lane.b32.xlu0 %v2472_v24, %s6161_s27  ;;  %2445 = vrot.lane.b32.xlu1 %v2436_v27, %s6161_s27  ;;  %v2541_v7 = vld [vmem:[#allocation3 + $0x98] sm:$0x33]  ;;  %v2155_v15 = vrot.slane %v2153_v34, 4  ;;  %v2670_v23 = vld [vmem:[#allocation3 + $0x10] sm:$0xe]  ;;  %v2553_v17 = vsel %vm7166_vm6, %v2551_v41, %v2552_v19  ;;  %v2557_v3 = vrot.slane %v2555_v42, 4  ;;  %v2080_v16 = vpop.permute.xlu0 %2079 }
 0x32b   :  { %v2597_v11 = vsel %vm7166_vm6, %v5508_v30, %v2596_v1  ;;  %v2631_v44 = vld [vmem:[#allocation3 + $0x10] sm:$0xf]  ;;  %v1792_v5 = vsel %vm7156_vm4, %v1790_v18, %v1791_v9  ;;  %1722 = vst.msk [vmem:[#allocation4 + $0x98] sm:$0xf] %vm615_vm2, %v1714_v40  ;;  %v2057_v60 = vsel %vm419_vm1, %v2048_v12, %v2053_v32  ;;  %v2671_v24 = vld [vmem:[#allocation3 + $0x34] sm:$0xf] }
 0x32c   :  { %v8006_v59 = vld [vmem:[#allocation3 + $0x58] sm:$0xf]  ;;  %2635 = vst.msk [vmem:[#allocation4 + $0x1ec] sm:$0xf] %vm615_vm2, %v2631_v44  ;;  %2065 = vst [vmem:[#allocation4 + $0x118] sm:$0xf] %v2057_v60 }
 0x32d   :  { %1800 = vst.msk [vmem:[#allocation4 + $0x98] sm:$0xf] %vm622_vm9, %v1792_v5  ;;  %v2602_v29 = vrot.slane %v2587_v51, 6  ;;  %v2156_v27 = vrot.slane %v7991_v53, 5  ;;  %v2633_v49 = vld [vmem:[#allocation3 + $0x58] sm:$0xf] }
 0x32e   :  { %2486 = vrot.lane.b32.xlu0 %v2478_v4, %s6161_s27  ;;  %2449 = vrot.lane.b32.xlu1 %v2438_v8, %s6161_s27  ;;  %v2558_v39 = vrot.slane %v2541_v7, 6  ;;  %v5510_v36 = vrot.slane %v2670_v23, 9  ;;  %2637 = vst.msk [vmem:[#allocation4 + $0x214] sm:$0xf] %vm615_vm2, %v2633_v49  ;;  %2089 = vst.msk [vmem:[#allocation4 + $0x124] sm:$0xf] %vm615_vm2, %v2080_v16 }
 0x32f   :  { %v2603_v4 = vsel %vm7166_vm6, %v2601_v13, %v2602_v29  ;;  %v2157_v19 = vsel %vm7156_vm4, %v2155_v15, %v2156_v27  ;;  %v2682_v43 = vrot.slane %v2671_v24, 5  ;;  %v2685_v8 = vrot.slane %v8006_v59, 5  ;;  %v2632_v26 = vld [vmem:[#allocation3 + $0x34] sm:$0xf]  ;;  %v2634_v37 = vld [vmem:[#allocation3 + $0x7c] sm:$0xf] }
 0x330   :  { %v2052_v63 = vrot.slane %v2046_v2, 4  ;;  %2167 = vst.msk [vmem:[#allocation4 + $0x124] sm:$0xf] %vm622_vm9, %v2157_v19  ;;  %v2559_v50 = vsel %vm7166_vm6, %v2557_v3, %v2558_v39  ;;  %v2598_v6 = vrot.slane %v2596_v1, 4  ;;  %v2588_v42 = vld [vmem:[#allocation3 + $0x9c] sm:$0x3] }
 0x331   :  { %2636 = vst.msk [vmem:[#allocation4 + $0x200] sm:$0xf] %vm615_vm2, %v2632_v26  ;;  %2638 = vst.msk [vmem:[#allocation4 + $0x228] sm:$0xf] %vm615_vm2, %v2634_v37  ;;  %v2683_v21 = vsel %vm7156_vm4, %v5510_v36, %v2682_v43  ;;  %v2687_v0 = vrot.slane %v2685_v8, 4  ;;  %v2152_v14 = vrot.slane %v2150_v22, 4 }
 0x332   :  { %2560 = vrot.lane.b32.xlu0 %v2550_v20, %s6161_s27  ;;  %2484 = vrot.lane.b32.xlu1 %v2475_v28, %s6161_s27  ;;  %v2673_v20 = vld [vmem:[#allocation3 + $0x7c] sm:$0xf]  ;;  %v2056_v55 = vsel %vm419_vm1, %v2046_v2, %v2052_v63  ;;  %v2050_v28 = vpop.permute.xlu1 %2049  ;;  %v2600_v35 = vsel %vm7166_vm6, %v2598_v6, %v2599_v46  ;;  %v2604_v54 = vrot.slane %v2602_v29, 4  ;;  %v2605_v38 = vrot.slane %v2588_v42, 6  ;;  %v2142_v18 = vld [vmem:[#allocation3 + $0x98] sm:$0x1] }
 0x333   :  { %2064 = vst [vmem:[#allocation4 + $0x104] sm:$0xf] %v2056_v55  ;;  %v2688_v45 = vrot.slane %v2673_v20, 5  ;;  %v2054_v31 = vrot.slane %v2050_v28, 4  ;;  %v2154_v52 = vsel %vm7156_vm4, %v2152_v14, %v2153_v34  ;;  %v2158_v46 = vrot.slane %v2156_v27, 4  ;;  %v2771_v32 = vld [vmem:[#allocation3 + $0xc] sm:$0xff] }
 0x334   :  { %v2606_v22 = vsel %vm7166_vm6, %v2604_v54, %v2605_v38  ;;  %v2684_v41 = vrot.slane %v2682_v43, 4  ;;  %v2674_v30 = vld [vmem:[#allocation3 + $0xa0] sm:$0x1]  ;;  %v2159_v51 = vrot.slane %v2142_v18, 5  ;;  %v2999_v23 = vld [vmem:[#allocation3 + $0x14] sm:$0xf] }
 0x335   :  { %v1586_v1 = vpop.permute.xlu0 %1585  ;;  %v2690_v7 = vrot.slane %v2688_v45, 4  ;;  %v1463_v40 = vld [vmem:[#allocation2 + $0x1e0] sm:$0xff]  ;;  %v8060_v5 = vld [vmem:[#allocation3 + $0x54] sm:$0xff]  ;;  %3003 = vst.msk [vmem:[#allocation4 + $0x28c] sm:$0xf] %vm615_vm2, %v2999_v23  ;;  %v1464_v27 = vld [vmem:[#allocation2 + $0x1e8] sm:$0xff] }
 0x336   :  { %2564 = vrot.lane.b32.xlu0 %v2556_v33, %s6161_s27  ;;  %2488 = vrot.lane.b32.xlu1 %v2481_v61, %s6161_s27  ;;  %v2058_v33 = vsel %vm419_vm1, %v2050_v28, %v2054_v31  ;;  %1597 = vst.msk [vmem:[#allocation4 + $0xc] sm:$0xf] %vm622_vm9, %v1586_v1  ;;  %v2689_v61 = vsel %vm7156_vm4, %v2687_v0, %v2688_v45  ;;  %v2078_v48 = vpop.permute.xlu1 %2077  ;;  %v3000_v29 = vld [vmem:[#allocation3 + $0x38] sm:$0xf]  ;;  %v1465_v49 = vld [vmem:[#allocation2 + $0x1f0] sm:$0xff]  ;;  %v2842_v55 = vrot.slane %v8060_v5, 5 }
 0x337   :  { %2066 = vst [vmem:[#allocation4 + $0x12c] sm:$0xf] %v2058_v33  ;;  %2088 = vst.msk [vmem:[#allocation4 + $0x110] sm:$0xf] %vm615_vm2, %v2078_v48  ;;  %v2160_v10 = vsel %vm7156_vm4, %v2158_v46, %v2159_v51  ;;  %v2686_v34 = vsel %vm7156_vm4, %v2684_v41, %v2685_v8  ;;  %v1467_v3 = vmul.f32 %v1463_v40, %v6571_v56  ;;  %v3002_v39 = vld [vmem:[#allocation3 + $0x80] sm:$0xf] }
 0x338   :  { %2166 = vst.msk [vmem:[#allocation4 + $0x110] sm:$0xf] %vm622_vm9, %v2154_v52  ;;  %v2803_v36 = vld [vmem:[#allocation3 + $0x10] sm:$0xf]  ;;  %v1468_v8 = vmul.f32 %v1464_v27, %v6571_v56  ;;  %v1469_v26 = vmul.f32 %v1465_v49, %v6571_v56  ;;  %v8088_v0 = vld [vmem:[#allocation3 + $0x78] sm:$0xff]  ;;  %v2844_v18 = vrot.slane %v2842_v55, 4 }
 0x339   :  { %v1747_v12 = vpop.permute.xlu0 %1746  ;;  %3004 = vst.msk [vmem:[#allocation4 + $0x2a0] sm:$0xf] %vm615_vm2, %v3000_v29  ;;  %3006 = vst.msk [vmem:[#allocation4 + $0x2c8] sm:$0xf] %vm615_vm2, %v3002_v39  ;;  %v1471_v2 = vadd.f32 %v1467_v3, %v6590_v47  ;;  %v8078_v19 = vld [vmem:[#allocation3 + $0x30] sm:$0xff] }
 0x33a   :  { %2607 = vrot.lane.b32.xlu0 %v2597_v11, %s6161_s27  ;;  %2562 = vrot.lane.b32.xlu1 %v2553_v17, %s6161_s27  ;;  %v1754_v9 = vrot.slane %v1747_v12, 4  ;;  %v2082_v53 = vpop.permute.xlu1 %2081  ;;  %v2691_v11 = vrot.slane %v2674_v30, 5  ;;  %v3001_v17 = vld [vmem:[#allocation3 + $0x5c] sm:$0xf]  ;;  %v2827_v43 = vld [vmem:[#allocation3 + $0xc] sm:$0xee]  ;;  %v1472_v56 = vadd.f32 %v1468_v8, %v6590_v47  ;;  %v1473_v45 = vadd.f32 %v1469_v26, %v6590_v47 }
 0x33b   :  { %2090 = vst.msk [vmem:[#allocation4 + $0x138] sm:$0xf] %vm615_vm2, %v2082_v53  ;;  %3005 = vst.msk [vmem:[#allocation4 + $0x2b4] sm:$0xf] %vm615_vm2, %v3001_v17  ;;  %v5513_v20 = vrot.slane %v2827_v43, 9  ;;  %v2839_v37 = vrot.slane %v8078_v19, 5 }
 0x33c   :  { %v1758_v13 = vsel %vm419_vm1, %v1747_v12, %v1754_v9  ;;  %2168 = vst.msk [vmem:[#allocation4 + $0x138] sm:$0xf] %vm622_vm9, %v2160_v10  ;;  %v2692_v24 = vsel %vm7156_vm4, %v2690_v7, %v2691_v11  ;;  %v3367_v42 = vld [vmem:[#allocation3 + $0x18] sm:$0xf]  ;;  %v2905_v33 = vld [vmem:[#allocation3 + $0xc] sm:$0xcc] }
 0x33d   :  { %1766 = vst [vmem:[#allocation4 + $0x54] sm:$0xf] %v1758_v13  ;;  %v1825_v15 = vpop.permute.xlu0 %1824  ;;  %3371 = vst.msk [vmem:[#allocation4 + $0x32c] sm:$0xf] %vm615_vm2, %v3367_v42  ;;  %v1476_v1 = vmax.f32 %v1472_v56, 0.0  ;;  %v1477_v38 = vmax.f32 %v1473_v45, 0.0  ;;  %v2840_v47 = vsel %vm7156_vm4, %v5513_v20, %v2839_v37 }
 0x33e   :  { %2611 = vrot.lane.b32.xlu0 %v2603_v4, %s6161_s27  ;;  %2566 = vrot.lane.b32.xlu1 %v2559_v50, %s6161_s27  ;;  %v1832_v44 = vrot.slane %v1825_v15, 4  ;;  %v1588_v60 = vpop.permute.xlu1 %1587  ;;  %v2805_v50 = vld [vmem:[#allocation3 + $0x58] sm:$0xf]  ;;  %v2804_v46 = vld [vmem:[#allocation3 + $0x34] sm:$0xf]  ;;  %v2845_v9 = vrot.slane %v8088_v0, 5 }
 0x33f   :  { %1598 = vst.msk [vmem:[#allocation4 + $0x20] sm:$0xf] %vm622_vm9, %v1588_v60  ;;  %v5696_v41 = vpack.c.bf16 %v1476_v1, %v1476_v1  ;;  %v5697_v30 = vpack.c.bf16 %v1477_v38, %v1477_v38  ;;  %v3368_v12 = vld [vmem:[#allocation3 + $0x3c] sm:$0xf]  ;;  %v3370_v10 = vld [vmem:[#allocation3 + $0x84] sm:$0xf] }
 0x340   :  { %v1836_v59 = vsel %vm419_vm1, %v1825_v15, %v1832_v44  ;;  %3372 = vst.msk [vmem:[#allocation4 + $0x340] sm:$0xf] %vm615_vm2, %v3368_v12  ;;  %v2920_v11 = vrot.slane %v8060_v5, 6  ;;  %3374 = vst.msk [vmem:[#allocation4 + $0x368] sm:$0xf] %vm615_vm2, %v3370_v10  ;;  %v2846_v23 = vsel %vm7156_vm4, %v2844_v18, %v2845_v9  ;;  %v2917_v60 = vrot.slane %v8078_v19, 6 }
 0x341   :  { %1844 = vst [vmem:[#allocation4 + $0x58] sm:$0xf] %v1836_v59  ;;  %v1872_v16 = vpop.permute.xlu0 %1871  ;;  %v1493_v40 = vrot.slane %v5696_v41, 7  ;;  %v1496_v13 = vrot.slane %v5697_v30, 7  ;;  %v2841_v17 = vrot.slane %v2839_v37, 4  ;;  %v9083_v43 = vrot.slane %v6898_v57, 7 }
 0x342   :  { %2693 = vrot.lane.b32.xlu0 %v2683_v21, %s6161_s27  ;;  %2609 = vrot.lane.b32.xlu1 %v2600_v35, %s6161_s27  ;;  %1883 = vst.msk [vmem:[#allocation4 + $0x60] sm:$0xf] %vm615_vm2, %v1872_v16  ;;  %v1592_v4 = vpop.permute.xlu1 %1591  ;;  %v1475_v21 = vmax.f32 %v1471_v2, 0.0  ;;  %v3369_v35 = vld [vmem:[#allocation3 + $0x60] sm:$0xf]  ;;  %v2923_v20 = vrot.slane %v8088_v0, 6 }
 0x343   :  { %1600 = vst.msk [vmem:[#allocation4 + $0x48] sm:$0xf] %vm622_vm9, %v1592_v4  ;;  %v1495_v59 = vrot.slane %v1493_v40, 4  ;;  %v1498_v29 = vrot.slane %v1496_v13, 4  ;;  %v2831_v16 = vld [vmem:[#allocation3 + $0x9c] sm:$0x11] }
 0x344   :  { %v5695_v31 = vpack.c.bf16 %v1475_v21, %v1475_v21  ;;  %3373 = vst.msk [vmem:[#allocation4 + $0x354] sm:$0xf] %vm615_vm2, %v3369_v35  ;;  %v2922_v4 = vrot.slane %v2920_v11, 4  ;;  %v2952_v2 = vld [vmem:[#allocation3 + $0x10] sm:$0xc]  ;;  %v2843_v21 = vsel %vm7156_vm4, %v2841_v17, %v2842_v55 }
 0x345   :  { %v1958_v63 = vpop.permute.xlu0 %1957  ;;  %v1500_v8 = vsel %vm6656_vm5, %v1498_v29, %v9083_v43  ;;  %v3735_v26 = vld [vmem:[#allocation3 + $0x1c] sm:$0xf]  ;;  %v2953_v37 = vld [vmem:[#allocation3 + $0x34] sm:$0xf]  ;;  %v3736_v58 = vld [vmem:[#allocation3 + $0x40] sm:$0xf] }
 0x346   :  { %2697 = vrot.lane.b32.xlu0 %v2689_v61, %s6161_s27  ;;  %2613 = vrot.lane.b32.xlu1 %v2606_v22, %s6161_s27  ;;  %1969 = vst.msk [vmem:[#allocation4 + $0xac] sm:$0xf] %vm622_vm9, %v1958_v63  ;;  %v1749_v6 = vpop.permute.xlu1 %1748  ;;  %v1491_v52 = vrot.slane %v5695_v31, 7  ;;  %v3737_v63 = vld [vmem:[#allocation3 + $0x64] sm:$0xf]  ;;  %v2924_v35 = vsel %vm7166_vm6, %v2922_v4, %v2923_v20 }
 0x347   :  { %v1755_v28 = vrot.slane %v1749_v6, 4  ;;  %1510 = vst.msk [vmem:[#allocation3 + $0x8c] sm:$0xf] %vm615_vm2, %v1500_v8  ;;  %3739 = vst.msk [vmem:[#allocation4 + $0x3cc] sm:$0xf] %vm615_vm2, %v3735_v26 }
 0x348   :  { %v1492_v53 = vrot.slane %v1491_v52, 4  ;;  %1507 = vst.msk [vmem:[#allocation3 + $0x20] sm:$0xe] %vm749_vm7, %v1491_v52  ;;  %v8141_v56 = vld [vmem:[#allocation3 + $0x58] sm:$0xf] }
 0x349   :  { %v1759_v14 = vsel %vm419_vm1, %v1749_v6, %v1755_v28  ;;  %v2115_v54 = vpop.permute.xlu0 %2114  ;;  %3741 = vst.msk [vmem:[#allocation4 + $0x3f4] sm:$0xf] %vm615_vm2, %v3737_v63  ;;  %v2847_v28 = vrot.slane %v2845_v9, 4  ;;  %3740 = vst.msk [vmem:[#allocation4 + $0x3e0] sm:$0xf] %vm615_vm2, %v3736_v58  ;;  %v2967_v1 = vrot.slane %v8141_v56, 6 }
 0x34a   :  { %2779 = vrot.lane.b32.xlu0 %v2771_v32, %s6161_s27  ;;  %2695 = vrot.lane.b32.xlu1 %v2686_v34, %s6161_s27  ;;  %1767 = vst [vmem:[#allocation4 + $0x68] sm:$0xf] %v1759_v14  ;;  %v2122_v61 = vrot.slane %v2115_v54, 4  ;;  %v1753_v48 = vpop.permute.xlu1 %1752  ;;  %v5515_v32 = vrot.slane %v2905_v33, 10  ;;  %v1494_v27 = vsel %vm6656_vm5, %v1492_v53, %v1493_v40  ;;  %v3738_v45 = vld [vmem:[#allocation3 + $0x88] sm:$0xf] }
 0x34b   :  { %v1757_v22 = vrot.slane %v1753_v48, 4  ;;  %1508 = vst.msk [vmem:[#allocation3 + $0x44] sm:$0xf] %vm615_vm2, %v1494_v27  ;;  %3742 = vst.msk [vmem:[#allocation4 + $0x408] sm:$0xf] %vm615_vm2, %v3738_v45  ;;  %v2964_v33 = vrot.slane %v2953_v37, 6 }
 0x34c   :  { %v2126_v51 = vsel %vm419_vm1, %v2115_v54, %v2122_v61  ;;  %v5516_v54 = vrot.slane %v2952_v2, 10  ;;  %v2919_v61 = vrot.slane %v2917_v60, 4  ;;  %v2909_v18 = vld [vmem:[#allocation3 + $0x9c] sm:$0x33]  ;;  %v2969_v30 = vrot.slane %v2967_v1, 4 }
 0x34d   :  { %2134 = vst [vmem:[#allocation4 + $0xf4] sm:$0xf] %v2126_v51  ;;  %v1761_v34 = vsel %vm419_vm1, %v1753_v48, %v1757_v22  ;;  %v2193_v7 = vpop.permute.xlu0 %2192  ;;  %v3038_v51 = vld [vmem:[#allocation3 + $0x14] sm:$0xe]  ;;  %v2926_v53 = vrot.slane %v2909_v18, 6 }
 0x34e   :  { %2783 = vrot.lane.b32.xlu0 %v8060_v5, %s6161_s27  ;;  %2699 = vrot.lane.b32.xlu1 %v2692_v24, %s6161_s27  ;;  %1769 = vst [vmem:[#allocation4 + $0x90] sm:$0xf] %v1761_v34  ;;  %v2200_v15 = vrot.slane %v2193_v7, 4  ;;  %v1827_v44 = vpop.permute.xlu1 %1826  ;;  %v2806_v24 = vld [vmem:[#allocation3 + $0x7c] sm:$0xf]  ;;  %v2921_v9 = vsel %vm7166_vm6, %v2919_v61, %v2920_v11  ;;  %v5518_v5 = vrot.slane %v3038_v51, 9 }
 0x34f   :  { %v1833_v3 = vrot.slane %v1827_v44, 4  ;;  %v3039_v10 = vld [vmem:[#allocation3 + $0x38] sm:$0xf]  ;;  %v3040_v34 = vld [vmem:[#allocation3 + $0x5c] sm:$0xf] }
 0x350   :  { %v2204_v49 = vsel %vm419_vm1, %v2193_v7, %v2200_v15  ;;  %v3041_v17 = vld [vmem:[#allocation3 + $0x80] sm:$0xf] }
 0x351   :  { %2212 = vst [vmem:[#allocation4 + $0xf8] sm:$0xf] %v2204_v49  ;;  %v1837_v39 = vsel %vm419_vm1, %v1827_v44, %v1833_v3  ;;  %v3053_v44 = vrot.slane %v3040_v34, 5  ;;  %v2956_v3 = vld [vmem:[#allocation3 + $0xa0] sm:$0x3]  ;;  %v3056_v49 = vrot.slane %v3041_v17, 5 }
 0x352   :  { %2811 = vrot.lane.b32.xlu0 %v2803_v36, %s6161_s27  ;;  %2781 = vrot.lane.b32.xlu1 %v8078_v19, %s6161_s27  ;;  %v1590_v36 = vpop.permute.xlu0 %1589  ;;  %v1497_v19 = vsel %vm6656_vm5, %v1495_v59, %v1496_v13  ;;  %1845 = vst [vmem:[#allocation4 + $0x6c] sm:$0xf] %v1837_v39  ;;  %v1831_v6 = vpop.permute.xlu1 %1830  ;;  %v4212_v61 = vld [vmem:[#allocation3 + $0x20] sm:$0xc] }
 0x353   :  { %1599 = vst.msk [vmem:[#allocation4 + $0x34] sm:$0xf] %vm622_vm9, %v1590_v36  ;;  %v1835_v57 = vrot.slane %v1831_v6, 4  ;;  %v3055_v27 = vrot.slane %v3053_v44, 4  ;;  %v2973_v36 = vrot.slane %v2956_v3, 6  ;;  %v3058_v56 = vrot.slane %v3056_v49, 4 }
 0x354   :  { %1509 = vst.msk [vmem:[#allocation3 + $0x68] sm:$0xf] %vm615_vm2, %v1497_v19  ;;  %v4215_v3 = vld [vmem:[#allocation3 + $0x8c] sm:$0xf] }
 0x355   :  { %v1839_v42 = vsel %vm419_vm1, %v1831_v6, %v1835_v57  ;;  %v3057_v19 = vsel %vm7156_vm4, %v3055_v27, %v3056_v49  ;;  %v3042_v6 = vld [vmem:[#allocation3 + $0xa4] sm:$0x1]  ;;  %v3139_v57 = vld [vmem:[#allocation3 + $0x10] sm:$0xff] }
 0x356   :  { %2815 = vrot.lane.b32.xlu0 %v2805_v50, %s6161_s27  ;;  %2785 = vrot.lane.b32.xlu1 %v8088_v0, %s6161_s27  ;;  %v2918_v50 = vsel %vm7166_vm6, %v5515_v32, %v2917_v60  ;;  %v2848_v0 = vrot.slane %v2831_v16, 5  ;;  %v1751_v31 = vpop.permute.xlu0 %1750  ;;  %1847 = vst [vmem:[#allocation4 + $0x94] sm:$0xf] %v1839_v42  ;;  %v1874_v55 = vpop.permute.xlu1 %1873  ;;  %v2925_v32 = vrot.slane %v2923_v20, 4  ;;  %v2966_v60 = vrot.slane %v2964_v33, 4 }
 0x357   :  { %v1756_v14 = vrot.slane %v1751_v31, 4  ;;  %1884 = vst.msk [vmem:[#allocation4 + $0x74] sm:$0xf] %vm615_vm2, %v1874_v55  ;;  %v3059_v45 = vrot.slane %v3042_v6, 5  ;;  %v3273_v27 = vld [vmem:[#allocation3 + $0x10] sm:$0xcc] }
 0x358   :  { %v2849_v38 = vsel %vm7156_vm4, %v2847_v28, %v2848_v0  ;;  %v2927_v11 = vsel %vm7166_vm6, %v2925_v32, %v2926_v53  ;;  %v2968_v16 = vsel %vm7166_vm6, %v2966_v60, %v2967_v1  ;;  %v8212_v32 = vld [vmem:[#allocation3 + $0x7c] sm:$0xff]  ;;  %v4213_v53 = vld [vmem:[#allocation3 + $0x44] sm:$0xf]  ;;  %v8240_v6 = vld [vmem:[#allocation3 + $0x30] sm:$0xf] }
 0x359   :  { %v1760_v48 = vsel %vm419_vm1, %v1751_v31, %v1756_v14  ;;  %v8197_v14 = vld [vmem:[#allocation3 + $0x58] sm:$0xff]  ;;  %v3213_v17 = vrot.slane %v8212_v32, 5 }
 0x35a   :  { %2850 = vrot.lane.b32.xlu0 %v2840_v47, %s6161_s27  ;;  %2813 = vrot.lane.b32.xlu1 %v2804_v46, %s6161_s27  ;;  %v2955_v47 = vld [vmem:[#allocation3 + $0x7c] sm:$0xf]  ;;  %1768 = vst [vmem:[#allocation4 + $0x7c] sm:$0xf] %v1760_v48  ;;  %v1829_v52 = vpop.permute.xlu0 %1828  ;;  %v2965_v46 = vsel %vm7166_vm6, %v5516_v54, %v2964_v33  ;;  %v1878_v41 = vpop.permute.xlu1 %1877  ;;  %v3060_v33 = vsel %vm7156_vm4, %v3058_v56, %v3059_v45  ;;  %v3171_v48 = vld [vmem:[#allocation3 + $0x14] sm:$0xf] }
 0x35b   :  { %v1834_v22 = vrot.slane %v1829_v52, 4  ;;  %v2970_v12 = vrot.slane %v2955_v47, 6  ;;  %1886 = vst.msk [vmem:[#allocation4 + $0x9c] sm:$0xf] %vm615_vm2, %v1878_v41  ;;  %v4214_v47 = vld [vmem:[#allocation3 + $0x68] sm:$0xf] }
 0x35c   :  { %v5544_v41 = vrot.slane %v4212_v61, 10  ;;  %v3215_v61 = vrot.slane %v3213_v17, 4 }
 0x35d   :  { %v1838_v7 = vsel %vm419_vm1, %v1829_v52, %v1834_v22  ;;  %v2971_v13 = vsel %vm7166_vm6, %v2969_v30, %v2970_v12  ;;  %v2972_v39 = vrot.slane %v2970_v12, 4  ;;  %v8207_v22 = vld [vmem:[#allocation3 + $0x34] sm:$0xff]  ;;  %v4227_v30 = vrot.slane %v4214_v47, 6  ;;  %v4216_v12 = vld [vmem:[#allocation3 + $0xb0] sm:$0x3] }
 0x35e   :  { %2854 = vrot.lane.b32.xlu0 %v2846_v23, %s6161_s27  ;;  %2817 = vrot.lane.b32.xlu1 %v2806_v24, %s6161_s27  ;;  %1846 = vst [vmem:[#allocation4 + $0x80] sm:$0xf] %v1838_v7  ;;  %v1876_v40 = vpop.permute.xlu0 %1875  ;;  %v1960_v15 = vpop.permute.xlu1 %1959  ;;  %v3050_v23 = vrot.slane %v3039_v10, 5  ;;  %v3173_v10 = vld [vmem:[#allocation3 + $0x5c] sm:$0xf] }
 0x35f   :  { %1885 = vst.msk [vmem:[#allocation4 + $0x88] sm:$0xf] %vm615_vm2, %v1876_v40  ;;  %v2974_v26 = vsel %vm7166_vm6, %v2972_v39, %v2973_v36  ;;  %v3207_v40 = vrot.slane %v8207_v22, 5  ;;  %v3172_v39 = vld [vmem:[#allocation3 + $0x38] sm:$0xf] }
 0x360   :  { %1970 = vst.msk [vmem:[#allocation4 + $0xc0] sm:$0xf] %vm622_vm9, %v1960_v15  ;;  %v3051_v59 = vsel %vm7156_vm4, %v5518_v5, %v3050_v23  ;;  %v3052_v63 = vrot.slane %v3050_v23, 4  ;;  %v4224_v15 = vrot.slane %v4213_v53, 6  ;;  %v4229_v5 = vrot.slane %v4227_v30, 4 }
 0x362   :  { %2928 = vrot.lane.b32.xlu0 %v2918_v50, %s6161_s27  ;;  %2852 = vrot.lane.b32.xlu1 %v2843_v21, %s6161_s27  ;;  %v1962_v24 = vpop.permute.xlu0 %1961  ;;  %v3054_v0 = vsel %vm7156_vm4, %v3052_v63, %v3053_v44  ;;  %v4225_v23 = vsel %vm7166_vm6, %v5544_v41, %v4224_v15  ;;  %v4226_v44 = vrot.slane %v4224_v15, 4  ;;  %v3277_v15 = vld [vmem:[#allocation3 + $0xa0] sm:$0x33] }
 0x363   :  { %1971 = vst.msk [vmem:[#allocation4 + $0xd4] sm:$0xf] %vm622_vm9, %v1962_v24 }
 0x364   :  { %v1964_v29 = vpop.permute.xlu1 %1963  ;;  %4239 = vst.msk [vmem:[#allocation4 + $0x470] sm:$0xf] %vm615_vm2, %v4225_v23  ;;  %v4228_v49 = vsel %vm7166_vm6, %v4226_v44, %v4227_v30 }
 0x365   :  { %1972 = vst.msk [vmem:[#allocation4 + $0xe8] sm:$0xf] %vm622_vm9, %v1964_v29 }
 0x366   :  { %2932 = vrot.lane.b32.xlu0 %v2924_v35, %s6161_s27  ;;  %2856 = vrot.lane.b32.xlu1 %v2849_v38, %s6161_s27  ;;  %v2119_v4 = vpop.permute.xlu0 %2118  ;;  %4240 = vst.msk [vmem:[#allocation4 + $0x484] sm:$0xf] %vm615_vm2, %v4228_v49 }
 0x367   :  { %v2124_v2 = vrot.slane %v2119_v4, 4 }
 0x368   :  { %v2117_v43 = vpop.permute.xlu1 %2116 }
 0x369   :  { %v2123_v8 = vrot.slane %v2117_v43, 4  ;;  %v2128_v50 = vsel %vm419_vm1, %v2119_v4, %v2124_v2 }
 0x36a   :  { %2975 = vrot.lane.b32.xlu0 %v2965_v46, %s6161_s27  ;;  %2930 = vrot.lane.b32.xlu1 %v2921_v9, %s6161_s27  ;;  %2136 = vst [vmem:[#allocation4 + $0x11c] sm:$0xf] %v2128_v50  ;;  %v3195_v46 = vld [vmem:[#allocation3 + $0x10] sm:$0xee] }
 0x36b   :  { %v2127_v20 = vsel %vm419_vm1, %v2117_v43, %v2123_v8  ;;  %v5521_v7 = vrot.slane %v3195_v46, 9  ;;  %v3285_v43 = vrot.slane %v8207_v22, 6  ;;  %v2506_v8 = vld [vmem:[#allocation3 + $0xc] sm:$0xe] }
 0x36c   :  { %2135 = vst [vmem:[#allocation4 + $0x108] sm:$0xf] %v2127_v20  ;;  %v3288_v20 = vrot.slane %v8197_v14, 6  ;;  %v5506_v45 = vrot.slane %v2506_v8, 9 }
 0x36d   :  { %v3208_v24 = vsel %vm7156_vm4, %v5521_v7, %v3207_v40  ;;  %v3287_v53 = vrot.slane %v3285_v43, 4 }
 0x36e   :  { %2979 = vrot.lane.b32.xlu0 %v2971_v13, %s6161_s27  ;;  %2934 = vrot.lane.b32.xlu1 %v2927_v11, %s6161_s27  ;;  %v3210_v13 = vrot.slane %v8197_v14, 5  ;;  %v4233_v11 = vrot.slane %v4216_v12, 6 }
 0x370   :  { %v3212_v29 = vrot.slane %v3210_v13, 4 }
 0x371   :  { %v2197_v37 = vpop.permute.xlu0 %2196 }
 0x372   :  { %3061 = vrot.lane.b32.xlu0 %v3051_v59, %s6161_s27  ;;  %2977 = vrot.lane.b32.xlu1 %v2968_v16, %s6161_s27  ;;  %v2202_v58 = vrot.slane %v2197_v37, 4  ;;  %v2121_v21 = vpop.permute.xlu1 %2120  ;;  %v4230_v16 = vrot.slane %v4215_v3, 6  ;;  %v3214_v63 = vsel %vm7156_vm4, %v3212_v29, %v3213_v17  ;;  %v3289_v17 = vsel %vm7166_vm6, %v3287_v53, %v3288_v20  ;;  %v3407_v29 = vld [vmem:[#allocation3 + $0x3c] sm:$0xf]  ;;  %v3507_v53 = vld [vmem:[#allocation3 + $0x14] sm:$0xff] }
 0x373   :  { %v2125_v28 = vrot.slane %v2121_v21, 4 }
 0x374   :  { %v2206_v42 = vsel %vm419_vm1, %v2197_v37, %v2202_v58  ;;  %v4231_v36 = vsel %vm7166_vm6, %v4229_v5, %v4230_v16  ;;  %v4232_v4 = vrot.slane %v4230_v16, 4  ;;  %v8243_v37 = vld [vmem:[#allocation3 + $0x54] sm:$0xf] }
 0x375   :  { %2214 = vst [vmem:[#allocation4 + $0x120] sm:$0xf] %v2206_v42  ;;  %v2129_v31 = vsel %vm419_vm1, %v2121_v21, %v2125_v28  ;;  %v2240_v35 = vpop.permute.xlu0 %2239  ;;  %4241 = vst.msk [vmem:[#allocation4 + $0x498] sm:$0xf] %vm615_vm2, %v4231_v36  ;;  %v3209_v21 = vrot.slane %v3207_v40, 4  ;;  %v2518_v42 = vrot.slane %v8240_v6, 5 }
 0x376   :  { %3065 = vrot.lane.b32.xlu0 %v3057_v19, %s6161_s27  ;;  %2981 = vrot.lane.b32.xlu1 %v2974_v26, %s6161_s27  ;;  %2137 = vst [vmem:[#allocation4 + $0x130] sm:$0xf] %v2129_v31  ;;  %2251 = vst.msk [vmem:[#allocation4 + $0x100] sm:$0xf] %vm615_vm2, %v2240_v35  ;;  %v2195_v55 = vpop.permute.xlu1 %2194  ;;  %v5523_v19 = vrot.slane %v3273_v27, 10  ;;  %v4234_v58 = vsel %vm7166_vm6, %v4232_v4, %v4233_v11  ;;  %v2521_v31 = vrot.slane %v8243_v37, 5 }
 0x377   :  { %v2201_v54 = vrot.slane %v2195_v55, 4  ;;  %4242 = vst.msk [vmem:[#allocation4 + $0x4ac] sm:$0xf] %vm615_vm2, %v4234_v58  ;;  %v2519_v46 = vsel %vm7156_vm4, %v5506_v45, %v2518_v42  ;;  %v2520_v49 = vrot.slane %v2518_v42, 4  ;;  %v8288_v36 = vld [vmem:[#allocation3 + $0x60] sm:$0xf] }
 0x378   :  { %v2523_v30 = vrot.slane %v2521_v31, 4  ;;  %v3421_v6 = vrot.slane %v8288_v36, 5 }
 0x379   :  { %v2205_v1 = vsel %vm419_vm1, %v2195_v55, %v2201_v54  ;;  %v2244_v38 = vpop.permute.xlu0 %2243  ;;  %v3290_v54 = vrot.slane %v3288_v20, 4  ;;  %v2522_v20 = vsel %vm7156_vm4, %v2520_v49, %v2521_v31  ;;  %v8342_v49 = vld [vmem:[#allocation3 + $0x38] sm:$0xff] }
 0x37a   :  { %3147 = vrot.lane.b32.xlu0 %v3139_v57, %s6161_s27  ;;  %3063 = vrot.lane.b32.xlu1 %v3054_v0, %s6161_s27  ;;  %2213 = vst [vmem:[#allocation4 + $0x10c] sm:$0xf] %v2205_v1  ;;  %2253 = vst.msk [vmem:[#allocation4 + $0x128] sm:$0xf] %vm615_vm2, %v2244_v38  ;;  %v2199_v18 = vpop.permute.xlu1 %2198  ;;  %v3174_v57 = vld [vmem:[#allocation3 + $0x80] sm:$0xf]  ;;  %v3211_v38 = vsel %vm7156_vm4, %v3209_v21, %v3210_v13 }
 0x37b   :  { %v2203_v52 = vrot.slane %v2199_v18, 4  ;;  %v3199_v0 = vld [vmem:[#allocation3 + $0xa0] sm:$0x11]  ;;  %v3320_v1 = vld [vmem:[#allocation3 + $0x14] sm:$0xc] }
 0x37c   :  { %v3216_v47 = vrot.slane %v3199_v0, 5  ;;  %v5524_v12 = vrot.slane %v3320_v1, 10  ;;  %v3323_v13 = vld [vmem:[#allocation3 + $0x80] sm:$0xf] }
 0x37d   :  { %v2207_v51 = vsel %vm419_vm1, %v2199_v18, %v2203_v52  ;;  %v2326_v9 = vpop.permute.xlu0 %2325  ;;  %v8261_v18 = vld [vmem:[#allocation3 + $0x5c] sm:$0xf] }
 0x37e   :  { %3151 = vrot.lane.b32.xlu0 %v8197_v14, %s6161_s27  ;;  %3067 = vrot.lane.b32.xlu1 %v3060_v33, %s6161_s27  ;;  %2215 = vst [vmem:[#allocation4 + $0x134] sm:$0xf] %v2207_v51  ;;  %2337 = vst.msk [vmem:[#allocation4 + $0x14c] sm:$0xf] %vm622_vm9, %v2326_v9  ;;  %v3286_v14 = vsel %vm7166_vm6, %v5523_v19, %v3285_v43  ;;  %v3291_v33 = vrot.slane %v8212_v32, 6  ;;  %v3217_v40 = vsel %vm7156_vm4, %v3215_v61, %v3216_v47 }
 0x380   :  { %v3292_v51 = vsel %vm7166_vm6, %v3290_v54, %v3291_v33  ;;  %v3293_v16 = vrot.slane %v3291_v33, 4 }
 0x381   :  { %v2242_v34 = vpop.permute.xlu1 %2241 }
 0x382   :  { %3179 = vrot.lane.b32.xlu0 %v3171_v48, %s6161_s27  ;;  %3149 = vrot.lane.b32.xlu1 %v8207_v22, %s6161_s27  ;;  %2252 = vst.msk [vmem:[#allocation4 + $0x114] sm:$0xf] %vm615_vm2, %v2242_v34  ;;  %v3321_v48 = vld [vmem:[#allocation3 + $0x38] sm:$0xf] }
 0x383   :  { %v2509_v22 = vld [vmem:[#allocation3 + $0x78] sm:$0xf] }
 0x384   :  { %v2524_v7 = vrot.slane %v2509_v22, 5 }
 0x386   :  { %3183 = vrot.lane.b32.xlu0 %v3173_v10, %s6161_s27  ;;  %3153 = vrot.lane.b32.xlu1 %v8212_v32, %s6161_s27  ;;  %v3332_v32 = vrot.slane %v3321_v48, 6  ;;  %v3335_v10 = vrot.slane %v8261_v18, 6  ;;  %v2525_v23 = vsel %vm7156_vm4, %v2523_v30, %v2524_v7 }
 0x388   :  { %v2330_v60 = vpop.permute.xlu0 %2329  ;;  %v2246_v59 = vpop.permute.xlu1 %2245  ;;  %v3333_v11 = vsel %vm7166_vm6, %v5524_v12, %v3332_v32  ;;  %v3337_v3 = vrot.slane %v3335_v10, 4  ;;  %v3334_v21 = vrot.slane %v3332_v32, 4  ;;  %v3410_v12 = vld [vmem:[#allocation3 + $0xa8] sm:$0x1] }
 0x389   :  { %2339 = vst.msk [vmem:[#allocation4 + $0x174] sm:$0xf] %vm622_vm9, %v2330_v60 }
 0x38a   :  { %3218 = vrot.lane.b32.xlu0 %v3208_v24, %s6161_s27  ;;  %2254 = vst.msk [vmem:[#allocation4 + $0x13c] sm:$0xf] %vm615_vm2, %v2246_v59  ;;  %3181 = vrot.lane.b32.xlu1 %v3172_v39, %s6161_s27  ;;  %v3338_v24 = vrot.slane %v3323_v13, 6  ;;  %v3406_v59 = vld [vmem:[#allocation3 + $0x18] sm:$0xe]  ;;  %v3294_v39 = vrot.slane %v3277_v15, 6  ;;  %v3336_v33 = vsel %vm7166_vm6, %v3334_v21, %v3335_v10 }
 0x38b   :  { %v5526_v19 = vrot.slane %v3406_v59, 9  ;;  %v3427_v13 = vrot.slane %v3410_v12, 5  ;;  %v3539_v59 = vld [vmem:[#allocation3 + $0x18] sm:$0xf]  ;;  %v3540_v21 = vld [vmem:[#allocation3 + $0x3c] sm:$0xf] }
 0x38c   :  { %v2412_v2 = vpop.permute.xlu0 %2411  ;;  %v2328_v50 = vpop.permute.xlu1 %2327  ;;  %v3339_v8 = vsel %vm7166_vm6, %v3337_v3, %v3338_v24  ;;  %v3295_v58 = vsel %vm7166_vm6, %v3293_v16, %v3294_v39  ;;  %v3340_v1 = vrot.slane %v3338_v24, 4  ;;  %v3563_v16 = vld [vmem:[#allocation3 + $0x14] sm:$0xee]  ;;  %v8379_v12 = vld [vmem:[#allocation3 + $0x7c] sm:$0xf] }
 0x38d   :  { %v2419_v26 = vrot.slane %v2412_v2, 4  ;;  %2338 = vst.msk [vmem:[#allocation4 + $0x160] sm:$0xf] %vm622_vm9, %v2328_v50  ;;  %v2510_v50 = vld [vmem:[#allocation3 + $0x9c] sm:$0x1] }
 0x38e   :  { %3222 = vrot.lane.b32.xlu0 %v3214_v63, %s6161_s27  ;;  %3185 = vrot.lane.b32.xlu1 %v3174_v57, %s6161_s27  ;;  %v3418_v63 = vrot.slane %v3407_v29, 5  ;;  %v2526_v57 = vrot.slane %v2524_v7, 4  ;;  %v2527_v45 = vrot.slane %v2510_v50, 5 }
 0x38f   :  { %v2423_v28 = vsel %vm419_vm1, %v2412_v2, %v2419_v26 }
 0x390   :  { %2431 = vst [vmem:[#allocation4 + $0x190] sm:$0xf] %v2423_v28  ;;  %v2416_v56 = vpop.permute.xlu0 %2415  ;;  %v2332_v55 = vpop.permute.xlu1 %2331  ;;  %v3409_v28 = vld [vmem:[#allocation3 + $0x84] sm:$0xf]  ;;  %v3419_v31 = vsel %vm7156_vm4, %v5526_v19, %v3418_v63  ;;  %v2528_v54 = vsel %vm7156_vm4, %v2526_v57, %v2527_v45  ;;  %v5529_v19 = vrot.slane %v3563_v16, 9 }
 0x391   :  { %v2421_v35 = vrot.slane %v2416_v56, 4  ;;  %2340 = vst.msk [vmem:[#allocation4 + $0x188] sm:$0xf] %vm622_vm9, %v2332_v55  ;;  %v3424_v55 = vrot.slane %v3409_v28, 5  ;;  %v3641_v57 = vld [vmem:[#allocation3 + $0x14] sm:$0xcc] }
 0x392   :  { %3296 = vrot.lane.b32.xlu0 %v3286_v14, %s6161_s27  ;;  %3220 = vrot.lane.b32.xlu1 %v3211_v38, %s6161_s27  ;;  %v3423_v14 = vrot.slane %v3421_v6, 4 }
 0x393   :  { %v2425_v52 = vsel %vm419_vm1, %v2416_v56, %v2421_v35  ;;  %v3324_v56 = vld [vmem:[#allocation3 + $0xa4] sm:$0x3] }
 0x394   :  { %2433 = vst [vmem:[#allocation4 + $0x1b8] sm:$0xf] %v2425_v52  ;;  %v2444_v41 = vpop.permute.xlu0 %2443  ;;  %v2414_v9 = vpop.permute.xlu1 %2413  ;;  %v3341_v38 = vrot.slane %v3324_v56, 6  ;;  %v3425_v18 = vsel %vm7156_vm4, %v3423_v14, %v3424_v55  ;;  %v3653_v56 = vrot.slane %v8342_v49, 6 }
 0x395   :  { %2455 = vst.msk [vmem:[#allocation4 + $0x19c] sm:$0xf] %vm615_vm2, %v2444_v41  ;;  %v2420_v34 = vrot.slane %v2414_v9, 4  ;;  %v3420_v41 = vrot.slane %v3418_v63, 4 }
 0x396   :  { %2533 = vst.msk [vmem:[#allocation4 + $0x19c] sm:$0xf] %vm622_vm9, %v2519_v46  ;;  %3300 = vrot.lane.b32.xlu0 %v3292_v51, %s6161_s27  ;;  %3224 = vrot.lane.b32.xlu1 %v3217_v40, %s6161_s27  ;;  %v3342_v46 = vsel %vm7166_vm6, %v3340_v1, %v3341_v38  ;;  %v3426_v40 = vrot.slane %v3424_v55, 4  ;;  %v8367_v55 = vld [vmem:[#allocation3 + $0x58] sm:$0xf] }
 0x397   :  { %v2424_v5 = vsel %vm419_vm1, %v2414_v9, %v2420_v34  ;;  %v3422_v7 = vsel %vm7156_vm4, %v3420_v41, %v3421_v6  ;;  %v3567_v1 = vld [vmem:[#allocation3 + $0xa4] sm:$0x11] }
 0x398   :  { %v2448_v44 = vpop.permute.xlu0 %2447  ;;  %2432 = vst [vmem:[#allocation4 + $0x1a4] sm:$0xf] %v2424_v5  ;;  %v2418_v60 = vpop.permute.xlu1 %2417 }
 0x399   :  { %2457 = vst.msk [vmem:[#allocation4 + $0x1c4] sm:$0xf] %vm615_vm2, %v2448_v44  ;;  %v2422_v27 = vrot.slane %v2418_v60, 4  ;;  %v8332_v44 = vld [vmem:[#allocation3 + $0x5c] sm:$0xff] }
 0x39a   :  { %2535 = vst.msk [vmem:[#allocation4 + $0x1c4] sm:$0xf] %vm622_vm9, %v2525_v23  ;;  %3343 = vrot.lane.b32.xlu0 %v3333_v11, %s6161_s27  ;;  %3298 = vrot.lane.b32.xlu1 %v3289_v17, %s6161_s27  ;;  %v3428_v17 = vsel %vm7156_vm4, %v3426_v40, %v3427_v13  ;;  %v3656_v14 = vrot.slane %v8332_v44, 6 }
 0x39b   :  { %v2426_v4 = vsel %vm419_vm1, %v2418_v60, %v2422_v27 }
 0x39c   :  { %v2483_v2 = vpop.permute.xlu0 %2482  ;;  %2434 = vst [vmem:[#allocation4 + $0x1cc] sm:$0xf] %v2426_v4  ;;  %v2446_v26 = vpop.permute.xlu1 %2445  ;;  %v3541_v4 = vld [vmem:[#allocation3 + $0x60] sm:$0xf] }
 0x39d   :  { %v2490_v43 = vrot.slane %v2483_v2, 4  ;;  %2456 = vst.msk [vmem:[#allocation4 + $0x1b0] sm:$0xf] %vm615_vm2, %v2446_v26  ;;  %v8352_v26 = vld [vmem:[#allocation3 + $0x80] sm:$0xff] }
 0x39e   :  { %3347 = vrot.lane.b32.xlu0 %v3339_v8, %s6161_s27  ;;  %2534 = vst.msk [vmem:[#allocation4 + $0x1b0] sm:$0xf] %vm622_vm9, %v2522_v20  ;;  %3302 = vrot.lane.b32.xlu1 %v3295_v58, %s6161_s27  ;;  %v3578_v8 = vrot.slane %v8332_v44, 5  ;;  %v3581_v58 = vrot.slane %v8352_v26, 5 }
 0x39f   :  { %v2494_v0 = vsel %vm419_vm1, %v2483_v2, %v2490_v43  ;;  %v3575_v43 = vrot.slane %v8342_v49, 5 }
 0x3a0   :  { %2502 = vst [vmem:[#allocation4 + $0x194] sm:$0xf] %v2494_v0  ;;  %v2487_v37 = vpop.permute.xlu0 %2486  ;;  %v2450_v35 = vpop.permute.xlu1 %2449  ;;  %v3580_v20 = vrot.slane %v3578_v8, 4  ;;  %v5531_v0 = vrot.slane %v3641_v57, 10  ;;  %v8413_v57 = vld [vmem:[#allocation3 + $0x64] sm:$0xf] }
 0x3a1   :  { %v2492_v42 = vrot.slane %v2487_v37, 4  ;;  %2458 = vst.msk [vmem:[#allocation4 + $0x1d8] sm:$0xf] %vm615_vm2, %v2450_v35  ;;  %v3576_v50 = vsel %vm7156_vm4, %v5529_v19, %v3575_v43  ;;  %v2875_v35 = vld [vmem:[#allocation3 + $0x34] sm:$0xf] }
 0x3a2   :  { %3429 = vrot.lane.b32.xlu0 %v3419_v31, %s6161_s27  ;;  %2536 = vst.msk [vmem:[#allocation4 + $0x1d8] sm:$0xf] %vm622_vm9, %v2528_v54  ;;  %3345 = vrot.lane.b32.xlu1 %v3336_v33, %s6161_s27  ;;  %v3542_v54 = vld [vmem:[#allocation3 + $0x84] sm:$0xf]  ;;  %v3577_v33 = vrot.slane %v3575_v43, 4 }
 0x3a3   :  { %v2496_v61 = vsel %vm419_vm1, %v2487_v37, %v2492_v42  ;;  %v2874_v37 = vld [vmem:[#allocation3 + $0x10] sm:$0xe]  ;;  %v3582_v42 = vsel %vm7156_vm4, %v3580_v20, %v3581_v58 }
 0x3a4   :  { %2504 = vst [vmem:[#allocation4 + $0x1bc] sm:$0xf] %v2496_v61  ;;  %v2561_v47 = vpop.permute.xlu0 %2560  ;;  %v2485_v52 = vpop.permute.xlu1 %2484  ;;  %v5514_v61 = vrot.slane %v2874_v37, 9 }
 0x3a5   :  { %v2568_v48 = vrot.slane %v2561_v47, 4  ;;  %v2491_v22 = vrot.slane %v2485_v52, 4 }
 0x3a6   :  { %3433 = vrot.lane.b32.xlu0 %v3425_v18, %s6161_s27  ;;  %3349 = vrot.lane.b32.xlu1 %v3342_v46, %s6161_s27  ;;  %v2886_v18 = vrot.slane %v2875_v35, 5  ;;  %v3789_v35 = vrot.slane %v8413_v57, 5 }
 0x3a7   :  { %v2572_v30 = vsel %vm419_vm1, %v2561_v47, %v2568_v48  ;;  %v2495_v51 = vsel %vm419_vm1, %v2485_v52, %v2491_v22  ;;  %v3654_v48 = vsel %vm7166_vm6, %v5531_v0, %v3653_v56  ;;  %v3659_v52 = vrot.slane %v8352_v26, 6 }
 0x3a8   :  { %2580 = vst [vmem:[#allocation4 + $0x198] sm:$0xf] %v2572_v30  ;;  %v2565_v9 = vpop.permute.xlu0 %2564  ;;  %2503 = vst [vmem:[#allocation4 + $0x1a8] sm:$0xf] %v2495_v51  ;;  %v2489_v10 = vpop.permute.xlu1 %2488  ;;  %v2889_v22 = vrot.slane %v8367_v55, 5  ;;  %v3658_v30 = vrot.slane %v3656_v14, 4  ;;  %v2887_v40 = vsel %vm7156_vm4, %v5514_v61, %v2886_v18 }
 0x3a9   :  { %v2570_v32 = vrot.slane %v2565_v9, 4  ;;  %v2493_v34 = vrot.slane %v2489_v10, 4  ;;  %v3583_v51 = vrot.slane %v3581_v58, 4  ;;  %v3775_v58 = vld [vmem:[#allocation3 + $0x40] sm:$0xf] }
 0x3aa   :  { %3515 = vrot.lane.b32.xlu0 %v3507_v53, %s6161_s27  ;;  %3431 = vrot.lane.b32.xlu1 %v3422_v7, %s6161_s27  ;;  %v3688_v53 = vld [vmem:[#allocation3 + $0x18] sm:$0xc]  ;;  %v3692_v61 = vld [vmem:[#allocation3 + $0xa8] sm:$0x3] }
 0x3ab   :  { %v2574_v15 = vsel %vm419_vm1, %v2565_v9, %v2570_v32  ;;  %v2497_v5 = vsel %vm419_vm1, %v2489_v10, %v2493_v34  ;;  %v3584_v9 = vrot.slane %v3567_v1, 5  ;;  %v3579_v32 = vsel %vm7156_vm4, %v3577_v33, %v3578_v8  ;;  %v3689_v10 = vld [vmem:[#allocation3 + $0x3c] sm:$0xf]  ;;  %v8385_v34 = vld [vmem:[#allocation3 + $0x60] sm:$0xf] }
 0x3ac   :  { %2582 = vst [vmem:[#allocation4 + $0x1c0] sm:$0xf] %v2574_v15  ;;  %v2608_v23 = vpop.permute.xlu0 %2607  ;;  %2505 = vst [vmem:[#allocation4 + $0x1d0] sm:$0xf] %v2497_v5  ;;  %v2563_v11 = vpop.permute.xlu1 %2562  ;;  %v2891_v15 = vrot.slane %v2889_v22, 4  ;;  %v2892_v5 = vrot.slane %v8379_v12, 5 }
 0x3ad   :  { %2619 = vst.msk [vmem:[#allocation4 + $0x1a0] sm:$0xf] %vm615_vm2, %v2608_v23  ;;  %v2569_v60 = vrot.slane %v2563_v11, 4  ;;  %v3660_v23 = vsel %vm7166_vm6, %v3658_v30, %v3659_v52  ;;  %v3777_v1 = vld [vmem:[#allocation3 + $0x88] sm:$0xf] }
 0x3ae   :  { %3519 = vrot.lane.b32.xlu0 %v8332_v44, %s6161_s27  ;;  %3435 = vrot.lane.b32.xlu1 %v3428_v17, %s6161_s27  ;;  %v3700_v17 = vrot.slane %v3689_v10, 6  ;;  %v2894_v55 = vrot.slane %v2892_v5, 4 }
 0x3af   :  { %v2573_v3 = vsel %vm419_vm1, %v2563_v11, %v2569_v60  ;;  %v5532_v60 = vrot.slane %v3688_v53, 10 }
 0x3b0   :  { %v2612_v24 = vpop.permute.xlu0 %2611  ;;  %2581 = vst [vmem:[#allocation4 + $0x1ac] sm:$0xf] %v2573_v3  ;;  %v2567_v29 = vpop.permute.xlu1 %2566  ;;  %v3703_v3 = vrot.slane %v8385_v34, 6  ;;  %v3702_v33 = vrot.slane %v3700_v17, 4 }
 0x3b1   :  { %2621 = vst.msk [vmem:[#allocation4 + $0x1c8] sm:$0xf] %vm615_vm2, %v2612_v24  ;;  %v2571_v27 = vrot.slane %v2567_v29, 4 }
 0x3b2   :  { %3547 = vrot.lane.b32.xlu0 %v3539_v59, %s6161_s27  ;;  %3517 = vrot.lane.b32.xlu1 %v8342_v49, %s6161_s27  ;;  %v3585_v59 = vsel %vm7156_vm4, %v3583_v51, %v3584_v9  ;;  %v3645_v49 = vld [vmem:[#allocation3 + $0xa4] sm:$0x33]  ;;  %v3705_v43 = vrot.slane %v3703_v3, 4  ;;  %v3704_v30 = vsel %vm7166_vm6, %v3702_v33, %v3703_v3  ;;  %v3709_v51 = vrot.slane %v3692_v61, 6 }
 0x3b3   :  { %v2575_v39 = vsel %vm419_vm1, %v2567_v29, %v2571_v27  ;;  %v3655_v29 = vrot.slane %v3653_v56, 4  ;;  %v3691_v27 = vld [vmem:[#allocation3 + $0x84] sm:$0xf]  ;;  %v3662_v20 = vrot.slane %v3645_v49, 6 }
 0x3b4   :  { %v2694_v36 = vpop.permute.xlu0 %2693  ;;  %2583 = vst [vmem:[#allocation4 + $0x1d4] sm:$0xf] %v2575_v39  ;;  %v2610_v2 = vpop.permute.xlu1 %2609  ;;  %v2893_v39 = vsel %vm7156_vm4, %v2891_v15, %v2892_v5  ;;  %v3706_v8 = vrot.slane %v3691_v27, 6  ;;  %v3778_v5 = vld [vmem:[#allocation3 + $0xac] sm:$0x1] }
 0x3b5   :  { %2705 = vst.msk [vmem:[#allocation4 + $0x1ec] sm:$0xf] %vm622_vm9, %v2694_v36  ;;  %v3795_v27 = vrot.slane %v3778_v5, 5 }
 0x3b6   :  { %3551 = vrot.lane.b32.xlu0 %v3541_v4, %s6161_s27  ;;  %2620 = vst.msk [vmem:[#allocation4 + $0x1b4] sm:$0xf] %vm615_vm2, %v2610_v2  ;;  %3521 = vrot.lane.b32.xlu1 %v8352_v26, %s6161_s27  ;;  %v2888_v4 = vrot.slane %v2886_v18, 4  ;;  %v3701_v2 = vsel %vm7166_vm6, %v5532_v60, %v3700_v17  ;;  %v3661_v26 = vrot.slane %v3659_v52, 4  ;;  %v3707_v44 = vsel %vm7166_vm6, %v3705_v43, %v3706_v8  ;;  %v3875_v17 = vld [vmem:[#allocation3 + $0x18] sm:$0xff] }
 0x3b7   :  { %v3708_v12 = vrot.slane %v3706_v8, 4 }
 0x3b8   :  { %v2698_v63 = vpop.permute.xlu0 %2697  ;;  %v2614_v6 = vpop.permute.xlu1 %2613  ;;  %v2890_v56 = vsel %vm7156_vm4, %v2888_v4, %v2889_v22  ;;  %v3791_v22 = vrot.slane %v3789_v35, 4 }
 0x3b9   :  { %2707 = vst.msk [vmem:[#allocation4 + $0x214] sm:$0xf] %vm622_vm9, %v2698_v63  ;;  %v3774_v63 = vld [vmem:[#allocation3 + $0x1c] sm:$0xe] }
 0x3ba   :  { %3586 = vrot.lane.b32.xlu0 %v3576_v50, %s6161_s27  ;;  %2622 = vst.msk [vmem:[#allocation4 + $0x1dc] sm:$0xf] %vm615_vm2, %v2614_v6  ;;  %3549 = vrot.lane.b32.xlu1 %v3540_v21, %s6161_s27  ;;  %v3657_v6 = vsel %vm7166_vm6, %v3655_v29, %v3656_v14  ;;  %v2878_v21 = vld [vmem:[#allocation3 + $0xa0] sm:$0x1]  ;;  %v5534_v37 = vrot.slane %v3774_v63, 9  ;;  %v3663_v14 = vsel %vm7166_vm6, %v3661_v26, %v3662_v20 }
 0x3bb   :  { %v3907_v26 = vld [vmem:[#allocation3 + $0x1c] sm:$0xf] }
 0x3bc   :  { %v2780_v28 = vpop.permute.xlu0 %2779  ;;  %v2696_v31 = vpop.permute.xlu1 %2695  ;;  %v3931_v20 = vld [vmem:[#allocation3 + $0x18] sm:$0xee] }
 0x3bd   :  { %v2787_v45 = vrot.slane %v2780_v28, 4  ;;  %2706 = vst.msk [vmem:[#allocation4 + $0x200] sm:$0xf] %vm622_vm9, %v2696_v31  ;;  %v3786_v31 = vrot.slane %v3775_v58, 5 }
 0x3be   :  { %3590 = vrot.lane.b32.xlu0 %v3582_v42, %s6161_s27  ;;  %3553 = vrot.lane.b32.xlu1 %v3542_v54, %s6161_s27  ;;  %v2895_v54 = vrot.slane %v2878_v21, 5  ;;  %v3909_v21 = vld [vmem:[#allocation3 + $0x64] sm:$0xf] }
 0x3bf   :  { %v2791_v38 = vsel %vm419_vm1, %v2780_v28, %v2787_v45  ;;  %v3787_v18 = vsel %vm7156_vm4, %v5534_v37, %v3786_v31 }
 0x3c0   :  { %2799 = vst [vmem:[#allocation4 + $0x230] sm:$0xf] %v2791_v38  ;;  %v2784_v47 = vpop.permute.xlu0 %2783  ;;  %v2700_v41 = vpop.permute.xlu1 %2699 }
 0x3c1   :  { %v2789_v46 = vrot.slane %v2784_v47, 4  ;;  %2708 = vst.msk [vmem:[#allocation4 + $0x228] sm:$0xf] %vm622_vm9, %v2700_v41  ;;  %v2896_v41 = vsel %vm7156_vm4, %v2894_v55, %v2895_v54  ;;  %v4009_v55 = vld [vmem:[#allocation3 + $0x18] sm:$0xcc] }
 0x3c2   :  { %3664 = vrot.lane.b32.xlu0 %v3654_v48, %s6161_s27  ;;  %3588 = vrot.lane.b32.xlu1 %v3579_v32, %s6161_s27  ;;  %v3908_v54 = vld [vmem:[#allocation3 + $0x40] sm:$0xf] }
 0x3c3   :  { %v2793_v7 = vsel %vm419_vm1, %v2784_v47, %v2789_v46  ;;  %v3792_v46 = vrot.slane %v3777_v1, 5  ;;  %v5539_v1 = vrot.slane %v4009_v55, 10 }
 0x3c4   :  { %2801 = vst [vmem:[#allocation4 + $0x258] sm:$0xf] %v2793_v7  ;;  %v2812_v13 = vpop.permute.xlu0 %2811  ;;  %v2782_v11 = vpop.permute.xlu1 %2781 }
 0x3c5   :  { %2823 = vst.msk [vmem:[#allocation4 + $0x23c] sm:$0xf] %vm615_vm2, %v2812_v13  ;;  %v2788_v24 = vrot.slane %v2782_v11, 4  ;;  %v3793_v10 = vsel %vm7156_vm4, %v3791_v22, %v3792_v46  ;;  %v3788_v13 = vrot.slane %v3786_v31, 4  ;;  %v3794_v29 = vrot.slane %v3792_v46, 4 }
 0x3c6   :  { %2901 = vst.msk [vmem:[#allocation4 + $0x23c] sm:$0xf] %vm622_vm9, %v2887_v40  ;;  %3668 = vrot.lane.b32.xlu0 %v3660_v23, %s6161_s27  ;;  %3592 = vrot.lane.b32.xlu1 %v3585_v59, %s6161_s27  ;;  %v3710_v40 = vsel %vm7166_vm6, %v3708_v12, %v3709_v51  ;;  %v3910_v46 = vld [vmem:[#allocation3 + $0x88] sm:$0xf] }
 0x3c7   :  { %v2792_v16 = vsel %vm419_vm1, %v2782_v11, %v2788_v24  ;;  %v3790_v59 = vsel %vm7156_vm4, %v3788_v13, %v3789_v35  ;;  %v3935_v51 = vld [vmem:[#allocation3 + $0xa8] sm:$0x11] }
 0x3c8   :  { %v2816_v36 = vpop.permute.xlu0 %2815  ;;  %2800 = vst [vmem:[#allocation4 + $0x244] sm:$0xf] %v2792_v16  ;;  %v2786_v19 = vpop.permute.xlu1 %2785 }
 0x3c9   :  { %2825 = vst.msk [vmem:[#allocation4 + $0x264] sm:$0xf] %vm615_vm2, %v2816_v36  ;;  %v2790_v50 = vrot.slane %v2786_v19, 4  ;;  %v8455_v36 = vld [vmem:[#allocation3 + $0x60] sm:$0xff] }
 0x3ca   :  { %2903 = vst.msk [vmem:[#allocation4 + $0x264] sm:$0xf] %vm622_vm9, %v2893_v39  ;;  %3711 = vrot.lane.b32.xlu0 %v3701_v2, %s6161_s27  ;;  %3666 = vrot.lane.b32.xlu1 %v3657_v6, %s6161_s27  ;;  %v8465_v6 = vld [vmem:[#allocation3 + $0x3c] sm:$0xff]  ;;  %v3946_v37 = vrot.slane %v8455_v36, 5  ;;  %v4024_v22 = vrot.slane %v8455_v36, 6 }
 0x3cb   :  { %v2794_v28 = vsel %vm419_vm1, %v2786_v19, %v2790_v50  ;;  %v3796_v19 = vsel %vm7156_vm4, %v3794_v29, %v3795_v27 }
 0x3cc   :  { %v2851_v0 = vpop.permute.xlu0 %2850  ;;  %2802 = vst [vmem:[#allocation4 + $0x26c] sm:$0xf] %v2794_v28  ;;  %v2814_v42 = vpop.permute.xlu1 %2813  ;;  %v3948_v35 = vrot.slane %v3946_v37, 4 }
 0x3cd   :  { %v2858_v45 = vrot.slane %v2851_v0, 4  ;;  %2824 = vst.msk [vmem:[#allocation4 + $0x250] sm:$0xf] %vm615_vm2, %v2814_v42 }
 0x3ce   :  { %3715 = vrot.lane.b32.xlu0 %v3707_v44, %s6161_s27  ;;  %2902 = vst.msk [vmem:[#allocation4 + $0x250] sm:$0xf] %vm622_vm9, %v2890_v56  ;;  %3670 = vrot.lane.b32.xlu1 %v3663_v14, %s6161_s27  ;;  %v3943_v56 = vrot.slane %v8465_v6, 5 }
 0x3cf   :  { %v2862_v38 = vsel %vm419_vm1, %v2851_v0, %v2858_v45  ;;  %v5537_v0 = vrot.slane %v3931_v20, 9  ;;  %v8475_v45 = vld [vmem:[#allocation3 + $0x84] sm:$0xff] }
 0x3d0   :  { %2870 = vst [vmem:[#allocation4 + $0x234] sm:$0xf] %v2862_v38  ;;  %v2855_v47 = vpop.permute.xlu0 %2854  ;;  %v2818_v52 = vpop.permute.xlu1 %2817  ;;  %v3949_v14 = vrot.slane %v8475_v45, 5  ;;  %v4021_v38 = vrot.slane %v8465_v6, 6  ;;  %v4027_v13 = vrot.slane %v8475_v45, 6 }
 0x3d1   :  { %v2860_v48 = vrot.slane %v2855_v47, 4  ;;  %2826 = vst.msk [vmem:[#allocation4 + $0x278] sm:$0xf] %vm615_vm2, %v2818_v52  ;;  %v3944_v42 = vsel %vm7156_vm4, %v5537_v0, %v3943_v56  ;;  %v3243_v52 = vld [vmem:[#allocation3 + $0x38] sm:$0xf] }
 0x3d2   :  { %3797 = vrot.lane.b32.xlu0 %v3787_v18, %s6161_s27  ;;  %2904 = vst.msk [vmem:[#allocation4 + $0x278] sm:$0xf] %vm622_vm9, %v2896_v41  ;;  %3713 = vrot.lane.b32.xlu1 %v3704_v30, %s6161_s27  ;;  %v3242_v18 = vld [vmem:[#allocation3 + $0x14] sm:$0xe]  ;;  %v3945_v41 = vrot.slane %v3943_v56, 4 }
 0x3d3   :  { %v2864_v9 = vsel %vm419_vm1, %v2855_v47, %v2860_v48  ;;  %v3950_v47 = vsel %vm7156_vm4, %v3948_v35, %v3949_v14  ;;  %v8492_v30 = vld [vmem:[#allocation3 + $0x5c] sm:$0xf]  ;;  %v3246_v0 = vld [vmem:[#allocation3 + $0xa4] sm:$0x1] }
 0x3d4   :  { %2872 = vst [vmem:[#allocation4 + $0x25c] sm:$0xf] %v2864_v9  ;;  %v2929_v32 = vpop.permute.xlu0 %2928  ;;  %v2853_v34 = vpop.permute.xlu1 %2852  ;;  %v3947_v5 = vsel %vm7156_vm4, %v3945_v41, %v3946_v37 }
 0x3d5   :  { %v2936_v53 = vrot.slane %v2929_v32, 4  ;;  %v2859_v7 = vrot.slane %v2853_v34, 4 }
 0x3d6   :  { %3801 = vrot.lane.b32.xlu0 %v3793_v10, %s6161_s27  ;;  %3717 = vrot.lane.b32.xlu1 %v3710_v40, %s6161_s27  ;;  %v3254_v10 = vrot.slane %v3243_v52, 5  ;;  %v4026_v40 = vrot.slane %v4024_v22, 4 }
 0x3d7   :  { %v2940_v15 = vsel %vm419_vm1, %v2929_v32, %v2936_v53  ;;  %v2863_v23 = vsel %vm419_vm1, %v2853_v34, %v2859_v7  ;;  %v4022_v32 = vsel %vm7166_vm6, %v5539_v1, %v4021_v38  ;;  %v5522_v53 = vrot.slane %v3242_v18, 9  ;;  %v8539_v1 = vld [vmem:[#allocation3 + $0x88] sm:$0xff] }
 0x3d8   :  { %2948 = vst [vmem:[#allocation4 + $0x238] sm:$0xf] %v2940_v15  ;;  %v2933_v11 = vpop.permute.xlu0 %2932  ;;  %2871 = vst [vmem:[#allocation4 + $0x248] sm:$0xf] %v2863_v23  ;;  %v2857_v3 = vpop.permute.xlu1 %2856  ;;  %v3257_v15 = vrot.slane %v8492_v30, 5 }
 0x3d9   :  { %v2938_v60 = vrot.slane %v2933_v11, 4  ;;  %v2861_v24 = vrot.slane %v2857_v3, 4  ;;  %v3245_v23 = vld [vmem:[#allocation3 + $0x80] sm:$0xf] }
 0x3da   :  { %3883 = vrot.lane.b32.xlu0 %v3875_v17, %s6161_s27  ;;  %3799 = vrot.lane.b32.xlu1 %v3790_v59, %s6161_s27  ;;  %v4028_v59 = vsel %vm7166_vm6, %v4026_v40, %v4027_v13  ;;  %v3259_v27 = vrot.slane %v3257_v15, 4 }
 0x3db   :  { %v2942_v49 = vsel %vm419_vm1, %v2933_v11, %v2938_v60  ;;  %v2865_v16 = vsel %vm419_vm1, %v2857_v3, %v2861_v24  ;;  %v3951_v11 = vrot.slane %v3949_v14, 4  ;;  %v3952_v60 = vrot.slane %v3935_v51, 5 }
 0x3dc   :  { %2950 = vst [vmem:[#allocation4 + $0x260] sm:$0xf] %v2942_v49  ;;  %v2976_v39 = vpop.permute.xlu0 %2975  ;;  %2873 = vst [vmem:[#allocation4 + $0x270] sm:$0xf] %v2865_v16  ;;  %v2931_v4 = vpop.permute.xlu1 %2930  ;;  %v3255_v24 = vsel %vm7156_vm4, %v5522_v53, %v3254_v10  ;;  %v3260_v49 = vrot.slane %v3245_v23, 5 }
 0x3dd   :  { %2987 = vst.msk [vmem:[#allocation4 + $0x240] sm:$0xf] %vm615_vm2, %v2976_v39  ;;  %v2937_v2 = vrot.slane %v2931_v4, 4  ;;  %v3953_v39 = vsel %vm7156_vm4, %v3951_v11, %v3952_v60 }
 0x3de   :  { %3887 = vrot.lane.b32.xlu0 %v8455_v36, %s6161_s27  ;;  %3803 = vrot.lane.b32.xlu1 %v3796_v19, %s6161_s27  ;;  %v4023_v36 = vrot.slane %v4021_v38, 4 }
 0x3df   :  { %v2941_v43 = vsel %vm419_vm1, %v2931_v4, %v2937_v2  ;;  %v4013_v4 = vld [vmem:[#allocation3 + $0xa8] sm:$0x33] }
 0x3e0   :  { %v2980_v8 = vpop.permute.xlu0 %2979  ;;  %2949 = vst [vmem:[#allocation4 + $0x24c] sm:$0xf] %v2941_v43  ;;  %v2935_v63 = vpop.permute.xlu1 %2934  ;;  %v3261_v43 = vsel %vm7156_vm4, %v3259_v27, %v3260_v49  ;;  %v4025_v20 = vsel %vm7166_vm6, %v4023_v36, %v4024_v22  ;;  %v4317_v22 = vrot.slane %v8539_v1, 5 }
 0x3e1   :  { %2989 = vst.msk [vmem:[#allocation4 + $0x268] sm:$0xf] %vm615_vm2, %v2980_v8  ;;  %v2939_v50 = vrot.slane %v2935_v63, 4  ;;  %v4243_v8 = vld [vmem:[#allocation3 + $0x1c] sm:$0xff] }
 0x3e2   :  { %3915 = vrot.lane.b32.xlu0 %v3907_v26, %s6161_s27  ;;  %3885 = vrot.lane.b32.xlu1 %v8465_v6, %s6161_s27  ;;  %v4319_v27 = vrot.slane %v4317_v22, 4 }
 0x3e3   :  { %v2943_v58 = vsel %vm419_vm1, %v2935_v63, %v2939_v50  ;;  %v3256_v63 = vrot.slane %v3254_v10, 4  ;;  %v4029_v50 = vrot.slane %v4027_v13, 4 }
 0x3e4   :  { %v3062_v57 = vpop.permute.xlu0 %3061  ;;  %2951 = vst [vmem:[#allocation4 + $0x274] sm:$0xf] %v2943_v58  ;;  %v2978_v28 = vpop.permute.xlu1 %2977  ;;  %v8524_v58 = vld [vmem:[#allocation3 + $0x64] sm:$0xff] }
 0x3e5   :  { %3073 = vst.msk [vmem:[#allocation4 + $0x28c] sm:$0xf] %vm622_vm9, %v3062_v57  ;;  %v4030_v57 = vrot.slane %v4013_v4, 6  ;;  %v4314_v35 = vrot.slane %v8524_v58, 5  ;;  %v3258_v14 = vsel %vm7156_vm4, %v3256_v63, %v3257_v15  ;;  %v4303_v15 = vld [vmem:[#allocation3 + $0xac] sm:$0x11] }
 0x3e6   :  { %3919 = vrot.lane.b32.xlu0 %v3909_v21, %s6161_s27  ;;  %2988 = vst.msk [vmem:[#allocation4 + $0x254] sm:$0xf] %vm615_vm2, %v2978_v28  ;;  %3889 = vrot.lane.b32.xlu1 %v8475_v45, %s6161_s27  ;;  %v4299_v21 = vld [vmem:[#allocation3 + $0x1c] sm:$0xee]  ;;  %v4381_v63 = vld [vmem:[#allocation3 + $0xac] sm:$0x33] }
 0x3e7   :  { %v8526_v28 = vld [vmem:[#allocation3 + $0x40] sm:$0xff]  ;;  %v4031_v55 = vsel %vm7166_vm6, %v4029_v50, %v4030_v57  ;;  %v4316_v52 = vrot.slane %v4314_v35, 4 }
 0x3e8   :  { %v3066_v44 = vpop.permute.xlu0 %3065  ;;  %v2982_v31 = vpop.permute.xlu1 %2981  ;;  %v4389_v10 = vrot.slane %v8526_v28, 6  ;;  %v8582_v57 = vld [vmem:[#allocation3 + $0x64] sm:$0xf] }
 0x3e9   :  { %3075 = vst.msk [vmem:[#allocation4 + $0x2b4] sm:$0xf] %vm622_vm9, %v3066_v44 }
 0x3ea   :  { %3954 = vrot.lane.b32.xlu0 %v3944_v42, %s6161_s27  ;;  %2990 = vst.msk [vmem:[#allocation4 + $0x27c] sm:$0xf] %vm615_vm2, %v2982_v31  ;;  %3917 = vrot.lane.b32.xlu1 %v3908_v54, %s6161_s27  ;;  %v5545_v42 = vrot.slane %v4299_v21, 9  ;;  %v4311_v31 = vrot.slane %v8526_v28, 5  ;;  %v3262_v54 = vrot.slane %v3260_v49, 4  ;;  %v4320_v49 = vrot.slane %v4303_v15, 5 }
 0x3ec   :  { %v3148_v33 = vpop.permute.xlu0 %3147  ;;  %v3064_v48 = vpop.permute.xlu1 %3063  ;;  %v4313_v40 = vrot.slane %v4311_v31, 4 }
 0x3ed   :  { %v3155_v61 = vrot.slane %v3148_v33, 4  ;;  %3074 = vst.msk [vmem:[#allocation4 + $0x2a0] sm:$0xf] %vm622_vm9, %v3064_v48  ;;  %v4312_v48 = vsel %vm7156_vm4, %v5545_v42, %v4311_v31  ;;  %v4071_v31 = vrot.slane %v8582_v57, 6 }
 0x3ee   :  { %3958 = vrot.lane.b32.xlu0 %v3950_v47, %s6161_s27  ;;  %3921 = vrot.lane.b32.xlu1 %v3910_v46, %s6161_s27  ;;  %v4377_v46 = vld [vmem:[#allocation3 + $0x1c] sm:$0xcc] }
 0x3ef   :  { %v3159_v12 = vsel %vm419_vm1, %v3148_v33, %v3155_v61  ;;  %v3263_v33 = vrot.slane %v3246_v0, 5  ;;  %v5547_v51 = vrot.slane %v4377_v46, 10  ;;  %v8603_v46 = vld [vmem:[#allocation3 + $0x68] sm:$0xf] }
 0x3f0   :  { %3167 = vst [vmem:[#allocation4 + $0x2d0] sm:$0xf] %v3159_v12  ;;  %v3152_v9 = vpop.permute.xlu0 %3151  ;;  %v3068_v7 = vpop.permute.xlu1 %3067 }
 0x3f1   :  { %v3157_v34 = vrot.slane %v3152_v9, 4  ;;  %3076 = vst.msk [vmem:[#allocation4 + $0x2c8] sm:$0xf] %vm622_vm9, %v3068_v7  ;;  %v3264_v41 = vsel %vm7156_vm4, %v3262_v54, %v3263_v33  ;;  %v4390_v60 = vsel %vm7166_vm6, %v5547_v51, %v4389_v10  ;;  %v4059_v54 = vld [vmem:[#allocation3 + $0x88] sm:$0xf] }
 0x3f2   :  { %4032 = vrot.lane.b32.xlu0 %v4022_v32, %s6161_s27  ;;  %3956 = vrot.lane.b32.xlu1 %v3947_v5, %s6161_s27  ;;  %v4318_v32 = vsel %vm7156_vm4, %v4316_v52, %v4317_v22  ;;  %v4143_v22 = vld [vmem:[#allocation3 + $0x44] sm:$0xf] }
 0x3f3   :  { %v3161_v17 = vsel %vm419_vm1, %v3152_v9, %v3157_v34  ;;  %v4392_v34 = vrot.slane %v8524_v58, 6  ;;  %v4154_v15 = vrot.slane %v4143_v22, 5 }
 0x3f4   :  { %3169 = vst [vmem:[#allocation4 + $0x2f8] sm:$0xf] %v3161_v17  ;;  %v3180_v3 = vpop.permute.xlu0 %3179  ;;  %v3150_v29 = vpop.permute.xlu1 %3149 }
 0x3f5   :  { %3191 = vst.msk [vmem:[#allocation4 + $0x2dc] sm:$0xf] %vm615_vm2, %v3180_v3  ;;  %v3156_v16 = vrot.slane %v3150_v29, 4  ;;  %v4394_v3 = vrot.slane %v4392_v34, 4 }
 0x3f6   :  { %3269 = vst.msk [vmem:[#allocation4 + $0x2dc] sm:$0xf] %vm622_vm9, %v3255_v24  ;;  %4036 = vrot.lane.b32.xlu0 %v4028_v59, %s6161_s27  ;;  %3960 = vrot.lane.b32.xlu1 %v3953_v39, %s6161_s27  ;;  %v4395_v24 = vrot.slane %v8539_v1, 6 }
 0x3f7   :  { %v3160_v2 = vsel %vm419_vm1, %v3150_v29, %v3156_v16  ;;  %v4315_v29 = vsel %vm7156_vm4, %v4313_v40, %v4314_v35 }
 0x3f8   :  { %v3184_v19 = vpop.permute.xlu0 %3183  ;;  %3168 = vst [vmem:[#allocation4 + $0x2e4] sm:$0xf] %v3160_v2  ;;  %v3154_v26 = vpop.permute.xlu1 %3153  ;;  %v4396_v4 = vsel %vm7166_vm6, %v4394_v3, %v4395_v24  ;;  %v4397_v0 = vrot.slane %v4395_v24, 4 }
 0x3f9   :  { %3193 = vst.msk [vmem:[#allocation4 + $0x304] sm:$0xf] %vm615_vm2, %v3184_v19  ;;  %v3158_v6 = vrot.slane %v3154_v26, 4 }
 0x3fa   :  { %3271 = vst.msk [vmem:[#allocation4 + $0x304] sm:$0xf] %vm622_vm9, %v3261_v43  ;;  %4251 = vrot.lane.b32.xlu0 %v4243_v8, %s6161_s27  ;;  %4034 = vrot.lane.b32.xlu1 %v4025_v20, %s6161_s27  ;;  %v4321_v43 = vsel %vm7156_vm4, %v4319_v27, %v4320_v49  ;;  %v4391_v8 = vrot.slane %v4389_v10, 4  ;;  %v8611_v10 = vld [vmem:[#allocation3 + $0x60] sm:$0xf] }
 0x3fb   :  { %v3162_v56 = vsel %vm419_vm1, %v3154_v26, %v3158_v6  ;;  %v4275_v26 = vld [vmem:[#allocation3 + $0x20] sm:$0xf]  ;;  %v3625_v49 = vrot.slane %v8611_v10, 5 }
 0x3fc   :  { %v3219_v37 = vpop.permute.xlu0 %3218  ;;  %3170 = vst [vmem:[#allocation4 + $0x30c] sm:$0xf] %v3162_v56  ;;  %v3182_v44 = vpop.permute.xlu1 %3181  ;;  %v4398_v56 = vrot.slane %v4381_v63, 6  ;;  %v8630_v63 = vld [vmem:[#allocation3 + $0x68] sm:$0xf] }
 0x3fd   :  { %v3226_v45 = vrot.slane %v3219_v37, 4  ;;  %3192 = vst.msk [vmem:[#allocation4 + $0x2f0] sm:$0xf] %vm615_vm2, %v3182_v44 }
 0x3fe   :  { %4255 = vrot.lane.b32.xlu0 %v8524_v58, %s6161_s27  ;;  %3270 = vst.msk [vmem:[#allocation4 + $0x2f0] sm:$0xf] %vm622_vm9, %v3258_v14  ;;  %4038 = vrot.lane.b32.xlu1 %v4031_v55, %s6161_s27  ;;  %v4056_v58 = vld [vmem:[#allocation3 + $0x1c] sm:$0xc]  ;;  %v4399_v33 = vsel %vm7166_vm6, %v4397_v0, %v4398_v56  ;;  %v3627_v56 = vrot.slane %v3625_v49, 4 }
 0x3ff   :  { %v3230_v38 = vsel %vm419_vm1, %v3219_v37, %v3226_v45  ;;  %v4057_v37 = vld [vmem:[#allocation3 + $0x40] sm:$0xf]  ;;  %v4277_v45 = vld [vmem:[#allocation3 + $0x68] sm:$0xf]  ;;  %v5540_v14 = vrot.slane %v4056_v58, 10 }
 0x400   :  { %3238 = vst [vmem:[#allocation4 + $0x2d4] sm:$0xf] %v3230_v38  ;;  %v3223_v61 = vpop.permute.xlu0 %3222  ;;  %v3186_v18 = vpop.permute.xlu1 %3185  ;;  %v4068_v55 = vrot.slane %v4057_v37, 6  ;;  %v4276_v38 = vld [vmem:[#allocation3 + $0x44] sm:$0xf] }
 0x401   :  { %v3228_v47 = vrot.slane %v3223_v61, 4  ;;  %3194 = vst.msk [vmem:[#allocation4 + $0x318] sm:$0xf] %vm615_vm2, %v3186_v18 }
 0x402   :  { %4322 = vrot.lane.b32.xlu0 %v4312_v48, %s6161_s27  ;;  %3272 = vst.msk [vmem:[#allocation4 + $0x318] sm:$0xf] %vm622_vm9, %v3264_v41  ;;  %4253 = vrot.lane.b32.xlu1 %v8526_v28, %s6161_s27  ;;  %v4393_v28 = vsel %vm7166_vm6, %v4391_v8, %v4392_v34  ;;  %v4142_v48 = vld [vmem:[#allocation3 + $0x20] sm:$0xe]  ;;  %v4069_v18 = vsel %vm7166_vm6, %v5540_v14, %v4068_v55  ;;  %v4104_v41 = vld [vmem:[#allocation3 + $0x44] sm:$0xf] }
 0x403   :  { %v3232_v30 = vsel %vm419_vm1, %v3223_v61, %v3228_v47  ;;  %v4073_v61 = vrot.slane %v4071_v31, 4  ;;  %v4074_v47 = vrot.slane %v4059_v54, 6  ;;  %4108 = vst.msk [vmem:[#allocation4 + $0x480] sm:$0xf] %vm615_vm2, %v4104_v41  ;;  %v4070_v40 = vrot.slane %v4068_v55, 4 }
 0x404   :  { %3240 = vst [vmem:[#allocation4 + $0x2fc] sm:$0xf] %v3232_v30  ;;  %v3297_v12 = vpop.permute.xlu0 %3296  ;;  %v3221_v53 = vpop.permute.xlu1 %3220  ;;  %v3610_v30 = vld [vmem:[#allocation3 + $0x18] sm:$0xe]  ;;  %v4427_v14 = vld [vmem:[#allocation3 + $0x8c] sm:$0xf] }
 0x405   :  { %v3304_v9 = vrot.slane %v3297_v12, 4  ;;  %v3227_v7 = vrot.slane %v3221_v53, 4  ;;  %v4072_v8 = vsel %vm7166_vm6, %v4070_v40, %v4071_v31  ;;  %v3614_v41 = vld [vmem:[#allocation3 + $0xa8] sm:$0x1] }
 0x406   :  { %4326 = vrot.lane.b32.xlu0 %v4318_v32, %s6161_s27  ;;  %4257 = vrot.lane.b32.xlu1 %v8539_v1, %s6161_s27  ;;  %v4278_v32 = vld [vmem:[#allocation3 + $0x8c] sm:$0xf] }
 0x407   :  { %v3308_v13 = vsel %vm419_vm1, %v3297_v12, %v3304_v9  ;;  %v3231_v5 = vsel %vm419_vm1, %v3221_v53, %v3227_v7  ;;  %v5542_v12 = vrot.slane %v4142_v48, 9  ;;  %v4075_v9 = vsel %vm7166_vm6, %v4073_v61, %v4074_v47  ;;  %v8609_v53 = vld [vmem:[#allocation3 + $0x3c] sm:$0xf] }
 0x408   :  { %3316 = vst [vmem:[#allocation4 + $0x2d8] sm:$0xf] %v3308_v13  ;;  %v3301_v23 = vpop.permute.xlu0 %3300  ;;  %3239 = vst [vmem:[#allocation4 + $0x2e8] sm:$0xf] %v3231_v5  ;;  %v3225_v17 = vpop.permute.xlu1 %3224  ;;  %v4060_v13 = vld [vmem:[#allocation3 + $0xac] sm:$0x3] }
 0x409   :  { %v3306_v11 = vrot.slane %v3301_v23, 4  ;;  %v3229_v59 = vrot.slane %v3225_v17, 4  ;;  %v4157_v5 = vrot.slane %v8603_v46, 5  ;;  %v4155_v3 = vsel %vm7156_vm4, %v5542_v12, %v4154_v15 }
 0x40a   :  { %4400 = vrot.lane.b32.xlu0 %v4390_v60, %s6161_s27  ;;  %4324 = vrot.lane.b32.xlu1 %v4315_v29, %s6161_s27  ;;  %v4106_v60 = vld [vmem:[#allocation3 + $0x8c] sm:$0xf]  ;;  %v5530_v29 = vrot.slane %v3610_v30, 9  ;;  %v3622_v27 = vrot.slane %v8609_v53, 5 }
 0x40b   :  { %v3310_v16 = vsel %vm419_vm1, %v3301_v23, %v3306_v11  ;;  %v3233_v39 = vsel %vm419_vm1, %v3225_v17, %v3229_v59  ;;  %v4145_v23 = vld [vmem:[#allocation3 + $0x8c] sm:$0xf]  ;;  %v4103_v11 = vld [vmem:[#allocation3 + $0x20] sm:$0xf]  ;;  %v4159_v24 = vrot.slane %v4157_v5, 4 }
 0x40c   :  { %3318 = vst [vmem:[#allocation4 + $0x300] sm:$0xf] %v3310_v16  ;;  %v3344_v36 = vpop.permute.xlu0 %3343  ;;  %3241 = vst [vmem:[#allocation4 + $0x310] sm:$0xf] %v3233_v39  ;;  %v3299_v2 = vpop.permute.xlu1 %3298  ;;  %v4424_v16 = vld [vmem:[#allocation3 + $0x20] sm:$0xc]  ;;  %v3623_v57 = vsel %vm7156_vm4, %v5530_v29, %v3622_v27 }
 0x40d   :  { %3355 = vst.msk [vmem:[#allocation4 + $0x2e0] sm:$0xf] %vm615_vm2, %v3344_v36  ;;  %v3305_v19 = vrot.slane %v3299_v2, 4  ;;  %4107 = vst.msk [vmem:[#allocation4 + $0x46c] sm:$0xf] %vm615_vm2, %v4103_v11  ;;  %v5548_v58 = vrot.slane %v4424_v16, 10 }
 0x40e   :  { %4404 = vrot.lane.b32.xlu0 %v4396_v4, %s6161_s27  ;;  %4328 = vrot.lane.b32.xlu1 %v4321_v43, %s6161_s27  ;;  %4110 = vst.msk [vmem:[#allocation4 + $0x4a8] sm:$0xf] %vm615_vm2, %v4106_v60  ;;  %v3613_v4 = vld [vmem:[#allocation3 + $0x84] sm:$0xf]  ;;  %v4160_v43 = vrot.slane %v4145_v23, 5  ;;  %v3624_v46 = vrot.slane %v3622_v27, 4 }
 0x40f   :  { %v3309_v50 = vsel %vm419_vm1, %v3299_v2, %v3305_v19  ;;  %v4076_v2 = vrot.slane %v4074_v47, 4  ;;  %v4077_v19 = vrot.slane %v4060_v13, 6  ;;  %v3628_v37 = vrot.slane %v3613_v4, 5 }
 0x410   :  { %v3348_v6 = vpop.permute.xlu0 %3347  ;;  %3317 = vst [vmem:[#allocation4 + $0x2ec] sm:$0xf] %v3309_v50  ;;  %v3303_v20 = vpop.permute.xlu1 %3302  ;;  %v4105_v50 = vld [vmem:[#allocation3 + $0x68] sm:$0xf]  ;;  %v4162_v61 = vrot.slane %v4160_v43, 4  ;;  %v3626_v40 = vsel %vm7156_vm4, %v3624_v46, %v3625_v49 }
 0x411   :  { %3357 = vst.msk [vmem:[#allocation4 + $0x308] sm:$0xf] %vm615_vm2, %v3348_v6  ;;  %v3307_v21 = vrot.slane %v3303_v20, 4  ;;  %4109 = vst.msk [vmem:[#allocation4 + $0x494] sm:$0xf] %vm615_vm2, %v4105_v50  ;;  %v3629_v48 = vsel %vm7156_vm4, %v3627_v56, %v3628_v37  ;;  %v3630_v13 = vrot.slane %v3628_v37, 4 }
 0x412   :  { %4283 = vrot.lane.b32.xlu0 %v4275_v26, %s6161_s27  ;;  %4402 = vrot.lane.b32.xlu1 %v4393_v28, %s6161_s27  ;;  %v4425_v26 = vld [vmem:[#allocation3 + $0x44] sm:$0xf]  ;;  %v4156_v28 = vrot.slane %v4154_v15, 4  ;;  %v3631_v15 = vrot.slane %v3614_v41, 5 }
 0x413   :  { %v3311_v44 = vsel %vm419_vm1, %v3303_v20, %v3307_v21  ;;  %v4161_v20 = vsel %vm7156_vm4, %v4159_v24, %v4160_v43 }
 0x414   :  { %v3430_v42 = vpop.permute.xlu0 %3429  ;;  %3319 = vst [vmem:[#allocation4 + $0x314] sm:$0xf] %v3311_v44  ;;  %v3346_v35 = vpop.permute.xlu1 %3345  ;;  %v4436_v44 = vrot.slane %v4425_v26, 6  ;;  %v3632_v24 = vsel %vm7156_vm4, %v3630_v13, %v3631_v15  ;;  %v3982_v13 = vld [vmem:[#allocation3 + $0xac] sm:$0x1] }
 0x415   :  { %3441 = vst.msk [vmem:[#allocation4 + $0x32c] sm:$0xf] %vm622_vm9, %v3430_v42  ;;  %v4439_v42 = vrot.slane %v8630_v63, 6 }
 0x416   :  { %4287 = vrot.lane.b32.xlu0 %v4277_v45, %s6161_s27  ;;  %3356 = vst.msk [vmem:[#allocation4 + $0x2f4] sm:$0xf] %vm615_vm2, %v3346_v35  ;;  %4406 = vrot.lane.b32.xlu1 %v4399_v33, %s6161_s27  ;;  %v4146_v45 = vld [vmem:[#allocation3 + $0xb0] sm:$0x1]  ;;  %v4078_v35 = vsel %vm7166_vm6, %v4076_v2, %v4077_v19  ;;  %v4437_v55 = vsel %vm7166_vm6, %v5548_v58, %v4436_v44 }
 0x417   :  { %v4441_v54 = vrot.slane %v4439_v42, 4  ;;  %v4163_v47 = vrot.slane %v4146_v45, 5 }
 0x418   :  { %v3434_v1 = vpop.permute.xlu0 %3433  ;;  %v3350_v52 = vpop.permute.xlu1 %3349 }
 0x419   :  { %3443 = vst.msk [vmem:[#allocation4 + $0x354] sm:$0xf] %vm622_vm9, %v3434_v1 }
 0x41a   :  { %4079 = vrot.lane.b32.xlu0 %v4069_v18, %s6161_s27  ;;  %3358 = vst.msk [vmem:[#allocation4 + $0x31c] sm:$0xf] %vm615_vm2, %v3350_v52  ;;  %4285 = vrot.lane.b32.xlu1 %v4276_v38, %s6161_s27  ;;  %v4158_v38 = vsel %vm7156_vm4, %v4156_v28, %v4157_v5  ;;  %v4442_v52 = vrot.slane %v4427_v14, 6  ;;  %v3979_v14 = vld [vmem:[#allocation3 + $0x40] sm:$0xf] }
 0x41c   :  { %v3516_v51 = vpop.permute.xlu0 %3515  ;;  %v3432_v7 = vpop.permute.xlu1 %3431  ;;  %v4443_v30 = vsel %vm7166_vm6, %v4441_v54, %v4442_v52  ;;  %v4444_v11 = vrot.slane %v4442_v52, 4 }
 0x41d   :  { %v3523_v34 = vrot.slane %v3516_v51, 4  ;;  %3442 = vst.msk [vmem:[#allocation4 + $0x340] sm:$0xf] %vm622_vm9, %v3432_v7  ;;  %v4428_v7 = vld [vmem:[#allocation3 + $0xb0] sm:$0x3] }
 0x41e   :  { %4083 = vrot.lane.b32.xlu0 %v4075_v9, %s6161_s27  ;;  %4289 = vrot.lane.b32.xlu1 %v4278_v32, %s6161_s27  ;;  %v4164_v9 = vsel %vm7156_vm4, %v4162_v61, %v4163_v47  ;;  %v4438_v32 = vrot.slane %v4436_v44, 4  ;;  %v4445_v60 = vrot.slane %v4428_v7, 6  ;;  %v3990_v47 = vrot.slane %v3979_v14, 5 }
 0x41f   :  { %v3527_v17 = vsel %vm419_vm1, %v3516_v51, %v3523_v34 }
 0x420   :  { %3535 = vst [vmem:[#allocation4 + $0x370] sm:$0xf] %v3527_v17  ;;  %v3520_v59 = vpop.permute.xlu0 %3519  ;;  %v3436_v36 = vpop.permute.xlu1 %3435  ;;  %v4440_v10 = vsel %vm7166_vm6, %v4438_v32, %v4439_v42  ;;  %v4446_v27 = vsel %vm7166_vm6, %v4444_v11, %v4445_v60 }
 0x421   :  { %v3525_v39 = vrot.slane %v3520_v59, 4  ;;  %3444 = vst.msk [vmem:[#allocation4 + $0x368] sm:$0xf] %vm622_vm9, %v3436_v36 }
 0x422   :  { %4165 = vrot.lane.b32.xlu0 %v4155_v3, %s6161_s27  ;;  %4081 = vrot.lane.b32.xlu1 %v4072_v8, %s6161_s27 }
 0x423   :  { %v3529_v6 = vsel %vm419_vm1, %v3520_v59, %v3525_v39 }
 0x424   :  { %3537 = vst [vmem:[#allocation4 + $0x398] sm:$0xf] %v3529_v6  ;;  %v3548_v21 = vpop.permute.xlu0 %3547  ;;  %v3518_v0 = vpop.permute.xlu1 %3517 }
 0x425   :  { %3559 = vst.msk [vmem:[#allocation4 + $0x37c] sm:$0xf] %vm615_vm2, %v3548_v21  ;;  %v3524_v31 = vrot.slane %v3518_v0, 4 }
 0x426   :  { %3637 = vst.msk [vmem:[#allocation4 + $0x37c] sm:$0xf] %vm622_vm9, %v3623_v57  ;;  %4169 = vrot.lane.b32.xlu0 %v4161_v20, %s6161_s27  ;;  %4085 = vrot.lane.b32.xlu1 %v4078_v35, %s6161_s27  ;;  %v3978_v35 = vld [vmem:[#allocation3 + $0x1c] sm:$0xe] }
 0x427   :  { %v3528_v33 = vsel %vm419_vm1, %v3518_v0, %v3524_v31  ;;  %v5538_v61 = vrot.slane %v3978_v35, 9 }
 0x428   :  { %v3552_v1 = vpop.permute.xlu0 %3551  ;;  %3536 = vst [vmem:[#allocation4 + $0x384] sm:$0xf] %v3528_v33  ;;  %v3522_v18 = vpop.permute.xlu1 %3521 }
 0x429   :  { %3561 = vst.msk [vmem:[#allocation4 + $0x3a4] sm:$0xf] %vm615_vm2, %v3552_v1  ;;  %v3526_v22 = vrot.slane %v3522_v18, 4  ;;  %v3991_v46 = vsel %vm7156_vm4, %v5538_v61, %v3990_v47 }
 0x42a   :  { %3639 = vst.msk [vmem:[#allocation4 + $0x3a4] sm:$0xf] %vm622_vm9, %v3629_v48  ;;  %4447 = vrot.lane.b32.xlu0 %v4437_v55, %s6161_s27  ;;  %4167 = vrot.lane.b32.xlu1 %v4158_v38, %s6161_s27  ;;  %v3980_v55 = vld [vmem:[#allocation3 + $0x64] sm:$0xf] }
 0x42b   :  { %v3530_v12 = vsel %vm419_vm1, %v3522_v18, %v3526_v22  ;;  %v3993_v48 = vrot.slane %v3980_v55, 5  ;;  %v3981_v18 = vld [vmem:[#allocation3 + $0x88] sm:$0xf] }
 0x42c   :  { %v3587_v51 = vpop.permute.xlu0 %3586  ;;  %3538 = vst [vmem:[#allocation4 + $0x3ac] sm:$0xf] %v3530_v12  ;;  %v3550_v34 = vpop.permute.xlu1 %3549  ;;  %v3996_v12 = vrot.slane %v3981_v18, 5 }
 0x42d   :  { %v3594_v53 = vrot.slane %v3587_v51, 4  ;;  %3560 = vst.msk [vmem:[#allocation4 + $0x390] sm:$0xf] %vm615_vm2, %v3550_v34 }
 0x42e   :  { %4451 = vrot.lane.b32.xlu0 %v4443_v30, %s6161_s27  ;;  %3638 = vst.msk [vmem:[#allocation4 + $0x390] sm:$0xf] %vm622_vm9, %v3626_v40  ;;  %4171 = vrot.lane.b32.xlu1 %v4164_v9, %s6161_s27  ;;  %v3995_v30 = vrot.slane %v3993_v48, 4  ;;  %v3992_v40 = vrot.slane %v3990_v47, 4  ;;  %v3998_v60 = vrot.slane %v3996_v12, 4 }
 0x42f   :  { %v3598_v5 = vsel %vm419_vm1, %v3587_v51, %v3594_v53 }
 0x430   :  { %3606 = vst [vmem:[#allocation4 + $0x374] sm:$0xf] %v3598_v5  ;;  %v3591_v23 = vpop.permute.xlu0 %3590  ;;  %v3554_v3 = vpop.permute.xlu1 %3553  ;;  %v3997_v53 = vsel %vm7156_vm4, %v3995_v30, %v3996_v12  ;;  %v3994_v11 = vsel %vm7156_vm4, %v3992_v40, %v3993_v48 }
 0x431   :  { %v3596_v17 = vrot.slane %v3591_v23, 4  ;;  %3562 = vst.msk [vmem:[#allocation4 + $0x3b8] sm:$0xf] %vm615_vm2, %v3554_v3 }
 0x432   :  { %3640 = vst.msk [vmem:[#allocation4 + $0x3b8] sm:$0xf] %vm622_vm9, %v3632_v24  ;;  %4449 = vrot.lane.b32.xlu1 %v4440_v10, %s6161_s27 }
 0x433   :  { %v3600_v59 = vsel %vm419_vm1, %v3591_v23, %v3596_v17  ;;  %v3999_v17 = vrot.slane %v3982_v13, 5 }
 0x434   :  { %3608 = vst [vmem:[#allocation4 + $0x39c] sm:$0xf] %v3600_v59  ;;  %v3665_v29 = vpop.permute.xlu0 %3664  ;;  %v3589_v16 = vpop.permute.xlu1 %3588 }
 0x435   :  { %v3672_v49 = vrot.slane %v3665_v29, 4  ;;  %v3595_v39 = vrot.slane %v3589_v16, 4 }
 0x436   :  { %4453 = vrot.lane.b32.xlu1 %v4446_v27, %s6161_s27  ;;  %v4000_v27 = vsel %vm7156_vm4, %v3998_v60, %v3999_v17 }
 0x437   :  { %v3676_v36 = vsel %vm419_vm1, %v3665_v29, %v3672_v49  ;;  %v3599_v4 = vsel %vm419_vm1, %v3589_v16, %v3595_v39 }
 0x438   :  { %3684 = vst [vmem:[#allocation4 + $0x378] sm:$0xf] %v3676_v36  ;;  %v3669_v2 = vpop.permute.xlu0 %3668  ;;  %3607 = vst [vmem:[#allocation4 + $0x388] sm:$0xf] %v3599_v4  ;;  %v3593_v43 = vpop.permute.xlu1 %3592 }
 0x439   :  { %v3674_v19 = vrot.slane %v3669_v2, 4  ;;  %v3597_v8 = vrot.slane %v3593_v43, 4 }
 0x43b   :  { %v3678_v26 = vsel %vm419_vm1, %v3669_v2, %v3674_v19  ;;  %v3601_v25 = vsel %vm419_vm1, %v3593_v43, %v3597_v8 }
 0x43c   :  { %3686 = vst [vmem:[#allocation4 + $0x3a0] sm:$0xf] %v3678_v26  ;;  %v3712_v63 = vpop.permute.xlu0 %3711  ;;  %3609 = vst [vmem:[#allocation4 + $0x3b0] sm:$0xf] %v3601_v25  ;;  %v3667_v50 = vpop.permute.xlu1 %3666 }
 0x43d   :  { %3723 = vst.msk [vmem:[#allocation4 + $0x380] sm:$0xf] %vm615_vm2, %v3712_v63  ;;  %v3673_v6 = vrot.slane %v3667_v50, 4 }
 0x43f   :  { %v3677_v20 = vsel %vm419_vm1, %v3667_v50, %v3673_v6 }
 0x440   :  { %v3716_v58 = vpop.permute.xlu0 %3715  ;;  %3685 = vst [vmem:[#allocation4 + $0x38c] sm:$0xf] %v3677_v20  ;;  %v3671_v57 = vpop.permute.xlu1 %3670 }
 0x441   :  { %3725 = vst.msk [vmem:[#allocation4 + $0x3a8] sm:$0xf] %vm615_vm2, %v3716_v58  ;;  %v3675_v21 = vrot.slane %v3671_v57, 4 }
 0x443   :  { %v3679_v28 = vsel %vm419_vm1, %v3671_v57, %v3675_v21 }
 0x444   :  { %v3798_v0 = vpop.permute.xlu0 %3797  ;;  %3687 = vst [vmem:[#allocation4 + $0x3b4] sm:$0xf] %v3679_v28  ;;  %v3714_v56 = vpop.permute.xlu1 %3713 }
 0x445   :  { %3809 = vst.msk [vmem:[#allocation4 + $0x3cc] sm:$0xf] %vm622_vm9, %v3798_v0 }
 0x446   :  { %3724 = vst.msk [vmem:[#allocation4 + $0x394] sm:$0xf] %vm615_vm2, %v3714_v56 }
 0x448   :  { %v3802_v37 = vpop.permute.xlu0 %3801  ;;  %v3718_v45 = vpop.permute.xlu1 %3717 }
 0x449   :  { %3811 = vst.msk [vmem:[#allocation4 + $0x3f4] sm:$0xf] %vm622_vm9, %v3802_v37 }
 0x44a   :  { %3726 = vst.msk [vmem:[#allocation4 + $0x3bc] sm:$0xf] %vm615_vm2, %v3718_v45 }
 0x44c   :  { %v3884_v44 = vpop.permute.xlu0 %3883  ;;  %v3800_v31 = vpop.permute.xlu1 %3799 }
 0x44d   :  { %v3891_v42 = vrot.slane %v3884_v44, 4  ;;  %3810 = vst.msk [vmem:[#allocation4 + $0x3e0] sm:$0xf] %vm622_vm9, %v3800_v31 }
 0x44f   :  { %v3895_v54 = vsel %vm419_vm1, %v3884_v44, %v3891_v42 }
 0x450   :  { %3903 = vst [vmem:[#allocation4 + $0x410] sm:$0xf] %v3895_v54  ;;  %v3888_v33 = vpop.permute.xlu0 %3887  ;;  %v3804_v38 = vpop.permute.xlu1 %3803 }
 0x451   :  { %v3893_v1 = vrot.slane %v3888_v33, 4  ;;  %3812 = vst.msk [vmem:[#allocation4 + $0x408] sm:$0xf] %vm622_vm9, %v3804_v38 }
 0x453   :  { %v3897_v52 = vsel %vm419_vm1, %v3888_v33, %v3893_v1 }
 0x454   :  { %3905 = vst [vmem:[#allocation4 + $0x438] sm:$0xf] %v3897_v52  ;;  %v3916_v22 = vpop.permute.xlu0 %3915  ;;  %v3886_v41 = vpop.permute.xlu1 %3885 }
 0x455   :  { %3927 = vst.msk [vmem:[#allocation4 + $0x41c] sm:$0xf] %vm615_vm2, %v3916_v22  ;;  %v3892_v51 = vrot.slane %v3886_v41, 4  ;;  %v4346_v22 = vld [vmem:[#allocation3 + $0x20] sm:$0xe] }
 0x456   :  { %4005 = vst.msk [vmem:[#allocation4 + $0x41c] sm:$0xf] %vm622_vm9, %v3991_v46  ;;  %v4348_v46 = vld [vmem:[#allocation3 + $0x68] sm:$0xf] }
 0x457   :  { %v3896_v9 = vsel %vm419_vm1, %v3886_v41, %v3892_v51  ;;  %v4347_v51 = vld [vmem:[#allocation3 + $0x44] sm:$0xf] }
 0x458   :  { %v3920_v32 = vpop.permute.xlu0 %3919  ;;  %3904 = vst [vmem:[#allocation4 + $0x424] sm:$0xf] %v3896_v9  ;;  %v3890_v34 = vpop.permute.xlu1 %3889 }
 0x459   :  { %3929 = vst.msk [vmem:[#allocation4 + $0x444] sm:$0xf] %vm615_vm2, %v3920_v32  ;;  %v3894_v7 = vrot.slane %v3890_v34, 4  ;;  %v5546_v32 = vrot.slane %v4346_v22, 9 }
 0x45a   :  { %4007 = vst.msk [vmem:[#allocation4 + $0x444] sm:$0xf] %vm622_vm9, %v3997_v53  ;;  %v4361_v53 = vrot.slane %v4348_v46, 5 }
 0x45b   :  { %v3898_v15 = vsel %vm419_vm1, %v3890_v34, %v3894_v7 }
 0x45c   :  { %v3955_v5 = vpop.permute.xlu0 %3954  ;;  %3906 = vst [vmem:[#allocation4 + $0x44c] sm:$0xf] %v3898_v15  ;;  %v3918_v10 = vpop.permute.xlu1 %3917  ;;  %v4358_v15 = vrot.slane %v4347_v51, 5  ;;  %v4363_v60 = vrot.slane %v4361_v53, 4 }
 0x45d   :  { %v3962_v23 = vrot.slane %v3955_v5, 4  ;;  %3928 = vst.msk [vmem:[#allocation4 + $0x430] sm:$0xf] %vm615_vm2, %v3918_v10 }
 0x45e   :  { %4006 = vst.msk [vmem:[#allocation4 + $0x430] sm:$0xf] %vm622_vm9, %v3994_v11  ;;  %v4359_v11 = vsel %vm7156_vm4, %v5546_v32, %v4358_v15 }
 0x45f   :  { %v3966_v3 = vsel %vm419_vm1, %v3955_v5, %v3962_v23  ;;  %v4349_v23 = vld [vmem:[#allocation3 + $0x8c] sm:$0xf] }
 0x460   :  { %3974 = vst [vmem:[#allocation4 + $0x414] sm:$0xf] %v3966_v3  ;;  %v3959_v24 = vpop.permute.xlu0 %3958  ;;  %v3922_v29 = vpop.permute.xlu1 %3921 }
 0x461   :  { %v3964_v59 = vrot.slane %v3959_v24, 4  ;;  %3930 = vst.msk [vmem:[#allocation4 + $0x458] sm:$0xf] %vm615_vm2, %v3922_v29 }
 0x462   :  { %4008 = vst.msk [vmem:[#allocation4 + $0x458] sm:$0xf] %vm622_vm9, %v4000_v27 }
 0x463   :  { %v3968_v49 = vsel %vm419_vm1, %v3959_v24, %v3964_v59  ;;  %v4364_v59 = vrot.slane %v4349_v23, 5 }
 0x464   :  { %3976 = vst [vmem:[#allocation4 + $0x43c] sm:$0xf] %v3968_v49  ;;  %v4033_v16 = vpop.permute.xlu0 %4032  ;;  %v3957_v36 = vpop.permute.xlu1 %3956 }
 0x465   :  { %v4040_v39 = vrot.slane %v4033_v16, 4  ;;  %v3963_v4 = vrot.slane %v3957_v36, 4  ;;  %v4365_v27 = vsel %vm7156_vm4, %v4363_v60, %v4364_v59 }
 0x467   :  { %v4044_v2 = vsel %vm419_vm1, %v4033_v16, %v4040_v39  ;;  %v3967_v19 = vsel %vm419_vm1, %v3957_v36, %v3963_v4  ;;  %v4360_v39 = vrot.slane %v4358_v15, 4  ;;  %v4350_v4 = vld [vmem:[#allocation3 + $0xb0] sm:$0x1] }
 0x468   :  { %4052 = vst [vmem:[#allocation4 + $0x418] sm:$0xf] %v4044_v2  ;;  %v4037_v43 = vpop.permute.xlu0 %4036  ;;  %3975 = vst [vmem:[#allocation4 + $0x428] sm:$0xf] %v3967_v19  ;;  %v3961_v26 = vpop.permute.xlu1 %3960 }
 0x469   :  { %v4042_v8 = vrot.slane %v4037_v43, 4  ;;  %v3965_v25 = vrot.slane %v3961_v26, 4 }
 0x46b   :  { %v4046_v63 = vsel %vm419_vm1, %v4037_v43, %v4042_v8  ;;  %v3969_v50 = vsel %vm419_vm1, %v3961_v26, %v3965_v25  ;;  %v4362_v8 = vsel %vm7156_vm4, %v4360_v39, %v4361_v53  ;;  %v4366_v26 = vrot.slane %v4364_v59, 4 }
 0x46c   :  { %4054 = vst [vmem:[#allocation4 + $0x440] sm:$0xf] %v4046_v63  ;;  %v4252_v6 = vpop.permute.xlu0 %4251  ;;  %3977 = vst [vmem:[#allocation4 + $0x450] sm:$0xf] %v3969_v50  ;;  %v4035_v58 = vpop.permute.xlu1 %4034  ;;  %v4367_v25 = vrot.slane %v4350_v4, 5 }
 0x46d   :  { %v4259_v20 = vrot.slane %v4252_v6, 4  ;;  %v4041_v57 = vrot.slane %v4035_v58, 4 }
 0x46f   :  { %v4263_v21 = vsel %vm419_vm1, %v4252_v6, %v4259_v20  ;;  %v4045_v28 = vsel %vm419_vm1, %v4035_v58, %v4041_v57  ;;  %v4368_v6 = vsel %vm7156_vm4, %v4366_v26, %v4367_v25 }
 0x470   :  { %4271 = vst [vmem:[#allocation4 + $0x4b0] sm:$0xf] %v4263_v21  ;;  %v4256_v0 = vpop.permute.xlu0 %4255  ;;  %4053 = vst [vmem:[#allocation4 + $0x42c] sm:$0xf] %v4045_v28  ;;  %v4039_v37 = vpop.permute.xlu1 %4038 }
 0x471   :  { %v4261_v56 = vrot.slane %v4256_v0, 4  ;;  %v4043_v45 = vrot.slane %v4039_v37, 4 }
 0x473   :  { %v4265_v44 = vsel %vm419_vm1, %v4256_v0, %v4261_v56  ;;  %v4047_v42 = vsel %vm419_vm1, %v4039_v37, %v4043_v45 }
 0x474   :  { %4273 = vst [vmem:[#allocation4 + $0x4d8] sm:$0xf] %v4265_v44  ;;  %v4323_v31 = vpop.permute.xlu0 %4322  ;;  %4055 = vst [vmem:[#allocation4 + $0x454] sm:$0xf] %v4047_v42  ;;  %v4254_v14 = vpop.permute.xlu1 %4253 }
 0x475   :  { %v4330_v35 = vrot.slane %v4323_v31, 4  ;;  %v4260_v55 = vrot.slane %v4254_v14, 4 }
 0x477   :  { %v4334_v54 = vsel %vm419_vm1, %v4323_v31, %v4330_v35  ;;  %v4264_v33 = vsel %vm419_vm1, %v4254_v14, %v4260_v55 }
 0x478   :  { %4342 = vst [vmem:[#allocation4 + $0x4b4] sm:$0xf] %v4334_v54  ;;  %v4327_v1 = vpop.permute.xlu0 %4326  ;;  %4272 = vst [vmem:[#allocation4 + $0x4c4] sm:$0xf] %v4264_v33  ;;  %v4258_v61 = vpop.permute.xlu1 %4257 }
 0x479   :  { %v4332_v38 = vrot.slane %v4327_v1, 4  ;;  %v4262_v47 = vrot.slane %v4258_v61, 4 }
 0x47b   :  { %v4336_v48 = vsel %vm419_vm1, %v4327_v1, %v4332_v38  ;;  %v4266_v18 = vsel %vm419_vm1, %v4258_v61, %v4262_v47 }
 0x47c   :  { %4344 = vst [vmem:[#allocation4 + $0x4dc] sm:$0xf] %v4336_v48  ;;  %v4401_v52 = vpop.permute.xlu0 %4400  ;;  %4274 = vst [vmem:[#allocation4 + $0x4ec] sm:$0xf] %v4266_v18  ;;  %v4325_v30 = vpop.permute.xlu1 %4324 }
 0x47d   :  { %v4408_v41 = vrot.slane %v4401_v52, 4  ;;  %v4331_v12 = vrot.slane %v4325_v30, 4 }
 0x47f   :  { %v4412_v9 = vsel %vm419_vm1, %v4401_v52, %v4408_v41  ;;  %v4335_v34 = vsel %vm419_vm1, %v4325_v30, %v4331_v12 }
 0x480   :  { %4420 = vst [vmem:[#allocation4 + $0x4b8] sm:$0xf] %v4412_v9  ;;  %v4405_v7 = vpop.permute.xlu0 %4404  ;;  %4343 = vst [vmem:[#allocation4 + $0x4c8] sm:$0xf] %v4335_v34  ;;  %v4329_v13 = vpop.permute.xlu1 %4328 }
 0x481   :  { %v4410_v40 = vrot.slane %v4405_v7, 4  ;;  %v4333_v5 = vrot.slane %v4329_v13, 4 }
 0x483   :  { %v4414_v10 = vsel %vm419_vm1, %v4405_v7, %v4410_v40  ;;  %v4337_v17 = vsel %vm419_vm1, %v4329_v13, %v4333_v5 }
 0x484   :  { %4422 = vst [vmem:[#allocation4 + $0x4e0] sm:$0xf] %v4414_v10  ;;  %v4284_v3 = vpop.permute.xlu0 %4283  ;;  %4345 = vst [vmem:[#allocation4 + $0x4f0] sm:$0xf] %v4337_v17  ;;  %v4403_v24 = vpop.permute.xlu1 %4402 }
 0x485   :  { %4295 = vst.msk [vmem:[#allocation4 + $0x4bc] sm:$0xf] %vm615_vm2, %v4284_v3  ;;  %v4409_v29 = vrot.slane %v4403_v24, 4 }
 0x486   :  { %4373 = vst.msk [vmem:[#allocation4 + $0x4bc] sm:$0xf] %vm622_vm9, %v4359_v11 }
 0x487   :  { %v4413_v49 = vsel %vm419_vm1, %v4403_v24, %v4409_v29 }
 0x488   :  { %v4288_v16 = vpop.permute.xlu0 %4287  ;;  %4421 = vst [vmem:[#allocation4 + $0x4cc] sm:$0xf] %v4413_v49  ;;  %v4407_v36 = vpop.permute.xlu1 %4406 }
 0x489   :  { %4297 = vst.msk [vmem:[#allocation4 + $0x4e4] sm:$0xf] %vm615_vm2, %v4288_v16  ;;  %v4411_v2 = vrot.slane %v4407_v36, 4 }
 0x48a   :  { %4375 = vst.msk [vmem:[#allocation4 + $0x4e4] sm:$0xf] %vm622_vm9, %v4365_v27 }
 0x48b   :  { %v4415_v19 = vsel %vm419_vm1, %v4407_v36, %v4411_v2 }
 0x48c   :  { %v4080_v43 = vpop.permute.xlu0 %4079  ;;  %4423 = vst [vmem:[#allocation4 + $0x4f4] sm:$0xf] %v4415_v19  ;;  %v4286_v63 = vpop.permute.xlu1 %4285 }
 0x48d   :  { %4091 = vst.msk [vmem:[#allocation4 + $0x420] sm:$0xf] %vm615_vm2, %v4080_v43  ;;  %4296 = vst.msk [vmem:[#allocation4 + $0x4d0] sm:$0xf] %vm615_vm2, %v4286_v63 }
 0x48e   :  { %4374 = vst.msk [vmem:[#allocation4 + $0x4d0] sm:$0xf] %vm622_vm9, %v4362_v8 }
 0x490   :  { %v4084_v50 = vpop.permute.xlu0 %4083  ;;  %v4290_v20 = vpop.permute.xlu1 %4289 }
 0x491   :  { %4093 = vst.msk [vmem:[#allocation4 + $0x448] sm:$0xf] %vm615_vm2, %v4084_v50  ;;  %4298 = vst.msk [vmem:[#allocation4 + $0x4f8] sm:$0xf] %vm615_vm2, %v4290_v20 }
 0x492   :  { %4376 = vst.msk [vmem:[#allocation4 + $0x4f8] sm:$0xf] %vm622_vm9, %v4368_v6 }
 0x494   :  { %v4166_v58 = vpop.permute.xlu0 %4165  ;;  %v4082_v57 = vpop.permute.xlu1 %4081 }
 0x495   :  { %4177 = vst.msk [vmem:[#allocation4 + $0x46c] sm:$0xf] %vm622_vm9, %v4166_v58 }
 0x496   :  { %4092 = vst.msk [vmem:[#allocation4 + $0x434] sm:$0xf] %vm615_vm2, %v4082_v57 }
 0x498   :  { %v4170_v21 = vpop.permute.xlu0 %4169  ;;  %v4086_v28 = vpop.permute.xlu1 %4085 }
 0x499   :  { %4179 = vst.msk [vmem:[#allocation4 + $0x494] sm:$0xf] %vm622_vm9, %v4170_v21 }
 0x49a   :  { %4094 = vst.msk [vmem:[#allocation4 + $0x45c] sm:$0xf] %vm615_vm2, %v4086_v28 }
 0x49c   :  { %v4448_v62 = vpop.permute.xlu0 %4447  ;;  %v4168_v0 = vpop.permute.xlu1 %4167 }
 0x49d   :  { %4459 = vst.msk [vmem:[#allocation4 + $0x4c0] sm:$0xf] %vm615_vm2, %v4448_v62 }
 0x49e   :  { %4178 = vst.msk [vmem:[#allocation4 + $0x480] sm:$0xf] %vm622_vm9, %v4168_v0 }
 0x4a0   :  { %v4452_v56 = vpop.permute.xlu0 %4451  ;;  %v4172_v37 = vpop.permute.xlu1 %4171 }
 0x4a1   :  { %4461 = vst.msk [vmem:[#allocation4 + $0x4e8] sm:$0xf] %vm615_vm2, %v4452_v56 }
 0x4a2   :  { %4180 = vst.msk [vmem:[#allocation4 + $0x4a8] sm:$0xf] %vm622_vm9, %v4172_v37 }
 0x4a4   :  { %v4450_v45 = vpop.permute.xlu1 %4449 }
 0x4a5   :  { %4460 = vst.msk [vmem:[#allocation4 + $0x4d4] sm:$0xf] %vm615_vm2, %v4450_v45 }
 0x4a8   :  { %v4454_v44 = vpop.permute.xlu1 %4453 }
 0x4a9   :  { %4462 = vst.msk [vmem:[#allocation4 + $0x4fc] sm:$0xf] %vm615_vm2, %v4454_v44 }
 0x4aa LB: > { %v5988_v42 = vld [vmem:[%s9064_s6 + $0x78] sm:$0xff]   ;;  %v5992_v55 = vld [vmem:[%s9064_s6 + $0x70] sm:$0xff]   ;;  %v5996_v38 = vld [vmem:[%s9064_s6 + $0x68] sm:$0xff]   ;;  %s5549_s16 = sshll.u32 %s6158_s28, 7  ;;  %s4468_s28 = sadd.s32 1, %s6158_s28   ;;  %s6158_s28 = sphi %s8766_s28, %s4468_s28  }
 0x4ab   : > { %v5989_v31 = vld [vmem:[%s9064_s6 + $0xf8] sm:$0xff]   ;;  %5709 = vmatprep.subr.bf16.mxu0 %v5988_v42  ;;  %v5993_v54 = vld [vmem:[%s9064_s6 + $0xf0] sm:$0xff]   ;;  %v5997_v61 = vld [vmem:[%s9064_s6 + $0xe8] sm:$0xff]   ;;  %s4470_s23 = sshra.s32 %s5549_s16, 3  ;;  %s8997_s3 = scalar_lea.vmem %s9065_s7, %s5549_s16 }
 0x4ac   : > { %v5990_v35 = vld [vmem:[%s9064_s6 + $0x38] sm:$0xff]   ;;  %5773 = vmatprep.subr.bf16.mxu1 %v5989_v31  ;;  %v5994_v33 = vld [vmem:[%s9064_s6 + $0x30] sm:$0xff]   ;;  %v5998_v47 = vld [vmem:[%s9064_s6 + $0x28] sm:$0xff]   ;;  %s5699_s26 = smul.u32 20, %s4470_s23  ;;  %p4465_p5 = scmp.ge.s32.totalorder %s4468_s28, 4  }
 0x4ad   : > { %v5991_v14 = vld [vmem:[%s9064_s6 + $0xb8] sm:$0xff]   ;;  %5710 = vmatpush3.bf16.msra.mxu0 %v5990_v35  ;;  %v5995_v1 = vld [vmem:[%s9064_s6 + $0xb0] sm:$0xff]   ;;  %v5999_v48 = vld [vmem:[%s9064_s6 + $0xa8] sm:$0xff]  }
 0x4ae   : > { %5774 = vmatpush3.bf16.msra.mxu1 %v5991_v14  ;;  %5711 = vmatprep.subr.bf16.mxu0 %v5992_v55  ;;  %v6000_v18 = vld [vmem:[%s9064_s6 + $0x60] sm:$0xff]   ;;  %v6004_v41 = vld [vmem:[%s9064_s6 + $0x58] sm:$0xff]   ;;  %v6008_v9 = vld [vmem:[%s9064_s6 + $0x50] sm:$0xff]   ;;  %s8870_s15 = scalar_lea.vmem [#allocation4], %s5699_s26 }
 0x4af   : > { %5775 = vmatprep.subr.bf16.mxu1 %v5993_v54  ;;  %v6001_v52 = vld [vmem:[%s9064_s6 + $0xe0] sm:$0xff]   ;;  %v6005_v30 = vld [vmem:[%s9064_s6 + $0xd8] sm:$0xff]   ;;  %v6009_v32 = vld [vmem:[%s9064_s6 + $0xd0] sm:$0xff]  }
 0x4b0   : > { %v6002_v22 = vld [vmem:[%s9064_s6 + $0x20] sm:$0xff]   ;;  %v6006_v12 = vld [vmem:[%s9064_s6 + $0x18] sm:$0xff]   ;;  %v6010_v53 = vld [vmem:[%s9064_s6 + $0x10] sm:$0xff]  }
 0x4b1   : > { %5712 = vmatpush3.bf16.msra.mxu0 %v5994_v33  ;;  %v6003_v46 = vld [vmem:[%s9064_s6 + $0xa0] sm:$0xff]   ;;  %v6007_v51 = vld [vmem:[%s9064_s6 + $0x98] sm:$0xff]   ;;  %v6011_v34 = vld [vmem:[%s9064_s6 + $0x90] sm:$0xff]  }
 0x4b2   : > { %5776 = vmatpush3.bf16.msra.mxu1 %v5995_v1  ;;  %5713 = vmatprep.subr.bf16.mxu0 %v5996_v38  ;;  %v6012_v7 = vld [vmem:[%s9064_s6 + $0x48] sm:$0xff]   ;;  %v6016_v5 = vld [vmem:[%s9064_s6 + $0x40] sm:$0xff]   ;;  %v6026_v59 = vld [vmem:[%s9064_s6 + $0x118] sm:$0xff]  }
 0x4b3   : > { %5777 = vmatprep.subr.bf16.mxu1 %v5997_v61  ;;  %v6013_v40 = vld [vmem:[%s9064_s6 + $0xc8] sm:$0xff]   ;;  %v6017_v23 = vld [vmem:[%s9064_s6 + $0xc0] sm:$0xff]   ;;  %v6039_v36 = vld [vmem:[%s9064_s6 + $0x110] sm:$0xff]  }
 0x4b4   : > { %v6014_v13 = vld [vmem:[%s9064_s6 + $0x8] sm:$0xff]   ;;  %v6018_v10 = vld [vmem:[%s9064_s6] sm:$0xff]   ;;  %v6035_v4 = vld [vmem:[%s8870_s15 + $0x5c] ss:$20 sps:$4 sm:$0xff]  }
 0x4b5   : > { %5714 = vmatpush3.bf16.msra.mxu0 %v5998_v47  ;;  %v6015_v15 = vld [vmem:[%s9064_s6 + $0x88] sm:$0xff]   ;;  %v6019_v11 = vld [vmem:[%s9064_s6 + $0x80] sm:$0xff]   ;;  %v6040_v8 = vld [vmem:[%s8870_s15 + $0x7c] ss:$20 sps:$4 sm:$0xff]  }
 0x4b6   : > { %5778 = vmatpush3.bf16.msra.mxu1 %v5999_v48  ;;  %5715 = vmatprep.subr.bf16.mxu0 %v6000_v18  ;;  %v6020_v60 = vld [vmem:[%s8870_s15] ss:$20 sps:$4 sm:$0xff]   ;;  %v6022_v17 = vld [vmem:[%s8870_s15 + $0x4] ss:$20 sps:$4 sm:$0xff]   ;;  %v6023_v3 = vld [vmem:[%s8870_s15 + $0x8] ss:$20 sps:$4 sm:$0xff]  }
 0x4b7   : > { %5779 = vmatprep.subr.bf16.mxu1 %v6001_v52  ;;  %v6025_v24 = vld [vmem:[%s8870_s15 + $0xc] ss:$20 sps:$4 sm:$0xff]   ;;  %5068 = vmatprep.mubr.bf16.mxu0 %v6022_v17  ;;  %v6029_v27 = vld [vmem:[%s8870_s15 + $0x34] ss:$20 sps:$4 sm:$0xff]   ;;  %v6032_v16 = vld [vmem:[%s8870_s15 + $0x30] ss:$20 sps:$4 sm:$0xff]  }
 0x4b8   : > { %5165 = vmatprep.mubr.bf16.mxu1 %v6025_v24  ;;  %v6027_v29 = vld [vmem:[%s8870_s15 + $0x2c] ss:$20 sps:$4 sm:$0xff]   ;;  %v6031_v49 = vld [vmem:[%s8870_s15 + $0x28] ss:$20 sps:$4 sm:$0xff]   ;;  %v6037_v2 = vld [vmem:[%s8870_s15 + $0x50] ss:$20 sps:$4 sm:$0xff]  }
 0x4b9   : > { %5716 = vmatpush3.bf16.msra.mxu0 %v6002_v22  ;;  %v6033_v39 = vld [vmem:[%s8870_s15 + $0x54] ss:$20 sps:$4 sm:$0xff]   ;;  %v6038_v19 = vld [vmem:[%s8870_s15 + $0x58] ss:$20 sps:$4 sm:$0xff]   ;;  %v6065_v25 = vld [vmem:[%s9064_s6 + $0x100] sm:$0xff]  }
 0x4ba   : > { %5780 = vmatpush3.bf16.msra.mxu1 %v6003_v46  ;;  %5717 = vmatprep.subr.bf16.mxu0 %v6004_v41  ;;  %v6052_v43 = vld [vmem:[%s9064_s6 + $0x108] sm:$0xff]   ;;  %v6042_v26 = vld [vmem:[%s8870_s15 + $0x84] ss:$20 sps:$4 sm:$0xff]   ;;  %v6045_v50 = vld [vmem:[%s8870_s15 + $0x80] ss:$20 sps:$4 sm:$0xff]  }
 0x4bb   : > { %5781 = vmatprep.subr.bf16.mxu1 %v6005_v30  ;;  %v6044_v63 = vld [vmem:[%s8870_s15 + $0x78] ss:$20 sps:$4 sm:$0xff]   ;;  %v6050_v58 = vld [vmem:[%s8870_s15 + $0xa0] ss:$20 sps:$4 sm:$0xff]   ;;  %v6051_v57 = vld [vmem:[%s8870_s15 + $0xa8] ss:$20 sps:$4 sm:$0xff]  }
 0x4bc   : > { %v6046_v6 = vld [vmem:[%s8870_s15 + $0xa4] ss:$20 sps:$4 sm:$0xff]   ;;  %v6048_v20 = vld [vmem:[%s8870_s15 + $0xac] ss:$20 sps:$4 sm:$0xff]   ;;  %v6055_v28 = vld [vmem:[%s8870_s15 + $0xd4] ss:$20 sps:$4 sm:$0xff]  }
 0x4bd   : > { %5718 = vmatpush3.bf16.msra.mxu0 %v6006_v12  ;;  %v6053_v21 = vld [vmem:[%s8870_s15 + $0xcc] ss:$20 sps:$4 sm:$0xff]   ;;  %v6057_v62 = vld [vmem:[%s8870_s15 + $0xc8] ss:$20 sps:$4 sm:$0xff]   ;;  %v6058_v0 = vld [vmem:[%s8870_s15 + $0xd0] ss:$20 sps:$4 sm:$0xff]  }
 0x4be   : > { %5782 = vmatpush3.bf16.msra.mxu1 %v6007_v51  ;;  %5719 = vmatprep.subr.bf16.mxu0 %v6008_v9  ;;  %v6059_v56 = vld [vmem:[%s8870_s15 + $0xf4] ss:$20 sps:$4 sm:$0xff]   ;;  %v6061_v37 = vld [vmem:[%s8870_s15 + $0xfc] ss:$20 sps:$4 sm:$0xff]   ;;  %v6064_v44 = vld [vmem:[%s8870_s15 + $0xf8] ss:$20 sps:$4 sm:$0xff]  }
 0x4bf   : > { %5783 = vmatprep.subr.bf16.mxu1 %v6009_v32  ;;  %v6063_v45 = vld [vmem:[%s8870_s15 + $0xf0] ss:$20 sps:$4 sm:$0xff]   ;;  %v6070_v35 = vld [vmem:[%s8870_s15 + $0x118] ss:$20 sps:$4 sm:$0xff]   ;;  %v6071_v14 = vld [vmem:[%s8870_s15 + $0x120] ss:$20 sps:$4 sm:$0xff]  }
 0x4c0   : > { %v6066_v42 = vld [vmem:[%s8870_s15 + $0x11c] ss:$20 sps:$4 sm:$0xff]   ;;  %v6068_v31 = vld [vmem:[%s8870_s15 + $0x124] ss:$20 sps:$4 sm:$0xff]   ;;  %v6076_v38 = vld [vmem:[%s8870_s15 + $0x60] ss:$20 sps:$4 sm:$0xff]  }
 0x4c1   : > { %5720 = vmatpush3.bf16.msra.mxu0 %v6010_v53  ;;  %v6072_v55 = vld [vmem:[%s8870_s15 + $0x10] ss:$20 sps:$4 sm:$0xff]   ;;  %v6074_v33 = vld [vmem:[%s8870_s15 + $0x38] ss:$20 sps:$4 sm:$0xff]   ;;  %v6077_v61 = vld [vmem:[%s8870_s15 + $0x100] ss:$20 sps:$4 sm:$0xff]  }
 0x4c2   : > { %5784 = vmatpush3.bf16.msra.mxu1 %v6011_v34  ;;  %5721 = vmatprep.subr.bf16.mxu0 %v6012_v7  ;;  %v6073_v54 = vld [vmem:[%s8870_s15 + $0xb0] ss:$20 sps:$4 sm:$0xff]   ;;  %v6075_v1 = vld [vmem:[%s8870_s15 + $0xd8] ss:$20 sps:$4 sm:$0xff]   ;;  %v6078_v47 = vld [vmem:[%s8870_s15 + $0x88] ss:$20 sps:$4 sm:$0xff]  }
 0x4c3   : > { %5785 = vmatprep.subr.bf16.mxu1 %v6013_v40  ;;  %v6079_v48 = vld [vmem:[%s8870_s15 + $0x128] ss:$20 sps:$4 sm:$0xff]  }
 0x4c5   : > { %5722 = vmatpush3.bf16.msra.mxu0 %v6014_v13 }
 0x4c6   : > { %5786 = vmatpush3.bf16.msra.mxu1 %v6015_v15  ;;  %5723 = vmatprep.subr.bf16.mxu0 %v6016_v5 }
 0x4c7   : > { %5787 = vmatprep.subr.bf16.mxu1 %v6017_v23 }
 0x4c9   : > { %5724 = vmatpush3.bf16.msra.mxu0 %v6018_v10 }
 0x4ca   : > { %5788 = vmatpush3.bf16.msra.mxu1 %v6019_v11  ;;  %5867 = vmatprep.subr.bf16.mxu0 %v6026_v59 }
 0x4cb   : > { %5893 = vmatprep.subr.bf16.mxu1 %v6026_v59 }
 0x4cc   : > { %5069 = vmatmul.mubr.bf16.vlgmr.msra.gmra.mxu0 %v6020_v60 }
 0x4cd   : > { %5166 = vmatmul.mubr.bf16.vlgmr.msra.gmra.mxu1 %v6023_v3  ;;  %5868 = vmatpush3.bf16.msra.mxu0 %v6026_v59 }
 0x4ce   : > { %5897 = vmatpush3.bf16.msra.mxu1 %v6026_v59  ;;  %5076 = vmatprep.mubr.bf16.mxu0 %v6027_v29 }
 0x4cf   : > { %5173 = vmatprep.mubr.bf16.mxu1 %v6029_v27  ;;  %5869 = vmatprep.subr.bf16.mxu0 %v6039_v36 }
 0x4d0   : > { %5894 = vmatprep.subr.bf16.mxu1 %v6039_v36 }
 0x4d1   : > { %5870 = vmatpush3.bf16.msra.mxu0 %v6039_v36 }
 0x4d2   : > { %5898 = vmatpush3.bf16.msra.mxu1 %v6039_v36  ;;  %5871 = vmatprep.subr.bf16.mxu0 %v6052_v43 }
 0x4d3   : > { %5895 = vmatprep.subr.bf16.mxu1 %v6052_v43 }
 0x4d4   : > { %5077 = vmatmul.mubr.bf16.gmra.mxu0 %v6031_v49 }
 0x4d5   : > { %5174 = vmatmul.mubr.bf16.gmra.mxu1 %v6032_v16  ;;  %5084 = vmatprep.mubr.bf16.mxu0 %v6033_v39 }
 0x4d6   : > { %5181 = vmatprep.mubr.bf16.mxu1 %v6035_v4  ;;  %5872 = vmatpush3.bf16.msra.mxu0 %v6052_v43 }
 0x4d7   : > { %5899 = vmatpush3.bf16.msra.mxu1 %v6052_v43  ;;  %5873 = vmatprep.subr.bf16.mxu0 %v6065_v25 }
 0x4d8   : > { %5896 = vmatprep.subr.bf16.mxu1 %v6065_v25 }
 0x4da   : > { %5874 = vmatpush3.bf16.msra.mxu0 %v6065_v25 }
 0x4db   : > { %5900 = vmatpush3.bf16.msra.mxu1 %v6065_v25 }
 0x4dc   : > { %5085 = vmatmul.mubr.bf16.gmra.mxu0 %v6037_v2 }
 0x4dd   : > { %5182 = vmatmul.mubr.bf16.gmra.mxu1 %v6038_v19  ;;  %5092 = vmatprep.mubr.bf16.mxu0 %v6040_v8 }
 0x4de   : > { %5189 = vmatprep.mubr.bf16.mxu1 %v6042_v26 }
 0x4e4   : > { %5093 = vmatmul.mubr.bf16.gmra.mxu0 %v6044_v63 }
 0x4e5   : > { %5190 = vmatmul.mubr.bf16.gmra.mxu1 %v6045_v50  ;;  %5100 = vmatprep.mubr.bf16.mxu0 %v6046_v6 }
 0x4e6   : > { %5197 = vmatprep.mubr.bf16.mxu1 %v6048_v20 }
 0x4ec   : > { %5101 = vmatmul.mubr.bf16.gmra.mxu0 %v6050_v58 }
 0x4ed   : > { %5198 = vmatmul.mubr.bf16.gmra.mxu1 %v6051_v57  ;;  %5108 = vmatprep.mubr.bf16.mxu0 %v6053_v21 }
 0x4ee   : > { %5205 = vmatprep.mubr.bf16.mxu1 %v6055_v28 }
 0x4f4   : > { %5109 = vmatmul.mubr.bf16.gmra.mxu0 %v6057_v62 }
 0x4f5   : > { %5206 = vmatmul.mubr.bf16.gmra.mxu1 %v6058_v0  ;;  %5116 = vmatprep.mubr.bf16.mxu0 %v6059_v56 }
 0x4f6   : > { %5213 = vmatprep.mubr.bf16.mxu1 %v6061_v37 }
 0x4fc   : > { %5117 = vmatmul.mubr.bf16.gmra.mxu0 %v6063_v45 }
 0x4fd   : > { %5214 = vmatmul.mubr.bf16.gmra.mxu1 %v6064_v44  ;;  %5124 = vmatprep.mubr.bf16.mxu0 %v6066_v42 }
 0x4fe   : > { %5221 = vmatprep.mubr.bf16.mxu1 %v6068_v31 }
 0x504   : > { %5125 = vmatmul.mubr.bf16.gmra.mxu0 %v6070_v35 }
 0x505   : > { %5222 = vmatmul.mubr.bf16.gmra.mxu1 %v6071_v14  ;;  %5875 = vmatprep.mubr.msk.bf16.mxu0 %vm419_vm1, %v6072_v55 }
 0x506   : > { %5883 = vmatprep.mubr.msk.bf16.mxu1 %vm419_vm1, %v6073_v54 }
 0x50c   : > { %5876 = vmatmul.mubr.msk.bf16.vlgmr.msra.gmra.mxu0 %vm419_vm1, %v6074_v33 }
 0x50d   : > { %5884 = vmatmul.mubr.msk.bf16.vlgmr.msra.gmra.mxu1 %vm419_vm1, %v6075_v1  ;;  %5879 = vmatprep.mubr.msk.bf16.mxu0 %vm419_vm1, %v6076_v38 }
 0x50e   : > { %5887 = vmatprep.mubr.msk.bf16.mxu1 %vm419_vm1, %v6077_v61 }
 0x514   : > { %5880 = vmatmul.mubr.msk.bf16.gmra.mxu0 %vm419_vm1, %v6078_v47 }
 0x515   : > { %5888 = vmatmul.mubr.msk.bf16.gmra.mxu1 %vm419_vm1, %v6079_v48 }
 0x58c   : > { %v8932_v18 = vpop.f32.mrf.mxu0 }
 0x58d   : > { %v8934_v52 = vpop.f32.mrf.mxu1 }
 0x58e   : > { %v8936_v22 = vpop.f32.mrf.mxu0 }
 0x58f   : > { %v8938_v46 = vpop.f32.mrf.mxu1 }
 0x590   : > { %v8940_v41 = vpop.f32.mrf.mxu0 }
 0x591   : > { %v8942_v30 = vpop.f32.mrf.mxu1 }
 0x592   : > { %v8944_v12 = vpop.f32.mrf.mxu0 }
 0x593   : > { %v8946_v51 = vpop.f32.mrf.mxu1 }
 0x594   : > { %v5731_v9 = vpop.f32.mrf.mxu0 }
 0x595   : > { %v5795_v32 = vpop.f32.mrf.mxu1 }
 0x596   : > { %v5732_v53 = vpop.f32.mrf.mxu0 }
 0x597   : > { %v5796_v34 = vpop.f32.mrf.mxu1  ;;  %v5733_v1 = vadd.f32 %v5732_v53, %v5731_v9 }
 0x598   : > { %v5734_v7 = vpop.f32.mrf.mxu0  ;;  %v5797_v38 = vadd.f32 %v5796_v34, %v5795_v32 }
 0x599   : > { %v5798_v40 = vpop.f32.mrf.mxu1 }
 0x59a   : > { %v5735_v13 = vpop.f32.mrf.mxu0  ;;  %v5176_v9 = vadd.f32 %v5797_v38, %v5733_v1 }
 0x59b   : > { %v5799_v15 = vpop.f32.mrf.mxu1 }
 0x59c   : > { %v8948_v5 = vpop.f32.mrf.mxu0 }
 0x59d   : > { %v8950_v23 = vpop.f32.mrf.mxu1 }
 0x59e   : > { %v8952_v10 = vpop.f32.mrf.mxu0 }
 0x59f   : > { %v8954_v11 = vpop.f32.mrf.mxu1 }
 0x5a0   : > { %v8956_v60 = vpop.f32.mrf.mxu0 }
 0x5a1   : > { %9084 = vst [vmem:[#allocation5_spill] sm:$0xff] %v8956_v60  ;;  %v8958_v17 = vpop.f32.mrf.mxu1  ;;  %v5736_v60 = vadd.f32 %v5735_v13, %v5734_v7 }
 0x5a2   : > { %9085 = vst [vmem:[#allocation6_spill] sm:$0xff] %v8958_v17  ;;  %v8960_v3 = vpop.f32.mrf.mxu0  ;;  %v5727_v17 = vadd.f32 %v8936_v22, %v8932_v18  ;;  %v5794_v22 = vadd.f32 %v8946_v51, %v8942_v30 }
 0x5a3   : > { %9086 = vst [vmem:[#allocation7_spill] sm:$0xff] %v8960_v3  ;;  %v8962_v24 = vpop.f32.mrf.mxu1 }
 0x5a4   : > { %9087 = vst [vmem:[#allocation8_spill] sm:$0xff] %v8962_v24  ;;  %v8964_v59 = vpop.f32.mrf.mxu0 }
 0x5a5   : > { %v8966_v29 = vpop.f32.mrf.mxu1 }
 0x5a6   : > { %v8968_v27 = vpop.f32.mrf.mxu0 }
 0x5a7   : > { %v8970_v49 = vpop.f32.mrf.mxu1 }
 0x5a8   : > { %v8972_v16 = vpop.f32.mrf.mxu0 }
 0x5a9   : > { %v8974_v39 = vpop.f32.mrf.mxu1 }
 0x5aa   : > { %9088 = vst [vmem:[#allocation9_spill] sm:$0xff] %v8974_v39  ;;  %v8976_v36 = vpop.f32.mrf.mxu0 }
 0x5ab   : > { %v8978_v4 = vpop.f32.mrf.mxu1 }
 0x5ac   : > { %9089 = vst [vmem:[#allocation10_spill] sm:$0xff] %v8978_v4  ;;  %v5749_v2 = vpop.f32.mrf.mxu0  ;;  %v5800_v4 = vadd.f32 %v5799_v15, %v5798_v40 }
 0x5ad   : > { %v5813_v19 = vpop.f32.mrf.mxu1 }
 0x5ae   : > { %v5750_v43 = vpop.f32.mrf.mxu0 }
 0x5af   : > { %v5814_v8 = vpop.f32.mrf.mxu1 }
 0x5b0   : > { %v5752_v26 = vpop.f32.mrf.mxu0  ;;  %v5815_v3 = vadd.f32 %v5814_v8, %v5813_v19  ;;  %v5745_v8 = vadd.f32 %v8968_v27, %v8964_v59  ;;  %v5739_v59 = vadd.f32 %v8952_v10, %v8948_v5  ;;  %v5748_v5 = vadd.f32 %v8976_v36, %v8972_v16  ;;  %v9098_v36 = vld [vmem:[#allocation6_spill] sm:$0xff] }
 0x5b1   : > { %v5816_v25 = vpop.f32.mrf.mxu1  ;;  %v9094_v10 = vld [vmem:[#allocation9_spill] sm:$0xff] }
 0x5b2   : > { %v5753_v63 = vpop.f32.mrf.mxu0 }
 0x5b3   : > { %v5817_v50 = vpop.f32.mrf.mxu1  ;;  %v5754_v13 = vadd.f32 %v5753_v63, %v5752_v26 }
 0x5b4   : > { %v5755_v6 = vpop.f32.mrf.mxu0  ;;  %v5818_v15 = vadd.f32 %v5817_v50, %v5816_v25 }
 0x5b5   : > { %v5819_v20 = vpop.f32.mrf.mxu1 }
 0x5b6   : > { %v5756_v58 = vpop.f32.mrf.mxu0 }
 0x5b7   : > { %v5820_v57 = vpop.f32.mrf.mxu1  ;;  %v5757_v47 = vadd.f32 %v5756_v58, %v5755_v6  ;;  %v5809_v6 = vadd.f32 %v8970_v49, %v8966_v29  ;;  %v5803_v29 = vadd.f32 %v8954_v11, %v8950_v23  ;;  %v5203_v58 = vadd.f32 %v5818_v15, %v5754_v13 }
 0x5b8   : > { %v5758_v21 = vpop.f32.mrf.mxu0  ;;  %v5821_v48 = vadd.f32 %v5820_v57, %v5819_v20  ;;  %v9095_v57 = vld [vmem:[#allocation10_spill] sm:$0xff] }
 0x5b9   : > { %v5822_v28 = vpop.f32.mrf.mxu1  ;;  %v5812_v23 = vadd.f32 %v9095_v57, %v9094_v10 }
 0x5ba   : > { %v5759_v62 = vpop.f32.mrf.mxu0  ;;  %v5208_v18 = vadd.f32 %v5821_v48, %v5757_v47 }
 0x5bb   : > { %v5823_v0 = vpop.f32.mrf.mxu1  ;;  %v5760_v32 = vadd.f32 %v5759_v62, %v5758_v21 }
 0x5bc   : > { %v5761_v56 = vpop.f32.mrf.mxu0  ;;  %v5824_v53 = vadd.f32 %v5823_v0, %v5822_v28  ;;  %v5192_v28 = vadd.f32 %v5809_v6, %v5745_v8 }
 0x5bd   : > { %v5825_v37 = vpop.f32.mrf.mxu1 }
 0x5be   : > { %v5762_v45 = vpop.f32.mrf.mxu0 }
 0x5bf   : > { %v5826_v44 = vpop.f32.mrf.mxu1 }
 0x5c0   : > { %v8980_v42 = vpop.f32.mrf.mxu0  ;;  %v5827_v63 = vadd.f32 %v5826_v44, %v5825_v37  ;;  %v9096_v44 = vld [vmem:[#allocation5_spill] sm:$0xff] }
 0x5c1   : > { %9090 = vst [vmem:[#allocation11_spill] sm:$0xff] %v8980_v42  ;;  %v8982_v31 = vpop.f32.mrf.mxu1 }
 0x5c2   : > { %9091 = vst [vmem:[#allocation12_spill] sm:$0xff] %v8982_v31  ;;  %v8984_v35 = vpop.f32.mrf.mxu0  ;;  %v5791_v31 = vadd.f32 %v8938_v46, %v8934_v52  ;;  %v5730_v52 = vadd.f32 %v8944_v12, %v8940_v41  ;;  %v5179_v12 = vadd.f32 %v5800_v4, %v5736_v60  ;;  %v5763_v4 = vadd.f32 %v5762_v45, %v5761_v56 }
 0x5c3   : > { %9092 = vst [vmem:[#allocation13_spill] sm:$0xff] %v8984_v35  ;;  %v8986_v14 = vpop.f32.mrf.mxu1  ;;  %v5751_v35 = vadd.f32 %v5750_v43, %v5749_v2 }
 0x5c4   : > { %9093 = vst [vmem:[#allocation14_spill] sm:$0xff] %v8986_v14  ;;  %v5767_v55 = vpop.f32.mrf.mxu0  ;;  %v5168_v40 = vadd.f32 %v5791_v31, %v5727_v17  ;;  %v5171_v60 = vadd.f32 %v5794_v22, %v5730_v52  ;;  %v9097_v31 = vld [vmem:[#allocation7_spill] sm:$0xff] }
 0x5c5   : > { %v5831_v54 = vpop.f32.mrf.mxu1  ;;  %v5200_v43 = vadd.f32 %v5815_v3, %v5751_v35  ;;  %v5211_v3 = vadd.f32 %v5824_v53, %v5760_v32  ;;  %v5742_v16 = vadd.f32 %v9097_v31, %v9096_v44  ;;  %v9099_v35 = vld [vmem:[#allocation8_spill] sm:$0xff] }
 0x5c6   : > { %v5768_v33 = vpop.f32.mrf.mxu0 }
 0x5c7   : > { %v5832_v61 = vpop.f32.mrf.mxu1  ;;  %v5769_v51 = vadd.f32 %v5768_v33, %v5767_v55  ;;  %v5806_v55 = vadd.f32 %v9099_v35, %v9098_v36 }
 0x5c8   : > { %v5770_v24 = vpop.f32.mrf.mxu0  ;;  %v5833_v17 = vadd.f32 %v5832_v61, %v5831_v54 }
 0x5c9   : > { %v5834_v42 = vpop.f32.mrf.mxu1  ;;  %v9102_v1 = vld [vmem:[#allocation12_spill] sm:$0xff] }
 0x5ca   : > { %v5771_v14 = vpop.f32.mrf.mxu0  ;;  %v5224_v45 = vadd.f32 %v5833_v17, %v5769_v51 }
 0x5cb   : > { %v5835_v39 = vpop.f32.mrf.mxu1  ;;  %v5772_v62 = vadd.f32 %v5771_v14, %v5770_v24  ;;  %v5184_v24 = vadd.f32 %v5803_v29, %v5739_v59  ;;  %v9103_v38 = vld [vmem:[#allocation14_spill] sm:$0xff] }
 0x5cc   : > { %v5877_v34 = vpop.f32.mrf.mxu0  ;;  %v5836_v0 = vadd.f32 %v5835_v39, %v5834_v42  ;;  %v9100_v39 = vld [vmem:[#allocation11_spill] sm:$0xff]  ;;  %v9101_v42 = vld [vmem:[#allocation13_spill] sm:$0xff]  ;;  %v5830_v61 = vadd.f32 %v9103_v38, %v9102_v1 }
 0x5cd   : > { %v5273_v46 = vadd.f32 %v5877_v34, %v5176_v9  ;;  %v5885_v7 = vpop.f32.mrf.mxu1  ;;  %v5766_v14 = vadd.f32 %v9101_v42, %v9100_v39  ;;  %v5216_v9 = vadd.f32 %v5827_v63, %v5763_v4  ;;  %v5195_v34 = vadd.f32 %v5812_v23, %v5748_v5 }
 0x5ce   : > { %v5305_v2 = vadd.f32 %v5885_v7, %v5208_v18  ;;  %v5264_v19 = vpop.f32.mrf.mxu0  ;;  %v5227_v22 = vadd.f32 %v5836_v0, %v5772_v62 }
 0x5cf   : > { %5331 = vst.msk [vmem:[%s8997_s3 + $0x10] sm:$0xff] %vm54_vm0, %v5273_v46  ;;  %v5265_v41 = vadd.f32 %v5264_v19, %v5168_v40  ;;  %v5296_v30 = vpop.f32.mrf.mxu1  ;;  %v5187_v40 = vadd.f32 %v5806_v55, %v5742_v16 }
 0x5d0   : > { %5339 = vst.msk [vmem:[%s8997_s3 + $0x50] sm:$0xff] %vm54_vm0, %v5305_v2  ;;  %v5297_v26 = vadd.f32 %v5296_v30, %v5200_v43  ;;  %v5878_v25 = vpop.f32.mrf.mxu0  ;;  %v5219_v2 = vadd.f32 %v5830_v61, %v5766_v14 }
 0x5d1   : > { %5329 = vst.msk [vmem:[%s8997_s3] sm:$0xff] %vm54_vm0, %v5265_v41  ;;  %v5276_v27 = vadd.f32 %v5878_v25, %v5179_v12  ;;  %v5886_v49 = vpop.f32.mrf.mxu1 }
 0x5d2   : > { %5337 = vst.msk [vmem:[%s8997_s3 + $0x40] sm:$0xff] %vm54_vm0, %v5297_v26  ;;  %v5308_v50 = vadd.f32 %v5886_v49, %v5211_v3  ;;  %v5267_v20 = vpop.f32.mrf.mxu0 }
 0x5d3   : > { %5332 = vst.msk [vmem:[%s8997_s3 + $0x18] sm:$0xff] %vm54_vm0, %v5276_v27  ;;  %v5268_v11 = vadd.f32 %v5267_v20, %v5171_v60  ;;  %v5299_v21 = vpop.f32.mrf.mxu1 }
 0x5d4   : > { %5340 = vst.msk [vmem:[%s8997_s3 + $0x58] sm:$0xff] %vm54_vm0, %v5308_v50  ;;  %v5300_v56 = vadd.f32 %v5299_v21, %v5203_v58  ;;  %v5881_v37 = vpop.f32.mrf.mxu0 }
 0x5d5   : > { %5330 = vst.msk [vmem:[%s8997_s3 + $0x8] sm:$0xff] %vm54_vm0, %v5268_v11  ;;  %v5289_v54 = vadd.f32 %v5881_v37, %v5192_v28  ;;  %v5889_v33 = vpop.f32.mrf.mxu1 }
 0x5d6   : > { %5338 = vst.msk [vmem:[%s8997_s3 + $0x48] sm:$0xff] %vm54_vm0, %v5300_v56  ;;  %v5321_v47 = vadd.f32 %v5889_v33, %v5224_v45  ;;  %v5280_v48 = vpop.f32.mrf.mxu0 }
 0x5d7   : > { %5335 = vst.msk [vmem:[%s8997_s3 + $0x30] sm:$0xff] %vm54_vm0, %v5289_v54  ;;  %v5281_v32 = vadd.f32 %v5280_v48, %v5184_v24  ;;  %v5312_v53 = vpop.f32.mrf.mxu1 }
 0x5d8   : > { %5343 = vst.msk [vmem:[%s8997_s3 + $0x70] sm:$0xff] %vm54_vm0, %v5321_v47  ;;  %v5313_v18 = vadd.f32 %v5312_v53, %v5216_v9  ;;  %v5882_v52 = vpop.f32.mrf.mxu0 }
 0x5d9   : > { %5333 = vst.msk [vmem:[%s8997_s3 + $0x20] sm:$0xff] %vm54_vm0, %v5281_v32  ;;  %v5292_v46 = vadd.f32 %v5882_v52, %v5195_v34  ;;  %v5890_v7 = vpop.f32.mrf.mxu1 }
 0x5da   : > { %5341 = vst.msk [vmem:[%s8997_s3 + $0x60] sm:$0xff] %vm54_vm0, %v5313_v18  ;;  %v5324_v13 = vadd.f32 %v5890_v7, %v5227_v22  ;;  %v5283_v15 = vpop.f32.mrf.mxu0  ;;  %4467 = sbr.rel (!%p4465_p5) target bundleno = 1194 (0x4aa), region = 153 }
 0x5db   : > { %5336 = vst.msk [vmem:[%s8997_s3 + $0x38] sm:$0xff] %vm54_vm0, %v5292_v46  ;;  %v5284_v19 = vadd.f32 %v5283_v15, %v5187_v40  ;;  %v5315_v43 = vpop.f32.mrf.mxu1 }
 0x5dc   : > { %5344 = vst.msk [vmem:[%s8997_s3 + $0x78] sm:$0xff] %vm54_vm0, %v5324_v13  ;;  %v5316_v8 = vadd.f32 %v5315_v43, %v5219_v2 }
 0x5dd   : > { %5334 = vst.msk [vmem:[%s8997_s3 + $0x28] sm:$0xff] %vm54_vm0, %v5284_v19 }
 0x5de   : > { %5342 = vst.msk [vmem:[%s8997_s3 + $0x68] sm:$0xff] %vm54_vm0, %v5316_v8 }

</bundles_post_ra>
